<compile_context>
chip_gen: v6e
topology: v6e:2x2x1
jax: 0.10.0
libtpu: 0.0.40
codegen_flags: <defaults>
</compile_context>

<pallas_src>
import functools

import jax
import jax.numpy as jnp
from jax.experimental import pallas as pl
from jax.experimental.pallas import tpu as pltpu


# ----------------------------------------------------------------------------
# In-kernel building blocks (operate on VMEM refs / values of one image)
# ----------------------------------------------------------------------------
def _conv3x3_relu(pad_ref, interior, w_ref, b_ref):
    """3x3 SAME conv + bias + ReLU on one image, entirely in VMEM.

    pad_ref : (h+2, w+2, cin) bf16 scratch; border rows/cols are already zero.
    interior: (h, w, cin)     bf16 value written into the halo buffer interior.
    w_ref   : (3, 3*cin, cout) bf16, ordering = (kh, kw*cin + cin_idx, cout).
    b_ref   : (1, cout) f32.
    returns : (h*w, cout) f32 post-ReLU activation (flat; lane dim = cout).
    """
    hp2, wp2, cin = pad_ref.shape
    h, w = hp2 - 2, wp2 - 2
    cout = w_ref.shape[-1]

    pad_ref[1:h + 1, 1:w + 1, :] = interior        # interior only; border stays 0

    acc = jnp.zeros((h * w, cout), jnp.float32)
    for kh in range(3):                            # 3 accumulating matmuls, K=3*cin
        slab = jnp.concatenate(
            [pad_ref[kh:kh + h, 0:w, :],
             pad_ref[kh:kh + h, 1:w + 1, :],
             pad_ref[kh:kh + h, 2:w + 2, :]],
            axis=-1).reshape(h * w, 3 * cin)
        acc = acc + jnp.dot(slab, w_ref[kh], preferred_element_type=jnp.float32)
    return jnp.maximum(acc + b_ref[...], 0.0)      # bias + ReLU, f32


def _max_pool_2x2(a_flat, h, w, c):
    """2x2 / stride-2 max pool of a flat (h*w, c) activation -> (h//2, w//2, c)."""
    a = a_flat.astype(jnp.bfloat16).reshape(h // 2, 2, w, c)
    a = jnp.maximum(a[:, 0, :, :], a[:, 1, :, :])            # pool rows -> (h/2, w, c)
    cols = [jnp.maximum(a[:, 2 * j:2 * j + 1, :], a[:, 2 * j + 1:2 * j + 2, :])
            for j in range(w // 2)]                          # pool columns (static)
    return jnp.concatenate(cols, axis=1)                     # (h/2, w/2, c) bf16


# ----------------------------------------------------------------------------
# Fused perceptual-loss kernel: feature extractor (3 blocks) + MSE accumulation
# ----------------------------------------------------------------------------
def _perceptual_loss_kernel(x_ref, y_ref, w1_ref, b1_ref, w2_ref, b2_ref,
                            w3_ref, b3_ref, o_ref,
                            pad1_ref, pad2_ref, pad3_ref, acc_ref, *, inv_count):
    n = pl.program_id(0)

    @pl.when(n == 0)
    def _init():
        # One-time zero of the halo buffers (borders stay zero forever, interiors
        # are fully overwritten every use) and of the loss accumulator.
        pad1_ref[...] = jnp.zeros_like(pad1_ref)
        pad2_ref[...] = jnp.zeros_like(pad2_ref)
        pad3_ref[...] = jnp.zeros_like(pad3_ref)
        acc_ref[...] = jnp.zeros_like(acc_ref)

    def feature_m2(img):
        # img: (H, W, C0) bf16 -> flat (H/4 * W/4, C3) f32  ==  VGG feature[-2]
        a1 = _conv3x3_relu(pad1_ref, img, w1_ref, b1_ref)
        p1 = _max_pool_2x2(a1, pad1_ref.shape[0] - 2, pad1_ref.shape[1] - 2,
                           w1_ref.shape[-1])
        a2 = _conv3x3_relu(pad2_ref, p1, w2_ref, b2_ref)
        p2 = _max_pool_2x2(a2, pad2_ref.shape[0] - 2, pad2_ref.shape[1] - 2,
                           w2_ref.shape[-1])
        return _conv3x3_relu(pad3_ref, p2, w3_ref, b3_ref)   # no pool on feats[-2]

    d = feature_m2(x_ref[0]) - feature_m2(y_ref[0])
    acc_ref[...] += d * d        # element-wise partials only (VPU); no per-step reduce

    @pl.when(n == pl.num_programs(0) - 1)
    def _finalize():
        o_ref[...] = jnp.sum(acc_ref[...], keepdims=True) * inv_count


# ----------------------------------------------------------------------------
# Synthetic VGG-style feature-extractor parameters (deterministic init)
# ----------------------------------------------------------------------------
_VGG_CHANNELS = (8, 16, 32, 32)   # per-block output channels (scaled-down VGG)


def init_vgg_params(in_channels=3, seed=42):
    # TODO(synk): pretrained VGG weights unavailable -> deterministic synthetic init.
    key = jax.random.PRNGKey(seed)
    params = []
    cin = in_channels
    for cout in _VGG_CHANNELS:
        key, k_w, k_b = jax.random.split(key, 3)
        scale = 1.0 / jnp.sqrt(3.0 * 3.0 * cin)
        w = jax.random.normal(k_w, (3, 3, cin, cout), jnp.float32) * scale
        b = jax.random.normal(k_b, (cout,), jnp.float32) * 0.01
        params.append((w, b))
        cin = cout
    return params


# ----------------------------------------------------------------------------
# PerceptualLoss forward
# ----------------------------------------------------------------------------
@jax.jit
def perceptual_loss(x_nchw, y_nchw, params):
    n, c0, h, w = x_nchw.shape
    assert x_nchw.shape == y_nchw.shape and h % 4 == 0 and w % 4 == 0

    # Only the blocks feeding feature[-2] are used (deeper blocks never computed).
    (w1, b1), (w2, b2), (w3, b3) = params[:-1]
    c1, c2, c3 = w1.shape[-1], w2.shape[-1], w3.shape[-1]
    feat_h, feat_w = h // 4, w // 4

    x = jnp.transpose(x_nchw, (0, 2, 3, 1)).astype(jnp.bfloat16)   # NCHW -> NHWC
    y = jnp.transpose(y_nchw, (0, 2, 3, 1)).astype(jnp.bfloat16)

    # (3,3,cin,cout) -> (3, 3*cin, cout): kh major, kw*cin + cin_idx minor
    # (matches the per-kh row-slab ordering built inside the kernel).
    w1p = w1.reshape(3, 3 * c0, c1).astype(jnp.bfloat16)
    w2p = w2.reshape(3, 3 * c1, c2).astype(jnp.bfloat16)
    w3p = w3.reshape(3, 3 * c2, c3).astype(jnp.bfloat16)
    b1p = b1.reshape(1, c1).astype(jnp.float32)
    b2p = b2.reshape(1, c2).astype(jnp.float32)
    b3p = b3.reshape(1, c3).astype(jnp.float32)

    inv_count = 1.0 / float(n * feat_h * feat_w * c3)

    out = pl.pallas_call(
        functools.partial(_perceptual_loss_kernel, inv_count=inv_count),
        out_shape=jax.ShapeDtypeStruct((1, 1), jnp.float32),
        grid_spec=pltpu.PrefetchScalarGridSpec(
            num_scalar_prefetch=0,
            grid=(n,),                       # one (x_i, y_i) pair per grid step
            in_specs=[
                pl.BlockSpec((1, h, w, c0), lambda i: (i, 0, 0, 0)),
                pl.BlockSpec((1, h, w, c0), lambda i: (i, 0, 0, 0)),
                pl.BlockSpec((3, 3 * c0, c1), lambda i: (0, 0, 0)),
                pl.BlockSpec((1, c1), lambda i: (0, 0)),
                pl.BlockSpec((3, 3 * c1, c2), lambda i: (0, 0, 0)),
                pl.BlockSpec((1, c2), lambda i: (0, 0)),
                pl.BlockSpec((3, 3 * c2, c3), lambda i: (0, 0, 0)),
                pl.BlockSpec((1, c3), lambda i: (0, 0)),
            ],
            out_specs=pl.BlockSpec((1, 1), lambda i: (0, 0)),
            scratch_shapes=[
                pltpu.VMEM((h + 2, w + 2, c0), jnp.bfloat16),             # L1 halo
                pltpu.VMEM((h // 2 + 2, w // 2 + 2, c1), jnp.bfloat16),   # L2 halo
                pltpu.VMEM((h // 4 + 2, w // 4 + 2, c2), jnp.bfloat16),   # L3 halo
                pltpu.VMEM((feat_h * feat_w, c3), jnp.float32),           # loss partials
            ],
        ),
        compiler_params=pltpu.CompilerParams(
            dimension_semantics=("arbitrary",),   # loss accumulates across the batch
            vmem_limit_bytes=32 * 1024 * 1024),
    )(x, y, w1p, b1p, w2p, b2p, w3p, b3p)
    return out[0, 0]


if __name__ == "__main__":
    key = jax.random.PRNGKey(0)
    kx, ky = jax.random.split(key)
    # small NCHW inputs consistent with an image perceptual loss
    x = jax.random.normal(kx, (2, 3, 16, 16), jnp.float32)
    y = jax.random.normal(ky, (2, 3, 16, 16), jnp.float32)

    params = init_vgg_params(in_channels=3, seed=42)

    loss = perceptual_loss(x, y, params)
    jax.block_until_ready(loss)
    assert loss.shape == () and bool(jnp.isfinite(loss))
    print("KERNEL_OK")
</pallas_src>

<mosaic_0001>
module attributes {stable_mosaic.version = 11 : i64} {
  func.func @_perceptual_loss_kernel(%arg0: i32, %arg1: memref<1x16x16x3xbf16, #tpu.memory_space<vmem>>, %arg2: memref<1x16x16x3xbf16, #tpu.memory_space<vmem>>, %arg3: memref<3x9x8xbf16, #tpu.memory_space<vmem>>, %arg4: memref<1x8xf32, #tpu.memory_space<vmem>>, %arg5: memref<3x24x16xbf16, #tpu.memory_space<vmem>>, %arg6: memref<1x16xf32, #tpu.memory_space<vmem>>, %arg7: memref<3x48x32xbf16, #tpu.memory_space<vmem>>, %arg8: memref<1x32xf32, #tpu.memory_space<vmem>>, %arg9: memref<1x1xf32, #tpu.memory_space<vmem>>, %arg10: memref<18x18x3xbf16, #tpu.memory_space<vmem>>, %arg11: memref<10x10x8xbf16, #tpu.memory_space<vmem>>, %arg12: memref<6x6x16xbf16, #tpu.memory_space<vmem>>, %arg13: memref<16x32xf32, #tpu.memory_space<vmem>>) attributes {dimension_semantics = [#tpu.dimension_semantics<arbitrary>], iteration_bounds = array<i64: 2>, scalar_prefetch = 0 : i64, scratch_operands = 4 : i64, tpu.core_type = #tpu.core_type<tc>, window_params = [{transform_indices = @transform_0, window_bounds = array<i64: 1, 16, 16, 3>}, {transform_indices = @transform_1, window_bounds = array<i64: 1, 16, 16, 3>}, {pipeline_mode = #tpu.pipeline_mode<synchronous>, transform_indices = @transform_2, window_bounds = array<i64: 3, 9, 8>}, {pipeline_mode = #tpu.pipeline_mode<synchronous>, transform_indices = @transform_3, window_bounds = array<i64: 1, 8>}, {pipeline_mode = #tpu.pipeline_mode<synchronous>, transform_indices = @transform_4, window_bounds = array<i64: 3, 24, 16>}, {pipeline_mode = #tpu.pipeline_mode<synchronous>, transform_indices = @transform_5, window_bounds = array<i64: 1, 16>}, {pipeline_mode = #tpu.pipeline_mode<synchronous>, transform_indices = @transform_6, window_bounds = array<i64: 3, 48, 32>}, {pipeline_mode = #tpu.pipeline_mode<synchronous>, transform_indices = @transform_7, window_bounds = array<i64: 1, 32>}, {pipeline_mode = #tpu.pipeline_mode<synchronous>, transform_indices = @transform_8, window_bounds = array<i64: 1, 1>}]} {
    %c0_i32 = arith.constant 0 : i32
    %0 = arith.cmpi eq, %arg0, %c0_i32 : i32
    %1 = arith.extui %0 : i1 to i32
    %c0_i32_0 = arith.constant 0 : i32
    %2 = arith.cmpi ne, %1, %c0_i32_0 : i32
    scf.if %2 {
      %cst_286 = arith.constant 0.000000e+00 : bf16
      %323 = vector.broadcast %cst_286 : bf16 to vector<18x18x3xbf16>
      %c0_287 = arith.constant 0 : index
      %c0_288 = arith.constant 0 : index
      %c0_289 = arith.constant 0 : index
      %324 = vector.load %arg10[%c0_287, %c0_288, %c0_289] : memref<18x18x3xbf16, #tpu.memory_space<vmem>>, vector<18x18x3xbf16>
      tpu.vector_store %arg10[%c0_287, %c0_288, %c0_289], %323 {strides = array<i32>} : memref<18x18x3xbf16, #tpu.memory_space<vmem>>, vector<18x18x3xbf16>,
      %cst_290 = arith.constant 0.000000e+00 : bf16
      %325 = vector.broadcast %cst_290 : bf16 to vector<10x10x8xbf16>
      %c0_291 = arith.constant 0 : index
      %c0_292 = arith.constant 0 : index
      %c0_293 = arith.constant 0 : index
      %326 = vector.load %arg11[%c0_291, %c0_292, %c0_293] : memref<10x10x8xbf16, #tpu.memory_space<vmem>>, vector<10x10x8xbf16>
      tpu.vector_store %arg11[%c0_291, %c0_292, %c0_293], %325 {strides = array<i32>} : memref<10x10x8xbf16, #tpu.memory_space<vmem>>, vector<10x10x8xbf16>,
      %cst_294 = arith.constant 0.000000e+00 : bf16
      %327 = vector.broadcast %cst_294 : bf16 to vector<6x6x16xbf16>
      %c0_295 = arith.constant 0 : index
      %c0_296 = arith.constant 0 : index
      %c0_297 = arith.constant 0 : index
      %328 = vector.load %arg12[%c0_295, %c0_296, %c0_297] : memref<6x6x16xbf16, #tpu.memory_space<vmem>>, vector<6x6x16xbf16>
      tpu.vector_store %arg12[%c0_295, %c0_296, %c0_297], %327 {strides = array<i32>} : memref<6x6x16xbf16, #tpu.memory_space<vmem>>, vector<6x6x16xbf16>,
      %cst_298 = arith.constant 0.000000e+00 : f32
      %329 = vector.broadcast %cst_298 : f32 to vector<16x32xf32>
      %c0_299 = arith.constant 0 : index
      %c0_300 = arith.constant 0 : index
      %330 = vector.load %arg13[%c0_299, %c0_300] : memref<16x32xf32, #tpu.memory_space<vmem>>, vector<16x32xf32>
      tpu.vector_store %arg13[%c0_299, %c0_300], %329 {strides = array<i32>} : memref<16x32xf32, #tpu.memory_space<vmem>>, vector<16x32xf32>,
    } else {
    }
    %c0 = arith.constant 0 : index
    %c0_1 = arith.constant 0 : index
    %c0_2 = arith.constant 0 : index
    %c0_3 = arith.constant 0 : index
    %3 = vector.load %arg1[%c0, %c0_1, %c0_2, %c0_3] : memref<1x16x16x3xbf16, #tpu.memory_space<vmem>>, vector<1x16x16x3xbf16>
    %4 = vector.shape_cast %3 : vector<1x16x16x3xbf16> to vector<16x16x3xbf16>
    %c1 = arith.constant 1 : index
    %c1_4 = arith.constant 1 : index
    %c0_5 = arith.constant 0 : index
    %5 = vector.load %arg10[%c1, %c1_4, %c0_5] : memref<18x18x3xbf16, #tpu.memory_space<vmem>>, vector<16x16x3xbf16>
    tpu.vector_store %arg10[%c1, %c1_4, %c0_5], %4 {strides = array<i32>} : memref<18x18x3xbf16, #tpu.memory_space<vmem>>, vector<16x16x3xbf16>,
    %cst = arith.constant 0.000000e+00 : f32
    %6 = vector.broadcast %cst : f32 to vector<256x8xf32>
    %c0_6 = arith.constant 0 : index
    %c0_7 = arith.constant 0 : index
    %c0_8 = arith.constant 0 : index
    %7 = vector.load %arg10[%c0_6, %c0_7, %c0_8] : memref<18x18x3xbf16, #tpu.memory_space<vmem>>, vector<16x16x3xbf16>
    %c0_9 = arith.constant 0 : index
    %c1_10 = arith.constant 1 : index
    %c0_11 = arith.constant 0 : index
    %8 = vector.load %arg10[%c0_9, %c1_10, %c0_11] : memref<18x18x3xbf16, #tpu.memory_space<vmem>>, vector<16x16x3xbf16>
    %c0_12 = arith.constant 0 : index
    %c2 = arith.constant 2 : index
    %c0_13 = arith.constant 0 : index
    %9 = vector.load %arg10[%c0_12, %c2, %c0_13] : memref<18x18x3xbf16, #tpu.memory_space<vmem>>, vector<16x16x3xbf16>
    %10 = tpu.concatenate %7, %8, %9 in 2 : vector<16x16x3xbf16>, vector<16x16x3xbf16>, vector<16x16x3xbf16> -> vector<16x16x9xbf16>
    %11 = vector.shape_cast %10 : vector<16x16x9xbf16> to vector<256x9xbf16>
    %c0_14 = arith.constant 0 : index
    %c0_15 = arith.constant 0 : index
    %c0_16 = arith.constant 0 : index
    %12 = vector.load %arg3[%c0_14, %c0_15, %c0_16] : memref<3x9x8xbf16, #tpu.memory_space<vmem>>, vector<1x9x8xbf16>
    %13 = vector.shape_cast %12 : vector<1x9x8xbf16> to vector<9x8xbf16>
    %cst_17 = arith.constant dense<0.000000e+00> : vector<256x8xf32>
    %14 = tpu.matmul %11, %13, %cst_17 {dimension_numbers = #tpu.dot_dimension_numbers<[1], [0], [0], [1], [0, 0, 1, 1], [], []>} : vector<256x9xbf16>, vector<9x8xbf16>, vector<256x8xf32> -> vector<256x8xf32>
    %15 = arith.addf %6, %14 : vector<256x8xf32>
    %c1_18 = arith.constant 1 : index
    %c0_19 = arith.constant 0 : index
    %c0_20 = arith.constant 0 : index
    %16 = vector.load %arg10[%c1_18, %c0_19, %c0_20] : memref<18x18x3xbf16, #tpu.memory_space<vmem>>, vector<16x16x3xbf16>
    %c1_21 = arith.constant 1 : index
    %c1_22 = arith.constant 1 : index
    %c0_23 = arith.constant 0 : index
    %17 = vector.load %arg10[%c1_21, %c1_22, %c0_23] : memref<18x18x3xbf16, #tpu.memory_space<vmem>>, vector<16x16x3xbf16>
    %c1_24 = arith.constant 1 : index
    %c2_25 = arith.constant 2 : index
    %c0_26 = arith.constant 0 : index
    %18 = vector.load %arg10[%c1_24, %c2_25, %c0_26] : memref<18x18x3xbf16, #tpu.memory_space<vmem>>, vector<16x16x3xbf16>
    %19 = tpu.concatenate %16, %17, %18 in 2 : vector<16x16x3xbf16>, vector<16x16x3xbf16>, vector<16x16x3xbf16> -> vector<16x16x9xbf16>
    %20 = vector.shape_cast %19 : vector<16x16x9xbf16> to vector<256x9xbf16>
    %c1_27 = arith.constant 1 : index
    %c0_28 = arith.constant 0 : index
    %c0_29 = arith.constant 0 : index
    %21 = vector.load %arg3[%c1_27, %c0_28, %c0_29] : memref<3x9x8xbf16, #tpu.memory_space<vmem>>, vector<1x9x8xbf16>
    %22 = vector.shape_cast %21 : vector<1x9x8xbf16> to vector<9x8xbf16>
    %cst_30 = arith.constant dense<0.000000e+00> : vector<256x8xf32>
    %23 = tpu.matmul %20, %22, %cst_30 {dimension_numbers = #tpu.dot_dimension_numbers<[1], [0], [0], [1], [0, 0, 1, 1], [], []>} : vector<256x9xbf16>, vector<9x8xbf16>, vector<256x8xf32> -> vector<256x8xf32>
    %24 = arith.addf %15, %23 : vector<256x8xf32>
    %c2_31 = arith.constant 2 : index
    %c0_32 = arith.constant 0 : index
    %c0_33 = arith.constant 0 : index
    %25 = vector.load %arg10[%c2_31, %c0_32, %c0_33] : memref<18x18x3xbf16, #tpu.memory_space<vmem>>, vector<16x16x3xbf16>
    %c2_34 = arith.constant 2 : index
    %c1_35 = arith.constant 1 : index
    %c0_36 = arith.constant 0 : index
    %26 = vector.load %arg10[%c2_34, %c1_35, %c0_36] : memref<18x18x3xbf16, #tpu.memory_space<vmem>>, vector<16x16x3xbf16>
    %c2_37 = arith.constant 2 : index
    %c2_38 = arith.constant 2 : index
    %c0_39 = arith.constant 0 : index
    %27 = vector.load %arg10[%c2_37, %c2_38, %c0_39] : memref<18x18x3xbf16, #tpu.memory_space<vmem>>, vector<16x16x3xbf16>
    %28 = tpu.concatenate %25, %26, %27 in 2 : vector<16x16x3xbf16>, vector<16x16x3xbf16>, vector<16x16x3xbf16> -> vector<16x16x9xbf16>
    %29 = vector.shape_cast %28 : vector<16x16x9xbf16> to vector<256x9xbf16>
    %c2_40 = arith.constant 2 : index
    %c0_41 = arith.constant 0 : index
    %c0_42 = arith.constant 0 : index
    %30 = vector.load %arg3[%c2_40, %c0_41, %c0_42] : memref<3x9x8xbf16, #tpu.memory_space<vmem>>, vector<1x9x8xbf16>
    %31 = vector.shape_cast %30 : vector<1x9x8xbf16> to vector<9x8xbf16>
    %cst_43 = arith.constant dense<0.000000e+00> : vector<256x8xf32>
    %32 = tpu.matmul %29, %31, %cst_43 {dimension_numbers = #tpu.dot_dimension_numbers<[1], [0], [0], [1], [0, 0, 1, 1], [], []>} : vector<256x9xbf16>, vector<9x8xbf16>, vector<256x8xf32> -> vector<256x8xf32>
    %33 = arith.addf %24, %32 : vector<256x8xf32>
    %c0_44 = arith.constant 0 : index
    %c0_45 = arith.constant 0 : index
    %34 = vector.load %arg4[%c0_44, %c0_45] : memref<1x8xf32, #tpu.memory_space<vmem>>, vector<1x8xf32>
    %35 = vector.broadcast %34 : vector<1x8xf32> to vector<256x8xf32>
    %36 = arith.addf %33, %35 : vector<256x8xf32>
    %cst_46 = arith.constant 0.000000e+00 : f32
    %37 = vector.broadcast %cst_46 : f32 to vector<256x8xf32>
    %38 = arith.maximumf %36, %37 : vector<256x8xf32>
    %39 = arith.truncf %38 : vector<256x8xf32> to vector<256x8xbf16>
    %40 = vector.shape_cast %39 : vector<256x8xbf16> to vector<8x2x16x8xbf16>
    %41 = vector.extract_strided_slice %40 {offsets = [0, 0, 0, 0], sizes = [8, 1, 16, 8], strides = [1, 1, 1, 1]} : vector<8x2x16x8xbf16> to vector<8x1x16x8xbf16>
    %42 = vector.shape_cast %41 : vector<8x1x16x8xbf16> to vector<8x16x8xbf16>
    %43 = vector.extract_strided_slice %40 {offsets = [0, 1, 0, 0], sizes = [8, 1, 16, 8], strides = [1, 1, 1, 1]} : vector<8x2x16x8xbf16> to vector<8x1x16x8xbf16>
    %44 = vector.shape_cast %43 : vector<8x1x16x8xbf16> to vector<8x16x8xbf16>
    %45 = arith.maximumf %42, %44 : vector<8x16x8xbf16>
    %46 = vector.extract_strided_slice %45 {offsets = [0, 0, 0], sizes = [8, 1, 8], strides = [1, 1, 1]} : vector<8x16x8xbf16> to vector<8x1x8xbf16>
    %47 = vector.extract_strided_slice %45 {offsets = [0, 1, 0], sizes = [8, 1, 8], strides = [1, 1, 1]} : vector<8x16x8xbf16> to vector<8x1x8xbf16>
    %48 = arith.maximumf %46, %47 : vector<8x1x8xbf16>
    %49 = vector.extract_strided_slice %45 {offsets = [0, 2, 0], sizes = [8, 1, 8], strides = [1, 1, 1]} : vector<8x16x8xbf16> to vector<8x1x8xbf16>
    %50 = vector.extract_strided_slice %45 {offsets = [0, 3, 0], sizes = [8, 1, 8], strides = [1, 1, 1]} : vector<8x16x8xbf16> to vector<8x1x8xbf16>
    %51 = arith.maximumf %49, %50 : vector<8x1x8xbf16>
    %52 = vector.extract_strided_slice %45 {offsets = [0, 4, 0], sizes = [8, 1, 8], strides = [1, 1, 1]} : vector<8x16x8xbf16> to vector<8x1x8xbf16>
    %53 = vector.extract_strided_slice %45 {offsets = [0, 5, 0], sizes = [8, 1, 8], strides = [1, 1, 1]} : vector<8x16x8xbf16> to vector<8x1x8xbf16>
    %54 = arith.maximumf %52, %53 : vector<8x1x8xbf16>
    %55 = vector.extract_strided_slice %45 {offsets = [0, 6, 0], sizes = [8, 1, 8], strides = [1, 1, 1]} : vector<8x16x8xbf16> to vector<8x1x8xbf16>
    %56 = vector.extract_strided_slice %45 {offsets = [0, 7, 0], sizes = [8, 1, 8], strides = [1, 1, 1]} : vector<8x16x8xbf16> to vector<8x1x8xbf16>
    %57 = arith.maximumf %55, %56 : vector<8x1x8xbf16>
    %58 = vector.extract_strided_slice %45 {offsets = [0, 8, 0], sizes = [8, 1, 8], strides = [1, 1, 1]} : vector<8x16x8xbf16> to vector<8x1x8xbf16>
    %59 = vector.extract_strided_slice %45 {offsets = [0, 9, 0], sizes = [8, 1, 8], strides = [1, 1, 1]} : vector<8x16x8xbf16> to vector<8x1x8xbf16>
    %60 = arith.maximumf %58, %59 : vector<8x1x8xbf16>
    %61 = vector.extract_strided_slice %45 {offsets = [0, 10, 0], sizes = [8, 1, 8], strides = [1, 1, 1]} : vector<8x16x8xbf16> to vector<8x1x8xbf16>
    %62 = vector.extract_strided_slice %45 {offsets = [0, 11, 0], sizes = [8, 1, 8], strides = [1, 1, 1]} : vector<8x16x8xbf16> to vector<8x1x8xbf16>
    %63 = arith.maximumf %61, %62 : vector<8x1x8xbf16>
    %64 = vector.extract_strided_slice %45 {offsets = [0, 12, 0], sizes = [8, 1, 8], strides = [1, 1, 1]} : vector<8x16x8xbf16> to vector<8x1x8xbf16>
    %65 = vector.extract_strided_slice %45 {offsets = [0, 13, 0], sizes = [8, 1, 8], strides = [1, 1, 1]} : vector<8x16x8xbf16> to vector<8x1x8xbf16>
    %66 = arith.maximumf %64, %65 : vector<8x1x8xbf16>
    %67 = vector.extract_strided_slice %45 {offsets = [0, 14, 0], sizes = [8, 1, 8], strides = [1, 1, 1]} : vector<8x16x8xbf16> to vector<8x1x8xbf16>
    %68 = vector.extract_strided_slice %45 {offsets = [0, 15, 0], sizes = [8, 1, 8], strides = [1, 1, 1]} : vector<8x16x8xbf16> to vector<8x1x8xbf16>
    %69 = arith.maximumf %67, %68 : vector<8x1x8xbf16>
    %70 = tpu.concatenate %48, %51, %54, %57, %60, %63, %66, %69 in 1 : vector<8x1x8xbf16>, vector<8x1x8xbf16>, vector<8x1x8xbf16>, vector<8x1x8xbf16>, vector<8x1x8xbf16>, vector<8x1x8xbf16>, vector<8x1x8xbf16>, vector<8x1x8xbf16> -> vector<8x8x8xbf16>
    %c1_47 = arith.constant 1 : index
    %c1_48 = arith.constant 1 : index
    %c0_49 = arith.constant 0 : index
    %71 = vector.load %arg11[%c1_47, %c1_48, %c0_49] : memref<10x10x8xbf16, #tpu.memory_space<vmem>>, vector<8x8x8xbf16>
    tpu.vector_store %arg11[%c1_47, %c1_48, %c0_49], %70 {strides = array<i32>} : memref<10x10x8xbf16, #tpu.memory_space<vmem>>, vector<8x8x8xbf16>,
    %cst_50 = arith.constant 0.000000e+00 : f32
    %72 = vector.broadcast %cst_50 : f32 to vector<64x16xf32>
    %c0_51 = arith.constant 0 : index
    %c0_52 = arith.constant 0 : index
    %c0_53 = arith.constant 0 : index
    %73 = vector.load %arg11[%c0_51, %c0_52, %c0_53] : memref<10x10x8xbf16, #tpu.memory_space<vmem>>, vector<8x8x8xbf16>
    %c0_54 = arith.constant 0 : index
    %c1_55 = arith.constant 1 : index
    %c0_56 = arith.constant 0 : index
    %74 = vector.load %arg11[%c0_54, %c1_55, %c0_56] : memref<10x10x8xbf16, #tpu.memory_space<vmem>>, vector<8x8x8xbf16>
    %c0_57 = arith.constant 0 : index
    %c2_58 = arith.constant 2 : index
    %c0_59 = arith.constant 0 : index
    %75 = vector.load %arg11[%c0_57, %c2_58, %c0_59] : memref<10x10x8xbf16, #tpu.memory_space<vmem>>, vector<8x8x8xbf16>
    %76 = tpu.concatenate %73, %74, %75 in 2 : vector<8x8x8xbf16>, vector<8x8x8xbf16>, vector<8x8x8xbf16> -> vector<8x8x24xbf16>
    %77 = vector.shape_cast %76 : vector<8x8x24xbf16> to vector<64x24xbf16>
    %c0_60 = arith.constant 0 : index
    %c0_61 = arith.constant 0 : index
    %c0_62 = arith.constant 0 : index
    %78 = vector.load %arg5[%c0_60, %c0_61, %c0_62] : memref<3x24x16xbf16, #tpu.memory_space<vmem>>, vector<1x24x16xbf16>
    %79 = vector.shape_cast %78 : vector<1x24x16xbf16> to vector<24x16xbf16>
    %cst_63 = arith.constant dense<0.000000e+00> : vector<64x16xf32>
    %80 = tpu.matmul %77, %79, %cst_63 {dimension_numbers = #tpu.dot_dimension_numbers<[1], [0], [0], [1], [0, 0, 1, 1], [], []>} : vector<64x24xbf16>, vector<24x16xbf16>, vector<64x16xf32> -> vector<64x16xf32>
    %81 = arith.addf %72, %80 : vector<64x16xf32>
    %c1_64 = arith.constant 1 : index
    %c0_65 = arith.constant 0 : index
    %c0_66 = arith.constant 0 : index
    %82 = vector.load %arg11[%c1_64, %c0_65, %c0_66] : memref<10x10x8xbf16, #tpu.memory_space<vmem>>, vector<8x8x8xbf16>
    %c1_67 = arith.constant 1 : index
    %c1_68 = arith.constant 1 : index
    %c0_69 = arith.constant 0 : index
    %83 = vector.load %arg11[%c1_67, %c1_68, %c0_69] : memref<10x10x8xbf16, #tpu.memory_space<vmem>>, vector<8x8x8xbf16>
    %c1_70 = arith.constant 1 : index
    %c2_71 = arith.constant 2 : index
    %c0_72 = arith.constant 0 : index
    %84 = vector.load %arg11[%c1_70, %c2_71, %c0_72] : memref<10x10x8xbf16, #tpu.memory_space<vmem>>, vector<8x8x8xbf16>
    %85 = tpu.concatenate %82, %83, %84 in 2 : vector<8x8x8xbf16>, vector<8x8x8xbf16>, vector<8x8x8xbf16> -> vector<8x8x24xbf16>
    %86 = vector.shape_cast %85 : vector<8x8x24xbf16> to vector<64x24xbf16>
    %c1_73 = arith.constant 1 : index
    %c0_74 = arith.constant 0 : index
    %c0_75 = arith.constant 0 : index
    %87 = vector.load %arg5[%c1_73, %c0_74, %c0_75] : memref<3x24x16xbf16, #tpu.memory_space<vmem>>, vector<1x24x16xbf16>
    %88 = vector.shape_cast %87 : vector<1x24x16xbf16> to vector<24x16xbf16>
    %cst_76 = arith.constant dense<0.000000e+00> : vector<64x16xf32>
    %89 = tpu.matmul %86, %88, %cst_76 {dimension_numbers = #tpu.dot_dimension_numbers<[1], [0], [0], [1], [0, 0, 1, 1], [], []>} : vector<64x24xbf16>, vector<24x16xbf16>, vector<64x16xf32> -> vector<64x16xf32>
    %90 = arith.addf %81, %89 : vector<64x16xf32>
    %c2_77 = arith.constant 2 : index
    %c0_78 = arith.constant 0 : index
    %c0_79 = arith.constant 0 : index
    %91 = vector.load %arg11[%c2_77, %c0_78, %c0_79] : memref<10x10x8xbf16, #tpu.memory_space<vmem>>, vector<8x8x8xbf16>
    %c2_80 = arith.constant 2 : index
    %c1_81 = arith.constant 1 : index
    %c0_82 = arith.constant 0 : index
    %92 = vector.load %arg11[%c2_80, %c1_81, %c0_82] : memref<10x10x8xbf16, #tpu.memory_space<vmem>>, vector<8x8x8xbf16>
    %c2_83 = arith.constant 2 : index
    %c2_84 = arith.constant 2 : index
    %c0_85 = arith.constant 0 : index
    %93 = vector.load %arg11[%c2_83, %c2_84, %c0_85] : memref<10x10x8xbf16, #tpu.memory_space<vmem>>, vector<8x8x8xbf16>
    %94 = tpu.concatenate %91, %92, %93 in 2 : vector<8x8x8xbf16>, vector<8x8x8xbf16>, vector<8x8x8xbf16> -> vector<8x8x24xbf16>
    %95 = vector.shape_cast %94 : vector<8x8x24xbf16> to vector<64x24xbf16>
    %c2_86 = arith.constant 2 : index
    %c0_87 = arith.constant 0 : index
    %c0_88 = arith.constant 0 : index
    %96 = vector.load %arg5[%c2_86, %c0_87, %c0_88] : memref<3x24x16xbf16, #tpu.memory_space<vmem>>, vector<1x24x16xbf16>
    %97 = vector.shape_cast %96 : vector<1x24x16xbf16> to vector<24x16xbf16>
    %cst_89 = arith.constant dense<0.000000e+00> : vector<64x16xf32>
    %98 = tpu.matmul %95, %97, %cst_89 {dimension_numbers = #tpu.dot_dimension_numbers<[1], [0], [0], [1], [0, 0, 1, 1], [], []>} : vector<64x24xbf16>, vector<24x16xbf16>, vector<64x16xf32> -> vector<64x16xf32>
    %99 = arith.addf %90, %98 : vector<64x16xf32>
    %c0_90 = arith.constant 0 : index
    %c0_91 = arith.constant 0 : index
    %100 = vector.load %arg6[%c0_90, %c0_91] : memref<1x16xf32, #tpu.memory_space<vmem>>, vector<1x16xf32>
    %101 = vector.broadcast %100 : vector<1x16xf32> to vector<64x16xf32>
    %102 = arith.addf %99, %101 : vector<64x16xf32>
    %cst_92 = arith.constant 0.000000e+00 : f32
    %103 = vector.broadcast %cst_92 : f32 to vector<64x16xf32>
    %104 = arith.maximumf %102, %103 : vector<64x16xf32>
    %105 = arith.truncf %104 : vector<64x16xf32> to vector<64x16xbf16>
    %106 = vector.shape_cast %105 : vector<64x16xbf16> to vector<4x2x8x16xbf16>
    %107 = vector.extract_strided_slice %106 {offsets = [0, 0, 0, 0], sizes = [4, 1, 8, 16], strides = [1, 1, 1, 1]} : vector<4x2x8x16xbf16> to vector<4x1x8x16xbf16>
    %108 = vector.shape_cast %107 : vector<4x1x8x16xbf16> to vector<4x8x16xbf16>
    %109 = vector.extract_strided_slice %106 {offsets = [0, 1, 0, 0], sizes = [4, 1, 8, 16], strides = [1, 1, 1, 1]} : vector<4x2x8x16xbf16> to vector<4x1x8x16xbf16>
    %110 = vector.shape_cast %109 : vector<4x1x8x16xbf16> to vector<4x8x16xbf16>
    %111 = arith.maximumf %108, %110 : vector<4x8x16xbf16>
    %112 = vector.extract_strided_slice %111 {offsets = [0, 0, 0], sizes = [4, 1, 16], strides = [1, 1, 1]} : vector<4x8x16xbf16> to vector<4x1x16xbf16>
    %113 = vector.extract_strided_slice %111 {offsets = [0, 1, 0], sizes = [4, 1, 16], strides = [1, 1, 1]} : vector<4x8x16xbf16> to vector<4x1x16xbf16>
    %114 = arith.maximumf %112, %113 : vector<4x1x16xbf16>
    %115 = vector.extract_strided_slice %111 {offsets = [0, 2, 0], sizes = [4, 1, 16], strides = [1, 1, 1]} : vector<4x8x16xbf16> to vector<4x1x16xbf16>
    %116 = vector.extract_strided_slice %111 {offsets = [0, 3, 0], sizes = [4, 1, 16], strides = [1, 1, 1]} : vector<4x8x16xbf16> to vector<4x1x16xbf16>
    %117 = arith.maximumf %115, %116 : vector<4x1x16xbf16>
    %118 = vector.extract_strided_slice %111 {offsets = [0, 4, 0], sizes = [4, 1, 16], strides = [1, 1, 1]} : vector<4x8x16xbf16> to vector<4x1x16xbf16>
    %119 = vector.extract_strided_slice %111 {offsets = [0, 5, 0], sizes = [4, 1, 16], strides = [1, 1, 1]} : vector<4x8x16xbf16> to vector<4x1x16xbf16>
    %120 = arith.maximumf %118, %119 : vector<4x1x16xbf16>
    %121 = vector.extract_strided_slice %111 {offsets = [0, 6, 0], sizes = [4, 1, 16], strides = [1, 1, 1]} : vector<4x8x16xbf16> to vector<4x1x16xbf16>
    %122 = vector.extract_strided_slice %111 {offsets = [0, 7, 0], sizes = [4, 1, 16], strides = [1, 1, 1]} : vector<4x8x16xbf16> to vector<4x1x16xbf16>
    %123 = arith.maximumf %121, %122 : vector<4x1x16xbf16>
    %124 = tpu.concatenate %114, %117, %120, %123 in 1 : vector<4x1x16xbf16>, vector<4x1x16xbf16>, vector<4x1x16xbf16>, vector<4x1x16xbf16> -> vector<4x4x16xbf16>
    %c1_93 = arith.constant 1 : index
    %c1_94 = arith.constant 1 : index
    %c0_95 = arith.constant 0 : index
    %125 = vector.load %arg12[%c1_93, %c1_94, %c0_95] : memref<6x6x16xbf16, #tpu.memory_space<vmem>>, vector<4x4x16xbf16>
    tpu.vector_store %arg12[%c1_93, %c1_94, %c0_95], %124 {strides = array<i32>} : memref<6x6x16xbf16, #tpu.memory_space<vmem>>, vector<4x4x16xbf16>,
    %cst_96 = arith.constant 0.000000e+00 : f32
    %126 = vector.broadcast %cst_96 : f32 to vector<16x32xf32>
    %c0_97 = arith.constant 0 : index
    %c0_98 = arith.constant 0 : index
    %c0_99 = arith.constant 0 : index
    %127 = vector.load %arg12[%c0_97, %c0_98, %c0_99] : memref<6x6x16xbf16, #tpu.memory_space<vmem>>, vector<4x4x16xbf16>
    %c0_100 = arith.constant 0 : index
    %c1_101 = arith.constant 1 : index
    %c0_102 = arith.constant 0 : index
    %128 = vector.load %arg12[%c0_100, %c1_101, %c0_102] : memref<6x6x16xbf16, #tpu.memory_space<vmem>>, vector<4x4x16xbf16>
    %c0_103 = arith.constant 0 : index
    %c2_104 = arith.constant 2 : index
    %c0_105 = arith.constant 0 : index
    %129 = vector.load %arg12[%c0_103, %c2_104, %c0_105] : memref<6x6x16xbf16, #tpu.memory_space<vmem>>, vector<4x4x16xbf16>
    %130 = tpu.concatenate %127, %128, %129 in 2 : vector<4x4x16xbf16>, vector<4x4x16xbf16>, vector<4x4x16xbf16> -> vector<4x4x48xbf16>
    %131 = vector.shape_cast %130 : vector<4x4x48xbf16> to vector<16x48xbf16>
    %c0_106 = arith.constant 0 : index
    %c0_107 = arith.constant 0 : index
    %c0_108 = arith.constant 0 : index
    %132 = vector.load %arg7[%c0_106, %c0_107, %c0_108] : memref<3x48x32xbf16, #tpu.memory_space<vmem>>, vector<1x48x32xbf16>
    %133 = vector.shape_cast %132 : vector<1x48x32xbf16> to vector<48x32xbf16>
    %cst_109 = arith.constant dense<0.000000e+00> : vector<16x32xf32>
    %134 = tpu.matmul %131, %133, %cst_109 {dimension_numbers = #tpu.dot_dimension_numbers<[1], [0], [0], [1], [0, 0, 1, 1], [], []>} : vector<16x48xbf16>, vector<48x32xbf16>, vector<16x32xf32> -> vector<16x32xf32>
    %135 = arith.addf %126, %134 : vector<16x32xf32>
    %c1_110 = arith.constant 1 : index
    %c0_111 = arith.constant 0 : index
    %c0_112 = arith.constant 0 : index
    %136 = vector.load %arg12[%c1_110, %c0_111, %c0_112] : memref<6x6x16xbf16, #tpu.memory_space<vmem>>, vector<4x4x16xbf16>
    %c1_113 = arith.constant 1 : index
    %c1_114 = arith.constant 1 : index
    %c0_115 = arith.constant 0 : index
    %137 = vector.load %arg12[%c1_113, %c1_114, %c0_115] : memref<6x6x16xbf16, #tpu.memory_space<vmem>>, vector<4x4x16xbf16>
    %c1_116 = arith.constant 1 : index
    %c2_117 = arith.constant 2 : index
    %c0_118 = arith.constant 0 : index
    %138 = vector.load %arg12[%c1_116, %c2_117, %c0_118] : memref<6x6x16xbf16, #tpu.memory_space<vmem>>, vector<4x4x16xbf16>
    %139 = tpu.concatenate %136, %137, %138 in 2 : vector<4x4x16xbf16>, vector<4x4x16xbf16>, vector<4x4x16xbf16> -> vector<4x4x48xbf16>
    %140 = vector.shape_cast %139 : vector<4x4x48xbf16> to vector<16x48xbf16>
    %c1_119 = arith.constant 1 : index
    %c0_120 = arith.constant 0 : index
    %c0_121 = arith.constant 0 : index
    %141 = vector.load %arg7[%c1_119, %c0_120, %c0_121] : memref<3x48x32xbf16, #tpu.memory_space<vmem>>, vector<1x48x32xbf16>
    %142 = vector.shape_cast %141 : vector<1x48x32xbf16> to vector<48x32xbf16>
    %cst_122 = arith.constant dense<0.000000e+00> : vector<16x32xf32>
    %143 = tpu.matmul %140, %142, %cst_122 {dimension_numbers = #tpu.dot_dimension_numbers<[1], [0], [0], [1], [0, 0, 1, 1], [], []>} : vector<16x48xbf16>, vector<48x32xbf16>, vector<16x32xf32> -> vector<16x32xf32>
    %144 = arith.addf %135, %143 : vector<16x32xf32>
    %c2_123 = arith.constant 2 : index
    %c0_124 = arith.constant 0 : index
    %c0_125 = arith.constant 0 : index
    %145 = vector.load %arg12[%c2_123, %c0_124, %c0_125] : memref<6x6x16xbf16, #tpu.memory_space<vmem>>, vector<4x4x16xbf16>
    %c2_126 = arith.constant 2 : index
    %c1_127 = arith.constant 1 : index
    %c0_128 = arith.constant 0 : index
    %146 = vector.load %arg12[%c2_126, %c1_127, %c0_128] : memref<6x6x16xbf16, #tpu.memory_space<vmem>>, vector<4x4x16xbf16>
    %c2_129 = arith.constant 2 : index
    %c2_130 = arith.constant 2 : index
    %c0_131 = arith.constant 0 : index
    %147 = vector.load %arg12[%c2_129, %c2_130, %c0_131] : memref<6x6x16xbf16, #tpu.memory_space<vmem>>, vector<4x4x16xbf16>
    %148 = tpu.concatenate %145, %146, %147 in 2 : vector<4x4x16xbf16>, vector<4x4x16xbf16>, vector<4x4x16xbf16> -> vector<4x4x48xbf16>
    %149 = vector.shape_cast %148 : vector<4x4x48xbf16> to vector<16x48xbf16>
    %c2_132 = arith.constant 2 : index
    %c0_133 = arith.constant 0 : index
    %c0_134 = arith.constant 0 : index
    %150 = vector.load %arg7[%c2_132, %c0_133, %c0_134] : memref<3x48x32xbf16, #tpu.memory_space<vmem>>, vector<1x48x32xbf16>
    %151 = vector.shape_cast %150 : vector<1x48x32xbf16> to vector<48x32xbf16>
    %cst_135 = arith.constant dense<0.000000e+00> : vector<16x32xf32>
    %152 = tpu.matmul %149, %151, %cst_135 {dimension_numbers = #tpu.dot_dimension_numbers<[1], [0], [0], [1], [0, 0, 1, 1], [], []>} : vector<16x48xbf16>, vector<48x32xbf16>, vector<16x32xf32> -> vector<16x32xf32>
    %153 = arith.addf %144, %152 : vector<16x32xf32>
    %c0_136 = arith.constant 0 : index
    %c0_137 = arith.constant 0 : index
    %154 = vector.load %arg8[%c0_136, %c0_137] : memref<1x32xf32, #tpu.memory_space<vmem>>, vector<1x32xf32>
    %155 = vector.broadcast %154 : vector<1x32xf32> to vector<16x32xf32>
    %156 = arith.addf %153, %155 : vector<16x32xf32>
    %cst_138 = arith.constant 0.000000e+00 : f32
    %157 = vector.broadcast %cst_138 : f32 to vector<16x32xf32>
    %158 = arith.maximumf %156, %157 : vector<16x32xf32>
    %c0_139 = arith.constant 0 : index
    %c0_140 = arith.constant 0 : index
    %c0_141 = arith.constant 0 : index
    %c0_142 = arith.constant 0 : index
    %159 = vector.load %arg2[%c0_139, %c0_140, %c0_141, %c0_142] : memref<1x16x16x3xbf16, #tpu.memory_space<vmem>>, vector<1x16x16x3xbf16>
    %160 = vector.shape_cast %159 : vector<1x16x16x3xbf16> to vector<16x16x3xbf16>
    %c1_143 = arith.constant 1 : index
    %c1_144 = arith.constant 1 : index
    %c0_145 = arith.constant 0 : index
    %161 = vector.load %arg10[%c1_143, %c1_144, %c0_145] : memref<18x18x3xbf16, #tpu.memory_space<vmem>>, vector<16x16x3xbf16>
    tpu.vector_store %arg10[%c1_143, %c1_144, %c0_145], %160 {strides = array<i32>} : memref<18x18x3xbf16, #tpu.memory_space<vmem>>, vector<16x16x3xbf16>,
    %cst_146 = arith.constant 0.000000e+00 : f32
    %162 = vector.broadcast %cst_146 : f32 to vector<256x8xf32>
    %c0_147 = arith.constant 0 : index
    %c0_148 = arith.constant 0 : index
    %c0_149 = arith.constant 0 : index
    %163 = vector.load %arg10[%c0_147, %c0_148, %c0_149] : memref<18x18x3xbf16, #tpu.memory_space<vmem>>, vector<16x16x3xbf16>
    %c0_150 = arith.constant 0 : index
    %c1_151 = arith.constant 1 : index
    %c0_152 = arith.constant 0 : index
    %164 = vector.load %arg10[%c0_150, %c1_151, %c0_152] : memref<18x18x3xbf16, #tpu.memory_space<vmem>>, vector<16x16x3xbf16>
    %c0_153 = arith.constant 0 : index
    %c2_154 = arith.constant 2 : index
    %c0_155 = arith.constant 0 : index
    %165 = vector.load %arg10[%c0_153, %c2_154, %c0_155] : memref<18x18x3xbf16, #tpu.memory_space<vmem>>, vector<16x16x3xbf16>
    %166 = tpu.concatenate %163, %164, %165 in 2 : vector<16x16x3xbf16>, vector<16x16x3xbf16>, vector<16x16x3xbf16> -> vector<16x16x9xbf16>
    %167 = vector.shape_cast %166 : vector<16x16x9xbf16> to vector<256x9xbf16>
    %c0_156 = arith.constant 0 : index
    %c0_157 = arith.constant 0 : index
    %c0_158 = arith.constant 0 : index
    %168 = vector.load %arg3[%c0_156, %c0_157, %c0_158] : memref<3x9x8xbf16, #tpu.memory_space<vmem>>, vector<1x9x8xbf16>
    %169 = vector.shape_cast %168 : vector<1x9x8xbf16> to vector<9x8xbf16>
    %cst_159 = arith.constant dense<0.000000e+00> : vector<256x8xf32>
    %170 = tpu.matmul %167, %169, %cst_159 {dimension_numbers = #tpu.dot_dimension_numbers<[1], [0], [0], [1], [0, 0, 1, 1], [], []>} : vector<256x9xbf16>, vector<9x8xbf16>, vector<256x8xf32> -> vector<256x8xf32>
    %171 = arith.addf %162, %170 : vector<256x8xf32>
    %c1_160 = arith.constant 1 : index
    %c0_161 = arith.constant 0 : index
    %c0_162 = arith.constant 0 : index
    %172 = vector.load %arg10[%c1_160, %c0_161, %c0_162] : memref<18x18x3xbf16, #tpu.memory_space<vmem>>, vector<16x16x3xbf16>
    %c1_163 = arith.constant 1 : index
    %c1_164 = arith.constant 1 : index
    %c0_165 = arith.constant 0 : index
    %173 = vector.load %arg10[%c1_163, %c1_164, %c0_165] : memref<18x18x3xbf16, #tpu.memory_space<vmem>>, vector<16x16x3xbf16>
    %c1_166 = arith.constant 1 : index
    %c2_167 = arith.constant 2 : index
    %c0_168 = arith.constant 0 : index
    %174 = vector.load %arg10[%c1_166, %c2_167, %c0_168] : memref<18x18x3xbf16, #tpu.memory_space<vmem>>, vector<16x16x3xbf16>
    %175 = tpu.concatenate %172, %173, %174 in 2 : vector<16x16x3xbf16>, vector<16x16x3xbf16>, vector<16x16x3xbf16> -> vector<16x16x9xbf16>
    %176 = vector.shape_cast %175 : vector<16x16x9xbf16> to vector<256x9xbf16>
    %c1_169 = arith.constant 1 : index
    %c0_170 = arith.constant 0 : index
    %c0_171 = arith.constant 0 : index
    %177 = vector.load %arg3[%c1_169, %c0_170, %c0_171] : memref<3x9x8xbf16, #tpu.memory_space<vmem>>, vector<1x9x8xbf16>
    %178 = vector.shape_cast %177 : vector<1x9x8xbf16> to vector<9x8xbf16>
    %cst_172 = arith.constant dense<0.000000e+00> : vector<256x8xf32>
    %179 = tpu.matmul %176, %178, %cst_172 {dimension_numbers = #tpu.dot_dimension_numbers<[1], [0], [0], [1], [0, 0, 1, 1], [], []>} : vector<256x9xbf16>, vector<9x8xbf16>, vector<256x8xf32> -> vector<256x8xf32>
    %180 = arith.addf %171, %179 : vector<256x8xf32>
    %c2_173 = arith.constant 2 : index
    %c0_174 = arith.constant 0 : index
    %c0_175 = arith.constant 0 : index
    %181 = vector.load %arg10[%c2_173, %c0_174, %c0_175] : memref<18x18x3xbf16, #tpu.memory_space<vmem>>, vector<16x16x3xbf16>
    %c2_176 = arith.constant 2 : index
    %c1_177 = arith.constant 1 : index
    %c0_178 = arith.constant 0 : index
    %182 = vector.load %arg10[%c2_176, %c1_177, %c0_178] : memref<18x18x3xbf16, #tpu.memory_space<vmem>>, vector<16x16x3xbf16>
    %c2_179 = arith.constant 2 : index
    %c2_180 = arith.constant 2 : index
    %c0_181 = arith.constant 0 : index
    %183 = vector.load %arg10[%c2_179, %c2_180, %c0_181] : memref<18x18x3xbf16, #tpu.memory_space<vmem>>, vector<16x16x3xbf16>
    %184 = tpu.concatenate %181, %182, %183 in 2 : vector<16x16x3xbf16>, vector<16x16x3xbf16>, vector<16x16x3xbf16> -> vector<16x16x9xbf16>
    %185 = vector.shape_cast %184 : vector<16x16x9xbf16> to vector<256x9xbf16>
    %c2_182 = arith.constant 2 : index
    %c0_183 = arith.constant 0 : index
    %c0_184 = arith.constant 0 : index
    %186 = vector.load %arg3[%c2_182, %c0_183, %c0_184] : memref<3x9x8xbf16, #tpu.memory_space<vmem>>, vector<1x9x8xbf16>
    %187 = vector.shape_cast %186 : vector<1x9x8xbf16> to vector<9x8xbf16>
    %cst_185 = arith.constant dense<0.000000e+00> : vector<256x8xf32>
    %188 = tpu.matmul %185, %187, %cst_185 {dimension_numbers = #tpu.dot_dimension_numbers<[1], [0], [0], [1], [0, 0, 1, 1], [], []>} : vector<256x9xbf16>, vector<9x8xbf16>, vector<256x8xf32> -> vector<256x8xf32>
    %189 = arith.addf %180, %188 : vector<256x8xf32>
    %c0_186 = arith.constant 0 : index
    %c0_187 = arith.constant 0 : index
    %190 = vector.load %arg4[%c0_186, %c0_187] : memref<1x8xf32, #tpu.memory_space<vmem>>, vector<1x8xf32>
    %191 = vector.broadcast %190 : vector<1x8xf32> to vector<256x8xf32>
    %192 = arith.addf %189, %191 : vector<256x8xf32>
    %cst_188 = arith.constant 0.000000e+00 : f32
    %193 = vector.broadcast %cst_188 : f32 to vector<256x8xf32>
    %194 = arith.maximumf %192, %193 : vector<256x8xf32>
    %195 = arith.truncf %194 : vector<256x8xf32> to vector<256x8xbf16>
    %196 = vector.shape_cast %195 : vector<256x8xbf16> to vector<8x2x16x8xbf16>
    %197 = vector.extract_strided_slice %196 {offsets = [0, 0, 0, 0], sizes = [8, 1, 16, 8], strides = [1, 1, 1, 1]} : vector<8x2x16x8xbf16> to vector<8x1x16x8xbf16>
    %198 = vector.shape_cast %197 : vector<8x1x16x8xbf16> to vector<8x16x8xbf16>
    %199 = vector.extract_strided_slice %196 {offsets = [0, 1, 0, 0], sizes = [8, 1, 16, 8], strides = [1, 1, 1, 1]} : vector<8x2x16x8xbf16> to vector<8x1x16x8xbf16>
    %200 = vector.shape_cast %199 : vector<8x1x16x8xbf16> to vector<8x16x8xbf16>
    %201 = arith.maximumf %198, %200 : vector<8x16x8xbf16>
    %202 = vector.extract_strided_slice %201 {offsets = [0, 0, 0], sizes = [8, 1, 8], strides = [1, 1, 1]} : vector<8x16x8xbf16> to vector<8x1x8xbf16>
    %203 = vector.extract_strided_slice %201 {offsets = [0, 1, 0], sizes = [8, 1, 8], strides = [1, 1, 1]} : vector<8x16x8xbf16> to vector<8x1x8xbf16>
    %204 = arith.maximumf %202, %203 : vector<8x1x8xbf16>
    %205 = vector.extract_strided_slice %201 {offsets = [0, 2, 0], sizes = [8, 1, 8], strides = [1, 1, 1]} : vector<8x16x8xbf16> to vector<8x1x8xbf16>
    %206 = vector.extract_strided_slice %201 {offsets = [0, 3, 0], sizes = [8, 1, 8], strides = [1, 1, 1]} : vector<8x16x8xbf16> to vector<8x1x8xbf16>
    %207 = arith.maximumf %205, %206 : vector<8x1x8xbf16>
    %208 = vector.extract_strided_slice %201 {offsets = [0, 4, 0], sizes = [8, 1, 8], strides = [1, 1, 1]} : vector<8x16x8xbf16> to vector<8x1x8xbf16>
    %209 = vector.extract_strided_slice %201 {offsets = [0, 5, 0], sizes = [8, 1, 8], strides = [1, 1, 1]} : vector<8x16x8xbf16> to vector<8x1x8xbf16>
    %210 = arith.maximumf %208, %209 : vector<8x1x8xbf16>
    %211 = vector.extract_strided_slice %201 {offsets = [0, 6, 0], sizes = [8, 1, 8], strides = [1, 1, 1]} : vector<8x16x8xbf16> to vector<8x1x8xbf16>
    %212 = vector.extract_strided_slice %201 {offsets = [0, 7, 0], sizes = [8, 1, 8], strides = [1, 1, 1]} : vector<8x16x8xbf16> to vector<8x1x8xbf16>
    %213 = arith.maximumf %211, %212 : vector<8x1x8xbf16>
    %214 = vector.extract_strided_slice %201 {offsets = [0, 8, 0], sizes = [8, 1, 8], strides = [1, 1, 1]} : vector<8x16x8xbf16> to vector<8x1x8xbf16>
    %215 = vector.extract_strided_slice %201 {offsets = [0, 9, 0], sizes = [8, 1, 8], strides = [1, 1, 1]} : vector<8x16x8xbf16> to vector<8x1x8xbf16>
    %216 = arith.maximumf %214, %215 : vector<8x1x8xbf16>
    %217 = vector.extract_strided_slice %201 {offsets = [0, 10, 0], sizes = [8, 1, 8], strides = [1, 1, 1]} : vector<8x16x8xbf16> to vector<8x1x8xbf16>
    %218 = vector.extract_strided_slice %201 {offsets = [0, 11, 0], sizes = [8, 1, 8], strides = [1, 1, 1]} : vector<8x16x8xbf16> to vector<8x1x8xbf16>
    %219 = arith.maximumf %217, %218 : vector<8x1x8xbf16>
    %220 = vector.extract_strided_slice %201 {offsets = [0, 12, 0], sizes = [8, 1, 8], strides = [1, 1, 1]} : vector<8x16x8xbf16> to vector<8x1x8xbf16>
    %221 = vector.extract_strided_slice %201 {offsets = [0, 13, 0], sizes = [8, 1, 8], strides = [1, 1, 1]} : vector<8x16x8xbf16> to vector<8x1x8xbf16>
    %222 = arith.maximumf %220, %221 : vector<8x1x8xbf16>
    %223 = vector.extract_strided_slice %201 {offsets = [0, 14, 0], sizes = [8, 1, 8], strides = [1, 1, 1]} : vector<8x16x8xbf16> to vector<8x1x8xbf16>
    %224 = vector.extract_strided_slice %201 {offsets = [0, 15, 0], sizes = [8, 1, 8], strides = [1, 1, 1]} : vector<8x16x8xbf16> to vector<8x1x8xbf16>
    %225 = arith.maximumf %223, %224 : vector<8x1x8xbf16>
    %226 = tpu.concatenate %204, %207, %210, %213, %216, %219, %222, %225 in 1 : vector<8x1x8xbf16>, vector<8x1x8xbf16>, vector<8x1x8xbf16>, vector<8x1x8xbf16>, vector<8x1x8xbf16>, vector<8x1x8xbf16>, vector<8x1x8xbf16>, vector<8x1x8xbf16> -> vector<8x8x8xbf16>
    %c1_189 = arith.constant 1 : index
    %c1_190 = arith.constant 1 : index
    %c0_191 = arith.constant 0 : index
    %227 = vector.load %arg11[%c1_189, %c1_190, %c0_191] : memref<10x10x8xbf16, #tpu.memory_space<vmem>>, vector<8x8x8xbf16>
    tpu.vector_store %arg11[%c1_189, %c1_190, %c0_191], %226 {strides = array<i32>} : memref<10x10x8xbf16, #tpu.memory_space<vmem>>, vector<8x8x8xbf16>,
    %cst_192 = arith.constant 0.000000e+00 : f32
    %228 = vector.broadcast %cst_192 : f32 to vector<64x16xf32>
    %c0_193 = arith.constant 0 : index
    %c0_194 = arith.constant 0 : index
    %c0_195 = arith.constant 0 : index
    %229 = vector.load %arg11[%c0_193, %c0_194, %c0_195] : memref<10x10x8xbf16, #tpu.memory_space<vmem>>, vector<8x8x8xbf16>
    %c0_196 = arith.constant 0 : index
    %c1_197 = arith.constant 1 : index
    %c0_198 = arith.constant 0 : index
    %230 = vector.load %arg11[%c0_196, %c1_197, %c0_198] : memref<10x10x8xbf16, #tpu.memory_space<vmem>>, vector<8x8x8xbf16>
    %c0_199 = arith.constant 0 : index
    %c2_200 = arith.constant 2 : index
    %c0_201 = arith.constant 0 : index
    %231 = vector.load %arg11[%c0_199, %c2_200, %c0_201] : memref<10x10x8xbf16, #tpu.memory_space<vmem>>, vector<8x8x8xbf16>
    %232 = tpu.concatenate %229, %230, %231 in 2 : vector<8x8x8xbf16>, vector<8x8x8xbf16>, vector<8x8x8xbf16> -> vector<8x8x24xbf16>
    %233 = vector.shape_cast %232 : vector<8x8x24xbf16> to vector<64x24xbf16>
    %c0_202 = arith.constant 0 : index
    %c0_203 = arith.constant 0 : index
    %c0_204 = arith.constant 0 : index
    %234 = vector.load %arg5[%c0_202, %c0_203, %c0_204] : memref<3x24x16xbf16, #tpu.memory_space<vmem>>, vector<1x24x16xbf16>
    %235 = vector.shape_cast %234 : vector<1x24x16xbf16> to vector<24x16xbf16>
    %cst_205 = arith.constant dense<0.000000e+00> : vector<64x16xf32>
    %236 = tpu.matmul %233, %235, %cst_205 {dimension_numbers = #tpu.dot_dimension_numbers<[1], [0], [0], [1], [0, 0, 1, 1], [], []>} : vector<64x24xbf16>, vector<24x16xbf16>, vector<64x16xf32> -> vector<64x16xf32>
    %237 = arith.addf %228, %236 : vector<64x16xf32>
    %c1_206 = arith.constant 1 : index
    %c0_207 = arith.constant 0 : index
    %c0_208 = arith.constant 0 : index
    %238 = vector.load %arg11[%c1_206, %c0_207, %c0_208] : memref<10x10x8xbf16, #tpu.memory_space<vmem>>, vector<8x8x8xbf16>
    %c1_209 = arith.constant 1 : index
    %c1_210 = arith.constant 1 : index
    %c0_211 = arith.constant 0 : index
    %239 = vector.load %arg11[%c1_209, %c1_210, %c0_211] : memref<10x10x8xbf16, #tpu.memory_space<vmem>>, vector<8x8x8xbf16>
    %c1_212 = arith.constant 1 : index
    %c2_213 = arith.constant 2 : index
    %c0_214 = arith.constant 0 : index
    %240 = vector.load %arg11[%c1_212, %c2_213, %c0_214] : memref<10x10x8xbf16, #tpu.memory_space<vmem>>, vector<8x8x8xbf16>
    %241 = tpu.concatenate %238, %239, %240 in 2 : vector<8x8x8xbf16>, vector<8x8x8xbf16>, vector<8x8x8xbf16> -> vector<8x8x24xbf16>
    %242 = vector.shape_cast %241 : vector<8x8x24xbf16> to vector<64x24xbf16>
    %c1_215 = arith.constant 1 : index
    %c0_216 = arith.constant 0 : index
    %c0_217 = arith.constant 0 : index
    %243 = vector.load %arg5[%c1_215, %c0_216, %c0_217] : memref<3x24x16xbf16, #tpu.memory_space<vmem>>, vector<1x24x16xbf16>
    %244 = vector.shape_cast %243 : vector<1x24x16xbf16> to vector<24x16xbf16>
    %cst_218 = arith.constant dense<0.000000e+00> : vector<64x16xf32>
    %245 = tpu.matmul %242, %244, %cst_218 {dimension_numbers = #tpu.dot_dimension_numbers<[1], [0], [0], [1], [0, 0, 1, 1], [], []>} : vector<64x24xbf16>, vector<24x16xbf16>, vector<64x16xf32> -> vector<64x16xf32>
    %246 = arith.addf %237, %245 : vector<64x16xf32>
    %c2_219 = arith.constant 2 : index
    %c0_220 = arith.constant 0 : index
    %c0_221 = arith.constant 0 : index
    %247 = vector.load %arg11[%c2_219, %c0_220, %c0_221] : memref<10x10x8xbf16, #tpu.memory_space<vmem>>, vector<8x8x8xbf16>
    %c2_222 = arith.constant 2 : index
    %c1_223 = arith.constant 1 : index
    %c0_224 = arith.constant 0 : index
    %248 = vector.load %arg11[%c2_222, %c1_223, %c0_224] : memref<10x10x8xbf16, #tpu.memory_space<vmem>>, vector<8x8x8xbf16>
    %c2_225 = arith.constant 2 : index
    %c2_226 = arith.constant 2 : index
    %c0_227 = arith.constant 0 : index
    %249 = vector.load %arg11[%c2_225, %c2_226, %c0_227] : memref<10x10x8xbf16, #tpu.memory_space<vmem>>, vector<8x8x8xbf16>
    %250 = tpu.concatenate %247, %248, %249 in 2 : vector<8x8x8xbf16>, vector<8x8x8xbf16>, vector<8x8x8xbf16> -> vector<8x8x24xbf16>
    %251 = vector.shape_cast %250 : vector<8x8x24xbf16> to vector<64x24xbf16>
    %c2_228 = arith.constant 2 : index
    %c0_229 = arith.constant 0 : index
    %c0_230 = arith.constant 0 : index
    %252 = vector.load %arg5[%c2_228, %c0_229, %c0_230] : memref<3x24x16xbf16, #tpu.memory_space<vmem>>, vector<1x24x16xbf16>
    %253 = vector.shape_cast %252 : vector<1x24x16xbf16> to vector<24x16xbf16>
    %cst_231 = arith.constant dense<0.000000e+00> : vector<64x16xf32>
    %254 = tpu.matmul %251, %253, %cst_231 {dimension_numbers = #tpu.dot_dimension_numbers<[1], [0], [0], [1], [0, 0, 1, 1], [], []>} : vector<64x24xbf16>, vector<24x16xbf16>, vector<64x16xf32> -> vector<64x16xf32>
    %255 = arith.addf %246, %254 : vector<64x16xf32>
    %c0_232 = arith.constant 0 : index
    %c0_233 = arith.constant 0 : index
    %256 = vector.load %arg6[%c0_232, %c0_233] : memref<1x16xf32, #tpu.memory_space<vmem>>, vector<1x16xf32>
    %257 = vector.broadcast %256 : vector<1x16xf32> to vector<64x16xf32>
    %258 = arith.addf %255, %257 : vector<64x16xf32>
    %cst_234 = arith.constant 0.000000e+00 : f32
    %259 = vector.broadcast %cst_234 : f32 to vector<64x16xf32>
    %260 = arith.maximumf %258, %259 : vector<64x16xf32>
    %261 = arith.truncf %260 : vector<64x16xf32> to vector<64x16xbf16>
    %262 = vector.shape_cast %261 : vector<64x16xbf16> to vector<4x2x8x16xbf16>
    %263 = vector.extract_strided_slice %262 {offsets = [0, 0, 0, 0], sizes = [4, 1, 8, 16], strides = [1, 1, 1, 1]} : vector<4x2x8x16xbf16> to vector<4x1x8x16xbf16>
    %264 = vector.shape_cast %263 : vector<4x1x8x16xbf16> to vector<4x8x16xbf16>
    %265 = vector.extract_strided_slice %262 {offsets = [0, 1, 0, 0], sizes = [4, 1, 8, 16], strides = [1, 1, 1, 1]} : vector<4x2x8x16xbf16> to vector<4x1x8x16xbf16>
    %266 = vector.shape_cast %265 : vector<4x1x8x16xbf16> to vector<4x8x16xbf16>
    %267 = arith.maximumf %264, %266 : vector<4x8x16xbf16>
    %268 = vector.extract_strided_slice %267 {offsets = [0, 0, 0], sizes = [4, 1, 16], strides = [1, 1, 1]} : vector<4x8x16xbf16> to vector<4x1x16xbf16>
    %269 = vector.extract_strided_slice %267 {offsets = [0, 1, 0], sizes = [4, 1, 16], strides = [1, 1, 1]} : vector<4x8x16xbf16> to vector<4x1x16xbf16>
    %270 = arith.maximumf %268, %269 : vector<4x1x16xbf16>
    %271 = vector.extract_strided_slice %267 {offsets = [0, 2, 0], sizes = [4, 1, 16], strides = [1, 1, 1]} : vector<4x8x16xbf16> to vector<4x1x16xbf16>
    %272 = vector.extract_strided_slice %267 {offsets = [0, 3, 0], sizes = [4, 1, 16], strides = [1, 1, 1]} : vector<4x8x16xbf16> to vector<4x1x16xbf16>
    %273 = arith.maximumf %271, %272 : vector<4x1x16xbf16>
    %274 = vector.extract_strided_slice %267 {offsets = [0, 4, 0], sizes = [4, 1, 16], strides = [1, 1, 1]} : vector<4x8x16xbf16> to vector<4x1x16xbf16>
    %275 = vector.extract_strided_slice %267 {offsets = [0, 5, 0], sizes = [4, 1, 16], strides = [1, 1, 1]} : vector<4x8x16xbf16> to vector<4x1x16xbf16>
    %276 = arith.maximumf %274, %275 : vector<4x1x16xbf16>
    %277 = vector.extract_strided_slice %267 {offsets = [0, 6, 0], sizes = [4, 1, 16], strides = [1, 1, 1]} : vector<4x8x16xbf16> to vector<4x1x16xbf16>
    %278 = vector.extract_strided_slice %267 {offsets = [0, 7, 0], sizes = [4, 1, 16], strides = [1, 1, 1]} : vector<4x8x16xbf16> to vector<4x1x16xbf16>
    %279 = arith.maximumf %277, %278 : vector<4x1x16xbf16>
    %280 = tpu.concatenate %270, %273, %276, %279 in 1 : vector<4x1x16xbf16>, vector<4x1x16xbf16>, vector<4x1x16xbf16>, vector<4x1x16xbf16> -> vector<4x4x16xbf16>
    %c1_235 = arith.constant 1 : index
    %c1_236 = arith.constant 1 : index
    %c0_237 = arith.constant 0 : index
    %281 = vector.load %arg12[%c1_235, %c1_236, %c0_237] : memref<6x6x16xbf16, #tpu.memory_space<vmem>>, vector<4x4x16xbf16>
    tpu.vector_store %arg12[%c1_235, %c1_236, %c0_237], %280 {strides = array<i32>} : memref<6x6x16xbf16, #tpu.memory_space<vmem>>, vector<4x4x16xbf16>,
    %cst_238 = arith.constant 0.000000e+00 : f32
    %282 = vector.broadcast %cst_238 : f32 to vector<16x32xf32>
    %c0_239 = arith.constant 0 : index
    %c0_240 = arith.constant 0 : index
    %c0_241 = arith.constant 0 : index
    %283 = vector.load %arg12[%c0_239, %c0_240, %c0_241] : memref<6x6x16xbf16, #tpu.memory_space<vmem>>, vector<4x4x16xbf16>
    %c0_242 = arith.constant 0 : index
    %c1_243 = arith.constant 1 : index
    %c0_244 = arith.constant 0 : index
    %284 = vector.load %arg12[%c0_242, %c1_243, %c0_244] : memref<6x6x16xbf16, #tpu.memory_space<vmem>>, vector<4x4x16xbf16>
    %c0_245 = arith.constant 0 : index
    %c2_246 = arith.constant 2 : index
    %c0_247 = arith.constant 0 : index
    %285 = vector.load %arg12[%c0_245, %c2_246, %c0_247] : memref<6x6x16xbf16, #tpu.memory_space<vmem>>, vector<4x4x16xbf16>
    %286 = tpu.concatenate %283, %284, %285 in 2 : vector<4x4x16xbf16>, vector<4x4x16xbf16>, vector<4x4x16xbf16> -> vector<4x4x48xbf16>
    %287 = vector.shape_cast %286 : vector<4x4x48xbf16> to vector<16x48xbf16>
    %c0_248 = arith.constant 0 : index
    %c0_249 = arith.constant 0 : index
    %c0_250 = arith.constant 0 : index
    %288 = vector.load %arg7[%c0_248, %c0_249, %c0_250] : memref<3x48x32xbf16, #tpu.memory_space<vmem>>, vector<1x48x32xbf16>
    %289 = vector.shape_cast %288 : vector<1x48x32xbf16> to vector<48x32xbf16>
    %cst_251 = arith.constant dense<0.000000e+00> : vector<16x32xf32>
    %290 = tpu.matmul %287, %289, %cst_251 {dimension_numbers = #tpu.dot_dimension_numbers<[1], [0], [0], [1], [0, 0, 1, 1], [], []>} : vector<16x48xbf16>, vector<48x32xbf16>, vector<16x32xf32> -> vector<16x32xf32>
    %291 = arith.addf %282, %290 : vector<16x32xf32>
    %c1_252 = arith.constant 1 : index
    %c0_253 = arith.constant 0 : index
    %c0_254 = arith.constant 0 : index
    %292 = vector.load %arg12[%c1_252, %c0_253, %c0_254] : memref<6x6x16xbf16, #tpu.memory_space<vmem>>, vector<4x4x16xbf16>
    %c1_255 = arith.constant 1 : index
    %c1_256 = arith.constant 1 : index
    %c0_257 = arith.constant 0 : index
    %293 = vector.load %arg12[%c1_255, %c1_256, %c0_257] : memref<6x6x16xbf16, #tpu.memory_space<vmem>>, vector<4x4x16xbf16>
    %c1_258 = arith.constant 1 : index
    %c2_259 = arith.constant 2 : index
    %c0_260 = arith.constant 0 : index
    %294 = vector.load %arg12[%c1_258, %c2_259, %c0_260] : memref<6x6x16xbf16, #tpu.memory_space<vmem>>, vector<4x4x16xbf16>
    %295 = tpu.concatenate %292, %293, %294 in 2 : vector<4x4x16xbf16>, vector<4x4x16xbf16>, vector<4x4x16xbf16> -> vector<4x4x48xbf16>
    %296 = vector.shape_cast %295 : vector<4x4x48xbf16> to vector<16x48xbf16>
    %c1_261 = arith.constant 1 : index
    %c0_262 = arith.constant 0 : index
    %c0_263 = arith.constant 0 : index
    %297 = vector.load %arg7[%c1_261, %c0_262, %c0_263] : memref<3x48x32xbf16, #tpu.memory_space<vmem>>, vector<1x48x32xbf16>
    %298 = vector.shape_cast %297 : vector<1x48x32xbf16> to vector<48x32xbf16>
    %cst_264 = arith.constant dense<0.000000e+00> : vector<16x32xf32>
    %299 = tpu.matmul %296, %298, %cst_264 {dimension_numbers = #tpu.dot_dimension_numbers<[1], [0], [0], [1], [0, 0, 1, 1], [], []>} : vector<16x48xbf16>, vector<48x32xbf16>, vector<16x32xf32> -> vector<16x32xf32>
    %300 = arith.addf %291, %299 : vector<16x32xf32>
    %c2_265 = arith.constant 2 : index
    %c0_266 = arith.constant 0 : index
    %c0_267 = arith.constant 0 : index
    %301 = vector.load %arg12[%c2_265, %c0_266, %c0_267] : memref<6x6x16xbf16, #tpu.memory_space<vmem>>, vector<4x4x16xbf16>
    %c2_268 = arith.constant 2 : index
    %c1_269 = arith.constant 1 : index
    %c0_270 = arith.constant 0 : index
    %302 = vector.load %arg12[%c2_268, %c1_269, %c0_270] : memref<6x6x16xbf16, #tpu.memory_space<vmem>>, vector<4x4x16xbf16>
    %c2_271 = arith.constant 2 : index
    %c2_272 = arith.constant 2 : index
    %c0_273 = arith.constant 0 : index
    %303 = vector.load %arg12[%c2_271, %c2_272, %c0_273] : memref<6x6x16xbf16, #tpu.memory_space<vmem>>, vector<4x4x16xbf16>
    %304 = tpu.concatenate %301, %302, %303 in 2 : vector<4x4x16xbf16>, vector<4x4x16xbf16>, vector<4x4x16xbf16> -> vector<4x4x48xbf16>
    %305 = vector.shape_cast %304 : vector<4x4x48xbf16> to vector<16x48xbf16>
    %c2_274 = arith.constant 2 : index
    %c0_275 = arith.constant 0 : index
    %c0_276 = arith.constant 0 : index
    %306 = vector.load %arg7[%c2_274, %c0_275, %c0_276] : memref<3x48x32xbf16, #tpu.memory_space<vmem>>, vector<1x48x32xbf16>
    %307 = vector.shape_cast %306 : vector<1x48x32xbf16> to vector<48x32xbf16>
    %cst_277 = arith.constant dense<0.000000e+00> : vector<16x32xf32>
    %308 = tpu.matmul %305, %307, %cst_277 {dimension_numbers = #tpu.dot_dimension_numbers<[1], [0], [0], [1], [0, 0, 1, 1], [], []>} : vector<16x48xbf16>, vector<48x32xbf16>, vector<16x32xf32> -> vector<16x32xf32>
    %309 = arith.addf %300, %308 : vector<16x32xf32>
    %c0_278 = arith.constant 0 : index
    %c0_279 = arith.constant 0 : index
    %310 = vector.load %arg8[%c0_278, %c0_279] : memref<1x32xf32, #tpu.memory_space<vmem>>, vector<1x32xf32>
    %311 = vector.broadcast %310 : vector<1x32xf32> to vector<16x32xf32>
    %312 = arith.addf %309, %311 : vector<16x32xf32>
    %cst_280 = arith.constant 0.000000e+00 : f32
    %313 = vector.broadcast %cst_280 : f32 to vector<16x32xf32>
    %314 = arith.maximumf %312, %313 : vector<16x32xf32>
    %315 = arith.subf %158, %314 : vector<16x32xf32>
    %c0_281 = arith.constant 0 : index
    %c0_282 = arith.constant 0 : index
    %316 = vector.load %arg13[%c0_281, %c0_282] : memref<16x32xf32, #tpu.memory_space<vmem>>, vector<16x32xf32>
    %317 = arith.mulf %315, %315 : vector<16x32xf32>
    %318 = arith.addf %316, %317 : vector<16x32xf32>
    %c0_283 = arith.constant 0 : index
    %c0_284 = arith.constant 0 : index
    %319 = vector.load %arg13[%c0_283, %c0_284] : memref<16x32xf32, #tpu.memory_space<vmem>>, vector<16x32xf32>
    tpu.vector_store %arg13[%c0_283, %c0_284], %318 {strides = array<i32>} : memref<16x32xf32, #tpu.memory_space<vmem>>, vector<16x32xf32>,
    %c1_i32 = arith.constant 1 : i32
    %320 = arith.cmpi eq, %arg0, %c1_i32 : i32
    %321 = arith.extui %320 : i1 to i32
    %c0_i32_285 = arith.constant 0 : i32
    %322 = arith.cmpi ne, %321, %c0_i32_285 : i32
    scf.if %322 {
      %c0_286 = arith.constant 0 : index
      %c0_287 = arith.constant 0 : index
      %323 = vector.load %arg13[%c0_286, %c0_287] : memref<16x32xf32, #tpu.memory_space<vmem>>, vector<16x32xf32>
      %324 = vector.shape_cast %323 : vector<16x32xf32> to vector<1x16x32xf32>
      %cst_288 = arith.constant dense<0.000000e+00> : vector<1xf32>
      %325 = vector.multi_reduction <add>, %324, %cst_288 [1, 2] : vector<1x16x32xf32> to vector<1xf32>
      %326 = vector.shape_cast %325 : vector<1xf32> to vector<1x1x1xf32>
      %327 = vector.extract %326[0, 0, 0] : f32 from vector<1x1x1xf32>
      %328 = vector.broadcast %327 : f32 to vector<1x1xf32>
      %cst_289 = arith.constant 9.765625E-4 : f32
      %329 = vector.broadcast %cst_289 : f32 to vector<1x1xf32>
      %330 = arith.mulf %328, %329 : vector<1x1xf32>
      %c0_290 = arith.constant 0 : index
      %c0_291 = arith.constant 0 : index
      %331 = vector.load %arg9[%c0_290, %c0_291] : memref<1x1xf32, #tpu.memory_space<vmem>>, vector<1x1xf32>
      tpu.vector_store %arg9[%c0_290, %c0_291], %330 {strides = array<i32>} : memref<1x1xf32, #tpu.memory_space<vmem>>, vector<1x1xf32>,
    } else {
    }
    return
  }
  func.func @transform_0(%arg0: i32) -> (i32, i32, i32, i32) {
    %c0_i32 = arith.constant 0 : i32
    %c0_i32_0 = arith.constant 0 : i32
    %c0_i32_1 = arith.constant 0 : i32
    %c0_i32_2 = arith.constant 0 : i32
    return %arg0, %c0_i32, %c0_i32_0, %c0_i32_1 : i32, i32, i32, i32
  }
  func.func @transform_1(%arg0: i32) -> (i32, i32, i32, i32) {
    %c0_i32 = arith.constant 0 : i32
    %c0_i32_0 = arith.constant 0 : i32
    %c0_i32_1 = arith.constant 0 : i32
    %c0_i32_2 = arith.constant 0 : i32
    return %arg0, %c0_i32, %c0_i32_0, %c0_i32_1 : i32, i32, i32, i32
  }
  func.func @transform_2(%arg0: i32) -> (i32, i32, i32) {
    %c0_i32 = arith.constant 0 : i32
    %c0_i32_0 = arith.constant 0 : i32
    %c0_i32_1 = arith.constant 0 : i32
    %c0_i32_2 = arith.constant 0 : i32
    return %c0_i32, %c0_i32_0, %c0_i32_1 : i32, i32, i32
  }
  func.func @transform_3(%arg0: i32) -> (i32, i32) {
    %c0_i32 = arith.constant 0 : i32
    %c0_i32_0 = arith.constant 0 : i32
    %c0_i32_1 = arith.constant 0 : i32
    return %c0_i32, %c0_i32_0 : i32, i32
  }
  func.func @transform_4(%arg0: i32) -> (i32, i32, i32) {
    %c0_i32 = arith.constant 0 : i32
    %c0_i32_0 = arith.constant 0 : i32
    %c0_i32_1 = arith.constant 0 : i32
    %c0_i32_2 = arith.constant 0 : i32
    return %c0_i32, %c0_i32_0, %c0_i32_1 : i32, i32, i32
  }
  func.func @transform_5(%arg0: i32) -> (i32, i32) {
    %c0_i32 = arith.constant 0 : i32
    %c0_i32_0 = arith.constant 0 : i32
    %c0_i32_1 = arith.constant 0 : i32
    return %c0_i32, %c0_i32_0 : i32, i32
  }
  func.func @transform_6(%arg0: i32) -> (i32, i32, i32) {
    %c0_i32 = arith.constant 0 : i32
    %c0_i32_0 = arith.constant 0 : i32
    %c0_i32_1 = arith.constant 0 : i32
    %c0_i32_2 = arith.constant 0 : i32
    return %c0_i32, %c0_i32_0, %c0_i32_1 : i32, i32, i32
  }
  func.func @transform_7(%arg0: i32) -> (i32, i32) {
    %c0_i32 = arith.constant 0 : i32
    %c0_i32_0 = arith.constant 0 : i32
    %c0_i32_1 = arith.constant 0 : i32
    return %c0_i32, %c0_i32_0 : i32, i32
  }
  func.func @transform_8(%arg0: i32) -> (i32, i32) {
    %c0_i32 = arith.constant 0 : i32
    %c0_i32_0 = arith.constant 0 : i32
    %c0_i32_1 = arith.constant 0 : i32
    return %c0_i32, %c0_i32_0 : i32, i32
  }
}

</mosaic_0001>

<bundles_post_ra>
// kernel: perceptual_loss.1
= control target key start
LH: loop header
LB: loop body
LE: loop exit
PB: predicated region body
PF: predicated region fallthrough
CT: control target
= control target key end

     0   :  { %13 = vsyncpa [#allocation7], 0  ;;  %s12949_s27 = smov 0   ;;  %s16940_s0 = inlined_call_operand.vmem [shape: bf16[2,16,16,3], index: 0, kind: input, shape index: {}]   ;;  %s16941_s1 = inlined_call_operand.vmem [shape: bf16[2,16,16,3], index: 1, kind: input, shape index: {}]   ;;  %s16942_s2 = inlined_call_operand.vmem [shape: bf16[3,9,8], index: 2, kind: input, shape index: {}]   ;;  %s16943_s3 = inlined_call_operand.vmem [shape: f32[1,8], index: 3, kind: input, shape index: {}]   ;;  %s16944_s4 = inlined_call_operand.vmem [shape: bf16[3,24,16], index: 4, kind: input, shape index: {}]   ;;  %s16945_s5 = inlined_call_operand.vmem [shape: f32[1,16], index: 5, kind: input, shape index: {}]   ;;  %s16946_s6 = inlined_call_operand.vmem [shape: bf16[3,48,32], index: 6, kind: input, shape index: {}]   ;;  %s16947_s7 = inlined_call_operand.vmem [shape: f32[1,32], index: 7, kind: input, shape index: {}]   ;;  %s16948_s8 = inlined_call_operand.hbm [shape: f32[1,1], index: 8, kind: output, shape index: {}]  }
   0x1 LB: > { %s12955_s28 = sadd.s32 4294967295, %s12890_s27   ;;  %p11120_p0 = scmp.ge.s32.totalorder %s12890_s27, 1  ;;  %s12890_s27 = sphi %s12949_s27, %s19_s27  }
   0x2   : > { %p268_p1 = scmp.lt.s32.totalorder %s12890_s27, 3 }
   0x4   : > { %p269_p2 = pnand %p11120_p0, %p268_p1 }
   0x6   : > { %272 = sbr.rel (%p269_p2) target bundleno = 2655 (0xa5f), region = 52 }
   0xb   : > { %p302_p3 = scmp.lt.s32.totalorder %s12955_s28, 1  ;;  %p11125_p4 = scmp.ne.s32.totalorder %s12955_s28, 0 }
   0xd   : > { %s303_s29 = scalar_select %p302_p3, %s12955_s28, 1 }
   0xe   : > { %316 = sbr.rel (%p11125_p4) target bundleno = 61 (0x3d), region = 56 }
   0xf   : > { %s11855_s30 = sshll.u32 %s303_s29, 7 }
  0x10   : > { %s12964_s11 = scalar_lea.vmem %s16940_s0, %s11855_s30  ;;  %s12969_s14 = scalar_lea.vmem %s16941_s1, %s11855_s30 }
  0x13   : > { %vm317_vm0 = vcmask 19456   ;;  %vm320_vm1 = vcmask 16384   ;;  %vm373_vm2 = vcmask 60416   ;;  %v12892_v0 = vmov 0  }
  0x14   : > { %318 = vst.msk [vmem:[#allocation2] sm:$0xf] %vm317_vm0, %v12892_v0  ;;  %319 = vst.msk [vmem:[#allocation2 + $0x4] sm:$0xf] %vm317_vm0, %v12892_v0  ;;  %vm375_vm3 = vcmask 57344   ;;  %vm395_vm4 = vcmask 124928  }
  0x15   : > { %322 = vst.msk [vmem:[#allocation2 + $0xc] sm:$0xf] %vm317_vm0, %v12892_v0  ;;  %323 = vst.msk [vmem:[#allocation2 + $0x10] sm:$0xf] %vm317_vm0, %v12892_v0  ;;  %vm402_vm5 = vcmask 261120   ;;  %v12893_v1 = vmov 0.0  }
  0x16   : > { %325 = vst.msk [vmem:[#allocation2 + $0x18] sm:$0xf] %vm317_vm0, %v12892_v0  ;;  %326 = vst.msk [vmem:[#allocation2 + $0x1c] sm:$0xf] %vm317_vm0, %v12892_v0 }
  0x17   : > { %328 = vst.msk [vmem:[#allocation2 + $0x24] sm:$0xf] %vm317_vm0, %v12892_v0  ;;  %329 = vst.msk [vmem:[#allocation2 + $0x28] sm:$0xf] %vm317_vm0, %v12892_v0 }
  0x18   : > { %331 = vst.msk [vmem:[#allocation2 + $0x30] sm:$0xf] %vm317_vm0, %v12892_v0  ;;  %332 = vst.msk [vmem:[#allocation2 + $0x34] sm:$0xf] %vm317_vm0, %v12892_v0 }
  0x19   : > { %334 = vst.msk [vmem:[#allocation2 + $0x3c] sm:$0xf] %vm317_vm0, %v12892_v0  ;;  %335 = vst.msk [vmem:[#allocation2 + $0x40] sm:$0xf] %vm317_vm0, %v12892_v0 }
  0x1a   : > { %337 = vst.msk [vmem:[#allocation2 + $0x48] sm:$0xf] %vm317_vm0, %v12892_v0  ;;  %338 = vst.msk [vmem:[#allocation2 + $0x4c] sm:$0xf] %vm317_vm0, %v12892_v0 }
  0x1b   : > { %340 = vst.msk [vmem:[#allocation2 + $0x54] sm:$0xf] %vm317_vm0, %v12892_v0  ;;  %341 = vst.msk [vmem:[#allocation2 + $0x58] sm:$0xf] %vm317_vm0, %v12892_v0 }
  0x1c   : > { %343 = vst.msk [vmem:[#allocation2 + $0x60] sm:$0xf] %vm317_vm0, %v12892_v0  ;;  %344 = vst.msk [vmem:[#allocation2 + $0x64] sm:$0xf] %vm317_vm0, %v12892_v0 }
  0x1d   : > { %346 = vst.msk [vmem:[#allocation2 + $0x6c] sm:$0xf] %vm317_vm0, %v12892_v0  ;;  %347 = vst.msk [vmem:[#allocation2 + $0x70] sm:$0xf] %vm317_vm0, %v12892_v0 }
  0x1e   : > { %349 = vst.msk [vmem:[#allocation2 + $0x78] sm:$0xf] %vm317_vm0, %v12892_v0  ;;  %350 = vst.msk [vmem:[#allocation2 + $0x7c] sm:$0xf] %vm317_vm0, %v12892_v0 }
  0x1f   : > { %352 = vst.msk [vmem:[#allocation2 + $0x84] sm:$0xf] %vm317_vm0, %v12892_v0  ;;  %353 = vst.msk [vmem:[#allocation2 + $0x88] sm:$0xf] %vm317_vm0, %v12892_v0 }
  0x20   : > { %355 = vst.msk [vmem:[#allocation2 + $0x90] sm:$0xf] %vm317_vm0, %v12892_v0  ;;  %356 = vst.msk [vmem:[#allocation2 + $0x94] sm:$0xf] %vm317_vm0, %v12892_v0 }
  0x21   : > { %358 = vst.msk [vmem:[#allocation2 + $0x9c] sm:$0xf] %vm317_vm0, %v12892_v0  ;;  %359 = vst.msk [vmem:[#allocation2 + $0xa0] sm:$0xf] %vm317_vm0, %v12892_v0 }
  0x22   : > { %361 = vst.msk [vmem:[#allocation2 + $0xa8] sm:$0xf] %vm317_vm0, %v12892_v0  ;;  %362 = vst.msk [vmem:[#allocation2 + $0xac] sm:$0xf] %vm317_vm0, %v12892_v0 }
  0x23   : > { %364 = vst.msk [vmem:[#allocation2 + $0xb4] sm:$0xf] %vm317_vm0, %v12892_v0  ;;  %365 = vst.msk [vmem:[#allocation2 + $0xb8] sm:$0xf] %vm317_vm0, %v12892_v0 }
  0x24   : > { %367 = vst.msk [vmem:[#allocation2 + $0xc0] sm:$0xf] %vm317_vm0, %v12892_v0  ;;  %368 = vst.msk [vmem:[#allocation2 + $0xc4] sm:$0xf] %vm317_vm0, %v12892_v0 }
  0x25   : > { %370 = vst.msk [vmem:[#allocation2 + $0xcc] sm:$0xf] %vm317_vm0, %v12892_v0  ;;  %371 = vst.msk [vmem:[#allocation2 + $0xd0] sm:$0xf] %vm317_vm0, %v12892_v0 }
  0x26   : > { %321 = vst.msk [vmem:[#allocation2 + $0x8] sm:$0x1] %vm320_vm1, %v12892_v0  ;;  %324 = vst.msk [vmem:[#allocation2 + $0x14] sm:$0x1] %vm320_vm1, %v12892_v0 }
  0x27   : > { %327 = vst.msk [vmem:[#allocation2 + $0x20] sm:$0x1] %vm320_vm1, %v12892_v0  ;;  %330 = vst.msk [vmem:[#allocation2 + $0x2c] sm:$0x1] %vm320_vm1, %v12892_v0 }
  0x28   : > { %333 = vst.msk [vmem:[#allocation2 + $0x38] sm:$0x1] %vm320_vm1, %v12892_v0  ;;  %336 = vst.msk [vmem:[#allocation2 + $0x44] sm:$0x1] %vm320_vm1, %v12892_v0 }
  0x29   : > { %339 = vst.msk [vmem:[#allocation2 + $0x50] sm:$0x1] %vm320_vm1, %v12892_v0  ;;  %342 = vst.msk [vmem:[#allocation2 + $0x5c] sm:$0x1] %vm320_vm1, %v12892_v0 }
  0x2a   : > { %345 = vst.msk [vmem:[#allocation2 + $0x68] sm:$0x1] %vm320_vm1, %v12892_v0  ;;  %348 = vst.msk [vmem:[#allocation2 + $0x74] sm:$0x1] %vm320_vm1, %v12892_v0 }
  0x2b   : > { %351 = vst.msk [vmem:[#allocation2 + $0x80] sm:$0x1] %vm320_vm1, %v12892_v0  ;;  %354 = vst.msk [vmem:[#allocation2 + $0x8c] sm:$0x1] %vm320_vm1, %v12892_v0 }
  0x2c   : > { %357 = vst.msk [vmem:[#allocation2 + $0x98] sm:$0x1] %vm320_vm1, %v12892_v0  ;;  %360 = vst.msk [vmem:[#allocation2 + $0xa4] sm:$0x1] %vm320_vm1, %v12892_v0 }
  0x2d   : > { %363 = vst.msk [vmem:[#allocation2 + $0xb0] sm:$0x1] %vm320_vm1, %v12892_v0  ;;  %366 = vst.msk [vmem:[#allocation2 + $0xbc] sm:$0x1] %vm320_vm1, %v12892_v0 }
  0x2e   : > { %369 = vst.msk [vmem:[#allocation2 + $0xc8] sm:$0x1] %vm320_vm1, %v12892_v0  ;;  %372 = vst.msk [vmem:[#allocation2 + $0xd4] sm:$0x1] %vm320_vm1, %v12892_v0 }
  0x2f   : > { %374 = vst.msk [vmem:[#allocation3] sm:$0xf] %vm373_vm2, %v12892_v0  ;;  %377 = vst.msk [vmem:[#allocation3 + $0x8] sm:$0xf] %vm373_vm2, %v12892_v0 }
  0x30   : > { %379 = vst.msk [vmem:[#allocation3 + $0x10] sm:$0xf] %vm373_vm2, %v12892_v0  ;;  %381 = vst.msk [vmem:[#allocation3 + $0x18] sm:$0xf] %vm373_vm2, %v12892_v0 }
  0x31   : > { %383 = vst.msk [vmem:[#allocation3 + $0x20] sm:$0xf] %vm373_vm2, %v12892_v0  ;;  %385 = vst.msk [vmem:[#allocation3 + $0x28] sm:$0xf] %vm373_vm2, %v12892_v0 }
  0x32   : > { %387 = vst.msk [vmem:[#allocation3 + $0x30] sm:$0xf] %vm373_vm2, %v12892_v0  ;;  %389 = vst.msk [vmem:[#allocation3 + $0x38] sm:$0xf] %vm373_vm2, %v12892_v0 }
  0x33   : > { %391 = vst.msk [vmem:[#allocation3 + $0x40] sm:$0xf] %vm373_vm2, %v12892_v0  ;;  %393 = vst.msk [vmem:[#allocation3 + $0x48] sm:$0xf] %vm373_vm2, %v12892_v0 }
  0x34   : > { %376 = vst.msk [vmem:[#allocation3 + $0x4] sm:$0x1] %vm375_vm3, %v12892_v0  ;;  %378 = vst.msk [vmem:[#allocation3 + $0xc] sm:$0x1] %vm375_vm3, %v12892_v0 }
  0x35   : > { %380 = vst.msk [vmem:[#allocation3 + $0x14] sm:$0x1] %vm375_vm3, %v12892_v0  ;;  %382 = vst.msk [vmem:[#allocation3 + $0x1c] sm:$0x1] %vm375_vm3, %v12892_v0 }
  0x36   : > { %384 = vst.msk [vmem:[#allocation3 + $0x24] sm:$0x1] %vm375_vm3, %v12892_v0  ;;  %386 = vst.msk [vmem:[#allocation3 + $0x2c] sm:$0x1] %vm375_vm3, %v12892_v0 }
  0x37   : > { %388 = vst.msk [vmem:[#allocation3 + $0x34] sm:$0x1] %vm375_vm3, %v12892_v0  ;;  %390 = vst.msk [vmem:[#allocation3 + $0x3c] sm:$0x1] %vm375_vm3, %v12892_v0 }
  0x38   : > { %392 = vst.msk [vmem:[#allocation3 + $0x44] sm:$0x1] %vm375_vm3, %v12892_v0  ;;  %394 = vst.msk [vmem:[#allocation3 + $0x4c] sm:$0x1] %vm375_vm3, %v12892_v0 }
  0x39   : > { %396 = vst.msk [vmem:[#allocation4] sm:$0x7] %vm395_vm4, %v12892_v0  ;;  %397 = vst.msk [vmem:[#allocation4 + $0x4] sm:$0x7] %vm395_vm4, %v12892_v0 }
  0x3a   : > { %398 = vst.msk [vmem:[#allocation4 + $0x8] sm:$0x7] %vm395_vm4, %v12892_v0  ;;  %399 = vst.msk [vmem:[#allocation4 + $0xc] sm:$0x7] %vm395_vm4, %v12892_v0 }
  0x3b   : > { %400 = vst.msk [vmem:[#allocation4 + $0x10] sm:$0x7] %vm395_vm4, %v12892_v0  ;;  %401 = vst.msk [vmem:[#allocation4 + $0x14] sm:$0x7] %vm395_vm4, %v12892_v0 }
  0x3c   : > { %403 = vst.msk [vmem:[#allocation5] sm:$0xff] %vm402_vm5, %v12893_v1  ;;  %404 = vst.msk [vmem:[#allocation5 + $0x8] sm:$0xff] %vm402_vm5, %v12893_v1 }
  0x3d PF: > { %v409_v2 = vld [vmem:[%s12964_s11 + $0x10] sm:$0xf]  ;;  %v410_v3 = vld [vmem:[%s12964_s11 + $0x14] sm:$0xf]  ;;  %vm437_vm6 = vsmask.f32 256 }
  0x3e   : > { %vm438_vm7 = vsmask.f32 4368  ;;  %v475_v4 = vshrl.u32 %v409_v2, 16  ;;  %v478_v5 = vshll.u32 %v409_v2, 16  ;;  %v483_v6 = vshrl.u32 %v410_v3, 16  ;;  %s12894_s15 = smov 6  }
  0x3f   : > { %vm13127_vm8 = vmor %vm437_vm6, %vm438_vm7  ;;  %v486_v8 = vshll.u32 %v410_v3, 16  ;;  %vm761_vm9 = vcmask 19456   ;;  %vm762_vm10 = vsmask.f32 7938  ;;  %vm769_vm11 = vcmask 16384   ;;  %s12895_s16 = smov 3  }
  0x40   : > { %v477_v9 = vrot.slane %v475_v4, 7  ;;  %v485_v10 = vrot.slane %v483_v6, 7  ;;  %vm13133_vm12 = vmand %vm761_vm9, %vm762_vm10  ;;  %v781_v12 = vld [vmem:[#allocation2 + $0x24] sm:$0xf]  ;;  %v785_v13 = vld [vmem:[#allocation2 + $0x2c] sm:$0x1] }
  0x41   : > { %vm13138_vm13 = vmand %vm769_vm11, %vm437_vm6  ;;  %v405_v15 = vld [vmem:[%s12964_s11] sm:$0xf]  ;;  %v406_v16 = vld [vmem:[%s12964_s11 + $0x4] sm:$0xf]  ;;  %vm1344_vm14 = vcmask 1046528   ;;  %vm16967_vm0 = vcmask 23552  }
  0x42   : > { %v480_v17 = vor.u32 %v478_v5, %v477_v9  ;;  %v481_v18 = vrot.slane %v477_v9, 4  ;;  %v488_v19 = vor.u32 %v486_v8, %v485_v10  ;;  %v490_v20 = vrot.slane %v485_v10, 4  ;;  %v5744_v25 = vld [vmem:[%s12969_s14] sm:$0xf]  ;;  %v764_v29 = vld [vmem:[#allocation2 + $0xc] sm:$0xf] }
  0x43   : > { %v441_v21 = vshrl.u32 %v405_v15, 16  ;;  %v444_v22 = vshll.u32 %v405_v15, 16  ;;  %v449_v23 = vshrl.u32 %v406_v16, 16  ;;  %v452_v24 = vshll.u32 %v406_v16, 16  ;;  %v5745_v30 = vld [vmem:[%s12969_s14 + $0x4] sm:$0xf] }
  0x44   : > { %v489_v26 = vsel %vm13127_vm8, %v481_v18, %v488_v19  ;;  %v782_v27 = vsel %vm13133_vm12, %v480_v17, %v781_v12  ;;  %v786_v28 = vsel %vm13138_vm13, %v490_v20, %v785_v13  ;;  %v5777_v31 = vshrl.u32 %v5744_v25, 16  ;;  %v413_v32 = vld [vmem:[%s12964_s11 + $0x20] sm:$0xf]  ;;  %v771_v35 = vld [vmem:[#allocation2 + $0x14] sm:$0x1]  ;;  %s12897_s23 = smov 8  }
  0x45   : > { %783 = vst [vmem:[#allocation2 + $0x24] sm:$0xf] %v782_v27  ;;  %784 = vst.msk [vmem:[#allocation2 + $0x28] sm:$0xf] %vm761_vm9, %v489_v26  ;;  %v443_v33 = vrot.slane %v441_v21, 7  ;;  %v451_v34 = vrot.slane %v449_v23, 7 }
  0x46   : > { %787 = vst [vmem:[#allocation2 + $0x2c] sm:$0x1] %v786_v28  ;;  %v5780_v36 = vshll.u32 %v5744_v25, 16  ;;  %v5785_v37 = vshrl.u32 %v5745_v30, 16  ;;  %v5779_v38 = vrot.slane %v5777_v31, 7  ;;  %v5788_v39 = vshll.u32 %v5745_v30, 16 }
  0x47   : > { %v414_v40 = vld [vmem:[%s12964_s11 + $0x24] sm:$0xf]  ;;  %v509_v41 = vshrl.u32 %v413_v32, 16  ;;  %v512_v42 = vshll.u32 %v413_v32, 16  ;;  %v446_v43 = vor.u32 %v444_v22, %v443_v33  ;;  %v447_v44 = vrot.slane %v443_v33, 4  ;;  %s12898_s24 = smov 16  }
  0x48   : > { %v454_v45 = vor.u32 %v452_v24, %v451_v34  ;;  %v456_v46 = vrot.slane %v451_v34, 4  ;;  %v13155_v47 = vor.u32 %v5780_v36, %v5779_v38  ;;  %v13157_v48 = vrot.slane %v5785_v37, 7  ;;  %v407_v50 = vld [vmem:[%s12964_s11 + $0x8] sm:$0xf]  ;;  %v795_v55 = vld [vmem:[#allocation2 + $0x3c] sm:$0xf] }
  0x49   : > { %v511_v49 = vrot.slane %v509_v41, 7  ;;  %v765_v52 = vsel %vm13133_vm12, %v446_v43, %v764_v29  ;;  %v517_v54 = vshrl.u32 %v414_v40, 16  ;;  %v5783_v56 = vrot.slane %v5779_v38, 4  ;;  %v799_v60 = vld [vmem:[#allocation2 + $0x44] sm:$0x1]  ;;  %s12899_s25 = smov 32  }
  0x4a   : > { %v455_v51 = vsel %vm13127_vm8, %v447_v44, %v454_v45  ;;  %v772_v53 = vsel %vm13138_vm13, %v456_v46, %v771_v35  ;;  %766 = vst [vmem:[#allocation2 + $0xc] sm:$0xf] %v765_v52  ;;  %v5790_v57 = vor.u32 %v5788_v39, %v13157_v48  ;;  %v520_v62 = vshll.u32 %v414_v40, 16  ;;  %v408_v63 = vld [vmem:[%s12964_s11 + $0xc] sm:$0xf]  ;;  %p11850_p5 = scmp.ne.s32.totalorder %s12955_s28, 1 }
  0x4b   : > { %768 = vst.msk [vmem:[#allocation2 + $0x10] sm:$0xf] %vm761_vm9, %v455_v51  ;;  %773 = vst [vmem:[#allocation2 + $0x14] sm:$0x1] %v772_v53  ;;  %v514_v58 = vor.u32 %v512_v42, %v511_v49  ;;  %v515_v59 = vrot.slane %v511_v49, 4  ;;  %v519_v61 = vrot.slane %v517_v54, 7 }
  0x4c   : > { %v458_v0 = vshrl.u32 %v407_v50, 16  ;;  %v461_v1 = vshll.u32 %v407_v50, 16  ;;  %v13169_v2 = vld [vmem:[#allocation2 + $0x28] sm:$0xf]  ;;  %v1543_v3 = vld [vmem:[#allocation2 + $0x24] sm:$0xe]  ;;  %v5791_v12 = vsel %vm13127_vm8, %v5783_v56, %v5790_v57 }
  0x4d   : > { %v796_v4 = vsel %vm13133_vm12, %v514_v58, %v795_v55  ;;  %v13173_v5 = vld [vmem:[#allocation2 + $0x2c] ss:$0 sps:$4 sm:$0x11]   ;;  %v11208_v6 = vcombine.low %v1543_v3, %v13169_v2  ;;  %v522_v8 = vor.u32 %v520_v62, %v519_v61  ;;  %v524_v9 = vrot.slane %v519_v61, 4  ;;  %v411_v10 = vld [vmem:[%s12964_s11 + $0x18] sm:$0xf] }
  0x4e   : > { %797 = vst [vmem:[#allocation2 + $0x3c] sm:$0xf] %v796_v4  ;;  %v460_v13 = vrot.slane %v458_v0, 7  ;;  %v466_v15 = vshrl.u32 %v408_v63, 16  ;;  %v469_v16 = vshll.u32 %v408_v63, 16  ;;  %v1964_v18 = vrot.slane %v13173_v5, 1 }
  0x4f   : > { %v1963_v17 = vrot.slane %v11208_v6, 1  ;;  %v523_v19 = vsel %vm13127_vm8, %v515_v59, %v522_v8  ;;  %v800_v20 = vsel %vm13138_vm13, %v524_v9, %v799_v60  ;;  %v774_v21 = vld [vmem:[#allocation2 + $0x18] sm:$0xf]  ;;  %v778_v25 = vld [vmem:[#allocation2 + $0x20] sm:$0x1]  ;;  %v492_v26 = vshrl.u32 %v411_v10, 16 }
  0x50   : > { %798 = vst.msk [vmem:[#allocation2 + $0x40] sm:$0xf] %vm761_vm9, %v523_v19  ;;  %801 = vst [vmem:[#allocation2 + $0x44] sm:$0x1] %v800_v20  ;;  %v463_v22 = vor.u32 %v461_v1, %v460_v13  ;;  %v464_v23 = vrot.slane %v460_v13, 4  ;;  %v468_v24 = vrot.slane %v466_v15, 7 }
  0x51   : > { %v1965_v27 = vsel %vm1344_vm14, %v1963_v17, %v1964_v18  ;;  %v1541_v30 = vld [vmem:[#allocation2 + $0xc] sm:$0xe]  ;;  %v412_v37 = vld [vmem:[%s12964_s11 + $0x1c] sm:$0xf]  ;;  %v494_v38 = vrot.slane %v492_v26, 7  ;;  %v495_v39 = vshll.u32 %v411_v10, 16 }
  0x52   : > { %v13186_v28 = vld [vmem:[#allocation2 + $0x10] sm:$0xf]  ;;  %2009 = vrot.lane.b32.xlu0 %v1965_v27, %s12894_s15  ;;  %v12408_v31 = vld [vmem:[#allocation2 + $0x14] ss:$0 sps:$4 sm:$0x11]   ;;  %v471_v32 = vor.u32 %v469_v16, %v468_v24  ;;  %v473_v33 = vrot.slane %v468_v24, 4  ;;  %v775_v34 = vsel %vm13133_vm12, %v463_v22, %v774_v21 }
  0x53   : > { %v1494_v29 = vld [vmem:[#allocation2 + $0x10] sm:$0xf]  ;;  %v1493_v36 = vld [vmem:[#allocation2 + $0xc] sm:$0xf]  ;;  %776 = vst [vmem:[#allocation2 + $0x18] sm:$0xf] %v775_v34  ;;  %v497_v51 = vor.u32 %v495_v39, %v494_v38 }
  0x54   : > { %6099 = vst.msk [vmem:[#allocation2 + $0x10] sm:$0xf] %vm761_vm9, %v5791_v12  ;;  %v11206_v35 = vcombine.low %v1541_v30, %v1494_v29  ;;  %v1958_v40 = vrot.slane %v12408_v31, 1  ;;  %v13193_v41 = vcombine.low %v1493_v36, %v1494_v29  ;;  %v472_v42 = vsel %vm13127_vm8, %v464_v23, %v471_v32  ;;  %v788_v43 = vld [vmem:[#allocation2 + $0x30] sm:$0xf] }
  0x55   : > { %v415_v44 = vld [vmem:[%s12964_s11 + $0x28] sm:$0xf]  ;;  %v1497_v45 = vld [vmem:[#allocation2 + $0x24] sm:$0xf]  ;;  %v1545_v49 = vld [vmem:[#allocation2 + $0x3c] sm:$0xe]  ;;  %v779_v50 = vsel %vm13138_vm13, %v473_v33, %v778_v25  ;;  %v789_v58 = vsel %vm13133_vm12, %v497_v51, %v788_v43 }
  0x56   : > { %v1957_v46 = vrot.slane %v11206_v35, 1  ;;  %777 = vst.msk [vmem:[#allocation2 + $0x1c] sm:$0xf] %vm761_vm9, %v472_v42  ;;  %v416_v52 = vld [vmem:[%s12964_s11 + $0x2c] sm:$0xf]  ;;  %v500_v53 = vshrl.u32 %v412_v37, 16  ;;  %v13211_v12 = vcombine.low %v1497_v45, %v13169_v2 }
  0x57   : > { %780 = vst [vmem:[#allocation2 + $0x20] sm:$0x1] %v779_v50  ;;  %v503_v54 = vshll.u32 %v412_v37, 16  ;;  %vm1071_vm15 = vsmask.f32 7424  ;;  %v1686_v55 = vshrl.u32 %v13193_v41, 16 }
  0x58   : > { %v1959_v56 = vsel %vm1344_vm14, %v1957_v46, %v1958_v40  ;;  %v1502_v57 = vld [vmem:[#allocation2 + $0x40] sm:$0xf]  ;;  %v1688_v59 = vshll.u32 %v13193_v41, 16  ;;  %v1693_v60 = vshll.u32 %v12408_v31, 16  ;;  %v498_v63 = vrot.slane %v494_v38, 4 }
  0x59   : > { %2005 = vrot.lane.b32.xlu1 %v1959_v56, %s12894_s15  ;;  %v13208_v61 = vld [vmem:[#allocation2 + $0x44] ss:$0 sps:$4 sm:$0x11]   ;;  %v11210_v62 = vcombine.low %v1545_v49, %v1502_v57  ;;  %v502_v0 = vrot.slane %v500_v53, 7  ;;  %790 = vst [vmem:[#allocation2 + $0x30] sm:$0xf] %v789_v58 }
  0x5a   : > { %v792_v1 = vld [vmem:[#allocation2 + $0x38] sm:$0x1]  ;;  %v526_v3 = vshrl.u32 %v415_v44, 16  ;;  %v1501_v4 = vld [vmem:[#allocation2 + $0x3c] sm:$0xf]  ;;  %v1690_v6 = vrot.slane %v1688_v59, 1 }
  0x5b   : > { %v1695_v8 = vrot.slane %v1693_v60, 1  ;;  %v529_v9 = vshll.u32 %v415_v44, 16  ;;  %v534_v10 = vshrl.u32 %v416_v52, 16  ;;  %v1969_v13 = vrot.slane %v11210_v62, 1  ;;  %v1495_v16 = vld [vmem:[#allocation2 + $0x18] sm:$0xf] }
  0x5c   : > { %v1970_v15 = vrot.slane %v13208_v61, 1  ;;  %v1542_v17 = vld [vmem:[#allocation2 + $0x18] sm:$0xe]  ;;  %v505_v18 = vor.u32 %v503_v54, %v502_v0  ;;  %v507_v19 = vrot.slane %v502_v0, 4  ;;  %v1691_v20 = vor.u32 %v1690_v6, %v1686_v55  ;;  %v802_v23 = vld [vmem:[#allocation2 + $0x48] sm:$0xf] }
  0x5d   : > { %v528_v21 = vrot.slane %v526_v3, 7  ;;  %v536_v22 = vrot.slane %v534_v10, 7  ;;  %v13214_v24 = vcombine.low %v1501_v4, %v1502_v57  ;;  %v1496_v26 = vld [vmem:[#allocation2 + $0x1c] sm:$0xf]  ;;  %v537_v27 = vshll.u32 %v416_v52, 16 }
  0x5e   : > { %v1971_v25 = vsel %vm1344_vm14, %v1969_v13, %v1970_v15  ;;  %v506_v2 = vsel %vm13127_vm8, %v498_v63, %v505_v18  ;;  %v806_v29 = vld [vmem:[#allocation2 + $0x50] sm:$0x1]  ;;  %v13220_v30 = vcombine.low %v1495_v16, %v1496_v26  ;;  %v12414_v31 = vld [vmem:[#allocation2 + $0x20] ss:$0 sps:$4 sm:$0x11]   ;;  %v11207_v32 = vcombine.low %v1542_v17, %v1496_v26 }
  0x5f   : > { %2013 = vrot.lane.b32.xlu0 %v1971_v25, %s12894_s15  ;;  %791 = vst.msk [vmem:[#allocation2 + $0x34] sm:$0xf] %vm761_vm9, %v506_v2  ;;  %v793_v33 = vsel %vm13138_vm13, %v507_v19, %v792_v1  ;;  %v1696_v34 = vsel %vm1071_vm15, %v1691_v20, %v1695_v8  ;;  %v531_v35 = vor.u32 %v529_v9, %v528_v21  ;;  %v532_v36 = vrot.slane %v528_v21, 4  ;;  %v419_v49 = vld [vmem:[%s12964_s11 + $0x38] sm:$0xf] }
  0x60   : > { %794 = vst [vmem:[#allocation2 + $0x38] sm:$0x1] %v793_v33  ;;  %v539_v37 = vor.u32 %v537_v27, %v536_v22  ;;  %v541_v38 = vrot.slane %v536_v22, 4  ;;  %v1960_v39 = vrot.slane %v11207_v32, 1  ;;  %v1961_v40 = vrot.slane %v12414_v31, 1 }
  0x61   : > { %v1710_v42 = vshrl.u32 %v13211_v12, 16  ;;  %v803_v44 = vsel %vm13133_vm12, %v531_v35, %v802_v23  ;;  %v1698_v46 = vshrl.u32 %v13220_v30, 16  ;;  %v1499_v51 = vld [vmem:[#allocation2 + $0x30] sm:$0xf]  ;;  %v1700_v52 = vshll.u32 %v13220_v30, 16 }
  0x62   : > { %v540_v43 = vsel %vm13127_vm8, %v532_v36, %v539_v37  ;;  %v807_v45 = vsel %vm13138_vm13, %v541_v38, %v806_v29  ;;  %v1962_v50 = vsel %vm1344_vm14, %v1960_v39, %v1961_v40  ;;  %804 = vst [vmem:[#allocation2 + $0x48] sm:$0xf] %v803_v44  ;;  %v1705_v53 = vshll.u32 %v12414_v31, 16  ;;  %v1544_v55 = vld [vmem:[#allocation2 + $0x30] sm:$0xe] }
  0x63   : > { %1877 = vrot.lane.b32.xlu0 %v1696_v34, %s12895_s16  ;;  %805 = vst.msk [vmem:[#allocation2 + $0x4c] sm:$0xf] %vm761_vm9, %v540_v43  ;;  %808 = vst [vmem:[#allocation2 + $0x50] sm:$0x1] %v807_v45  ;;  %v1712_v54 = vshll.u32 %v13211_v12, 16  ;;  %2007 = vrot.lane.b32.xlu1 %v1962_v50, %s12894_s15  ;;  %v1717_v56 = vshll.u32 %v13173_v5, 16 }
  0x64   : > { %v1734_v57 = vshrl.u32 %v13214_v24, 16  ;;  %v1736_v58 = vshll.u32 %v13214_v24, 16  ;;  %v1741_v59 = vshll.u32 %v13208_v61, 16  ;;  %v1702_v60 = vrot.slane %v1700_v52, 1  ;;  %v420_v0 = vld [vmem:[%s12964_s11 + $0x3c] sm:$0xf] }
  0x65   : > { %v1707_v62 = vrot.slane %v1705_v53, 1  ;;  %v1714_v63 = vrot.slane %v1712_v54, 1  ;;  %v560_v1 = vshrl.u32 %v419_v49, 16  ;;  %v1719_v4 = vrot.slane %v1717_v56, 1  ;;  %v816_v40 = vld [vmem:[#allocation2 + $0x60] sm:$0xf] }
  0x66   : > { %v1500_v3 = vld [vmem:[#allocation2 + $0x34] sm:$0xf]  ;;  %v1738_v6 = vrot.slane %v1736_v58, 1  ;;  %v1743_v8 = vrot.slane %v1741_v59, 1  ;;  %v563_v9 = vshll.u32 %v419_v49, 16  ;;  %v1703_v15 = vor.u32 %v1702_v60, %v1698_v46 }
  0x67   : > { %v13246_v10 = vcombine.low %v1499_v51, %v1500_v3  ;;  %v12417_v13 = vld [vmem:[#allocation2 + $0x38] ss:$0 sps:$4 sm:$0x11]   ;;  %v11209_v5 = vcombine.low %v1544_v55, %v1500_v3  ;;  %v1715_v16 = vor.u32 %v1714_v63, %v1710_v42  ;;  %v562_v18 = vrot.slane %v560_v1, 7  ;;  %v417_v46 = vld [vmem:[%s12964_s11 + $0x30] sm:$0xf] }
  0x68   : > { %v1739_v17 = vor.u32 %v1738_v6, %v1734_v57  ;;  %v568_v19 = vshrl.u32 %v420_v0, 16  ;;  %v571_v61 = vshll.u32 %v420_v0, 16  ;;  %v1967_v21 = vrot.slane %v12417_v13, 1  ;;  %v820_v53 = vld [vmem:[#allocation2 + $0x68] sm:$0x1] }
  0x69   : > { %v1966_v20 = vrot.slane %v11209_v5, 1  ;;  %v1708_v22 = vsel %vm1071_vm15, %v1703_v15, %v1707_v62  ;;  %v1722_v23 = vshrl.u32 %v13246_v10, 16  ;;  %v1503_v25 = vld [vmem:[#allocation2 + $0x48] sm:$0xf]  ;;  %v1720_v2 = vsel %vm1071_vm15, %v1715_v16, %v1719_v4  ;;  %v418_v58 = vld [vmem:[%s12964_s11 + $0x34] sm:$0xf] }
  0x6a   : > { %v1504_v26 = vld [vmem:[#allocation2 + $0x4c] sm:$0xf]  ;;  %1879 = vrot.lane.b32.xlu0 %v1708_v22, %s12895_s16  ;;  %v1744_v27 = vsel %vm1071_vm15, %v1739_v17, %v1743_v8  ;;  %v1546_v31 = vld [vmem:[#allocation2 + $0x48] sm:$0xe]  ;;  %v1724_v34 = vshll.u32 %v13246_v10, 16  ;;  %v565_v35 = vor.u32 %v563_v9, %v562_v18  ;;  %v1729_v37 = vshll.u32 %v12417_v13, 16 }
  0x6b   : > { %v1968_v29 = vsel %vm1344_vm14, %v1966_v20, %v1967_v21  ;;  %v13254_v32 = vcombine.low %v1503_v25, %v1504_v26  ;;  %v12420_v33 = vld [vmem:[#allocation2 + $0x50] ss:$0 sps:$4 sm:$0x11]   ;;  %v11211_v36 = vcombine.low %v1546_v31, %v1504_v26  ;;  %v566_v38 = vrot.slane %v562_v18, 4  ;;  %v423_v59 = vld [vmem:[%s12964_s11 + $0x48] sm:$0xf] }
  0x6c   : > { %2011 = vrot.lane.b32.xlu1 %v1968_v29, %s12894_s15  ;;  %v570_v39 = vrot.slane %v568_v19, 7  ;;  %v1973_v42 = vrot.slane %v12420_v33, 1  ;;  %v1726_v43 = vrot.slane %v1724_v34, 1  ;;  %v1731_v50 = vrot.slane %v1729_v37, 1  ;;  %v424_v1 = vld [vmem:[%s12964_s11 + $0x4c] sm:$0xf] }
  0x6d   : > { %v1746_v44 = vshrl.u32 %v13254_v32, 16  ;;  %v1748_v45 = vshll.u32 %v13254_v32, 16  ;;  %v1972_v49 = vrot.slane %v11211_v36, 1  ;;  %v1753_v51 = vshll.u32 %v12420_v33, 16  ;;  %v421_v9 = vld [vmem:[%s12964_s11 + $0x40] sm:$0xf] }
  0x6e   : > { %1881 = vrot.lane.b32.xlu0 %v1720_v2, %s12895_s16  ;;  %v573_v52 = vor.u32 %v571_v61, %v570_v39  ;;  %v1727_v54 = vor.u32 %v1726_v43, %v1722_v23  ;;  %v575_v56 = vrot.slane %v570_v39, 4  ;;  %v817_v57 = vsel %vm13133_vm12, %v565_v35, %v816_v40  ;;  %v422_v17 = vld [vmem:[%s12964_s11 + $0x44] sm:$0xf]  ;;  %v809_v19 = vld [vmem:[#allocation2 + $0x54] sm:$0xf] }
  0x6f   : > { %v1750_v55 = vrot.slane %v1748_v45, 1  ;;  %v1974_v60 = vsel %vm1344_vm14, %v1972_v49, %v1973_v42  ;;  %v1755_v62 = vrot.slane %v1753_v51, 1  ;;  %818 = vst [vmem:[#allocation2 + $0x60] sm:$0xf] %v817_v57  ;;  %v543_v0 = vshrl.u32 %v417_v46, 16 }
  0x70   : > { %v574_v63 = vsel %vm13127_vm8, %v566_v38, %v573_v52  ;;  %2015 = vrot.lane.b32.xlu1 %v1974_v60, %s12894_s15  ;;  %v1732_v3 = vsel %vm1071_vm15, %v1727_v54, %v1731_v50  ;;  %v821_v6 = vsel %vm13138_vm13, %v575_v56, %v820_v53  ;;  %v546_v8 = vshll.u32 %v417_v46, 16  ;;  %v813_v26 = vld [vmem:[#allocation2 + $0x5c] sm:$0x1]  ;;  %v830_v29 = vld [vmem:[#allocation2 + $0x78] sm:$0xf] }
  0x71   : > { %v1751_v4 = vor.u32 %v1750_v55, %v1746_v44  ;;  %819 = vst.msk [vmem:[#allocation2 + $0x64] sm:$0xf] %vm761_vm9, %v574_v63  ;;  %822 = vst [vmem:[#allocation2 + $0x68] sm:$0x1] %v821_v6  ;;  %v545_v13 = vrot.slane %v543_v0, 7  ;;  %v551_v5 = vshrl.u32 %v418_v58, 16 }
  0x72   : > { %1885 = vrot.lane.b32.xlu0 %v1744_v27, %s12895_s16  ;;  %v554_v15 = vshll.u32 %v418_v58, 16  ;;  %v594_v16 = vshrl.u32 %v423_v59, 16  ;;  %v597_v61 = vshll.u32 %v423_v59, 16  ;;  %v602_v20 = vshrl.u32 %v424_v1, 16  ;;  %v834_v39 = vld [vmem:[#allocation2 + $0x80] sm:$0x1] }
  0x73   : > { %v1756_v18 = vsel %vm1071_vm15, %v1751_v4, %v1755_v62  ;;  %v605_v21 = vshll.u32 %v424_v1, 16  ;;  %v548_v22 = vor.u32 %v546_v8, %v545_v13  ;;  %v549_v23 = vrot.slane %v545_v13, 4  ;;  %v823_v53 = vld [vmem:[#allocation2 + $0x6c] sm:$0xf]  ;;  %v427_v0 = vld [vmem:[%s12964_s11 + $0x58] sm:$0xf] }
  0x74   : > { %v553_v25 = vrot.slane %v551_v5, 7  ;;  %v596_v2 = vrot.slane %v594_v16, 7  ;;  %1883 = vrot.lane.b32.xlu1 %v1732_v3, %s12895_s16  ;;  %v604_v27 = vrot.slane %v602_v20, 7  ;;  %v577_v31 = vshrl.u32 %v421_v9, 16  ;;  %v827_v6 = vld [vmem:[#allocation2 + $0x74] sm:$0x1] }
  0x75   : > { %v580_v33 = vshll.u32 %v421_v9, 16  ;;  %v585_v34 = vshrl.u32 %v422_v17, 16  ;;  %v810_v37 = vsel %vm13133_vm12, %v548_v22, %v809_v19  ;;  %v588_v63 = vshll.u32 %v422_v17, 16  ;;  %v13301_v9 = vld [vmem:[#allocation2 + $0xc] sm:$0xf] }
  0x76   : > { %v556_v35 = vor.u32 %v554_v15, %v553_v25  ;;  %v558_v36 = vrot.slane %v553_v25, 4  ;;  %v599_v38 = vor.u32 %v597_v61, %v596_v2  ;;  %v1507_v40 = vld [vmem:[#allocation2 + $0x60] sm:$0xf]  ;;  %811 = vst [vmem:[#allocation2 + $0x54] sm:$0xf] %v810_v37  ;;  %v600_v43 = vrot.slane %v596_v2, 4 }
  0x77   : > { %v1548_v42 = vld [vmem:[#allocation2 + $0x60] sm:$0xe]  ;;  %v607_v44 = vor.u32 %v605_v21, %v604_v27  ;;  %v609_v45 = vrot.slane %v604_v27, 4  ;;  %v579_v52 = vrot.slane %v577_v31, 7  ;;  %v587_v62 = vrot.slane %v585_v34, 7 }
  0x78   : > { %v1508_v46 = vld [vmem:[#allocation2 + $0x64] sm:$0xf]  ;;  %v557_v49 = vsel %vm13127_vm8, %v549_v23, %v556_v35  ;;  %v814_v50 = vsel %vm13138_vm13, %v558_v36, %v813_v26  ;;  %v831_v51 = vsel %vm13133_vm12, %v599_v38, %v830_v29  ;;  %1887 = vrot.lane.b32.xlu1 %v1756_v18, %s12895_s16  ;;  %v12423_v55 = vld [vmem:[#allocation2 + $0x68] ss:$0 sps:$4 sm:$0x11]   ;;  %v5792_v8 = vrot.slane %v13157_v48, 4 }
  0x79   : > { %v13289_v54 = vcombine.low %v1507_v40, %v1508_v46  ;;  %812 = vst.msk [vmem:[#allocation2 + $0x58] sm:$0xf] %vm761_vm9, %v557_v49  ;;  %815 = vst [vmem:[#allocation2 + $0x5c] sm:$0x1] %v814_v50  ;;  %v11213_v56 = vcombine.low %v1548_v42, %v1508_v46  ;;  %v608_v57 = vsel %vm13127_vm8, %v600_v43, %v607_v44  ;;  %v583_v60 = vrot.slane %v579_v52, 4 }
  0x7a   : > { %832 = vst [vmem:[#allocation2 + $0x78] sm:$0xf] %v831_v51  ;;  %v835_v58 = vsel %vm13138_vm13, %v609_v45, %v834_v39  ;;  %833 = vst.msk [vmem:[#allocation2 + $0x7c] sm:$0xf] %vm761_vm9, %v608_v57  ;;  %v582_v59 = vor.u32 %v580_v33, %v579_v52  ;;  %v1777_v4 = vshll.u32 %v12423_v55, 16  ;;  %v590_v13 = vor.u32 %v588_v63, %v587_v62 }
  0x7b   : > { %836 = vst [vmem:[#allocation2 + $0x80] sm:$0x1] %v835_v58  ;;  %v1770_v1 = vshrl.u32 %v13289_v54, 16  ;;  %v1772_v3 = vshll.u32 %v13289_v54, 16  ;;  %v592_v5 = vrot.slane %v587_v62, 4  ;;  %v1978_v19 = vrot.slane %v11213_v56, 1 }
  0x7c   : > { %v824_v15 = vsel %vm13133_vm12, %v582_v59, %v823_v53  ;;  %v13306_v16 = vld [vmem:[%s12964_s11 + $0x5c] sm:$0xf]  ;;  %v1779_v18 = vrot.slane %v1777_v4, 1  ;;  %v628_v61 = vshrl.u32 %v427_v0, 16  ;;  %v13309_v20 = vld [vmem:[%s12964_s11 + $0x50] sm:$0xf]  ;;  %v591_v25 = vsel %vm13127_vm8, %v583_v60, %v590_v13 }
  0x7d   : > { %v1774_v17 = vrot.slane %v1772_v3, 1  ;;  %825 = vst [vmem:[#allocation2 + $0x6c] sm:$0xf] %v824_v15  ;;  %v1505_v21 = vld [vmem:[#allocation2 + $0x54] sm:$0xf]  ;;  %v1979_v22 = vrot.slane %v12423_v55, 1  ;;  %v828_v26 = vsel %vm13138_vm13, %v592_v5, %v827_v6  ;;  %v6097_v34 = vsel %vm13133_vm12, %v13155_v47, %v13301_v9 }
  0x7e   : > { %v1547_v23 = vld [vmem:[#allocation2 + $0x54] sm:$0xe]  ;;  %v631_v2 = vshll.u32 %v427_v0, 16  ;;  %826 = vst.msk [vmem:[#allocation2 + $0x70] sm:$0xf] %vm761_vm9, %v591_v25  ;;  %v13316_v29 = vrot.slane %v628_v61, 7 }
  0x7f   : > { %v1775_v27 = vor.u32 %v1774_v17, %v1770_v1  ;;  %829 = vst [vmem:[#allocation2 + $0x74] sm:$0x1] %v828_v26  ;;  %v636_v31 = vshrl.u32 %v13306_v16, 16  ;;  %v639_v33 = vshll.u32 %v13306_v16, 16  ;;  %v844_v43 = vld [vmem:[#allocation2 + $0x90] sm:$0xf]  ;;  %v1980_v45 = vsel %vm1344_vm14, %v1978_v19, %v1979_v22 }
  0x80   : > { %v1506_v35 = vld [vmem:[#allocation2 + $0x58] sm:$0xf]  ;;  %v12425_v39 = vld [vmem:[#allocation2 + $0x5c] ss:$0 sps:$4 sm:$0x11]   ;;  %v611_v44 = vshrl.u32 %v13309_v20, 16  ;;  %v633_v50 = vor.u32 %v631_v2, %v13316_v29 }
  0x81   : > { %v1511_v36 = vld [vmem:[#allocation2 + $0x78] sm:$0xf]  ;;  %v1780_v37 = vsel %vm1071_vm15, %v1775_v27, %v1779_v18  ;;  %v13325_v38 = vcombine.low %v1505_v21, %v1506_v35  ;;  %v11212_v40 = vcombine.low %v1547_v23, %v1506_v35  ;;  %v1512_v42 = vld [vmem:[#allocation2 + $0x7c] sm:$0xf]  ;;  %v634_v51 = vrot.slane %v13316_v29, 4 }
  0x82   : > { %1891 = vrot.lane.b32.xlu1 %v1780_v37, %s12895_s16  ;;  %v13330_v46 = vcombine.low %v1511_v36, %v1512_v42  ;;  %v12428_v49 = vld [vmem:[#allocation2 + $0x80] ss:$0 sps:$4 sm:$0x11]   ;;  %v1765_v55 = vshll.u32 %v12425_v39, 16  ;;  %v1550_v57 = vld [vmem:[#allocation2 + $0x78] sm:$0xe]  ;;  %v845_v18 = vsel %vm13133_vm12, %v633_v50, %v844_v43 }
  0x83   : > { %v1758_v52 = vshrl.u32 %v13325_v38, 16  ;;  %v1760_v53 = vshll.u32 %v13325_v38, 16  ;;  %v1975_v56 = vrot.slane %v11212_v40, 1  ;;  %v1976_v58 = vrot.slane %v12425_v39, 1  ;;  %846 = vst [vmem:[#allocation2 + $0x90] sm:$0xf] %v845_v18 }
  0x84   : > { %v1794_v59 = vshrl.u32 %v13330_v46, 16  ;;  %v1796_v60 = vshll.u32 %v13330_v46, 16  ;;  %v1801_v62 = vshll.u32 %v12428_v49, 16  ;;  %v1509_v63 = vld [vmem:[#allocation2 + $0x6c] sm:$0xf]  ;;  %v1767_v1 = vrot.slane %v1765_v55, 1 }
  0x85   : > { %v1762_v0 = vrot.slane %v1760_v53, 1  ;;  %v11215_v3 = vcombine.low %v1550_v57, %v1512_v42  ;;  %v1985_v4 = vrot.slane %v12428_v49, 1  ;;  %v1549_v6 = vld [vmem:[#allocation2 + $0x6c] sm:$0xe]  ;;  %v1977_v13 = vsel %vm1344_vm14, %v1975_v56, %v1976_v58  ;;  %v1510_v17 = vld [vmem:[#allocation2 + $0x70] sm:$0xf] }
  0x86   : > { %2019 = vrot.lane.b32.xlu1 %v1980_v45, %s12894_s15  ;;  %v1798_v5 = vrot.slane %v1796_v60, 1  ;;  %v1803_v15 = vrot.slane %v1801_v62, 1  ;;  %v13342_v61 = vcombine.low %v1509_v63, %v1510_v17  ;;  %v12430_v21 = vld [vmem:[#allocation2 + $0x74] ss:$0 sps:$4 sm:$0x11]   ;;  %v11214_v23 = vcombine.low %v1549_v6, %v1510_v17 }
  0x87   : > { %v1763_v19 = vor.u32 %v1762_v0, %v1758_v52  ;;  %v1984_v22 = vrot.slane %v11215_v3, 1  ;;  %v638_v26 = vrot.slane %v636_v31, 7  ;;  %v848_v2 = vld [vmem:[#allocation2 + $0x98] sm:$0x1]  ;;  %v426_v27 = vld [vmem:[%s12964_s11 + $0x54] sm:$0xf] }
  0x88   : > { %v1799_v25 = vor.u32 %v1798_v5, %v1794_v59  ;;  %v613_v29 = vrot.slane %v611_v44, 7  ;;  %v614_v35 = vshll.u32 %v13309_v20, 16  ;;  %v1782_v37 = vshrl.u32 %v13342_v61, 16  ;;  %v837_v42 = vld [vmem:[#allocation2 + $0x84] sm:$0xf] }
  0x89   : > { %v1768_v36 = vsel %vm1071_vm15, %v1763_v19, %v1767_v1  ;;  %v1784_v39 = vshll.u32 %v13342_v61, 16  ;;  %v1789_v40 = vshll.u32 %v12430_v21, 16  ;;  %v1986_v31 = vsel %vm1344_vm14, %v1984_v22, %v1985_v4  ;;  %v431_v50 = vld [vmem:[%s12964_s11 + $0x68] sm:$0xf]  ;;  %v432_v44 = vld [vmem:[%s12964_s11 + $0x6c] sm:$0xf] }
  0x8a   : > { %1889 = vrot.lane.b32.xlu0 %v1768_v36, %s12895_s16  ;;  %v1804_v43 = vsel %vm1071_vm15, %v1799_v25, %v1803_v15  ;;  %v1981_v45 = vrot.slane %v11214_v23, 1  ;;  %v1982_v49 = vrot.slane %v12430_v21, 1  ;;  %v641_v53 = vor.u32 %v639_v33, %v638_v26  ;;  %v879_v56 = vld [vmem:[#allocation2] sm:$0xf]  ;;  %v13360_v62 = vld [vmem:[#allocation2 + $0x4] sm:$0xf] }
  0x8b   : > { %1895 = vrot.lane.b32.xlu1 %v1804_v43, %s12895_s16  ;;  %v1786_v20 = vrot.slane %v1784_v39, 1  ;;  %v1791_v52 = vrot.slane %v1789_v40, 1  ;;  %v643_v55 = vrot.slane %v638_v26, 4  ;;  %v616_v58 = vor.u32 %v614_v35, %v613_v29  ;;  %v429_v33 = vld [vmem:[%s12964_s11 + $0x60] sm:$0xf] }
  0x8c   : > { %v13358_v57 = vsel %vm1344_vm14, %v1981_v45, %v1982_v49  ;;  %v617_v59 = vrot.slane %v613_v29, 4  ;;  %v619_v60 = vshrl.u32 %v426_v27, 16  ;;  %v642_v0 = vsel %vm13127_vm8, %v634_v51, %v641_v53  ;;  %v841_v6 = vld [vmem:[#allocation2 + $0x8c] sm:$0x1]  ;;  %v430_v15 = vld [vmem:[%s12964_s11 + $0x64] sm:$0xf] }
  0x8d   : > { %v1787_v63 = vor.u32 %v1786_v20, %v1782_v37  ;;  %v849_v1 = vsel %vm13138_vm13, %v643_v55, %v848_v2  ;;  %v622_v16 = vshll.u32 %v426_v27, 16  ;;  %847 = vst.msk [vmem:[#allocation2 + $0x94] sm:$0xf] %vm761_vm9, %v642_v0  ;;  %v838_v4 = vsel %vm13133_vm12, %v616_v58, %v837_v42  ;;  %v858_v21 = vld [vmem:[#allocation2 + $0xa8] sm:$0xf] }
  0x8e   : > { %2017 = vrot.lane.b32.xlu0 %v1977_v13, %s12894_s15  ;;  %850 = vst [vmem:[#allocation2 + $0x98] sm:$0x1] %v849_v1  ;;  %v621_v3 = vrot.slane %v619_v60, 7  ;;  %v662_v5 = vshrl.u32 %v431_v50, 16  ;;  %v13373_v51 = vcombine.low %v879_v56, %v13360_v62  ;;  %839 = vst [vmem:[#allocation2 + $0x84] sm:$0xf] %v838_v4 }
  0x8f   : > { %v1792_v17 = vsel %vm1071_vm15, %v1787_v63, %v1791_v52  ;;  %2023 = vrot.lane.b32.xlu1 %v1986_v31, %s12894_s15  ;;  %v665_v13 = vshll.u32 %v431_v50, 16  ;;  %v670_v18 = vshrl.u32 %v432_v44, 16  ;;  %v673_v19 = vshll.u32 %v432_v44, 16  ;;  %v435_v22 = vld [vmem:[%s12964_s11 + $0x78] sm:$0xf] }
  0x90   : > { %v624_v23 = vor.u32 %v622_v16, %v621_v3  ;;  %v626_v25 = vrot.slane %v621_v3, 4  ;;  %v664_v26 = vrot.slane %v662_v5, 7  ;;  %v862_v2 = vld [vmem:[#allocation2 + $0xb0] sm:$0x1]  ;;  %v645_v27 = vshrl.u32 %v429_v33, 16 }
  0x91   : > { %v13379_v29 = vld [vmem:[%s12964_s11 + $0x7c] sm:$0xf]  ;;  %v672_v35 = vrot.slane %v670_v18, 7  ;;  %v648_v36 = vshll.u32 %v429_v33, 16  ;;  %v653_v37 = vshrl.u32 %v430_v15, 16  ;;  %v656_v39 = vshll.u32 %v430_v15, 16 }
  0x92   : > { %v881_v40 = vld [vmem:[#allocation2 + $0xc] sm:$0xf]  ;;  %1893 = vrot.lane.b32.xlu0 %v1792_v17, %s12895_s16  ;;  %v1515_v42 = vld [vmem:[#allocation2 + $0x90] sm:$0xf]  ;;  %v625_v43 = vsel %vm13127_vm8, %v617_v59, %v624_v23  ;;  %v842_v31 = vsel %vm13138_vm13, %v626_v25, %v841_v6  ;;  %v667_v45 = vor.u32 %v665_v13, %v664_v26  ;;  %v668_v49 = vrot.slane %v664_v26, 4 }
  0x93   : > { %v851_v50 = vld [vmem:[#allocation2 + $0x9c] sm:$0xf]  ;;  %v13386_v44 = vld [vmem:[#allocation2 + $0xc] sm:$0xe]  ;;  %840 = vst.msk [vmem:[#allocation2 + $0x88] sm:$0xf] %vm761_vm9, %v625_v43  ;;  %v675_v52 = vor.u32 %v673_v19, %v672_v35 }
  0x94   : > { %843 = vst [vmem:[#allocation2 + $0x8c] sm:$0x1] %v842_v31  ;;  %v1552_v20 = vld [vmem:[#allocation2 + $0x90] sm:$0xe]  ;;  %v677_v53 = vrot.slane %v672_v35, 4  ;;  %v647_v55 = vrot.slane %v645_v27, 7  ;;  %v859_v58 = vsel %vm13133_vm12, %v667_v45, %v858_v21  ;;  %v13420_v31 = vcombine.low %v881_v40, %v13186_v28 }
  0x95   : > { %v655_v56 = vrot.slane %v653_v37, 7  ;;  %6098 = vst [vmem:[#allocation2 + $0xc] sm:$0xf] %v6097_v34  ;;  %v855_v59 = vld [vmem:[#allocation2 + $0xa4] sm:$0x1]  ;;  %v696_v60 = vshrl.u32 %v435_v22, 16  ;;  %v676_v16 = vsel %vm13127_vm8, %v668_v49, %v675_v52 }
  0x96   : > { %v699_v63 = vshll.u32 %v435_v22, 16  ;;  %v704_v0 = vshrl.u32 %v13379_v29, 16  ;;  %v1516_v1 = vld [vmem:[#allocation2 + $0x94] sm:$0xf]  ;;  %860 = vst [vmem:[#allocation2 + $0xa8] sm:$0xf] %v859_v58  ;;  %v863_v33 = vsel %vm13138_vm13, %v677_v53, %v862_v2  ;;  %v650_v3 = vor.u32 %v648_v36, %v647_v55  ;;  %2021 = vrot.lane.b32.xlu0 %v13358_v57, %s12894_s15 }
  0x97   : > { %v651_v4 = vrot.slane %v647_v55, 4  ;;  %v13403_v47 = vcombine.low %v1515_v42, %v1516_v1  ;;  %v12433_v9 = vld [vmem:[#allocation2 + $0x98] ss:$0 sps:$4 sm:$0x11]   ;;  %v1513_v34 = vld [vmem:[#allocation2 + $0x84] sm:$0xf]  ;;  %v11217_v6 = vcombine.low %v1552_v20, %v1516_v1  ;;  %v658_v5 = vor.u32 %v656_v39, %v655_v56 }
  0x98   : > { %861 = vst.msk [vmem:[#allocation2 + $0xac] sm:$0xf] %vm761_vm9, %v676_v16  ;;  %864 = vst [vmem:[#allocation2 + $0xb0] sm:$0x1] %v863_v33  ;;  %v660_v15 = vrot.slane %v655_v56, 4  ;;  %v852_v13 = vsel %vm13133_vm12, %v650_v3, %v851_v50  ;;  %v698_v18 = vrot.slane %v696_v60, 7 }
  0x99   : > { %v1551_v17 = vld [vmem:[#allocation2 + $0x84] sm:$0xe]  ;;  %v706_v19 = vrot.slane %v704_v0, 7  ;;  %v707_v21 = vshll.u32 %v13379_v29, 16  ;;  %v1818_v57 = vshrl.u32 %v13403_v47, 16  ;;  %v1820_v22 = vshll.u32 %v13403_v47, 16 }
  0x9a   : > { %v1825_v23 = vshll.u32 %v12433_v9, 16  ;;  %v1990_v25 = vrot.slane %v11217_v6, 1  ;;  %853 = vst [vmem:[#allocation2 + $0x9c] sm:$0xf] %v852_v13  ;;  %v1991_v26 = vrot.slane %v12433_v9, 1  ;;  %v659_v2 = vsel %vm13127_vm8, %v651_v4, %v658_v5 }
  0x9b   : > { %v856_v27 = vsel %vm13138_vm13, %v660_v15, %v855_v59  ;;  %v701_v35 = vor.u32 %v699_v63, %v698_v18  ;;  %v872_v36 = vld [vmem:[#allocation2 + $0xc0] sm:$0xf]  ;;  %v13416_v37 = vld [vmem:[%s12964_s11 + $0x70] sm:$0xf]  ;;  %v1822_v39 = vrot.slane %v1820_v22, 1  ;;  %v709_v43 = vor.u32 %v707_v21, %v706_v19 }
  0x9c   : > { %v1827_v29 = vrot.slane %v1825_v23, 1  ;;  %v1514_v42 = vld [vmem:[#allocation2 + $0x88] sm:$0xf]  ;;  %854 = vst.msk [vmem:[#allocation2 + $0xa0] sm:$0xf] %vm761_vm9, %v659_v2  ;;  %v1992_v50 = vsel %vm1344_vm14, %v1990_v25, %v1991_v26  ;;  %v702_v52 = vrot.slane %v698_v18, 4 }
  0x9d   : > { %857 = vst [vmem:[#allocation2 + $0xa4] sm:$0x1] %v856_v27  ;;  %v13422_v45 = vcombine.low %v1513_v34, %v1514_v42  ;;  %v12435_v49 = vld [vmem:[#allocation2 + $0x8c] ss:$0 sps:$4 sm:$0x11]   ;;  %v11216_v20 = vcombine.low %v1551_v17, %v1514_v42  ;;  %v1823_v55 = vor.u32 %v1822_v39, %v1818_v57  ;;  %v711_v59 = vrot.slane %v706_v19, 4 }
  0x9e   : > { %v876_v53 = vld [vmem:[#allocation2 + $0xc8] sm:$0x1]  ;;  %v1554_v58 = vld [vmem:[#allocation2 + $0xa8] sm:$0xe]  ;;  %v873_v60 = vsel %vm13133_vm12, %v701_v35, %v872_v36  ;;  %v679_v63 = vshrl.u32 %v13416_v37, 16  ;;  %v1813_v16 = vshll.u32 %v12435_v49, 16  ;;  %v710_v19 = vsel %vm13127_vm8, %v702_v52, %v709_v43 }
  0x9f   : > { %v1519_v56 = vld [vmem:[#allocation2 + $0xa8] sm:$0xf]  ;;  %v6100_v0 = vld [vmem:[#allocation2 + $0x14] sm:$0x1]  ;;  %v1806_v40 = vshrl.u32 %v13422_v45, 16  ;;  %v1808_v1 = vshll.u32 %v13422_v45, 16  ;;  %v1828_v4 = vsel %vm1071_vm15, %v1823_v55, %v1827_v29  ;;  %v877_v21 = vsel %vm13138_vm13, %v711_v59, %v876_v53 }
  0xa0   : > { %v1987_v33 = vrot.slane %v11216_v20, 1  ;;  %v1520_v3 = vld [vmem:[#allocation2 + $0xac] sm:$0xf]  ;;  %874 = vst [vmem:[#allocation2 + $0xc0] sm:$0xf] %v873_v60  ;;  %v1988_v9 = vrot.slane %v12435_v49, 1  ;;  %1899 = vrot.lane.b32.xlu1 %v1828_v4, %s12895_s16  ;;  %v6101_v29 = vsel %vm13138_vm13, %v5792_v8, %v6100_v0 }
  0xa1   : > { %v13431_v34 = vcombine.low %v1519_v56, %v1520_v3  ;;  %v12438_v6 = vld [vmem:[#allocation2 + $0xb0] ss:$0 sps:$4 sm:$0x11]   ;;  %v11219_v5 = vcombine.low %v1554_v58, %v1520_v3  ;;  %v1810_v15 = vrot.slane %v1808_v1, 1  ;;  %v1815_v17 = vrot.slane %v1813_v16, 1 }
  0xa2   : > { %v1517_v13 = vld [vmem:[#allocation2 + $0x9c] sm:$0xf]  ;;  %v13438_v57 = vld [vmem:[#allocation2 + $0x14] ss:$0 sps:$4 sm:$0x11]   ;;  %v1989_v22 = vsel %vm1344_vm14, %v1987_v33, %v1988_v9  ;;  %v1849_v26 = vshll.u32 %v12438_v6, 16 }
  0xa3   : > { %v1553_v18 = vld [vmem:[#allocation2 + $0x9c] sm:$0xe]  ;;  %v1842_v23 = vshrl.u32 %v13431_v34, 16  ;;  %v1844_v25 = vshll.u32 %v13431_v34, 16  ;;  %875 = vst.msk [vmem:[#allocation2 + $0xc4] sm:$0xf] %vm761_vm9, %v710_v19  ;;  %v1811_v2 = vor.u32 %v1810_v15, %v1806_v40 }
  0xa4   : > { %878 = vst [vmem:[#allocation2 + $0xc8] sm:$0x1] %v877_v21  ;;  %v1518_v27 = vld [vmem:[#allocation2 + $0xa0] sm:$0xf]  ;;  %v1996_v35 = vrot.slane %v11219_v5, 1  ;;  %v1997_v36 = vrot.slane %v12438_v6, 1  ;;  %2027 = vrot.lane.b32.xlu1 %v1992_v50, %s12894_s15 }
  0xa5   : > { %v434_v39 = vld [vmem:[%s12964_s11 + $0x74] sm:$0xf]  ;;  %v1846_v42 = vrot.slane %v1844_v25, 1  ;;  %v1851_v43 = vrot.slane %v1849_v26, 1  ;;  %v13449_v49 = vcombine.low %v1517_v13, %v1518_v27  ;;  %v11218_v52 = vcombine.low %v1553_v18, %v1518_v27  ;;  %6102 = vst [vmem:[#allocation2 + $0x14] sm:$0x1] %v6101_v29 }
  0xa6   : > { %v12440_v20 = vld [vmem:[#allocation2 + $0xa4] ss:$0 sps:$4 sm:$0x11]   ;;  %v865_v53 = vld [vmem:[#allocation2 + $0xb4] sm:$0xf]  ;;  %v1816_v55 = vsel %vm1071_vm15, %v1811_v2, %v1815_v17  ;;  %v1998_v56 = vsel %vm1344_vm14, %v1996_v35, %v1997_v36  ;;  %v681_v58 = vrot.slane %v679_v63, 7 }
  0xa7   : > { %v682_v48 = vshll.u32 %v13416_v37, 16  ;;  %v13455_v59 = vld [vmem:[#allocation2 + $0x8] ss:$0 sps:$4 sm:$0x11]   ;;  %1897 = vrot.lane.b32.xlu0 %v1816_v55, %s12895_s16  ;;  %v1847_v8 = vor.u32 %v1846_v42, %v1842_v23  ;;  %v1830_v60 = vshrl.u32 %v13449_v49, 16  ;;  %v1832_v0 = vshll.u32 %v13449_v49, 16 }
  0xa8   : > { %v1837_v40 = vshll.u32 %v12440_v20, 16  ;;  %v1523_v1 = vld [vmem:[#allocation2 + $0xc0] sm:$0xf]  ;;  %v1993_v16 = vrot.slane %v11218_v52, 1  ;;  %v1994_v33 = vrot.slane %v12440_v20, 1  ;;  %v685_v50 = vrot.slane %v681_v58, 4 }
  0xa9   : > { %v684_v3 = vor.u32 %v682_v48, %v681_v58  ;;  %v1556_v4 = vld [vmem:[#allocation2 + $0xc0] sm:$0xe]  ;;  %v1852_v63 = vsel %vm1071_vm15, %v1847_v8, %v1851_v43  ;;  %v1834_v9 = vrot.slane %v1832_v0, 1  ;;  %v687_v6 = vshrl.u32 %v434_v39, 16  ;;  %v869_v2 = vld [vmem:[#allocation2 + $0xbc] sm:$0x1] }
  0xaa   : > { %v1839_v37 = vrot.slane %v1837_v40, 1  ;;  %1903 = vrot.lane.b32.xlu1 %v1852_v63, %s12895_s16  ;;  %v1995_v5 = vsel %vm1344_vm14, %v1993_v16, %v1994_v33  ;;  %v1524_v15 = vld [vmem:[#allocation2 + $0xc4] sm:$0xf]  ;;  %v690_v17 = vshll.u32 %v434_v39, 16  ;;  %v1073_v18 = vshrl.u32 %v13373_v51, 16 }
  0xab   : > { %v866_v13 = vsel %vm13133_vm12, %v684_v3, %v865_v53  ;;  %2025 = vrot.lane.b32.xlu0 %v1989_v22, %s12894_s15  ;;  %v1835_v19 = vor.u32 %v1834_v9, %v1830_v60  ;;  %v13467_v21 = vcombine.low %v1523_v1, %v1524_v15  ;;  %v12443_v23 = vld [vmem:[#allocation2 + $0xc8] ss:$0 sps:$4 sm:$0x11]   ;;  %v689_v25 = vrot.slane %v687_v6, 7  ;;  %v927_v20 = vld [vmem:[#allocation2] sm:$0xe] }
  0xac   : > { %867 = vst [vmem:[#allocation2 + $0xb4] sm:$0xf] %v866_v13  ;;  %v11221_v26 = vcombine.low %v1556_v4, %v1524_v15  ;;  %v1075_v27 = vshll.u32 %v13373_v51, 16  ;;  %v1080_v35 = vshll.u32 %v13455_v59, 16  ;;  %v1085_v36 = vshrl.u32 %v13420_v31, 16 }
  0xad   : > { %v1087_v39 = vshll.u32 %v13420_v31, 16  ;;  %v1840_v29 = vsel %vm1071_vm15, %v1835_v19, %v1839_v37  ;;  %v1866_v22 = vshrl.u32 %v13467_v21, 16  ;;  %v1868_v42 = vshll.u32 %v13467_v21, 16  ;;  %v2512_v40 = vld [vmem:[#allocation2 + $0x18] sm:$0xf] }
  0xae   : > { %v1873_v43 = vshll.u32 %v12443_v23, 16  ;;  %2031 = vrot.lane.b32.xlu1 %v1998_v56, %s12894_s15  ;;  %v692_v52 = vor.u32 %v690_v17, %v689_v25  ;;  %v694_v53 = vrot.slane %v689_v25, 4  ;;  %v2002_v55 = vrot.slane %v11221_v26, 1  ;;  %v2513_v1 = vld [vmem:[#allocation2 + $0x1c] sm:$0xf] }
  0xaf   : > { %v2003_v58 = vrot.slane %v12443_v23, 1  ;;  %1901 = vrot.lane.b32.xlu0 %v1840_v29, %s12895_s16  ;;  %v1870_v48 = vrot.slane %v1868_v42, 1  ;;  %v1077_v60 = vrot.slane %v1075_v27, 1  ;;  %v1082_v0 = vrot.slane %v1080_v35, 1  ;;  %v2514_v63 = vld [vmem:[#allocation2 + $0x24] sm:$0xf] }
  0xb0   : > { %v1875_v8 = vrot.slane %v1873_v43, 1  ;;  %v693_v16 = vsel %vm13127_vm8, %v685_v50, %v692_v52  ;;  %v870_v33 = vsel %vm13138_vm13, %v694_v53, %v869_v2  ;;  %v1089_v3 = vrot.slane %v1087_v39, 1  ;;  %v12452_v4 = vld [vmem:[#allocation2 + $0x20] ss:$0 sps:$4 sm:$0x11]  }
  0xb1   : > { %v2004_v56 = vsel %vm1344_vm14, %v2002_v55, %v2003_v58  ;;  %v1871_v9 = vor.u32 %v1870_v48, %v1866_v22  ;;  %868 = vst.msk [vmem:[#allocation2 + $0xb8] sm:$0xf] %vm761_vm9, %v693_v16  ;;  %871 = vst [vmem:[#allocation2 + $0xbc] sm:$0x1] %v870_v33  ;;  %v1078_v37 = vor.u32 %v1077_v60, %v1073_v18  ;;  %v1092_v6 = vshll.u32 %v13438_v57, 16 }
  0xb2   : > { %v11158_v15 = vcombine.low %v927_v20, %v13360_v62  ;;  %v2515_v17 = vld [vmem:[#allocation2 + $0x28] sm:$0xf]  ;;  %v12454_v13 = vld [vmem:[#allocation2 + $0x2c] ss:$0 sps:$4 sm:$0x11]   ;;  %v1090_v50 = vor.u32 %v1089_v3, %v1085_v36  ;;  %v1346_v19 = vrot.slane %v13455_v59, 1  ;;  %v11159_v23 = vcombine.low %v13386_v44, %v13186_v28 }
  0xb3   : > { %v1349_v25 = vrot.slane %v13438_v57, 1  ;;  %v2560_v26 = vld [vmem:[#allocation2 + $0x18] sm:$0xe]  ;;  %2029 = vrot.lane.b32.xlu0 %v1995_v5, %s12894_s15  ;;  %v1876_v2 = vsel %vm1071_vm15, %v1871_v9, %v1875_v8  ;;  %v13493_v18 = vsel %vm1071_vm15, %v1078_v37, %v1082_v0  ;;  %v1094_v27 = vrot.slane %v1092_v6, 1  ;;  %v2561_v35 = vld [vmem:[#allocation2 + $0x24] sm:$0xe] }
  0xb4   : > { %v1345_v62 = vrot.slane %v11158_v15, 1  ;;  %1907 = vrot.lane.b32.xlu1 %v1876_v2, %s12895_s16  ;;  %v1348_v36 = vrot.slane %v11159_v23, 1  ;;  %v13496_v59 = vcombine.low %v2512_v40, %v2513_v1  ;;  %v2712_v39 = vshll.u32 %v12452_v4, 16  ;;  %v883_v44 = vld [vmem:[#allocation2 + $0x18] sm:$0xf] }
  0xb5   : > { %v13498_v28 = vcombine.low %v2514_v63, %v2515_v17  ;;  %v1521_v57 = vld [vmem:[#allocation2 + $0xb4] sm:$0xf]  ;;  %v1095_v5 = vsel %vm1071_vm15, %v1090_v50, %v1094_v27  ;;  %v2724_v22 = vshll.u32 %v12454_v13, 16  ;;  %v11290_v42 = vcombine.low %v2560_v26, %v2513_v1  ;;  %v13504_v43 = vld [vmem:[#allocation2 + $0x1c] sm:$0xf] }
  0xb6   : > { %17041 = vst [vmem:[#allocation9_spill] sm:$0xff] %v13496_v59  ;;  %v13502_v29 = vsel %vm1344_vm14, %v1345_v62, %v1346_v19  ;;  %v1555_v20 = vld [vmem:[#allocation2 + $0xb4] sm:$0xe]  ;;  %v1350_v52 = vsel %vm1344_vm14, %v1348_v36, %v1349_v25  ;;  %v2705_v53 = vshrl.u32 %v13496_v59, 16  ;;  %v2707_v55 = vshll.u32 %v13496_v59, 16 }
  0xb7   : > { %17042 = vst [vmem:[#allocation10_spill] sm:$0xff] %v13498_v28  ;;  %v2714_v58 = vrot.slane %v2712_v39, 1  ;;  %v2717_v48 = vshrl.u32 %v13498_v28, 16  ;;  %v2719_v8 = vshll.u32 %v13498_v28, 16  ;;  %v2726_v60 = vrot.slane %v2724_v22, 1 }
  0xb8   : > { %v2976_v0 = vrot.slane %v11290_v42, 1  ;;  %v13511_v40 = vld [vmem:[#allocation2 + $0x20] ss:$0 sps:$4 sm:$0x11]   ;;  %v1522_v1 = vld [vmem:[#allocation2 + $0xb8] sm:$0xf]  ;;  %2035 = vrot.lane.b32.xlu1 %v2004_v56, %s12894_s15  ;;  %v11291_v3 = vcombine.low %v2561_v35, %v2515_v17  ;;  %v13515_v63 = vcombine.low %v883_v44, %v13504_v43 }
  0xb9   : > { %v2709_v16 = vrot.slane %v2707_v55, 1  ;;  %v2977_v33 = vrot.slane %v12452_v4, 1  ;;  %v13517_v9 = vcombine.low %v1521_v57, %v1522_v1  ;;  %v12445_v37 = vld [vmem:[#allocation2 + $0xbc] ss:$0 sps:$4 sm:$0x11]   ;;  %v11220_v6 = vcombine.low %v1555_v20, %v1522_v1 }
  0xba   : > { %17043 = vst [vmem:[#allocation11_spill] sm:$0xff] %v13515_v63  ;;  %v2721_v15 = vrot.slane %v2719_v8, 1  ;;  %v2980_v50 = vrot.slane %v12454_v13, 1  ;;  %v2979_v25 = vrot.slane %v11291_v3, 1  ;;  %v1097_v26 = vshrl.u32 %v13515_v63, 16 }
  0xbb   : > { %v2710_v19 = vor.u32 %v2709_v16, %v2705_v53  ;;  %v13520_v23 = vsel %vm1344_vm14, %v2976_v0, %v2977_v33  ;;  %v5746_v56 = vld [vmem:[%s12969_s14 + $0x8] sm:$0xf]  ;;  %v5747_v2 = vld [vmem:[%s12969_s14 + $0xc] sm:$0xf]  ;;  %v1854_v4 = vshrl.u32 %v13517_v9, 16  ;;  %v1856_v17 = vshll.u32 %v13517_v9, 16 }
  0xbc   : > { %v1861_v27 = vshll.u32 %v12445_v37, 16  ;;  %v1999_v62 = vrot.slane %v11220_v6, 1  ;;  %v885_v35 = vld [vmem:[#allocation2 + $0x24] sm:$0xf]  ;;  %v2000_v36 = vrot.slane %v12445_v37, 1  ;;  %1266 = vrot.lane.b32.xlu1 %v1095_v5, %s12895_s16  ;;  %v2722_v39 = vor.u32 %v2721_v15, %v2717_v48 }
  0xbd   : > { %v13529_v13 = vsel %vm1071_vm15, %v2710_v19, %v2714_v58  ;;  %v13532_v44 = vsel %vm1344_vm14, %v2979_v25, %v2980_v50  ;;  %v13534_v57 = vld [vmem:[#allocation2 + $0x2c] ss:$0 sps:$4 sm:$0x11]   ;;  %v1858_v22 = vrot.slane %v1856_v17, 1  ;;  %v1099_v20 = vshll.u32 %v13515_v63, 16 }
  0xbe   : > { %v1863_v42 = vrot.slane %v1861_v27, 1  ;;  %v1104_v53 = vshll.u32 %v13511_v40, 16  ;;  %v13538_v55 = vld [vmem:[#allocation2 + $0x28] sm:$0xf]  ;;  %v2001_v8 = vsel %vm1344_vm14, %v1999_v62, %v2000_v36  ;;  %v2727_v5 = vsel %vm1071_vm15, %v2722_v39, %v2726_v60  ;;  %v5748_v48 = vld [vmem:[%s12969_s14 + $0x10] sm:$0xf] }
  0xbf   : > { %v5794_v58 = vshrl.u32 %v5746_v56, 16  ;;  %v5797_v0 = vshll.u32 %v5746_v56, 16  ;;  %v1859_v1 = vor.u32 %v1858_v22, %v1854_v4  ;;  %v1101_v16 = vrot.slane %v1099_v20, 1  ;;  %v6103_v37 = vld [vmem:[#allocation2 + $0x18] sm:$0xf] }
  0xc0   : > { %v1106_v33 = vrot.slane %v1104_v53, 1  ;;  %v5802_v3 = vshrl.u32 %v5747_v2, 16  ;;  %1395 = vrot.lane.b32.xlu1 %v1350_v52, %s12894_s15  ;;  %v5805_v15 = vshll.u32 %v5747_v2, 16  ;;  %v13545_v50 = vcombine.low %v885_v35, %v13538_v55  ;;  %v6107_v17 = vld [vmem:[#allocation2 + $0x20] sm:$0x1] }
  0xc1   : > { %v5796_v6 = vrot.slane %v5794_v58, 7  ;;  %v1116_v19 = vshll.u32 %v13534_v57, 16  ;;  %v1864_v60 = vsel %vm1071_vm15, %v1859_v1, %v1863_v42  ;;  %v1102_v25 = vor.u32 %v1101_v16, %v1097_v26  ;;  %v5749_v27 = vld [vmem:[%s12969_s14 + $0x14] sm:$0xf]  ;;  %v929_v39 = vld [vmem:[#allocation2 + $0x18] sm:$0xe] }
  0xc2   : > { %17044 = vst [vmem:[#allocation12_spill] sm:$0xff] %v13545_v50  ;;  %v5804_v56 = vrot.slane %v5802_v3, 7  ;;  %v5811_v4 = vshrl.u32 %v5748_v48, 16  ;;  %1905 = vrot.lane.b32.xlu0 %v1864_v60, %s12895_s16  ;;  %v1109_v52 = vshrl.u32 %v13545_v50, 16  ;;  %v1111_v2 = vshll.u32 %v13545_v50, 16 }
  0xc3   : > { %v5799_v62 = vor.u32 %v5797_v0, %v5796_v6  ;;  %v5800_v36 = vrot.slane %v5796_v6, 4  ;;  %v13554_v35 = vsel %vm1071_vm15, %v1102_v25, %v1106_v33  ;;  %v1118_v42 = vrot.slane %v1116_v19, 1  ;;  %v6110_v26 = vld [vmem:[#allocation2 + $0x24] sm:$0xf]  ;;  %v2516_v58 = vld [vmem:[#allocation2 + $0x30] sm:$0xf] }
  0xc4   : > { %v5807_v22 = vor.u32 %v5805_v15, %v5804_v56  ;;  %v5809_v20 = vrot.slane %v5804_v56, 4  ;;  %v930_v53 = vld [vmem:[#allocation2 + $0x24] sm:$0xe]  ;;  %2898 = vrot.lane.b32.xlu1 %v2727_v5, %s12895_s16  ;;  %v1113_v1 = vrot.slane %v1111_v2, 1  ;;  %v5813_v16 = vrot.slane %v5811_v4, 7 }
  0xc5   : > { %v6104_v0 = vsel %vm13133_vm12, %v5799_v62, %v6103_v37  ;;  %v5814_v3 = vshll.u32 %v5748_v48, 16  ;;  %v13559_v6 = vld [vmem:[#allocation2 + $0x38] ss:$0 sps:$4 sm:$0x11]   ;;  %v5819_v19 = vshrl.u32 %v5749_v27, 16  ;;  %v5822_v60 = vshll.u32 %v5749_v27, 16 }
  0xc6   : > { %v5808_v33 = vsel %vm13127_vm8, %v5800_v36, %v5807_v22  ;;  %v6108_v15 = vsel %vm13138_vm13, %v5809_v20, %v6107_v17  ;;  %6105 = vst [vmem:[#allocation2 + $0x18] sm:$0xf] %v6104_v0  ;;  %v2517_v25 = vld [vmem:[#allocation2 + $0x34] sm:$0xf]  ;;  %2033 = vrot.lane.b32.xlu0 %v2001_v8, %s12894_s15  ;;  %v1114_v5 = vor.u32 %v1113_v1, %v1109_v52  ;;  %v5817_v48 = vrot.slane %v5813_v16, 4 }
  0xc7   : > { %6106 = vst.msk [vmem:[#allocation2 + $0x1c] sm:$0xf] %vm761_vm9, %v5808_v33  ;;  %6109 = vst [vmem:[#allocation2 + $0x20] sm:$0x1] %v6108_v15  ;;  %v5816_v37 = vor.u32 %v5814_v3, %v5813_v16  ;;  %v6114_v56 = vld [vmem:[#allocation2 + $0x2c] sm:$0x1]  ;;  %v11160_v4 = vcombine.low %v929_v39, %v13504_v43  ;;  %v11161_v17 = vcombine.low %v930_v53, %v13538_v55 }
  0xc8   : > { %v2518_v62 = vld [vmem:[#allocation2 + $0x3c] sm:$0xf]  ;;  %v5821_v36 = vrot.slane %v5819_v19, 7  ;;  %v1352_v2 = vrot.slane %v13511_v40, 1  ;;  %v1355_v27 = vrot.slane %v13534_v57, 1  ;;  %3026 = vrot.lane.b32.xlu1 %v13532_v44, %s12894_s15  ;;  %v1119_v8 = vsel %vm1071_vm15, %v1114_v5, %v1118_v42 }
  0xc9   : > { %v2519_v22 = vld [vmem:[#allocation2 + $0x40] sm:$0xf]  ;;  %v6111_v52 = vsel %vm13133_vm12, %v5816_v37, %v6110_v26  ;;  %v1351_v20 = vrot.slane %v11160_v4, 1  ;;  %v13576_v0 = vcombine.low %v2516_v58, %v2517_v25  ;;  %v12464_v43 = vld [vmem:[#allocation2 + $0x44] ss:$0 sps:$4 sm:$0x11]  }
  0xca   : > { %v2562_v39 = vld [vmem:[#allocation2 + $0x30] sm:$0xe]  ;;  %v5824_v1 = vor.u32 %v5822_v60, %v5821_v36  ;;  %v5826_v40 = vrot.slane %v5821_v36, 4  ;;  %v1354_v16 = vrot.slane %v11161_v17, 1  ;;  %6112 = vst [vmem:[#allocation2 + $0x24] sm:$0xf] %v6111_v52  ;;  %1264 = vrot.lane.b32.xlu0 %v13493_v18, %s12895_s16  ;;  %v13586_v53 = vcombine.low %v2518_v62, %v2519_v22 }
  0xcb   : > { %17045 = vst [vmem:[#allocation13_spill] sm:$0xff] %v13576_v0  ;;  %v2736_v57 = vshll.u32 %v13559_v6, 16  ;;  %v2563_v55 = vld [vmem:[#allocation2 + $0x3c] sm:$0xe]  ;;  %v13582_v44 = vsel %vm1344_vm14, %v1351_v20, %v1352_v2  ;;  %v2729_v42 = vshrl.u32 %v13576_v0, 16  ;;  %v2731_v26 = vshll.u32 %v13576_v0, 16 }
  0xcc   : > { %17046 = vst [vmem:[#allocation14_spill] sm:$0xff] %v13586_v53  ;;  %v887_v58 = vld [vmem:[#allocation2 + $0x30] sm:$0xf]  ;;  %v5825_v3 = vsel %vm13127_vm8, %v5817_v48, %v5824_v1  ;;  %v6115_v33 = vsel %vm13138_vm13, %v5826_v40, %v6114_v56  ;;  %v1356_v15 = vsel %vm1344_vm14, %v1354_v16, %v1355_v27  ;;  %v13593_v19 = vld [vmem:[#allocation2 + $0x34] sm:$0xf]  ;;  %1270 = vrot.lane.b32.xlu1 %v1119_v8, %s12895_s16  ;;  %v2741_v37 = vshrl.u32 %v13586_v53, 16 }
  0xcd   : > { %v2738_v18 = vrot.slane %v2736_v57, 1  ;;  %v13595_v60 = vld [vmem:[#allocation2 + $0x38] ss:$0 sps:$4 sm:$0x11]   ;;  %6113 = vst.msk [vmem:[#allocation2 + $0x28] sm:$0xf] %vm761_vm9, %v5825_v3  ;;  %v11292_v62 = vcombine.low %v2562_v39, %v2517_v25  ;;  %v11293_v2 = vcombine.low %v2563_v55, %v2519_v22  ;;  %v13607_v8 = vcombine.low %v887_v58, %v13593_v19 }
  0xce   : > { %6116 = vst [vmem:[#allocation2 + $0x2c] sm:$0x1] %v6115_v33  ;;  %v2733_v5 = vrot.slane %v2731_v26, 1  ;;  %v2743_v48 = vshll.u32 %v13586_v53, 16  ;;  %v2748_v4 = vshll.u32 %v12464_v43, 16  ;;  %v2983_v36 = vrot.slane %v13559_v6, 1  ;;  %1393 = vrot.lane.b32.xlu0 %v13502_v29, %s12894_s15 }
  0xcf   : > { %v5750_v56 = vld [vmem:[%s12969_s14 + $0x18] sm:$0xf]  ;;  %v2986_v17 = vrot.slane %v12464_v43, 1  ;;  %v5751_v27 = vld [vmem:[%s12969_s14 + $0x1c] sm:$0xf]  ;;  %17047 = vst [vmem:[#allocation15_spill] sm:$0xff] %v13607_v8 }
  0xd0   : > { %v2734_v52 = vor.u32 %v2733_v5, %v2729_v42  ;;  %v2745_v20 = vrot.slane %v2743_v48, 1  ;;  %v2750_v1 = vrot.slane %v2748_v4, 1  ;;  %v13609_v40 = vld [vmem:[#allocation2 + $0x44] ss:$0 sps:$4 sm:$0x11]   ;;  %v2982_v16 = vrot.slane %v11292_v62, 1  ;;  %1399 = vrot.lane.b32.xlu1 %v1356_v15, %s12894_s15 }
  0xd1   : > { %v2985_v57 = vrot.slane %v11293_v2, 1  ;;  %v1128_v25 = vshll.u32 %v13595_v60, 16  ;;  %v5828_v6 = vshrl.u32 %v5750_v56, 16  ;;  %v889_v22 = vld [vmem:[#allocation2 + $0x3c] sm:$0xf]  ;;  %v1121_v39 = vshrl.u32 %v13607_v8, 16 }
  0xd2   : > { %v13614_v43 = vsel %vm1071_vm15, %v2734_v52, %v2738_v18  ;;  %v2746_v29 = vor.u32 %v2745_v20, %v2741_v37  ;;  %v1123_v55 = vshll.u32 %v13607_v8, 16  ;;  %v13618_v42 = vld [vmem:[#allocation2 + $0x40] sm:$0xf]  ;;  %v13621_v26 = vsel %vm1344_vm14, %v2982_v16, %v2983_v36  ;;  %2896 = vrot.lane.b32.xlu0 %v13529_v13, %s12895_s16  ;;  %v6117_v4 = vld [vmem:[#allocation2 + $0x30] sm:$0xf] }
  0xd3   : > { %v2987_v58 = vsel %vm1344_vm14, %v2985_v57, %v2986_v17  ;;  %v1130_v3 = vrot.slane %v1128_v25, 1  ;;  %v5830_v33 = vrot.slane %v5828_v6, 7  ;;  %v5752_v5 = vld [vmem:[%s12969_s14 + $0x20] sm:$0xf]  ;;  %v5831_v37 = vshll.u32 %v5750_v56, 16 }
  0xd4   : > { %v2751_v15 = vsel %vm1071_vm15, %v2746_v29, %v2750_v1  ;;  %v1125_v18 = vrot.slane %v1123_v55, 1  ;;  %v5836_v48 = vshrl.u32 %v5751_v27, 16  ;;  %v5839_v2 = vshll.u32 %v5751_v27, 16  ;;  %v6121_v57 = vld [vmem:[#allocation2 + $0x38] sm:$0x1] }
  0xd5   : > { %v5834_v62 = vrot.slane %v5830_v33, 4  ;;  %v13629_v36 = vcombine.low %v889_v22, %v13618_v42  ;;  %v1140_v17 = vshll.u32 %v13609_v40, 16  ;;  %2902 = vrot.lane.b32.xlu1 %v2751_v15, %s12895_s16  ;;  %v5833_v20 = vor.u32 %v5831_v37, %v5830_v33  ;;  %v5753_v13 = vld [vmem:[%s12969_s14 + $0x24] sm:$0xf]  ;;  %v931_v27 = vld [vmem:[#allocation2 + $0x30] sm:$0xe] }
  0xd6   : > { %v1126_v52 = vor.u32 %v1125_v18, %v1121_v39  ;;  %v5838_v16 = vrot.slane %v5836_v48, 7  ;;  %v5845_v25 = vshrl.u32 %v5752_v5, 16  ;;  %v5848_v29 = vshll.u32 %v5752_v5, 16  ;;  %3024 = vrot.lane.b32.xlu0 %v13520_v23, %s12894_s15  ;;  %v6124_v15 = vld [vmem:[#allocation2 + $0x3c] sm:$0xf] }
  0xd7   : > { %17048 = vst [vmem:[#allocation16_spill] sm:$0xff] %v13629_v36  ;;  %v1133_v1 = vshrl.u32 %v13629_v36, 16  ;;  %v1135_v56 = vshll.u32 %v13629_v36, 16  ;;  %v1142_v6 = vrot.slane %v1140_v17, 1  ;;  %v6118_v33 = vsel %vm13133_vm12, %v5833_v20, %v6117_v4  ;;  %v932_v18 = vld [vmem:[#allocation2 + $0x3c] sm:$0xe] }
  0xd8   : > { %v13639_v22 = vsel %vm1071_vm15, %v1126_v52, %v1130_v3  ;;  %v5841_v55 = vor.u32 %v5839_v2, %v5838_v16  ;;  %v5843_v39 = vrot.slane %v5838_v16, 4  ;;  %v2520_v37 = vld [vmem:[#allocation2 + $0x48] sm:$0xf]  ;;  %v5847_v8 = vrot.slane %v5845_v25, 7  ;;  %6119 = vst [vmem:[#allocation2 + $0x30] sm:$0xf] %v6118_v33  ;;  %v13652_v16 = vpop.permute.xlu1 %2005 }
  0xd9   : > { %v1137_v48 = vrot.slane %v1135_v56, 1  ;;  %v5853_v36 = vshrl.u32 %v5753_v13, 16  ;;  %v5856_v17 = vshll.u32 %v5753_v13, 16  ;;  %v2521_v5 = vld [vmem:[#allocation2 + $0x4c] sm:$0xf]  ;;  %3030 = vrot.lane.b32.xlu1 %v2987_v58, %s12894_s15  ;;  %v11162_v4 = vcombine.low %v931_v27, %v13593_v19 }
  0xda   : > { %v5842_v23 = vsel %vm13127_vm8, %v5834_v62, %v5841_v55  ;;  %v6122_v3 = vsel %vm13138_vm13, %v5843_v39, %v6121_v57  ;;  %v6128_v2 = vld [vmem:[#allocation2 + $0x44] sm:$0x1]  ;;  %v1358_v52 = vrot.slane %v13595_v60, 1  ;;  %v13650_v20 = vld [vmem:[#allocation2 + $0x50] ss:$0 sps:$4 sm:$0x11]   ;;  %v5850_v58 = vor.u32 %v5848_v29, %v5847_v8  ;;  %1268 = vrot.lane.b32.xlu0 %v13554_v35, %s12895_s16 }
  0xdb   : > { %6120 = vst.msk [vmem:[#allocation2 + $0x34] sm:$0xf] %vm761_vm9, %v5842_v23  ;;  %6123 = vst [vmem:[#allocation2 + $0x38] sm:$0x1] %v6122_v3  ;;  %v1138_v13 = vor.u32 %v1137_v48, %v1133_v1  ;;  %v5851_v25 = vrot.slane %v5847_v8, 4  ;;  %v5855_v56 = vrot.slane %v5853_v36, 7  ;;  %v11163_v19 = vcombine.low %v932_v18, %v13618_v42  ;;  %v13679_v3 = vpop.permute.xlu0 %2009 }
  0xdc   : > { %v2522_v62 = vld [vmem:[#allocation2 + $0x54] sm:$0xf]  ;;  %v2523_v55 = vld [vmem:[#allocation2 + $0x58] sm:$0xf]  ;;  %v1357_v57 = vrot.slane %v11162_v4, 1  ;;  %v1361_v60 = vrot.slane %v13609_v40, 1  ;;  %v13659_v27 = vcombine.low %v2520_v37, %v2521_v5  ;;  %v6125_v8 = vsel %vm13133_vm12, %v5850_v58, %v6124_v15 }
  0xdd   : > { %v12474_v39 = vld [vmem:[#allocation2 + $0x5c] ss:$0 sps:$4 sm:$0x11]   ;;  %v1143_v33 = vsel %vm1071_vm15, %v1138_v13, %v1142_v6  ;;  %v5858_v23 = vor.u32 %v5856_v17, %v5855_v56  ;;  %v5860_v1 = vrot.slane %v5855_v56, 4  ;;  %v2564_v36 = vld [vmem:[#allocation2 + $0x48] sm:$0xe]  ;;  %v13675_v37 = vcombine.low %v2522_v62, %v2523_v55  ;;  %v13687_v56 = vpop.permute.xlu1 %2007 }
  0xde   : > { %17049 = vst [vmem:[#allocation17_spill] sm:$0xff] %v13659_v27  ;;  %1274 = vrot.lane.b32.xlu1 %v1143_v33, %s12895_s16  ;;  %v13666_v35 = vsel %vm1344_vm14, %v1357_v57, %v1358_v52  ;;  %v1360_v29 = vrot.slane %v11163_v19, 1  ;;  %6126 = vst [vmem:[#allocation2 + $0x3c] sm:$0xf] %v6125_v8  ;;  %v2753_v40 = vshrl.u32 %v13659_v27, 16  ;;  %v2755_v42 = vshll.u32 %v13659_v27, 16  ;;  %1397 = vrot.lane.b32.xlu0 %v13582_v44, %s12894_s15 }
  0xdf   : > { %v5859_v6 = vsel %vm13127_vm8, %v5851_v25, %v5858_v23  ;;  %v6129_v18 = vsel %vm13138_vm13, %v5860_v1, %v6128_v2  ;;  %v2760_v15 = vshll.u32 %v13650_v20, 16  ;;  %17050 = vst [vmem:[#allocation18_spill] sm:$0xff] %v13675_v37  ;;  %v2565_v48 = vld [vmem:[#allocation2 + $0x54] sm:$0xe]  ;;  %v2772_v2 = vshll.u32 %v12474_v39, 16 }
  0xe0   : > { %v13677_v17 = vld [vmem:[#allocation2 + $0x50] ss:$0 sps:$4 sm:$0x11]   ;;  %6127 = vst.msk [vmem:[#allocation2 + $0x40] sm:$0xf] %vm761_vm9, %v5859_v6  ;;  %v1362_v4 = vsel %vm1344_vm14, %v1360_v29, %v1361_v60  ;;  %v2757_v52 = vrot.slane %v2755_v42, 1  ;;  %v11294_v13 = vcombine.low %v2564_v36, %v2521_v5  ;;  %v11295_v8 = vcombine.low %v2565_v48, %v2523_v55 }
  0xe1   : > { %6130 = vst [vmem:[#allocation2 + $0x44] sm:$0x1] %v6129_v18  ;;  %v891_v58 = vld [vmem:[#allocation2 + $0x48] sm:$0xf]  ;;  %v13685_v25 = vld [vmem:[#allocation2 + $0x4c] sm:$0xf] }
  0xe2   : > { %v2762_v62 = vrot.slane %v2760_v15, 1  ;;  %v2765_v57 = vshrl.u32 %v13675_v37, 16  ;;  %v2767_v19 = vshll.u32 %v13675_v37, 16  ;;  %v2989_v44 = vrot.slane %v13650_v20, 1  ;;  %v5754_v33 = vld [vmem:[%s12969_s14 + $0x28] sm:$0xf]  ;;  %1403 = vrot.lane.b32.xlu1 %v1362_v4, %s12894_s15  ;;  %2900 = vrot.lane.b32.xlu0 %v13614_v43, %s12895_s16  ;;  %v13713_v43 = vpop.permute.xlu0 %2013 }
  0xe3   : > { %v2758_v60 = vor.u32 %v2757_v52, %v2753_v40  ;;  %v2774_v23 = vrot.slane %v2772_v2, 1  ;;  %v2988_v1 = vrot.slane %v11294_v13, 1  ;;  %v5755_v5 = vld [vmem:[%s12969_s14 + $0x2c] sm:$0xf]  ;;  %v893_v36 = vld [vmem:[#allocation2 + $0x54] sm:$0xf]  ;;  %v13696_v6 = vcombine.low %v891_v58, %v13685_v25 }
  0xe4   : > { %v2769_v29 = vrot.slane %v2767_v19, 1  ;;  %v2992_v42 = vrot.slane %v12474_v39, 1  ;;  %v1152_v18 = vshll.u32 %v13677_v17, 16  ;;  %v13699_v15 = vld [vmem:[#allocation2 + $0x5c] ss:$0 sps:$4 sm:$0x11]  }
  0xe5   : > { %17051 = vst [vmem:[#allocation19_spill] sm:$0xff] %v13696_v6  ;;  %v13704_v20 = vsel %vm1071_vm15, %v2758_v60, %v2762_v62  ;;  %v13707_v55 = vsel %vm1344_vm14, %v2988_v1, %v2989_v44  ;;  %v2991_v40 = vrot.slane %v11295_v8, 1  ;;  %v5862_v48 = vshrl.u32 %v5754_v33, 16  ;;  %v13709_v39 = vld [vmem:[#allocation2 + $0x58] sm:$0xf]  ;;  %v13717_v8 = vpop.permute.xlu1 %2011 }
  0xe6   : > { %v2770_v4 = vor.u32 %v2769_v29, %v2765_v57  ;;  %v1145_v52 = vshrl.u32 %v13696_v6, 16  ;;  %v1147_v2 = vshll.u32 %v13696_v6, 16  ;;  %v1154_v13 = vrot.slane %v1152_v18, 1  ;;  %v6131_v58 = vld [vmem:[#allocation2 + $0x48] sm:$0xf]  ;;  %3028 = vrot.lane.b32.xlu0 %v13621_v26, %s12894_s15 }
  0xe7   : > { %v2993_v62 = vsel %vm1344_vm14, %v2991_v40, %v2992_v42  ;;  %v5864_v19 = vrot.slane %v5862_v48, 7  ;;  %v5865_v60 = vshll.u32 %v5754_v33, 16  ;;  %v5870_v44 = vshrl.u32 %v5755_v5, 16  ;;  %v5756_v1 = vld [vmem:[%s12969_s14 + $0x30] sm:$0xf] }
  0xe8   : > { %v2775_v27 = vsel %vm1071_vm15, %v2770_v4, %v2774_v23  ;;  %v1149_v57 = vrot.slane %v1147_v2, 1  ;;  %v5873_v29 = vshll.u32 %v5755_v5, 16  ;;  %v6135_v37 = vld [vmem:[#allocation2 + $0x50] sm:$0x1]  ;;  %v13721_v0 = vcombine.low %v893_v36, %v13709_v39  ;;  %v5757_v18 = vld [vmem:[%s12969_s14 + $0x34] sm:$0xf] }
  0xe9   : > { %2906 = vrot.lane.b32.xlu1 %v2775_v27, %s12895_s16  ;;  %v5867_v42 = vor.u32 %v5865_v60, %v5864_v19  ;;  %v5868_v33 = vrot.slane %v5864_v19, 4  ;;  %v5872_v40 = vrot.slane %v5870_v44, 7  ;;  %v1164_v48 = vshll.u32 %v13699_v15, 16  ;;  %v933_v6 = vld [vmem:[#allocation2 + $0x48] sm:$0xe] }
  0xea   : > { %17052 = vst [vmem:[#allocation20_spill] sm:$0xff] %v13721_v0  ;;  %v1150_v53 = vor.u32 %v1149_v57, %v1145_v52  ;;  %v1157_v23 = vshrl.u32 %v13721_v0, 16  ;;  %v1159_v5 = vshll.u32 %v13721_v0, 16  ;;  %v5879_v4 = vshrl.u32 %v5756_v1, 16  ;;  %v934_v36 = vld [vmem:[#allocation2 + $0x54] sm:$0xe]  ;;  %v13737_v0 = vpop.permute.xlu0 %1877  ;;  %1272 = vrot.lane.b32.xlu0 %v13639_v22, %s12895_s16 }
  0xeb   : > { %v5875_v2 = vor.u32 %v5873_v29, %v5872_v40  ;;  %v5877_v63 = vrot.slane %v5872_v40, 4  ;;  %v6132_v26 = vsel %vm13133_vm12, %v5867_v42, %v6131_v58  ;;  %v1166_v50 = vrot.slane %v1164_v48, 1  ;;  %v6138_v27 = vld [vmem:[#allocation2 + $0x54] sm:$0xf]  ;;  %v2524_v60 = vld [vmem:[#allocation2 + $0x60] sm:$0xf]  ;;  %v13748_v40 = vpop.permute.xlu1 %2015 }
  0xec   : > { %v13732_v19 = vld [vmem:[#allocation2 + $0x64] sm:$0xf]  ;;  %v13735_v44 = vsel %vm1071_vm15, %v1150_v53, %v1154_v13  ;;  %v1161_v52 = vrot.slane %v1159_v5, 1  ;;  %v5881_v57 = vrot.slane %v5879_v4, 7  ;;  %v5882_v28 = vshll.u32 %v5756_v1, 16 }
  0xed   : > { %6133 = vst [vmem:[#allocation2 + $0x48] sm:$0xf] %v6132_v26  ;;  %3034 = vrot.lane.b32.xlu1 %v2993_v62, %s12894_s15  ;;  %v5876_v58 = vsel %vm13127_vm8, %v5868_v33, %v5875_v2  ;;  %v6136_v29 = vsel %vm13138_vm13, %v5877_v63, %v6135_v37  ;;  %v5887_v42 = vshrl.u32 %v5757_v18, 16  ;;  %v5890_v53 = vshll.u32 %v5757_v18, 16  ;;  %v2526_v5 = vld [vmem:[#allocation2 + $0x6c] sm:$0xf] }
  0xee   : > { %v13746_v13 = vld [vmem:[#allocation2 + $0x68] ss:$0 sps:$4 sm:$0x11]   ;;  %6134 = vst.msk [vmem:[#allocation2 + $0x4c] sm:$0xf] %vm761_vm9, %v5876_v58  ;;  %v1162_v1 = vor.u32 %v1161_v52, %v1157_v23  ;;  %v5884_v48 = vor.u32 %v5882_v28, %v5881_v57  ;;  %v5885_v22 = vrot.slane %v5881_v57, 4  ;;  %v11164_v62 = vcombine.low %v933_v6, %v13685_v25  ;;  %1401 = vrot.lane.b32.xlu0 %v13666_v35, %s12894_s15  ;;  %v1880_v35 = vpop.permute.xlu0 %1879 }
  0xef   : > { %6137 = vst [vmem:[#allocation2 + $0x50] sm:$0x1] %v6136_v29  ;;  %v5889_v4 = vrot.slane %v5887_v42, 7  ;;  %v1364_v33 = vrot.slane %v13677_v17, 1  ;;  %v11165_v63 = vcombine.low %v934_v36, %v13709_v39  ;;  %v1367_v37 = vrot.slane %v13699_v15, 1 }
  0xf0   : > { %v2527_v18 = vld [vmem:[#allocation2 + $0x70] sm:$0xf]  ;;  %v1167_v2 = vsel %vm1071_vm15, %v1162_v1, %v1166_v50  ;;  %v6139_v26 = vsel %vm13133_vm12, %v5884_v48, %v6138_v27  ;;  %v6142_v58 = vld [vmem:[#allocation2 + $0x5c] sm:$0x1]  ;;  %v1363_v23 = vrot.slane %v11164_v62, 1  ;;  %v13759_v28 = vcombine.low %v2524_v60, %v13732_v19  ;;  %v13777_v48 = vpop.permute.xlu1 %1883 }
  0xf1   : > { %v12484_v25 = vld [vmem:[#allocation2 + $0x74] ss:$0 sps:$4 sm:$0x11]   ;;  %v5892_v17 = vor.u32 %v5890_v53, %v5889_v4  ;;  %v5894_v6 = vrot.slane %v5889_v4, 4  ;;  %1278 = vrot.lane.b32.xlu1 %v1167_v2, %s12895_s16  ;;  %v1366_v15 = vrot.slane %v11165_v63, 1  ;;  %v2784_v50 = vshll.u32 %v13746_v13, 16 }
  0xf2   : > { %17053 = vst [vmem:[#allocation21_spill] sm:$0xff] %v13759_v28  ;;  %6140 = vst [vmem:[#allocation2 + $0x54] sm:$0xf] %v6139_v26  ;;  %v13766_v39 = vsel %vm1344_vm14, %v1363_v23, %v1364_v33  ;;  %v2777_v36 = vshrl.u32 %v13759_v28, 16  ;;  %v2779_v27 = vshll.u32 %v13759_v28, 16  ;;  %v13770_v60 = vcombine.low %v2526_v5, %v2527_v18  ;;  %2904 = vrot.lane.b32.xlu0 %v13704_v20, %s12895_s16 }
  0xf3   : > { %v2566_v52 = vld [vmem:[#allocation2 + $0x60] sm:$0xe]  ;;  %v2567_v57 = vld [vmem:[#allocation2 + $0x6c] sm:$0xe]  ;;  %v5893_v29 = vsel %vm13127_vm8, %v5885_v22, %v5892_v17  ;;  %v6143_v42 = vsel %vm13138_vm13, %v5894_v6, %v6142_v58  ;;  %v1368_v53 = vsel %vm1344_vm14, %v1366_v15, %v1367_v37  ;;  %v2786_v1 = vrot.slane %v2784_v50, 1 }
  0xf4   : > { %17054 = vst [vmem:[#allocation22_spill] sm:$0xff] %v13770_v60  ;;  %6141 = vst.msk [vmem:[#allocation2 + $0x58] sm:$0xf] %vm761_vm9, %v5893_v29  ;;  %v2781_v62 = vrot.slane %v2779_v27, 1  ;;  %v2789_v5 = vshrl.u32 %v13770_v60, 16  ;;  %v2791_v4 = vshll.u32 %v13770_v60, 16  ;;  %v11296_v22 = vcombine.low %v2566_v52, %v13732_v19  ;;  %v13802_v29 = vpop.permute.xlu0 %1881 }
  0xf5   : > { %6144 = vst [vmem:[#allocation2 + $0x5c] sm:$0x1] %v6143_v42  ;;  %v2796_v33 = vshll.u32 %v12484_v25, 16  ;;  %1407 = vrot.lane.b32.xlu1 %v1368_v53, %s12894_s15  ;;  %v2995_v63 = vrot.slane %v13746_v13, 1  ;;  %v11297_v37 = vcombine.low %v2567_v57, %v2527_v18  ;;  %v12487_v2 = vld [vmem:[%s16942_s2 + $0x8] sm:$0x1f]   ;;  %v2038_v20 = vsel %vm16967_vm0, %v13193_v41, %v13737_v0 }
  0xf6   : > { %v2782_v26 = vor.u32 %v2781_v62, %v2777_v36  ;;  %v2793_v58 = vrot.slane %v2791_v4, 1  ;;  %v895_v17 = vld [vmem:[#allocation2 + $0x60] sm:$0xf]  ;;  %v13793_v6 = vld [vmem:[#allocation2 + $0x64] sm:$0xf]  ;;  %v2994_v19 = vrot.slane %v11296_v22, 1  ;;  %3032 = vrot.lane.b32.xlu0 %v13707_v55, %s12894_s15  ;;  %v2040_v22 = vsel %vm16967_vm0, %v13220_v30, %v1880_v35 }
  0xf7   : > { %v2798_v23 = vrot.slane %v2796_v33, 1  ;;  %v13795_v15 = vld [vmem:[#allocation2 + $0x68] ss:$0 sps:$4 sm:$0x11]   ;;  %v2997_v13 = vrot.slane %v11297_v37, 1  ;;  %v2998_v18 = vrot.slane %v12484_v25, 1 }
  0xf8   : > { %vm17025_vm1 = vcmask 1043456   ;;  %v5758_v50 = vld [vmem:[%s12969_s14 + $0x38] sm:$0xf]  ;;  %v13799_v27 = vsel %vm1071_vm15, %v2782_v26, %v2786_v1  ;;  %v2794_v36 = vor.u32 %v2793_v58, %v2789_v5  ;;  %vm2143_vm2 = vcmask 1044480   ;;  %v5759_v52 = vld [vmem:[%s12969_s14 + $0x3c] sm:$0xf]  ;;  %v13813_v1 = vpop.permute.xlu1 %1887 }
  0xf9   : > { %v897_v57 = vld [vmem:[#allocation2 + $0x6c] sm:$0xf]  ;;  %v13807_v41 = vsel %vm1344_vm14, %v2994_v19, %v2995_v63  ;;  %v2999_v0 = vsel %vm1344_vm14, %v2997_v13, %v2998_v18  ;;  %v12896_v25 = vmov 65535   ;;  %vm16966_vm3 = vcmask 48128   ;;  %v13820_v4 = vld [vmem:[#allocation2 + $0x70] sm:$0xf] }
  0xfa   : > { %v2144_v42 = vsel %vm17025_vm1, 4294967295, %v12896_v25  ;;  %v13811_v53 = vld [vmem:[#allocation2 + $0x74] ss:$0 sps:$4 sm:$0x11]   ;;  %v2799_v62 = vsel %vm1071_vm15, %v2794_v36, %v2798_v23  ;;  %v2070_v55 = vsel %vm16966_vm3, %v2038_v20, %v13652_v16  ;;  %vm16965_vm4 = vcmask 72704   ;;  %1276 = vrot.lane.b32.xlu0 %v13735_v44, %s12895_s16  ;;  %v1886_v25 = vpop.permute.xlu0 %1885 }
  0xfb   : > { %v13816_v5 = vsel %vm2143_vm2, %v2144_v42, 0  ;;  %2910 = vrot.lane.b32.xlu1 %v2799_v62, %s12895_s16  ;;  %12037 = vmatprep.mubr.msk.bf16.mxu0 %vm16965_vm4, %v2070_v55  ;;  %v13828_v63 = vcombine.low %v895_v17, %v13793_v6  ;;  %v1176_v37 = vshll.u32 %v13795_v15, 16  ;;  %v5760_v26 = vld [vmem:[%s12969_s14 + $0x40] sm:$0xf]  ;;  %v5896_v58 = vshrl.u32 %v5758_v50, 16 }
  0xfc   : > { %v2147_v33 = vand.u32 %v12487_v2, %v13816_v5  ;;  %v5899_v16 = vshll.u32 %v5758_v50, 16  ;;  %v5904_v23 = vshrl.u32 %v5759_v52, 16  ;;  %v5907_v20 = vshll.u32 %v5759_v52, 16  ;;  %v6145_v35 = vld [vmem:[#allocation2 + $0x60] sm:$0xf] }
  0xfd   : > { %17055 = vst [vmem:[#allocation23_spill] sm:$0xff] %v13828_v63  ;;  %v1169_v2 = vshrl.u32 %v13828_v63, 16  ;;  %v1171_v19 = vshll.u32 %v13828_v63, 16  ;;  %v1178_v30 = vrot.slane %v1176_v37, 1  ;;  %v13837_v17 = vcombine.low %v897_v57, %v13820_v4  ;;  %v6149_v50 = vld [vmem:[#allocation2 + $0x68] sm:$0x1]  ;;  %v13844_v63 = vpop.permute.xlu1 %1891 }
  0xfe   : > { %12035 = vmatprep.subr.bf16.mxu0 %v2147_v33  ;;  %v5898_v13 = vrot.slane %v5896_v58, 7  ;;  %v5906_v18 = vrot.slane %v5904_v23, 7  ;;  %v1188_v36 = vshll.u32 %v13811_v53, 16  ;;  %v5913_v52 = vshrl.u32 %v5760_v26, 16  ;;  %v5761_v55 = vld [vmem:[%s12969_s14 + $0x44] sm:$0xf]  ;;  %1405 = vrot.lane.b32.xlu0 %v13766_v39, %s12894_s15 }
  0xff   : > { %17056 = vst [vmem:[#allocation24_spill] sm:$0xff] %v13837_v17  ;;  %12036 = vmatpush3.bf16.msra.mxu0 %v2147_v33  ;;  %3038 = vrot.lane.b32.xlu1 %v2999_v0, %s12894_s15  ;;  %v1173_v44 = vrot.slane %v1171_v19, 1  ;;  %v1181_v42 = vshrl.u32 %v13837_v17, 16  ;;  %v1183_v62 = vshll.u32 %v13837_v17, 16  ;;  %v5916_v37 = vshll.u32 %v5760_v26, 16 }
 0x100   : > { %v5901_v57 = vor.u32 %v5899_v16, %v5898_v13  ;;  %v5902_v33 = vrot.slane %v5898_v13, 4  ;;  %v5909_v58 = vor.u32 %v5907_v20, %v5906_v18  ;;  %v5911_v23 = vrot.slane %v5906_v18, 4  ;;  %v6152_v13 = vld [vmem:[#allocation2 + $0x6c] sm:$0xf]  ;;  %v935_v20 = vld [vmem:[#allocation2 + $0x60] sm:$0xe] }
 0x101   : > { %v1174_v28 = vor.u32 %v1173_v44, %v1169_v2  ;;  %v1185_v60 = vrot.slane %v1183_v62, 1  ;;  %v1190_v59 = vrot.slane %v1188_v36, 1  ;;  %v5915_v0 = vrot.slane %v5913_v52, 7  ;;  %v6156_v52 = vld [vmem:[#allocation2 + $0x74] sm:$0x1] }
 0x102   : > { %v5910_v19 = vsel %vm13127_vm8, %v5902_v33, %v5909_v58  ;;  %v6146_v17 = vsel %vm13133_vm12, %v5901_v57, %v6145_v35  ;;  %v6150_v26 = vsel %vm13138_vm13, %v5911_v23, %v6149_v50  ;;  %v5921_v16 = vshrl.u32 %v5761_v55, 16  ;;  %v936_v44 = vld [vmem:[#allocation2 + $0x6c] sm:$0xe]  ;;  %v13865_v33 = vld [vmem:[#allocation2 + $0x80] ss:$0 sps:$4 sm:$0x11]   ;;  %2908 = vrot.lane.b32.xlu0 %v13799_v27, %s12895_s16 }
 0x103   : > { %v13855_v18 = vsel %vm1071_vm15, %v1174_v28, %v1178_v30  ;;  %6148 = vst.msk [vmem:[#allocation2 + $0x64] sm:$0xf] %vm761_vm9, %v5910_v19  ;;  %6151 = vst [vmem:[#allocation2 + $0x68] sm:$0x1] %v6150_v26  ;;  %v1186_v39 = vor.u32 %v1185_v60, %v1181_v42  ;;  %v5918_v2 = vor.u32 %v5916_v37, %v5915_v0  ;;  %v5919_v36 = vrot.slane %v5915_v0, 4  ;;  %v1890_v60 = vpop.permute.xlu0 %1889 }
 0x104   : > { %6147 = vst [vmem:[#allocation2 + $0x60] sm:$0xf] %v6146_v17  ;;  %v5923_v62 = vrot.slane %v5921_v16, 7  ;;  %v5924_v35 = vshll.u32 %v5761_v55, 16  ;;  %v2072_v50 = vsel %vm16966_vm3, %v2040_v22, %v13687_v56  ;;  %v2044_v57 = vsel %vm16967_vm0, %v13246_v10, %v13777_v48  ;;  %v2528_v28 = vld [vmem:[#allocation2 + $0x78] sm:$0xf]  ;;  %v2020_v22 = vpop.permute.xlu1 %2019 }
 0x105   : > { %v13863_v30 = vld [vmem:[#allocation2 + $0x7c] sm:$0xf]  ;;  %v1191_v17 = vsel %vm1071_vm15, %v1186_v39, %v1190_v59  ;;  %v6153_v42 = vsel %vm13133_vm12, %v5918_v2, %v6152_v13  ;;  %12038 = vmatmul.mubr.msk.bf16.vlgmr.msra.gmra.mxu0 %vm16965_vm4, %v2072_v50  ;;  %v2042_v10 = vsel %vm16967_vm0, %v13211_v12, %v13802_v29  ;;  %v1370_v56 = vrot.slane %v13795_v15, 1  ;;  %v13877_v48 = vld [vmem:[#allocation2 + $0x8c] ss:$0 sps:$4 sm:$0x11]  }
 0x106   : > { %v5926_v55 = vor.u32 %v5924_v35, %v5923_v62  ;;  %v5928_v37 = vrot.slane %v5923_v62, 4  ;;  %1282 = vrot.lane.b32.xlu1 %v1191_v17, %s12895_s16  ;;  %v11166_v59 = vcombine.low %v935_v20, %v13793_v6  ;;  %v11167_v27 = vcombine.low %v936_v44, %v13820_v4  ;;  %6154 = vst [vmem:[#allocation2 + $0x6c] sm:$0xf] %v6153_v42  ;;  %v2530_v58 = vld [vmem:[#allocation2 + $0x84] sm:$0xf] }
 0x107   : > { %v2531_v23 = vld [vmem:[#allocation2 + $0x88] sm:$0xf]  ;;  %v1373_v0 = vrot.slane %v13811_v53, 1  ;;  %v2074_v12 = vsel %vm16966_vm3, %v2042_v10, %v13679_v3  ;;  %v13888_v15 = vsel %vm16967_vm0, %v13254_v32, %v13813_v1  ;;  %v2046_v29 = vsel %vm16967_vm0, %v13214_v24, %v1886_v25  ;;  %3036 = vrot.lane.b32.xlu0 %v13807_v41, %s12894_s15  ;;  %v2568_v1 = vld [vmem:[#allocation2 + $0x78] sm:$0xe]  ;;  %v2018_v39 = vpop.permute.xlu0 %2017 }
 0x108   : > { %v5927_v6 = vsel %vm13127_vm8, %v5919_v36, %v5926_v55  ;;  %v6157_v4 = vsel %vm13138_vm13, %v5928_v37, %v6156_v52  ;;  %v1369_v19 = vrot.slane %v11166_v59, 1  ;;  %v1372_v26 = vrot.slane %v11167_v27, 1  ;;  %12041 = vmatprep.mubr.msk.bf16.mxu0 %vm16965_vm4, %v2074_v12  ;;  %v2569_v20 = vld [vmem:[#allocation2 + $0x84] sm:$0xe]  ;;  %v899_v2 = vld [vmem:[#allocation2 + $0x78] sm:$0xf] }
 0x109   : > { %6155 = vst.msk [vmem:[#allocation2 + $0x70] sm:$0xf] %vm761_vm9, %v5927_v6  ;;  %6158 = vst [vmem:[#allocation2 + $0x74] sm:$0x1] %v6157_v4  ;;  %v13901_v32 = vcombine.low %v2528_v28, %v13863_v30  ;;  %v2808_v24 = vshll.u32 %v13865_v33, 16  ;;  %v13904_v3 = vcombine.low %v2530_v58, %v2531_v23  ;;  %v2820_v53 = vshll.u32 %v13877_v48, 16 }
 0x10a   : > { %v1371_v25 = vsel %vm1344_vm14, %v1369_v19, %v1370_v56  ;;  %v1374_v16 = vsel %vm1344_vm14, %v1372_v26, %v1373_v0  ;;  %v2076_v41 = vsel %vm16966_vm3, %v2044_v57, %v13717_v8  ;;  %v2052_v13 = vsel %vm16967_vm0, %v13289_v54, %v13844_v63  ;;  %v13918_v35 = vld [vmem:[#allocation2 + $0x7c] sm:$0xf]  ;;  %v13920_v8 = vpop.permute.xlu1 %1895  ;;  %v13927_v28 = vld [vmem:[#allocation2 + $0x80] ss:$0 sps:$4 sm:$0x11]  }
 0x10b   : > { %1411 = vrot.lane.b32.xlu1 %v1374_v16, %s12894_s15  ;;  %v2801_v36 = vshrl.u32 %v13901_v32, 16  ;;  %v2803_v52 = vshll.u32 %v13901_v32, 16  ;;  %v2810_v44 = vrot.slane %v2808_v24, 1  ;;  %v2813_v62 = vshrl.u32 %v13904_v3, 16  ;;  %1280 = vrot.lane.b32.xlu0 %v13855_v18, %s12895_s16  ;;  %v5762_v55 = vld [vmem:[%s12969_s14 + $0x48] sm:$0xf]  ;;  %v1894_v6 = vpop.permute.xlu0 %1893 }
 0x10c   : > { %v2815_v50 = vshll.u32 %v13904_v3, 16  ;;  %v2822_v54 = vrot.slane %v2820_v53, 1  ;;  %v2078_v63 = vsel %vm16966_vm3, %v2046_v29, %v13713_v43  ;;  %v2050_v57 = vsel %vm16967_vm0, %v13325_v38, %v1890_v60  ;;  %v5763_v18 = vld [vmem:[%s12969_s14 + $0x4c] sm:$0xf]  ;;  %v901_v59 = vld [vmem:[#allocation2 + $0x84] sm:$0xf] }
 0x10d   : > { %v2805_v17 = vrot.slane %v2803_v52, 1  ;;  %12042 = vmatmul.mubr.msk.bf16.gmra.mxu0 %vm16965_vm4, %v2076_v41  ;;  %v11298_v42 = vcombine.low %v2568_v1, %v13863_v30  ;;  %v3001_v10 = vrot.slane %v13865_v33, 1  ;;  %v11299_v56 = vcombine.low %v2569_v20, %v2531_v23  ;;  %v13947_v23 = vld [vmem:[#allocation2 + $0x8c] ss:$0 sps:$4 sm:$0x11]  }
 0x10e   : > { %v2817_v37 = vrot.slane %v2815_v50, 1  ;;  %12045 = vmatprep.mubr.msk.bf16.mxu0 %vm16965_vm4, %v2078_v63  ;;  %v3004_v43 = vrot.slane %v13877_v48, 1  ;;  %v13938_v38 = vsel %vm16966_vm3, %v2052_v13, %v2020_v22  ;;  %v13941_v60 = vsel %vm16966_vm3, %v2050_v57, %v2018_v39  ;;  %v13950_v29 = vld [vmem:[#allocation2 + $0x88] sm:$0xf]  ;;  %v5764_v53 = vld [vmem:[%s12969_s14 + $0x50] sm:$0xf]  ;;  %v13958_v1 = vpop.permute.xlu1 %2023 }
 0x10f   : > { %v2806_v27 = vor.u32 %v2805_v17, %v2801_v36  ;;  %v3000_v30 = vrot.slane %v11298_v42, 1  ;;  %v3003_v58 = vrot.slane %v11299_v56, 1  ;;  %v13945_v33 = vcombine.low %v899_v2, %v13918_v35  ;;  %1409 = vrot.lane.b32.xlu0 %v1371_v25, %s12894_s15  ;;  %v6159_v2 = vld [vmem:[#allocation2 + $0x78] sm:$0xf]  ;;  %v5765_v63 = vld [vmem:[%s12969_s14 + $0x54] sm:$0xf] }
 0x110   : > { %v2818_v0 = vor.u32 %v2817_v37, %v2813_v62  ;;  %v1200_v48 = vshll.u32 %v13927_v28, 16  ;;  %v5930_v12 = vshrl.u32 %v5762_v55, 16  ;;  %v5933_v22 = vshll.u32 %v5762_v55, 16  ;;  %v6163_v17 = vld [vmem:[#allocation2 + $0x80] sm:$0x1] }
 0x111   : > { %v2811_v4 = vsel %vm1071_vm15, %v2806_v27, %v2810_v44  ;;  %v3002_v19 = vsel %vm1344_vm14, %v3000_v30, %v3001_v10  ;;  %v3005_v26 = vsel %vm1344_vm14, %v3003_v58, %v3004_v43  ;;  %v1193_v24 = vshrl.u32 %v13945_v33, 16  ;;  %v937_v27 = vld [vmem:[#allocation2 + $0x78] sm:$0xe]  ;;  %v2022_v30 = vpop.permute.xlu0 %2021 }
 0x112   : > { %v2823_v16 = vsel %vm1071_vm15, %v2818_v0, %v2822_v54  ;;  %v1195_v41 = vshll.u32 %v13945_v33, 16  ;;  %v1202_v13 = vrot.slane %v1200_v48, 1  ;;  %v5932_v20 = vrot.slane %v5930_v12, 7 }
 0x113   : > { %2914 = vrot.lane.b32.xlu1 %v2823_v16, %s12895_s16  ;;  %v5938_v25 = vshrl.u32 %v5763_v18, 16  ;;  %v5941_v39 = vshll.u32 %v5763_v18, 16  ;;  %v13964_v36 = vcombine.low %v901_v59, %v13950_v29  ;;  %v1212_v52 = vshll.u32 %v13947_v23, 16  ;;  %2912 = vrot.lane.b32.xlu0 %v2811_v4, %s12895_s16  ;;  %v6166_v59 = vld [vmem:[#allocation2 + $0x84] sm:$0xf] }
 0x114   : > { %v1197_v44 = vrot.slane %v1195_v41, 1  ;;  %v5935_v62 = vor.u32 %v5933_v22, %v5932_v20  ;;  %v5936_v50 = vrot.slane %v5932_v20, 4  ;;  %v5947_v57 = vshrl.u32 %v5764_v53, 16  ;;  %v1900_v22 = vpop.permute.xlu1 %1899  ;;  %v6170_v20 = vld [vmem:[#allocation2 + $0x8c] sm:$0x1] }
 0x115   : > { %v5940_v54 = vrot.slane %v5938_v25, 7  ;;  %v1205_v42 = vshrl.u32 %v13964_v36, 16  ;;  %v1207_v10 = vshll.u32 %v13964_v36, 16  ;;  %v1214_v56 = vrot.slane %v1212_v52, 1  ;;  %v938_v25 = vld [vmem:[#allocation2 + $0x84] sm:$0xe] }
 0x116   : > { %v1198_v55 = vor.u32 %v1197_v44, %v1193_v24  ;;  %v6160_v37 = vsel %vm13133_vm12, %v5935_v62, %v6159_v2  ;;  %v5949_v43 = vrot.slane %v5947_v57, 7  ;;  %v5950_v18 = vshll.u32 %v5764_v53, 16  ;;  %v2532_v52 = vld [vmem:[#allocation2 + $0x90] sm:$0xf]  ;;  %v13980_v44 = vld [vmem:[#allocation2 + $0x94] sm:$0xf] }
 0x117   : > { %3042 = vrot.lane.b32.xlu1 %v3005_v26, %s12894_s15  ;;  %v5943_v58 = vor.u32 %v5941_v39, %v5940_v54  ;;  %v5945_v0 = vrot.slane %v5940_v54, 4  ;;  %v1209_v48 = vrot.slane %v1207_v10, 1  ;;  %v5955_v12 = vshrl.u32 %v5765_v63, 16  ;;  %6161 = vst [vmem:[#allocation2 + $0x78] sm:$0xf] %v6160_v37  ;;  %3040 = vrot.lane.b32.xlu0 %v3002_v19, %s12894_s15 }
 0x118   : > { %v1203_v4 = vsel %vm1071_vm15, %v1198_v55, %v1202_v13  ;;  %v5952_v16 = vor.u32 %v5950_v18, %v5949_v43  ;;  %v5953_v24 = vrot.slane %v5949_v43, 4  ;;  %v5958_v41 = vshll.u32 %v5765_v63, 16  ;;  %v13993_v63 = vld [vmem:[#allocation2 + $0x98] ss:$0 sps:$4 sm:$0x11]   ;;  %v2028_v55 = vpop.permute.xlu1 %2027 }
 0x119   : > { %v5944_v53 = vsel %vm13127_vm8, %v5936_v50, %v5943_v58  ;;  %v6164_v26 = vsel %vm13138_vm13, %v5945_v0, %v6163_v17  ;;  %v1210_v39 = vor.u32 %v1209_v48, %v1205_v42  ;;  %v5957_v2 = vrot.slane %v5955_v12, 7  ;;  %v2534_v57 = vld [vmem:[#allocation2 + $0x9c] sm:$0xf]  ;;  %v2570_v18 = vld [vmem:[#allocation2 + $0x90] sm:$0xe] }
 0x11a   : > { %6162 = vst.msk [vmem:[#allocation2 + $0x7c] sm:$0xf] %vm761_vm9, %v5944_v53  ;;  %6165 = vst [vmem:[#allocation2 + $0x80] sm:$0x1] %v6164_v26  ;;  %v6167_v13 = vsel %vm13133_vm12, %v5952_v16, %v6166_v59  ;;  %v2080_v19 = vsel %vm16966_vm3, %v13888_v15, %v13748_v40  ;;  %v2056_v62 = vsel %vm16967_vm0, %v13330_v46, %v13920_v8  ;;  %v2535_v40 = vld [vmem:[#allocation2 + $0xa0] sm:$0xf] }
 0x11b   : > { %v2054_v50 = vsel %vm16967_vm0, %v13342_v61, %v1894_v6  ;;  %v1215_v54 = vsel %vm1071_vm15, %v1210_v39, %v1214_v56  ;;  %v5960_v17 = vor.u32 %v5958_v41, %v5957_v2  ;;  %v5962_v42 = vrot.slane %v5957_v2, 4  ;;  %12046 = vmatmul.mubr.msk.bf16.gmra.mxu0 %vm16965_vm4, %v2080_v19  ;;  %6168 = vst [vmem:[#allocation2 + $0x84] sm:$0xf] %v6167_v13  ;;  %v13998_v15 = vld [vmem:[#allocation2 + $0xa4] ss:$0 sps:$4 sm:$0x11]  }
 0x11c   : > { %v11168_v10 = vcombine.low %v937_v27, %v13918_v35  ;;  %1286 = vrot.lane.b32.xlu1 %v1215_v54, %s12895_s16  ;;  %12049 = vmatprep.mubr.msk.bf16.mxu0 %vm16965_vm4, %v13941_v60  ;;  %v1376_v46 = vrot.slane %v13927_v28, 1  ;;  %v11169_v61 = vcombine.low %v938_v25, %v13950_v29  ;;  %v1379_v8 = vrot.slane %v13947_v23, 1  ;;  %v1898_v35 = vpop.permute.xlu0 %1897  ;;  %v2571_v0 = vld [vmem:[#allocation2 + $0x9c] sm:$0xe]  ;;  %v903_v48 = vld [vmem:[#allocation2 + $0x90] sm:$0xf]  ;;  %v14029_v12 = vpop.permute.xlu1 %1903 }
 0x11d   : > { %v14008_v6 = vsel %vm16966_vm3, %v2056_v62, %v13958_v1  ;;  %1284 = vrot.lane.b32.xlu0 %v1203_v4, %s12895_s16  ;;  %v5961_v56 = vsel %vm13127_vm8, %v5953_v24, %v5960_v17  ;;  %v6171_v37 = vsel %vm13138_vm13, %v5962_v42, %v6170_v20  ;;  %v2086_v28 = vsel %vm16966_vm3, %v2054_v50, %v2022_v30  ;;  %v14034_v25 = vld [vmem:[#allocation2 + $0x98] ss:$0 sps:$4 sm:$0x11]   ;;  %v14041_v26 = vld [vmem:[#allocation2 + $0x94] sm:$0xf] }
 0x11e   : > { %v1375_v60 = vrot.slane %v11168_v10, 1  ;;  %6169 = vst.msk [vmem:[#allocation2 + $0x88] sm:$0xf] %vm761_vm9, %v5961_v56  ;;  %6172 = vst [vmem:[#allocation2 + $0x8c] sm:$0x1] %v6171_v37  ;;  %v1378_v23 = vrot.slane %v11169_v61, 1  ;;  %v14018_v29 = vcombine.low %v2532_v52, %v13980_v44  ;;  %v14021_v43 = vcombine.low %v2534_v57, %v2535_v40 }
 0x11f   : > { %v2832_v1 = vshll.u32 %v13993_v63, 16  ;;  %v2844_v27 = vshll.u32 %v13998_v15, 16  ;;  %v2060_v58 = vsel %vm16967_vm0, %v13403_v47, %v1900_v22  ;;  %v2058_v30 = vsel %vm16967_vm0, %v13422_v45, %v1898_v35  ;;  %v5766_v19 = vld [vmem:[%s12969_s14 + $0x58] sm:$0xf]  ;;  %v14063_v35 = vld [vmem:[#allocation2 + $0xa0] sm:$0xf] }
 0x120   : > { %v1377_v59 = vsel %vm1344_vm14, %v1375_v60, %v1376_v46  ;;  %v1380_v4 = vsel %vm1344_vm14, %v1378_v23, %v1379_v8  ;;  %v2825_v16 = vshrl.u32 %v14018_v29, 16  ;;  %v2827_v24 = vshll.u32 %v14018_v29, 16  ;;  %v2026_v20 = vpop.permute.xlu0 %2025  ;;  %v14053_v17 = vpop.permute.xlu1 %2031  ;;  %v905_v8 = vld [vmem:[#allocation2 + $0x9c] sm:$0xf]  ;;  %v5768_v23 = vld [vmem:[%s12969_s14 + $0x60] sm:$0xf] }
 0x121   : > { %v2834_v41 = vrot.slane %v2832_v1, 1  ;;  %1413 = vrot.lane.b32.xlu0 %v1377_v59, %s12894_s15  ;;  %1415 = vrot.lane.b32.xlu1 %v1380_v4, %s12894_s15  ;;  %v2837_v47 = vshrl.u32 %v14021_v43, 16  ;;  %v2839_v45 = vshll.u32 %v14021_v43, 16  ;;  %v2846_v22 = vrot.slane %v2844_v27, 1 }
 0x122   : > { %v11300_v53 = vcombine.low %v2570_v18, %v13980_v44  ;;  %v2829_v39 = vrot.slane %v2827_v24, 1  ;;  %v3007_v2 = vrot.slane %v13993_v63, 1  ;;  %v11301_v52 = vcombine.low %v2571_v0, %v2535_v40  ;;  %v5767_v44 = vld [vmem:[%s12969_s14 + $0x5c] sm:$0xf] }
 0x123   : > { %v3010_v13 = vrot.slane %v13998_v15, 1  ;;  %v2841_v62 = vrot.slane %v2839_v45, 1  ;;  %12050 = vmatmul.mubr.msk.bf16.gmra.mxu0 %vm16965_vm4, %v13938_v38  ;;  %v14049_v57 = vsel %vm16966_vm3, %v2060_v58, %v2028_v55  ;;  %v2090_v54 = vsel %vm16966_vm3, %v2058_v30, %v2026_v20  ;;  %v14060_v38 = vld [vmem:[#allocation2 + $0xa4] ss:$0 sps:$4 sm:$0x11]  }
 0x124   : > { %v3006_v50 = vrot.slane %v11300_v53, 1  ;;  %v2830_v42 = vor.u32 %v2829_v39, %v2825_v16  ;;  %12053 = vmatprep.mubr.msk.bf16.mxu0 %vm16965_vm4, %v2086_v28  ;;  %v3009_v63 = vrot.slane %v11301_v52, 1  ;;  %v14057_v10 = vcombine.low %v903_v48, %v14041_v26  ;;  %v6173_v58 = vld [vmem:[#allocation2 + $0x90] sm:$0xf]  ;;  %v5769_v20 = vld [vmem:[%s12969_s14 + $0x64] sm:$0xf]  ;;  %v1902_v45 = vpop.permute.xlu0 %1901 }
 0x125   : > { %v1224_v40 = vshll.u32 %v14034_v25, 16  ;;  %v2842_v15 = vor.u32 %v2841_v62, %v2837_v47  ;;  %v5964_v46 = vshrl.u32 %v5766_v19, 16  ;;  %v5967_v61 = vshll.u32 %v5766_v19, 16  ;;  %v6177_v39 = vld [vmem:[#allocation2 + $0x98] sm:$0x1] }
 0x126   : > { %v3008_v55 = vsel %vm1344_vm14, %v3006_v50, %v3007_v2  ;;  %v2835_v56 = vsel %vm1071_vm15, %v2830_v42, %v2834_v41  ;;  %v3011_v37 = vsel %vm1344_vm14, %v3009_v63, %v3010_v13  ;;  %v1217_v60 = vshrl.u32 %v14057_v10, 16  ;;  %v6180_v42 = vld [vmem:[#allocation2 + $0x9c] sm:$0xf]  ;;  %v939_v63 = vld [vmem:[#allocation2 + $0x90] sm:$0xe] }
 0x127   : > { %v1219_v28 = vshll.u32 %v14057_v10, 16  ;;  %2916 = vrot.lane.b32.xlu0 %v2835_v56, %s12895_s16  ;;  %v2847_v1 = vsel %vm1071_vm15, %v2842_v15, %v2846_v22  ;;  %v1226_v18 = vrot.slane %v1224_v40, 1  ;;  %v5966_v59 = vrot.slane %v5964_v46, 7  ;;  %v14078_v22 = vpop.permute.xlu1 %1907 }
 0x128   : > { %v5972_v27 = vshrl.u32 %v5767_v44, 16  ;;  %2918 = vrot.lane.b32.xlu1 %v2847_v1, %s12895_s16  ;;  %v5975_v0 = vshll.u32 %v5767_v44, 16  ;;  %v14074_v48 = vcombine.low %v905_v8, %v14063_v35  ;;  %v1236_v4 = vshll.u32 %v14060_v38, 16  ;;  %v2536_v1 = vld [vmem:[#allocation2 + $0xa8] sm:$0xf] }
 0x129   : > { %v1221_v30 = vrot.slane %v1219_v28, 1  ;;  %v5969_v16 = vor.u32 %v5967_v61, %v5966_v59  ;;  %v5970_v24 = vrot.slane %v5966_v59, 4  ;;  %v5981_v47 = vshrl.u32 %v5768_v23, 16  ;;  %v6184_v28 = vld [vmem:[#allocation2 + $0xa4] sm:$0x1] }
 0x12a   : > { %v5974_v41 = vrot.slane %v5972_v27, 7  ;;  %v1229_v2 = vshrl.u32 %v14074_v48, 16  ;;  %v1231_v52 = vshll.u32 %v14074_v48, 16  ;;  %v1238_v13 = vrot.slane %v1236_v4, 1 }
 0x12b   : > { %v1222_v53 = vor.u32 %v1221_v30, %v1217_v60  ;;  %3044 = vrot.lane.b32.xlu0 %v3008_v55, %s12894_s15  ;;  %v6174_v50 = vsel %vm13133_vm12, %v5969_v16, %v6173_v58  ;;  %v5983_v44 = vrot.slane %v5981_v47, 7  ;;  %12054 = vmatmul.mubr.msk.bf16.gmra.mxu0 %vm16965_vm4, %v14008_v6  ;;  %v5984_v46 = vshll.u32 %v5768_v23, 16  ;;  %v940_v55 = vld [vmem:[#allocation2 + $0x9c] sm:$0xe]  ;;  %v14098_v23 = vpop.permute.xlu1 %2035  ;;  %v2538_v30 = vld [vmem:[#allocation2 + $0xb4] sm:$0xf] }
 0x12c   : > { %v5977_v19 = vor.u32 %v5975_v0, %v5974_v41  ;;  %v5979_v62 = vrot.slane %v5974_v41, 4  ;;  %3046 = vrot.lane.b32.xlu1 %v3011_v37, %s12894_s15  ;;  %v1233_v15 = vrot.slane %v1231_v52, 1  ;;  %v5989_v61 = vshrl.u32 %v5769_v20, 16  ;;  %12057 = vmatprep.mubr.msk.bf16.mxu0 %vm16965_vm4, %v2090_v54  ;;  %6175 = vst [vmem:[#allocation2 + $0x90] sm:$0xf] %v6174_v50  ;;  %v2030_v41 = vpop.permute.xlu0 %2029 }
 0x12d   : > { %v1227_v40 = vsel %vm1071_vm15, %v1222_v53, %v1226_v18  ;;  %v5987_v60 = vrot.slane %v5983_v44, 4  ;;  %v5992_v6 = vshll.u32 %v5769_v20, 16  ;;  %v14094_v37 = vld [vmem:[#allocation2 + $0xac] sm:$0xf]  ;;  %v5986_v59 = vor.u32 %v5984_v46, %v5983_v44  ;;  %v2539_v20 = vld [vmem:[#allocation2 + $0xb8] sm:$0xf] }
 0x12e   : > { %v5978_v8 = vsel %vm13127_vm8, %v5970_v24, %v5977_v19  ;;  %v6178_v56 = vsel %vm13138_vm13, %v5979_v62, %v6177_v39  ;;  %v14096_v18 = vld [vmem:[#allocation2 + $0xb0] ss:$0 sps:$4 sm:$0x11]   ;;  %v1234_v54 = vor.u32 %v1233_v15, %v1229_v2  ;;  %v5991_v27 = vrot.slane %v5989_v61, 7  ;;  %v2572_v62 = vld [vmem:[#allocation2 + $0xa8] sm:$0xe] }
 0x12f   : > { %6176 = vst.msk [vmem:[#allocation2 + $0x94] sm:$0xf] %vm761_vm9, %v5978_v8  ;;  %6179 = vst [vmem:[#allocation2 + $0x98] sm:$0x1] %v6178_v56  ;;  %v2064_v58 = vsel %vm16967_vm0, %v13431_v34, %v14029_v12  ;;  %1288 = vrot.lane.b32.xlu0 %v1227_v40, %s12895_s16  ;;  %v2062_v0 = vsel %vm16967_vm0, %v13449_v49, %v1902_v45  ;;  %v11170_v4 = vcombine.low %v939_v63, %v14041_v26  ;;  %v907_v63 = vld [vmem:[#allocation2 + $0xa8] sm:$0xf] }
 0x130   : > { %v1382_v16 = vrot.slane %v14034_v25, 1  ;;  %v11171_v24 = vcombine.low %v940_v55, %v14063_v35  ;;  %v1239_v47 = vsel %vm1071_vm15, %v1234_v54, %v1238_v13  ;;  %v5994_v53 = vor.u32 %v5992_v6, %v5991_v27  ;;  %v14113_v12 = vld [vmem:[#allocation2 + $0xbc] ss:$0 sps:$4 sm:$0x11]   ;;  %v14121_v35 = vpop.permute.xlu1 %1266  ;;  %v14147_v55 = vld [vmem:[#allocation2 + $0xac] sm:$0xf] }
 0x131   : > { %v5996_v39 = vrot.slane %v5991_v27, 4  ;;  %v6181_v34 = vsel %vm13133_vm12, %v5986_v59, %v6180_v42  ;;  %1290 = vrot.lane.b32.xlu1 %v1239_v47, %s12895_s16  ;;  %v1381_v49 = vrot.slane %v11170_v4, 1  ;;  %v1385_v26 = vrot.slane %v14060_v38, 1  ;;  %v2573_v42 = vld [vmem:[#allocation2 + $0xb4] sm:$0xe] }
 0x132   : > { %v1384_v45 = vrot.slane %v11171_v24, 1  ;;  %6182 = vst [vmem:[#allocation2 + $0x9c] sm:$0xf] %v6181_v34  ;;  %v14119_v25 = vsel %vm16966_vm3, %v2064_v58, %v14053_v17  ;;  %v5995_v2 = vsel %vm13127_vm8, %v5987_v60, %v5994_v53  ;;  %v2094_v13 = vsel %vm16966_vm3, %v2062_v0, %v2030_v41  ;;  %v14153_v6 = vld [vmem:[#allocation2 + $0xb0] ss:$0 sps:$4 sm:$0x11]  }
 0x133   : > { %v6185_v52 = vsel %vm13138_vm13, %v5996_v39, %v6184_v28  ;;  %v14129_v19 = vcombine.low %v2536_v1, %v14094_v37  ;;  %6183 = vst.msk [vmem:[#allocation2 + $0xa0] sm:$0xf] %vm761_vm9, %v5995_v2  ;;  %v1383_v17 = vsel %vm1344_vm14, %v1381_v49, %v1382_v16  ;;  %v2856_v50 = vshll.u32 %v14096_v18, 16  ;;  %12058 = vmatmul.mubr.msk.bf16.gmra.mxu0 %vm16965_vm4, %v14049_v57  ;;  %v5770_v59 = vld [vmem:[%s12969_s14 + $0x68] sm:$0xf] }
 0x134   : > { %6186 = vst [vmem:[#allocation2 + $0xa4] sm:$0x1] %v6185_v52  ;;  %v1386_v38 = vsel %vm1344_vm14, %v1384_v45, %v1385_v26  ;;  %v14135_v44 = vcombine.low %v2538_v30, %v2539_v20  ;;  %1417 = vrot.lane.b32.xlu0 %v1383_v17, %s12894_s15  ;;  %v2868_v46 = vshll.u32 %v14113_v12, 16  ;;  %v2068_v61 = vsel %vm16967_vm0, %v13467_v21, %v14078_v22  ;;  %v14155_v28 = vpop.permute.xlu1 %1395  ;;  %v1906_v58 = vpop.permute.xlu0 %1905  ;;  %v14170_v47 = vld [vmem:[#allocation2 + $0xbc] ss:$0 sps:$4 sm:$0x11]  }
 0x135   : > { %v2849_v40 = vshrl.u32 %v14129_v19, 16  ;;  %v2851_v15 = vshll.u32 %v14129_v19, 16  ;;  %12061 = vmatprep.mubr.msk.bf16.mxu0 %vm16965_vm4, %v2094_v13  ;;  %1419 = vrot.lane.b32.xlu1 %v1386_v38, %s12894_s15  ;;  %v2858_v57 = vrot.slane %v2856_v50, 1  ;;  %v11302_v60 = vcombine.low %v2572_v62, %v14094_v37  ;;  %v5771_v37 = vld [vmem:[%s12969_s14 + $0x6c] sm:$0xf] }
 0x136   : > { %v2861_v8 = vshrl.u32 %v14135_v44, 16  ;;  %v2863_v56 = vshll.u32 %v14135_v44, 16  ;;  %v2870_v21 = vrot.slane %v2868_v46, 1  ;;  %v3013_v22 = vrot.slane %v14096_v18, 1  ;;  %v5772_v49 = vld [vmem:[%s12969_s14 + $0x70] sm:$0xf] }
 0x137   : > { %v2853_v1 = vrot.slane %v2851_v15, 1  ;;  %v11303_v54 = vcombine.low %v2573_v42, %v2539_v20  ;;  %v3012_v30 = vrot.slane %v11302_v60, 1  ;;  %v3016_v0 = vrot.slane %v14113_v12, 1  ;;  %v909_v20 = vld [vmem:[#allocation2 + $0xb4] sm:$0xf] }
 0x138   : > { %v2865_v27 = vrot.slane %v2863_v56, 1  ;;  %v14162_v4 = vsel %vm16966_vm3, %v2068_v61, %v14098_v23  ;;  %v2066_v24 = vsel %vm16967_vm0, %v13517_v9, %v1906_v58  ;;  %v14168_v18 = vcombine.low %v907_v63, %v14147_v55  ;;  %v14174_v23 = vld [vmem:[#allocation2 + $0xb8] sm:$0xf]  ;;  %v14177_v45 = vpop.permute.xlu1 %2898  ;;  %v6187_v13 = vld [vmem:[#allocation2 + $0xa8] sm:$0xf]  ;;  %v2034_v17 = vpop.permute.xlu0 %2033 }
 0x139   : > { %v2854_v16 = vor.u32 %v2853_v1, %v2849_v40  ;;  %v3015_v41 = vrot.slane %v11303_v54, 1  ;;  %v3014_v39 = vsel %vm1344_vm14, %v3012_v30, %v3013_v22  ;;  %v1248_v34 = vshll.u32 %v14153_v6, 16  ;;  %v5773_v61 = vld [vmem:[%s12969_s14 + $0x74] sm:$0xf]  ;;  %v6191_v56 = vld [vmem:[#allocation2 + $0xb0] sm:$0x1] }
 0x13a   : > { %v2866_v53 = vor.u32 %v2865_v27, %v2861_v8  ;;  %v5998_v12 = vshrl.u32 %v5770_v59, 16  ;;  %v1241_v2 = vshrl.u32 %v14168_v18, 16  ;;  %v1243_v52 = vshll.u32 %v14168_v18, 16 }
 0x13b   : > { %v2859_v9 = vsel %vm1071_vm15, %v2854_v16, %v2858_v57  ;;  %v3017_v26 = vsel %vm1344_vm14, %v3015_v41, %v3016_v0  ;;  %v1250_v38 = vrot.slane %v1248_v34, 1  ;;  %v6001_v42 = vshll.u32 %v5770_v59, 16  ;;  %12062 = vmatmul.mubr.msk.bf16.gmra.mxu0 %vm16965_vm4, %v14119_v25  ;;  %v6194_v16 = vld [vmem:[#allocation2 + $0xb4] sm:$0xf] }
 0x13c   : > { %2920 = vrot.lane.b32.xlu0 %v2859_v9, %s12895_s16  ;;  %v2871_v62 = vsel %vm1071_vm15, %v2866_v53, %v2870_v21  ;;  %v6000_v50 = vrot.slane %v5998_v12, 7  ;;  %v2098_v63 = vsel %vm16966_vm3, %v2066_v24, %v2034_v17  ;;  %v1245_v40 = vrot.slane %v1243_v52, 1  ;;  %v941_v21 = vld [vmem:[#allocation2 + $0xa8] sm:$0xe]  ;;  %v14195_v25 = vpop.permute.xlu1 %3026  ;;  %v1265_v24 = vpop.permute.xlu0 %1264  ;;  %v942_v41 = vld [vmem:[#allocation2 + $0xb4] sm:$0xe] }
 0x13d   : > { %2922 = vrot.lane.b32.xlu1 %v2871_v62, %s12895_s16  ;;  %v6006_v15 = vshrl.u32 %v5771_v37, 16  ;;  %v6009_v46 = vshll.u32 %v5771_v37, 16  ;;  %v14191_v60 = vcombine.low %v909_v20, %v14174_v23  ;;  %v1260_v1 = vshll.u32 %v14170_v47, 16  ;;  %12065 = vmatprep.mubr.msk.bf16.mxu0 %vm16965_vm4, %v2098_v63  ;;  %v2540_v63 = vld [vmem:[#allocation2 + $0xc0] sm:$0xf] }
 0x13e   : > { %v6003_v57 = vor.u32 %v6001_v42, %v6000_v50  ;;  %v6004_v8 = vrot.slane %v6000_v50, 4  ;;  %v1246_v22 = vor.u32 %v1245_v40, %v1241_v2  ;;  %v6015_v59 = vshrl.u32 %v5772_v49, 16  ;;  %v6198_v42 = vld [vmem:[#allocation2 + $0xbc] sm:$0x1]  ;;  %v14220_v40 = vld [vmem:[#allocation2 + $0xc4] sm:$0xf] }
 0x13f   : > { %v6008_v54 = vrot.slane %v6006_v15, 7  ;;  %v6018_v27 = vshll.u32 %v5772_v49, 16  ;;  %v1253_v30 = vshrl.u32 %v14191_v60, 16  ;;  %v1255_v0 = vshll.u32 %v14191_v60, 16  ;;  %v12523_v49 = vld [vmem:[%s16942_s2 + $0x10] sm:$0x1f]  }
 0x140   : > { %3048 = vrot.lane.b32.xlu0 %v3014_v39, %s12894_s15  ;;  %v6188_v58 = vsel %vm13133_vm12, %v6003_v57, %v6187_v13  ;;  %v1262_v37 = vrot.slane %v1260_v1, 1  ;;  %v1251_v20 = vsel %vm1071_vm15, %v1246_v22, %v1250_v38  ;;  %v6017_v12 = vrot.slane %v6015_v59, 7  ;;  %v12522_v39 = vld [vmem:[%s16942_s2] sm:$0x1f]   ;;  %v14214_v13 = vpop.permute.xlu1 %1270 }
 0x141   : > { %3050 = vrot.lane.b32.xlu1 %v3017_v26, %s12894_s15  ;;  %v6011_v53 = vor.u32 %v6009_v46, %v6008_v54  ;;  %v6013_v34 = vrot.slane %v6008_v54, 4  ;;  %6189 = vst [vmem:[#allocation2 + $0xa8] sm:$0xf] %v6188_v58  ;;  %v1257_v9 = vrot.slane %v1255_v0, 1  ;;  %v6023_v2 = vshrl.u32 %v5773_v61, 16 }
 0x142   : > { %v6026_v52 = vshll.u32 %v5773_v61, 16  ;;  %v14212_v26 = vsel %vm16967_vm0, %v13373_v51, %v1265_v24  ;;  %v6020_v38 = vor.u32 %v6018_v27, %v6017_v12  ;;  %v6021_v50 = vrot.slane %v6017_v12, 4  ;;  %v14222_v15 = vld [vmem:[#allocation2 + $0xc8] ss:$0 sps:$4 sm:$0x11]  }
 0x143   : > { %v6012_v62 = vsel %vm13127_vm8, %v6004_v8, %v6011_v53  ;;  %v6192_v17 = vsel %vm13138_vm13, %v6013_v34, %v6191_v56  ;;  %v1258_v51 = vor.u32 %v1257_v9, %v1253_v30  ;;  %v6025_v46 = vrot.slane %v6023_v2, 7  ;;  %v1394_v8 = vpop.permute.xlu0 %1393  ;;  %v5774_v56 = vld [vmem:[%s12969_s14 + $0x78] sm:$0xf]  ;;  %12066 = vmatmul.mubr.msk.bf16.gmra.mxu0 %vm16965_vm4, %v14162_v4  ;;  %v5775_v27 = vld [vmem:[%s12969_s14 + $0x7c] sm:$0xf] }
 0x144   : > { %6190 = vst.msk [vmem:[#allocation2 + $0xac] sm:$0xf] %vm761_vm9, %v6012_v62  ;;  %6193 = vst [vmem:[#allocation2 + $0xb0] sm:$0x1] %v6192_v17  ;;  %1292 = vrot.lane.b32.xlu0 %v1251_v20, %s12895_s16  ;;  %v1429_v61 = vsel %vm16967_vm0, %v13420_v31, %v14121_v35  ;;  %v11172_v57 = vcombine.low %v941_v21, %v14147_v55  ;;  %v6195_v1 = vsel %vm13133_vm12, %v6020_v38, %v6194_v16  ;;  %v2542_v21 = vld [vmem:[#allocation2 + $0xcc] sm:$0xf]  ;;  %v14244_v0 = vpop.permute.xlu1 %1399 }
 0x145   : > { %v1388_v22 = vrot.slane %v14153_v6, 1  ;;  %v11173_v54 = vcombine.low %v942_v41, %v14174_v23  ;;  %v1391_v59 = vrot.slane %v14170_v47, 1  ;;  %v1263_v58 = vsel %vm1071_vm15, %v1258_v51, %v1262_v37  ;;  %6196 = vst [vmem:[#allocation2 + $0xb4] sm:$0xf] %v6195_v1  ;;  %v14240_v30 = vld [vmem:[#allocation2 + $0xd0] sm:$0xf] }
 0x146   : > { %v6028_v31 = vor.u32 %v6026_v52, %v6025_v46  ;;  %v6030_v35 = vrot.slane %v6025_v46, 4  ;;  %v1387_v55 = vrot.slane %v11172_v57, 1  ;;  %v14242_v4 = vld [vmem:[#allocation2 + $0xd4] ss:$0 sps:$4 sm:$0x11]   ;;  %1294 = vrot.lane.b32.xlu1 %v1263_v58, %s12895_s16  ;;  %v2348_v23 = vand.u32 %v12522_v39, %v13816_v5 }
 0x147   : > { %v1390_v6 = vrot.slane %v11173_v54, 1  ;;  %v1462_v47 = vsel %vm16966_vm3, %v1429_v61, %v14155_v28  ;;  %v3161_v37 = vand.u32 %v12523_v49, %v13816_v5  ;;  %v14257_v20 = vcombine.low %v2540_v63, %v14220_v40  ;;  %v2897_v53 = vpop.permute.xlu0 %2896  ;;  %v2574_v62 = vld [vmem:[#allocation2 + $0xc0] sm:$0xe]  ;;  %v17057_v1 = vld [vmem:[#allocation9_spill] sm:$0xff]  ;;  %v2575_v54 = vld [vmem:[#allocation2 + $0xcc] sm:$0xe] }
 0x148   : > { %v6029_v16 = vsel %vm13127_vm8, %v6021_v50, %v6028_v31  ;;  %v6199_v24 = vsel %vm13138_vm13, %v6030_v35, %v6198_v42  ;;  %v1389_v41 = vsel %vm1344_vm14, %v1387_v55, %v1388_v22  ;;  %12069 = vmatprep.subr.bf16.mxu1 %v2348_v23  ;;  %v2880_v34 = vshll.u32 %v14222_v15, 16  ;;  %v14265_v17 = vpop.permute.xlu1 %2902  ;;  %v6205_v42 = vld [vmem:[#allocation2 + $0xc8] sm:$0x1]  ;;  %v6201_v46 = vld [vmem:[#allocation2 + $0xc0] sm:$0xf] }
 0x149   : > { %6197 = vst.msk [vmem:[#allocation2 + $0xb8] sm:$0xf] %vm761_vm9, %v6029_v16  ;;  %6200 = vst [vmem:[#allocation2 + $0xbc] sm:$0x1] %v6199_v24  ;;  %1421 = vrot.lane.b32.xlu0 %v1389_v41, %s12894_s15  ;;  %v1392_v28 = vsel %vm1344_vm14, %v1390_v6, %v1391_v59  ;;  %v6032_v12 = vshrl.u32 %v5774_v56, 16  ;;  %v6035_v39 = vshll.u32 %v5774_v56, 16  ;;  %12070 = vmatpush3.bf16.msra.mxu1 %v2348_v23 }
 0x14a   : > { %12103 = vmatprep.subr.bf16.mxu0 %v3161_v37  ;;  %v2873_v49 = vshrl.u32 %v14257_v20, 16  ;;  %v2875_v9 = vshll.u32 %v14257_v20, 16  ;;  %v6040_v2 = vshrl.u32 %v5775_v27, 16  ;;  %v6043_v52 = vshll.u32 %v5775_v27, 16  ;;  %1423 = vrot.lane.b32.xlu1 %v1392_v28, %s12894_s15 }
 0x14b   : > { %v2882_v38 = vrot.slane %v2880_v34, 1  ;;  %v6034_v50 = vrot.slane %v6032_v12, 7  ;;  %v1460_v63 = vsel %vm16966_vm3, %v14212_v26, %v1394_v8  ;;  %v14271_v51 = vcombine.low %v2542_v21, %v14240_v30  ;;  %12104 = vmatpush3.bf16.msra.mxu0 %v3161_v37  ;;  %v3025_v59 = vpop.permute.xlu0 %3024  ;;  %v17058_v37 = vld [vmem:[#allocation10_spill] sm:$0xff] }
 0x14c   : > { %v2877_v61 = vrot.slane %v2875_v9, 1  ;;  %v6042_v57 = vrot.slane %v6040_v2, 7  ;;  %12071 = vmatprep.mubr.msk.bf16.mxu1 %vm16965_vm4, %v1460_v63  ;;  %v2892_v56 = vshll.u32 %v14242_v4, 16  ;;  %v3057_v22 = vsel %vm16967_vm0, %v17057_v1, %v2897_v53  ;;  %v3031_v6 = vpop.permute.xlu1 %3030 }
 0x14d   : > { %v6037_v27 = vor.u32 %v6035_v39, %v6034_v50  ;;  %v6038_v58 = vrot.slane %v6034_v50, 4  ;;  %v2885_v26 = vshrl.u32 %v14271_v51, 16  ;;  %v2887_v8 = vshll.u32 %v14271_v51, 16  ;;  %12072 = vmatmul.mubr.msk.bf16.vlgmr.msra.gmra.mxu1 %vm16965_vm4, %v1462_v47 }
 0x14e   : > { %v2878_v31 = vor.u32 %v2877_v61, %v2873_v49  ;;  %v6045_v35 = vor.u32 %v6043_v52, %v6042_v57  ;;  %v6047_v55 = vrot.slane %v6042_v57, 4  ;;  %v2894_v21 = vrot.slane %v2892_v56, 1  ;;  %v17059_v52 = vld [vmem:[#allocation12_spill] sm:$0xff]  ;;  %v17062_v57 = vld [vmem:[#allocation13_spill] sm:$0xff] }
 0x14f   : > { %v2889_v23 = vrot.slane %v2887_v8, 1  ;;  %v3059_v16 = vsel %vm16967_vm0, %v17058_v37, %v14177_v45  ;;  %v11304_v24 = vcombine.low %v2574_v62, %v14220_v40  ;;  %v3019_v41 = vrot.slane %v14222_v15, 1  ;;  %v1269_v12 = vpop.permute.xlu0 %1268  ;;  %v17064_v8 = vld [vmem:[#allocation15_spill] sm:$0xff]  ;;  %v17065_v37 = vld [vmem:[#allocation18_spill] sm:$0xff] }
 0x150   : > { %v2883_v53 = vsel %vm1071_vm15, %v2878_v31, %v2882_v38  ;;  %v6046_v28 = vsel %vm13127_vm8, %v6038_v58, %v6045_v35  ;;  %v6206_v47 = vsel %vm13138_vm13, %v6047_v55, %v6205_v42  ;;  %v6202_v34 = vsel %vm13133_vm12, %v6037_v27, %v6201_v46  ;;  %v1275_v11 = vpop.permute.xlu1 %1274  ;;  %v17061_v46 = vld [vmem:[#allocation14_spill] sm:$0xff]  ;;  %v17063_v58 = vld [vmem:[#allocation16_spill] sm:$0xff] }
 0x151   : > { %6204 = vst.msk [vmem:[#allocation2 + $0xc4] sm:$0xf] %vm761_vm9, %v6046_v28  ;;  %6207 = vst [vmem:[#allocation2 + $0xc8] sm:$0x1] %v6206_v47  ;;  %2924 = vrot.lane.b32.xlu0 %v2883_v53, %s12895_s16  ;;  %v2890_v45 = vor.u32 %v2889_v23, %v2885_v26  ;;  %v3018_v40 = vrot.slane %v11304_v24, 1  ;;  %v11305_v15 = vcombine.low %v2575_v54, %v14240_v30  ;;  %v3022_v7 = vrot.slane %v14242_v4, 1 }
 0x152   : > { %6203 = vst [vmem:[#allocation2 + $0xc0] sm:$0xf] %v6202_v34  ;;  %v3089_v39 = vsel %vm16966_vm3, %v3057_v22, %v3025_v59  ;;  %v3091_v14 = vsel %vm16966_vm3, %v3059_v16, %v14195_v25  ;;  %v1433_v62 = vsel %vm16967_vm0, %v17059_v52, %v14214_v13  ;;  %v17060_v30 = vld [vmem:[#allocation11_spill] sm:$0xff]  ;;  %v3063_v61 = vsel %vm16967_vm0, %v17061_v46, %v14265_v17  ;;  %v17066_v24 = vld [vmem:[#allocation17_spill] sm:$0xff]  ;;  %v17069_v52 = vld [vmem:[#allocation22_spill] sm:$0xff] }
 0x153   : > { %v2895_v49 = vsel %vm1071_vm15, %v2890_v45, %v2894_v21  ;;  %v3020_v9 = vsel %vm1344_vm14, %v3018_v40, %v3019_v41  ;;  %v3021_v2 = vrot.slane %v11305_v15, 1  ;;  %12105 = vmatprep.mubr.msk.bf16.mxu0 %vm16965_vm4, %v3089_v39  ;;  %v1431_v4 = vsel %vm16967_vm0, %v17060_v30, %v1269_v12  ;;  %v1398_v25 = vpop.permute.xlu0 %1397  ;;  %v17067_v45 = vld [vmem:[#allocation20_spill] sm:$0xff]  ;;  %v17068_v15 = vld [vmem:[#allocation19_spill] sm:$0xff]  ;;  %v17070_v30 = vld [vmem:[#allocation21_spill] sm:$0xff] }
 0x154   : > { %2926 = vrot.lane.b32.xlu1 %v2895_v49, %s12895_s16  ;;  %12106 = vmatmul.mubr.msk.bf16.vlgmr.msra.gmra.mxu0 %vm16965_vm4, %v3091_v14  ;;  %v1466_v38 = vsel %vm16966_vm3, %v1433_v62, %v14244_v0  ;;  %v1464_v42 = vsel %vm16966_vm3, %v1431_v4, %v1398_v25  ;;  %v1404_v13 = vpop.permute.xlu1 %1403  ;;  %v3095_v1 = vsel %vm16966_vm3, %v3063_v61, %v3031_v6  ;;  %v17072_v61 = vld [vmem:[#allocation23_spill] sm:$0xff]  ;;  %vm17029_vm5 = vcmask 1040384  }
 0x155   : > { %3052 = vrot.lane.b32.xlu0 %v3020_v9, %s12894_s15  ;;  %v3023_v50 = vsel %vm1344_vm14, %v3021_v2, %v3022_v7  ;;  %12075 = vmatprep.mubr.msk.bf16.mxu1 %vm16965_vm4, %v1464_v42  ;;  %v1437_v26 = vsel %vm16967_vm0, %v17063_v58, %v1275_v11  ;;  %vm17028_vm7 = vcmask 1041408   ;;  %vm3655_vm8 = vsmask.f32 1280  ;;  %vm14490_vm9 = vmand %vm17029_vm5, %vm437_vm6 }
 0x156   : > { %12076 = vmatmul.mubr.msk.bf16.gmra.mxu1 %vm16965_vm4, %v1466_v38  ;;  %v1470_v35 = vsel %vm16966_vm3, %v1437_v26, %v1404_v13  ;;  %vm17027_vm11 = vcmask 1042432   ;;  %vm3699_vm12 = vsmask.f32 2304  ;;  %vm14495_vm13 = vmand %vm17028_vm7, %vm3655_vm8  ;;  %vm3743_vm2 = vsmask.f32 3328 }
 0x157   : > { %v2901_v63 = vpop.permute.xlu0 %2900  ;;  %vm14511_vm8 = vmand %vm17025_vm1, %vm3743_vm2  ;;  %vm3863_vm2 = vcmask 57344  }
 0x158   : > { %3054 = vrot.lane.b32.xlu1 %v3023_v50, %s12894_s15  ;;  %v3061_v0 = vsel %vm16967_vm0, %v17062_v57, %v2901_v63  ;;  %v17071_v63 = vld [vmem:[#allocation24_spill] sm:$0xff] }
 0x15b   : > { %v3029_v56 = vpop.permute.xlu0 %3028  ;;  %v2907_v22 = vpop.permute.xlu1 %2906 }
 0x15c   : > { %v3093_v54 = vsel %vm16966_vm3, %v3061_v0, %v3029_v56  ;;  %v3067_v16 = vsel %vm16967_vm0, %v17065_v37, %v2907_v22 }
 0x15d   : > { %12109 = vmatprep.mubr.msk.bf16.mxu0 %vm16965_vm4, %v3093_v54 }
 0x15e   : > { %12110 = vmatmul.mubr.msk.bf16.gmra.mxu0 %vm16965_vm4, %v3095_v1 }
 0x15f   : > { %v1273_v59 = vpop.permute.xlu0 %1272  ;;  %v3035_v27 = vpop.permute.xlu1 %3034 }
 0x160   : > { %v1435_v17 = vsel %vm16967_vm0, %v17064_v8, %v1273_v59  ;;  %v3099_v28 = vsel %vm16966_vm3, %v3067_v16, %v3035_v27 }
 0x163   : > { %v1402_v31 = vpop.permute.xlu0 %1401  ;;  %v1279_v55 = vpop.permute.xlu1 %1278 }
 0x164   : > { %v1468_v21 = vsel %vm16966_vm3, %v1435_v17, %v1402_v31  ;;  %v1441_v40 = vsel %vm16967_vm0, %v17067_v45, %v1279_v55 }
 0x165   : > { %12079 = vmatprep.mubr.msk.bf16.mxu1 %vm16965_vm4, %v1468_v21 }
 0x166   : > { %12080 = vmatmul.mubr.msk.bf16.gmra.mxu1 %vm16965_vm4, %v1470_v35 }
 0x167   : > { %v2905_v6 = vpop.permute.xlu0 %2904  ;;  %v1408_v23 = vpop.permute.xlu1 %1407 }
 0x168   : > { %v3065_v41 = vsel %vm16967_vm0, %v17066_v24, %v2905_v6  ;;  %v1474_v14 = vsel %vm16966_vm3, %v1441_v40, %v1408_v23 }
 0x16b   : > { %v3033_v53 = vpop.permute.xlu0 %3032 }
 0x16c   : > { %v3097_v47 = vsel %vm16966_vm3, %v3065_v41, %v3033_v53 }
 0x16d   : > { %12113 = vmatprep.mubr.msk.bf16.mxu0 %vm16965_vm4, %v3097_v47  ;;  %v2911_v34 = vpop.permute.xlu1 %2910 }
 0x16e   : > { %12114 = vmatmul.mubr.msk.bf16.gmra.mxu0 %vm16965_vm4, %v3099_v28  ;;  %v3071_v62 = vsel %vm16967_vm0, %v17069_v52, %v2911_v34 }
 0x16f   : > { %v1277_v12 = vpop.permute.xlu0 %1276 }
 0x170   : > { %v1439_v7 = vsel %vm16967_vm0, %v17068_v15, %v1277_v12 }
 0x171   : > { %v3039_v11 = vpop.permute.xlu1 %3038 }
 0x172   : > { %v3103_v38 = vsel %vm16966_vm3, %v3071_v62, %v3039_v11 }
 0x173   : > { %v1406_v39 = vpop.permute.xlu0 %1405 }
 0x174   : > { %v1472_v49 = vsel %vm16966_vm3, %v1439_v7, %v1406_v39 }
 0x175   : > { %12083 = vmatprep.mubr.msk.bf16.mxu1 %vm16965_vm4, %v1472_v49 }
 0x176   : > { %12084 = vmatmul.mubr.msk.bf16.gmra.mxu1 %vm16965_vm4, %v1474_v14 }
 0x177   : > { %v2909_v9 = vpop.permute.xlu0 %2908 }
 0x178   : > { %v1283_v2 = vpop.permute.xlu1 %1282  ;;  %v3069_v4 = vsel %vm16967_vm0, %v17070_v30, %v2909_v9 }
 0x179   : > { %v1445_v46 = vsel %vm16967_vm0, %v17071_v63, %v1283_v2 }
 0x17b   : > { %v3037_v25 = vpop.permute.xlu0 %3036 }
 0x17c   : > { %v3101_v50 = vsel %vm16966_vm3, %v3069_v4, %v3037_v25 }
 0x17d   : > { %12117 = vmatprep.mubr.msk.bf16.mxu0 %vm16965_vm4, %v3101_v50  ;;  %v1412_v13 = vpop.permute.xlu1 %1411  ;;  %v3918_v50 = vld [vmem:[#allocation3 + $0x4] sm:$0x1] }
 0x17e   : > { %12118 = vmatmul.mubr.msk.bf16.gmra.mxu0 %vm16965_vm4, %v3103_v38  ;;  %v1478_v56 = vsel %vm16966_vm3, %v1445_v46, %v1412_v13  ;;  %v3910_v38 = vld [vmem:[#allocation3] sm:$0xf] }
 0x17f   : > { %v1281_v42 = vpop.permute.xlu0 %1280 }
 0x180   : > { %v1443_v57 = vsel %vm16967_vm0, %v17072_v61, %v1281_v42  ;;  %v11334_v42 = vcombine.low %v3910_v38, %v3918_v50 }
 0x182   : > { %v3977_v63 = vshll.u32 %v11334_v42, 16  ;;  %v3975_v61 = vshrl.u32 %v11334_v42, 16 }
 0x183   : > { %v1410_v0 = vpop.permute.xlu0 %1409 }
 0x184   : > { %v1476_v1 = vsel %vm16966_vm3, %v1443_v57, %v1410_v0  ;;  %v3979_v57 = vrot.slane %v3977_v63, 1 }
 0x185   : > { %12087 = vmatprep.mubr.msk.bf16.mxu1 %vm16965_vm4, %v1476_v1  ;;  %v2915_v22 = vpop.permute.xlu1 %2914 }
 0x186   : > { %12088 = vmatmul.mubr.msk.bf16.gmra.mxu1 %vm16965_vm4, %v1478_v56  ;;  %v3075_v27 = vsel %vm16967_vm0, %v13904_v3, %v2915_v22  ;;  %v3980_v22 = vor.u32 %v3979_v57, %v3975_v61 }
 0x187   : > { %v2913_v54 = vpop.permute.xlu0 %2912 }
 0x188   : > { %v3073_v58 = vsel %vm16967_vm0, %v13901_v32, %v2913_v54  ;;  %v3926_v54 = vld [vmem:[#allocation3] sm:$0xe]  ;;  %4030 = vrot.lane.b32.xlu0 %v3980_v22, %s12897_s23 }
 0x189   : > { %v3043_v59 = vpop.permute.xlu1 %3042 }
 0x18a   : > { %v3107_v8 = vsel %vm16966_vm3, %v3075_v27, %v3043_v59 }
 0x18b   : > { %v3041_v26 = vpop.permute.xlu0 %3040 }
 0x18c   : > { %v3105_v17 = vsel %vm16966_vm3, %v3073_v58, %v3041_v26  ;;  %v11342_v26 = vcombine.low %v3926_v54, %v3918_v50 }
 0x18d   : > { %12121 = vmatprep.mubr.msk.bf16.mxu0 %vm16965_vm4, %v3105_v17 }
 0x18e   : > { %12122 = vmatmul.mubr.msk.bf16.gmra.mxu0 %vm16965_vm4, %v3107_v8  ;;  %v1287_v31 = vpop.permute.xlu1 %1286  ;;  %v4070_v17 = vrot.slane %v11342_v26, 1 }
 0x18f   : > { %v1285_v35 = vpop.permute.xlu0 %1284  ;;  %v1449_v3 = vsel %vm16967_vm0, %v13964_v36, %v1287_v31 }
 0x190   : > { %v1447_v55 = vsel %vm16967_vm0, %v13945_v33, %v1285_v35  ;;  %4078 = vrot.lane.b32.xlu0 %v4070_v17, %s12898_s24 }
 0x193   : > { %v1414_v21 = vpop.permute.xlu0 %1413  ;;  %v1416_v6 = vpop.permute.xlu1 %1415 }
 0x194   : > { %v1480_v32 = vsel %vm16966_vm3, %v1447_v55, %v1414_v21  ;;  %v1482_v23 = vsel %vm16966_vm3, %v1449_v3, %v1416_v6 }
 0x195   : > { %12091 = vmatprep.mubr.msk.bf16.mxu1 %vm16965_vm4, %v1480_v32 }
 0x196   : > { %12092 = vmatmul.mubr.msk.bf16.gmra.mxu1 %vm16965_vm4, %v1482_v23 }
 0x199   : > { %v2917_v37 = vpop.permute.xlu0 %2916 }
 0x19a   : > { %v2919_v16 = vpop.permute.xlu1 %2918  ;;  %v3077_v24 = vsel %vm16967_vm0, %v14018_v29, %v2917_v37 }
 0x19b   : > { %v3079_v33 = vsel %vm16967_vm0, %v14021_v43, %v2919_v16 }
 0x19d   : > { %v3045_v41 = vpop.permute.xlu0 %3044 }
 0x19e   : > { %v3109_v36 = vsel %vm16966_vm3, %v3077_v24, %v3045_v41  ;;  %v3047_v53 = vpop.permute.xlu1 %3046 }
 0x19f   : > { %v3111_v28 = vsel %vm16966_vm3, %v3079_v33, %v3047_v53  ;;  %12125 = vmatprep.mubr.msk.bf16.mxu0 %vm16965_vm4, %v3109_v36 }
 0x1a0   : > { %12126 = vmatmul.mubr.msk.bf16.gmra.mxu0 %vm16965_vm4, %v3111_v28 }
 0x1a1   : > { %v1289_v47 = vpop.permute.xlu0 %1288 }
 0x1a2   : > { %v1451_v12 = vsel %vm16967_vm0, %v14057_v10, %v1289_v47 }
 0x1a3   : > { %v1291_v34 = vpop.permute.xlu1 %1290 }
 0x1a4   : > { %v1453_v29 = vsel %vm16967_vm0, %v14074_v48, %v1291_v34 }
 0x1a6   : > { %v1418_v45 = vpop.permute.xlu0 %1417 }
 0x1a7   : > { %v1484_v43 = vsel %vm16966_vm3, %v1451_v12, %v1418_v45  ;;  %v1420_v40 = vpop.permute.xlu1 %1419 }
 0x1a8   : > { %v1486_v15 = vsel %vm16966_vm3, %v1453_v29, %v1420_v40  ;;  %12095 = vmatprep.mubr.msk.bf16.mxu1 %vm16965_vm4, %v1484_v43 }
 0x1a9   : > { %12096 = vmatmul.mubr.msk.bf16.gmra.mxu1 %vm16965_vm4, %v1486_v15 }
 0x1ae   : > { %v2921_v7 = vpop.permute.xlu0 %2920 }
 0x1af   : > { %v2923_v39 = vpop.permute.xlu1 %2922  ;;  %v3081_v14 = vsel %vm16967_vm0, %v14129_v19, %v2921_v7 }
 0x1b0   : > { %v3083_v10 = vsel %vm16967_vm0, %v14135_v44, %v2923_v39 }
 0x1b2   : > { %v3049_v11 = vpop.permute.xlu0 %3048 }
 0x1b3   : > { %v3113_v48 = vsel %vm16966_vm3, %v3081_v14, %v3049_v11  ;;  %v3051_v49 = vpop.permute.xlu1 %3050 }
 0x1b4   : > { %v3115_v9 = vsel %vm16966_vm3, %v3083_v10, %v3051_v49  ;;  %12129 = vmatprep.mubr.msk.bf16.mxu0 %vm16965_vm4, %v3113_v48 }
 0x1b5   : > { %12130 = vmatmul.mubr.msk.bf16.gmra.mxu0 %vm16965_vm4, %v3115_v9 }
 0x1b6   : > { %v1293_v2 = vpop.permute.xlu0 %1292 }
 0x1b7   : > { %v1455_v62 = vsel %vm16967_vm0, %v14168_v18, %v1293_v2 }
 0x1b8   : > { %v1295_v52 = vpop.permute.xlu1 %1294 }
 0x1b9   : > { %v1457_v44 = vsel %vm16967_vm0, %v14191_v60, %v1295_v52 }
 0x1bb   : > { %v1422_v30 = vpop.permute.xlu0 %1421 }
 0x1bc   : > { %v1488_v19 = vsel %vm16966_vm3, %v1455_v62, %v1422_v30  ;;  %v1424_v4 = vpop.permute.xlu1 %1423 }
 0x1bd   : > { %12099 = vmatprep.mubr.msk.bf16.mxu1 %vm16965_vm4, %v1488_v19  ;;  %v1490_v25 = vsel %vm16966_vm3, %v1457_v44, %v1424_v4 }
 0x1be   : > { %12100 = vmatmul.mubr.msk.bf16.gmra.mxu1 %vm16965_vm4, %v1490_v25  ;;  %v14477_v25 = vld [vmem:[%s16943_s3] ss:$0 sm:$0xff] }
 0x1c3   : > { %v2925_v13 = vpop.permute.xlu0 %2924 }
 0x1c4   : > { %v3085_v0 = vsel %vm16967_vm0, %v14257_v20, %v2925_v13 }
 0x1c5   : > { %v12039_v18 = vpop.f32.mrf.mxu0 }
 0x1c6   : > { %v2927_v46 = vpop.permute.xlu1 %2926 }
 0x1c7   : > { %v3053_v60 = vpop.permute.xlu0 %3052  ;;  %v2183_v1 = vpop.f32.mrf.mxu0  ;;  %v3087_v59 = vsel %vm16967_vm0, %v14271_v51, %v2927_v46  ;;  %vm14537_vm0 = vmand %vm3863_vm2, %vm437_vm6  ;;  %vm16969_vm6 = vcmask 64512   ;;  %vm5132_vm2 = vcmask 124928  }
 0x1c8   : > { %v3117_v56 = vsel %vm16966_vm3, %v3085_v0, %v3053_v60 }
 0x1c9   : > { %12133 = vmatprep.mubr.msk.bf16.mxu0 %vm16965_vm4, %v3117_v56  ;;  %v12040_v58 = vpop.f32.mrf.mxu0 }
 0x1ca   : > { %v3055_v27 = vpop.permute.xlu1 %3054 }
 0x1cb   : > { %v3119_v8 = vsel %vm16966_vm3, %v3087_v59, %v3055_v27  ;;  %v2186_v20 = vpop.f32.mrf.mxu0 }
 0x1cc   : > { %12134 = vmatmul.mubr.msk.bf16.gmra.mxu0 %vm16965_vm4, %v3119_v8  ;;  %vm14503_vm4 = vmand %vm17027_vm11, %vm3699_vm12  ;;  %vm3858_vm12 = vcmask 60416  }
 0x1cd   : > { %v12043_v31 = vpop.f32.mrf.mxu0  ;;  %vm14529_vm3 = vmand %vm3858_vm12, %vm762_vm10  ;;  %vm17034_vm10 = vcmask 130048   ;;  %vm16968_vm12 = vcmask 195584  }
 0x1cf   : > { %v2199_v35 = vpop.f32.mrf.mxu0 }
 0x1d1   : > { %v12044_v55 = vpop.f32.mrf.mxu0 }
 0x1d3   : > { %v14424_v3 = vpop.f32.mrf.mxu0 }
 0x1db   : > { %v14426_v51 = vpop.f32.mrf.mxu0 }
 0x1dd   : > { %v14428_v21 = vpop.f32.mrf.mxu0 }
 0x1df   : > { %v14430_v6 = vpop.f32.mrf.mxu0 }
 0x1e1   : > { %v14432_v32 = vpop.f32.mrf.mxu0 }
 0x1e3   : > { %v14434_v23 = vpop.f32.mrf.mxu0 }
 0x1e5   : > { %v14436_v37 = vpop.f32.mrf.mxu0 }
 0x1e7   : > { %v14438_v16 = vpop.f32.mrf.mxu0 }
 0x1e9   : > { %v14440_v24 = vpop.f32.mrf.mxu0 }
 0x1eb   : > { %v14442_v41 = vpop.f32.mrf.mxu0 }
 0x1ed   : > { %v14444_v33 = vpop.f32.mrf.mxu0 }
 0x1ef   : > { %v14446_v36 = vpop.f32.mrf.mxu0 }
 0x1f1   : > { %v14448_v53 = vpop.f32.mrf.mxu0 }
 0x1f3   : > { %v14450_v28 = vpop.f32.mrf.mxu0 }
 0x1f5   : > { %v14452_v47 = vpop.f32.mrf.mxu0 }
 0x1f7   : > { %v14454_v34 = vpop.f32.mrf.mxu0 }
 0x1f9   : > { %v14456_v12 = vpop.f32.mrf.mxu0 }
 0x1fb   : > { %v14458_v45 = vpop.f32.mrf.mxu0 }
 0x1fd   : > { %v14460_v29 = vpop.f32.mrf.mxu0 }
 0x1ff   : > { %v14462_v43 = vpop.f32.mrf.mxu0 }
 0x201   : > { %v14464_v40 = vpop.f32.mrf.mxu0 }
 0x203   : > { %v14466_v15 = vpop.f32.mrf.mxu0 }
 0x205   : > { %v14468_v7 = vpop.f32.mrf.mxu0 }
 0x207   : > { %v14470_v39 = vpop.f32.mrf.mxu0 }
 0x209   : > { %v14472_v10 = vpop.f32.mrf.mxu0 }
 0x20d   : > { %v12073_v14 = vpop.f32.mrf.mxu1 }
 0x20e   : > { %v2393_v9 = vadd.f32 %v12073_v14, %v12039_v18 }
 0x20f   : > { %v2384_v11 = vpop.f32.mrf.mxu1 }
 0x210   : > { %v2385_v2 = vadd.f32 %v2384_v11, %v2183_v1 }
 0x211   : > { %v12074_v48 = vpop.f32.mrf.mxu1 }
 0x212   : > { %v2396_v30 = vadd.f32 %v12074_v48, %v12040_v58 }
 0x213   : > { %v2387_v52 = vpop.f32.mrf.mxu1 }
 0x214   : > { %v12107_v49 = vpop.f32.mrf.mxu0  ;;  %v2388_v50 = vadd.f32 %v2387_v52, %v2186_v20 }
 0x215   : > { %v3326_v19 = vadd.f32 %v12107_v49, %v2393_v9 }
 0x216   : > { %v3197_v62 = vpop.f32.mrf.mxu0  ;;  %v12077_v4 = vpop.f32.mrf.mxu1 }
 0x217   : > { %v3324_v44 = vadd.f32 %v3197_v62, %v2385_v2  ;;  %v3365_v46 = vadd.f32 %v14477_v25, %v3326_v19  ;;  %v2409_v27 = vadd.f32 %v12077_v4, %v12043_v31 }
 0x218   : > { %v12108_v38 = vpop.f32.mrf.mxu0  ;;  %v2400_v13 = vpop.f32.mrf.mxu1 }
 0x219   : > { %v3327_v42 = vadd.f32 %v12108_v38, %v2396_v30  ;;  %v3363_v18 = vadd.f32 %v14477_v25, %v3324_v44  ;;  %v3397_v1 = vmax.f32 %v3365_v46, 0.0  ;;  %v2401_v58 = vadd.f32 %v2400_v13, %v2199_v35 }
 0x21a   : > { %v3200_v63 = vpop.f32.mrf.mxu0  ;;  %v12078_v56 = vpop.f32.mrf.mxu1 }
 0x21b   : > { %v3366_v61 = vadd.f32 %v14477_v25, %v3327_v42  ;;  %v3325_v57 = vadd.f32 %v3200_v63, %v2388_v50  ;;  %v3395_v22 = vmax.f32 %v3363_v18, 0.0  ;;  %v2412_v14 = vadd.f32 %v12078_v56, %v12044_v55 }
 0x21c   : > { %v2403_v20 = vpop.f32.mrf.mxu1 }
 0x21d   : > { %v3398_v0 = vmax.f32 %v3366_v61, 0.0  ;;  %v3364_v60 = vadd.f32 %v14477_v25, %v3325_v57  ;;  %v2404_v2 = vadd.f32 %v2403_v20, %v14424_v3  ;;  %v17073_v3 = vmov 0 }
 0x21e   : > { %v12111_v59 = vpop.f32.mrf.mxu0  ;;  %v17074_v3 = vsel %vm14490_vm9, 4294967295, %v17073_v3 }
 0x21f   : > { %v3396_v54 = vmax.f32 %v3364_v60, 0.0  ;;  %v3428_v26 = vpack.c.bf16 %v3398_v0, %v3397_v1  ;;  %v3330_v11 = vadd.f32 %v12111_v59, %v2409_v27  ;;  %17075 = vst [vmem:[#allocation9_spill] sm:$0xff] %v17074_v3  ;;  %v17076_v0 = vmov 0 }
 0x220   : > { %v3213_v17 = vpop.f32.mrf.mxu0  ;;  %v17077_v0 = vsel %vm14495_vm13, 4294967295, %v17076_v0  ;;  %v17079_v27 = vmov 0 }
 0x221   : > { %v3427_v8 = vpack.c.bf16 %v3396_v54, %v3395_v22  ;;  %v3328_v48 = vadd.f32 %v3213_v17, %v2401_v58  ;;  %v3369_v19 = vadd.f32 %v14477_v25, %v3330_v11  ;;  %17078 = vst [vmem:[#allocation10_spill] sm:$0xff] %v17077_v0  ;;  %v17080_v27 = vsel %vm14503_vm4, 4294967295, %v17079_v27  ;;  %v15249_v0 = vld [vmem:[#allocation2 + $0x34] sm:$0xf] }
 0x222   : > { %v12112_v9 = vpop.f32.mrf.mxu0  ;;  %17081 = vst [vmem:[#allocation12_spill] sm:$0xff] %v17080_v27  ;;  %v6257_v27 = vld [vmem:[#allocation2 + $0xc] sm:$0xe] }
 0x223   : > { %v3443_v49 = vmax.bf16 %v3428_v26, %v3427_v8  ;;  %v3331_v52 = vadd.f32 %v12112_v9, %v2412_v14  ;;  %v3367_v44 = vadd.f32 %v14477_v25, %v3328_v48  ;;  %v3401_v13 = vmax.f32 %v3369_v19, 0.0 }
 0x224   : > { %v3216_v30 = vpop.f32.mrf.mxu0  ;;  %v17082_v48 = vmov 0 }
 0x225   : > { %v3452_v62 = vshrl.u32 %v3443_v49, 16  ;;  %v3370_v31 = vadd.f32 %v14477_v25, %v3331_v52  ;;  %v3329_v35 = vadd.f32 %v3216_v30, %v2404_v2  ;;  %v3399_v63 = vmax.f32 %v3367_v44, 0.0 }
 0x226   : > { %v12081_v38 = vpop.f32.mrf.mxu1  ;;  %v17083_v48 = vsel %vm14511_vm8, 4294967295, %v17082_v48 }
 0x227   : > { %v3483_v4 = vmax.bf16 %v3452_v62, %v3443_v49  ;;  %v3402_v55 = vmax.f32 %v3370_v31, 0.0  ;;  %v3368_v50 = vadd.f32 %v14477_v25, %v3329_v35  ;;  %17084 = vst [vmem:[#allocation11_spill] sm:$0xff] %v17083_v48  ;;  %v2425_v9 = vadd.f32 %v12081_v38, %v14426_v51  ;;  %v15234_v48 = vld [vmem:[#allocation2 + $0x38] ss:$0 sps:$4 sm:$0x11]  }
 0x228   : > { %v2416_v18 = vpop.f32.mrf.mxu1 }
 0x229   : > { %v3492_v42 = vshll.u32 %v3483_v4, 16  ;;  %v3400_v46 = vmax.f32 %v3368_v50, 0.0  ;;  %v3539_v57 = vrot.slane %v3483_v4, 1  ;;  %v3430_v60 = vpack.c.bf16 %v3402_v55, %v3401_v13 }
 0x22a   : > { %v3563_v54 = vrot.slane %v3483_v4, 2  ;;  %v12082_v26 = vpop.f32.mrf.mxu1  ;;  %v3587_v14 = vrot.slane %v3483_v4, 3  ;;  %v2417_v62 = vadd.f32 %v2416_v18, %v14428_v21 }
 0x22b   : > { %v3494_v61 = vrot.slane %v3492_v42, 1  ;;  %v3429_v56 = vpack.c.bf16 %v3400_v46, %v3399_v63  ;;  %v3547_v1 = vrot.slane %v3492_v42, 2  ;;  %v3571_v8 = vrot.slane %v3492_v42, 3 }
 0x22c   : > { %v3595_v2 = vrot.slane %v3492_v42, 4  ;;  %v2419_v31 = vpop.f32.mrf.mxu1  ;;  %v2428_v55 = vadd.f32 %v12082_v26, %v14430_v6 }
 0x22d   : > { %v3613_v22 = vsel %vm14490_vm9, %v3483_v4, %v3494_v61  ;;  %v3444_v58 = vmax.bf16 %v3430_v60, %v3429_v56  ;;  %v2420_v42 = vadd.f32 %v2419_v31, %v14432_v32  ;;  %v3860_v32 = vld [vmem:[#allocation3 + $0x8] sm:$0xf] }
 0x22e   : > { %v3624_v59 = vsel %vm17029_vm5, %v3613_v22, %v3539_v57  ;;  %v12115_v17 = vpop.f32.mrf.mxu0 }
 0x22f   : > { %v3657_v20 = vsel %vm14495_vm13, %v3624_v59, %v3547_v1  ;;  %v3455_v49 = vshrl.u32 %v3444_v58, 16  ;;  %v3334_v35 = vadd.f32 %v12115_v17, %v2425_v9  ;;  %v17085_v59 = vmov 0  ;;  %v3865_v17 = vld [vmem:[#allocation3 + $0xc] sm:$0x1] }
 0x230   : > { %v3668_v11 = vsel %vm17028_vm7, %v3657_v20, %v3563_v54  ;;  %v3229_v30 = vpop.f32.mrf.mxu0  ;;  %v17086_v59 = vsel %vm14529_vm3, 4294967295, %v17085_v59  ;;  %v17088_v20 = vmov 0 }
 0x231   : > { %v3701_v52 = vsel %vm14503_vm4, %v3668_v11, %v3571_v8  ;;  %v3484_v44 = vmax.bf16 %v3455_v49, %v3444_v58  ;;  %v3332_v50 = vadd.f32 %v3229_v30, %v2417_v62  ;;  %v3373_v57 = vadd.f32 %v14477_v25, %v3334_v35  ;;  %17087 = vst [vmem:[#allocation14_spill] sm:$0xff] %v17086_v59  ;;  %v15226_v59 = vld [vmem:[#allocation2 + $0x28] sm:$0xf] }
 0x232   : > { %v3712_v19 = vsel %vm17027_vm11, %v3701_v52, %v3587_v14  ;;  %v12116_v13 = vpop.f32.mrf.mxu0  ;;  %v17089_v20 = vsel %vm14537_vm0, 4294967295, %v17088_v20 }
 0x233   : > { %v3745_v4 = vsel %vm14511_vm8, %v3712_v19, %v3595_v2  ;;  %v3496_v38 = vshll.u32 %v3484_v44, 16  ;;  %v3335_v21 = vadd.f32 %v12116_v13, %v2428_v55  ;;  %v3540_v61 = vrot.slane %v3484_v44, 1  ;;  %17090 = vst [vmem:[#allocation13_spill] sm:$0xff] %v17089_v20 }
 0x234   : > { %v11326_v51 = vcombine.low %v3745_v4, %v3745_v4  ;;  %v3232_v63 = vpop.f32.mrf.mxu0  ;;  %v3564_v56 = vrot.slane %v3484_v44, 2  ;;  %v3371_v1 = vadd.f32 %v14477_v25, %v3332_v50  ;;  %v3588_v11 = vrot.slane %v3484_v44, 3 }
 0x235   : > { %v3498_v18 = vrot.slane %v3496_v38, 1  ;;  %v3374_v6 = vadd.f32 %v14477_v25, %v3335_v21  ;;  %v3548_v58 = vrot.slane %v3496_v38, 2  ;;  %v3333_v8 = vadd.f32 %v3232_v63, %v2420_v42 }
 0x236   : > { %v3778_v46 = vshrl.u32 %v11326_v51, 16  ;;  %v3781_v60 = vshll.u32 %v11326_v51, 16  ;;  %v12085_v22 = vpop.f32.mrf.mxu1  ;;  %v3572_v14 = vrot.slane %v3496_v38, 3  ;;  %v3596_v19 = vrot.slane %v3496_v38, 4 }
 0x237   : > { %v3614_v26 = vsel %vm14490_vm9, %v3484_v44, %v3498_v18  ;;  %v3406_v9 = vmax.f32 %v3374_v6, 0.0  ;;  %v3372_v30 = vadd.f32 %v14477_v25, %v3333_v8  ;;  %v3405_v35 = vmax.f32 %v3373_v57, 0.0 }
 0x238   : > { %v3780_v54 = vrot.slane %v3778_v46, 7  ;;  %v3628_v49 = vsel %vm17029_vm5, %v3614_v26, %v3540_v61  ;;  %v3403_v4 = vmax.f32 %v3371_v1, 0.0  ;;  %v2432_v55 = vpop.f32.mrf.mxu1  ;;  %v2441_v46 = vadd.f32 %v12085_v22, %v14434_v23 }
 0x239   : > { %v3658_v62 = vsel %vm14495_vm13, %v3628_v49, %v3548_v58  ;;  %v3404_v51 = vmax.f32 %v3372_v30, 0.0  ;;  %v3432_v21 = vpack.c.bf16 %v3406_v9, %v3405_v35  ;;  %v2433_v6 = vadd.f32 %v2432_v55, %v14436_v37  ;;  %v3871_v9 = vld [vmem:[#allocation3 + $0x14] sm:$0x1] }
 0x23a   : > { %v3783_v2 = vor.u32 %v3781_v60, %v3780_v54  ;;  %v3784_v52 = vrot.slane %v3780_v54, 4  ;;  %v3672_v31 = vsel %vm17028_vm7, %v3658_v62, %v3564_v56  ;;  %v12086_v61 = vpop.f32.mrf.mxu1 }
 0x23b   : > { %v3702_v13 = vsel %vm14503_vm4, %v3672_v31, %v3572_v14  ;;  %v3431_v63 = vpack.c.bf16 %v3404_v51, %v3403_v4  ;;  %v2444_v58 = vadd.f32 %v12086_v61, %v14438_v16 }
 0x23c   : > { %v3861_v50 = vsel %vm14529_vm3, %v3783_v2, %v3860_v32  ;;  %v3866_v44 = vsel %vm14537_vm0, %v3784_v52, %v3865_v17  ;;  %v3716_v42 = vsel %vm17027_vm11, %v3702_v13, %v3588_v11  ;;  %v3868_v17 = vld [vmem:[#allocation3 + $0x10] sm:$0xf]  ;;  %v2435_v14 = vpop.f32.mrf.mxu1 }
 0x23d   : > { %3862 = vst [vmem:[#allocation3 + $0x8] sm:$0xf] %v3861_v50  ;;  %3867 = vst [vmem:[#allocation3 + $0xc] sm:$0x1] %v3866_v44  ;;  %v3746_v38 = vsel %vm14511_vm8, %v3716_v42, %v3596_v19  ;;  %v3445_v60 = vmax.bf16 %v3432_v21, %v3431_v63  ;;  %v2436_v16 = vadd.f32 %v2435_v14, %v14440_v24 }
 0x23e   : > { %v11327_v18 = vcombine.low %v3746_v38, %v3746_v38  ;;  %v12119_v57 = vpop.f32.mrf.mxu0 }
 0x23f   : > { %v3338_v56 = vadd.f32 %v12119_v57, %v2441_v46  ;;  %v3458_v32 = vshrl.u32 %v3445_v60, 16 }
 0x240   : > { %v3786_v1 = vshrl.u32 %v11327_v18, 16  ;;  %v3245_v54 = vpop.f32.mrf.mxu0  ;;  %v3789_v8 = vshll.u32 %v11327_v18, 16 }
 0x241   : > { %v3336_v11 = vadd.f32 %v3245_v54, %v2433_v6  ;;  %v3485_v23 = vmax.bf16 %v3458_v32, %v3445_v60  ;;  %v3377_v22 = vadd.f32 %v14477_v25, %v3338_v56 }
 0x242   : > { %v3788_v26 = vrot.slane %v3786_v1, 7  ;;  %v12120_v49 = vpop.f32.mrf.mxu0 }
 0x243   : > { %v3339_v2 = vadd.f32 %v12120_v49, %v2444_v58  ;;  %v3500_v35 = vshll.u32 %v3485_v23, 16  ;;  %v3375_v13 = vadd.f32 %v14477_v25, %v3336_v11  ;;  %v3541_v46 = vrot.slane %v3485_v23, 1 }
 0x244   : > { %v4147_v52 = vld [vmem:[#allocation3 + $0xc] sm:$0x1]  ;;  %v4155_v62 = vld [vmem:[#allocation3 + $0x8] sm:$0xe]  ;;  %v3791_v30 = vor.u32 %v3789_v8, %v3788_v26  ;;  %v3792_v19 = vrot.slane %v3788_v26, 4  ;;  %v3248_v42 = vpop.f32.mrf.mxu0  ;;  %v3565_v24 = vrot.slane %v3485_v23, 2 }
 0x245   : > { %v11358_v37 = vcombine.low %v4155_v62, %v4147_v52  ;;  %v3919_v31 = vld [vmem:[#allocation3 + $0xc] sm:$0x1]  ;;  %v3927_v4 = vld [vmem:[#allocation3 + $0x8] sm:$0xe]  ;;  %v3378_v51 = vadd.f32 %v14477_v25, %v3339_v2  ;;  %v3502_v63 = vrot.slane %v3500_v35, 1  ;;  %v3409_v18 = vmax.f32 %v3377_v22, 0.0 }
 0x246   : > { %v3911_v55 = vld [vmem:[#allocation3 + $0x8] sm:$0xf]  ;;  %v3869_v50 = vsel %vm14529_vm3, %v3791_v30, %v3868_v17  ;;  %v3872_v44 = vsel %vm14537_vm0, %v3792_v19, %v3871_v9  ;;  %v12089_v38 = vpop.f32.mrf.mxu1  ;;  %v3589_v61 = vrot.slane %v3485_v23, 3  ;;  %v11343_v60 = vcombine.low %v3927_v4, %v3919_v31 }
 0x247   : > { %v4139_v21 = vld [vmem:[#allocation3 + $0x8] sm:$0xf]  ;;  %3870 = vst [vmem:[#allocation3 + $0x10] sm:$0xf] %v3869_v50  ;;  %3873 = vst [vmem:[#allocation3 + $0x14] sm:$0x1] %v3872_v44  ;;  %v11335_v56 = vcombine.low %v3911_v55, %v3919_v31  ;;  %v3615_v54 = vsel %vm14490_vm9, %v3485_v23, %v3502_v63  ;;  %v3337_v32 = vadd.f32 %v3248_v42, %v2436_v16 }
 0x248   : > { %v4299_v57 = vrot.slane %v11358_v37, 1  ;;  %v2448_v1 = vpop.f32.mrf.mxu1  ;;  %v3549_v6 = vrot.slane %v3500_v35, 2  ;;  %v11350_v58 = vcombine.low %v4139_v21, %v4147_v52  ;;  %v3632_v26 = vsel %vm17029_vm5, %v3615_v54, %v3541_v46 }
 0x249   : > { %v3407_v8 = vmax.f32 %v3375_v13, 0.0  ;;  %v3410_v17 = vmax.f32 %v3378_v51, 0.0  ;;  %v4071_v14 = vrot.slane %v11343_v60, 1  ;;  %v3573_v11 = vrot.slane %v3500_v35, 3 }
 0x24a   : > { %4307 = vrot.lane.b32.xlu0 %v4299_v57, %s12898_s24  ;;  %v3659_v49 = vsel %vm14495_vm13, %v3632_v26, %v3549_v6  ;;  %v3376_v9 = vadd.f32 %v14477_v25, %v3337_v32  ;;  %v4206_v22 = vshll.u32 %v11350_v58, 16  ;;  %v3597_v2 = vrot.slane %v3500_v35, 4  ;;  %v12090_v30 = vpop.f32.mrf.mxu1 }
 0x24b   : > { %v3676_v62 = vsel %vm17028_vm7, %v3659_v49, %v3565_v24  ;;  %4080 = vrot.lane.b32.xlu1 %v4071_v14, %s12898_s24  ;;  %v2457_v23 = vadd.f32 %v12089_v38, %v14442_v41  ;;  %v3984_v52 = vshll.u32 %v11335_v56, 16  ;;  %v4204_v31 = vshrl.u32 %v11350_v58, 16 }
 0x24c   : > { %v3703_v19 = vsel %vm14503_vm4, %v3676_v62, %v3573_v11  ;;  %v3408_v37 = vmax.f32 %v3376_v9, 0.0  ;;  %v4208_v16 = vrot.slane %v4206_v22, 1  ;;  %v3434_v55 = vpack.c.bf16 %v3410_v17, %v3409_v18 }
 0x24d   : > { %v3720_v4 = vsel %vm17027_vm11, %v3703_v19, %v3589_v61  ;;  %v3982_v50 = vshrl.u32 %v11335_v56, 16  ;;  %v3986_v44 = vrot.slane %v3984_v52, 1  ;;  %v2449_v21 = vadd.f32 %v2448_v1, %v14444_v33  ;;  %v2451_v61 = vpop.f32.mrf.mxu1 }
 0x24e   : > { %v12123_v35 = vpop.f32.mrf.mxu0  ;;  %v4148_v13 = vld [vmem:[#allocation3 + $0x14] sm:$0x1]  ;;  %v4156_v51 = vld [vmem:[#allocation3 + $0x10] sm:$0xe]  ;;  %v3747_v42 = vsel %vm14511_vm8, %v3720_v4, %v3597_v2  ;;  %v3433_v41 = vpack.c.bf16 %v3408_v37, %v3407_v8  ;;  %v4209_v38 = vor.u32 %v4208_v16, %v4204_v31  ;;  %v2460_v32 = vadd.f32 %v12090_v30, %v14446_v36  ;;  %v3874_v36 = vld [vmem:[#allocation3 + $0x18] sm:$0xf] }
 0x24f   : > { %v3920_v63 = vld [vmem:[#allocation3 + $0x14] sm:$0x1]  ;;  %v3928_v46 = vld [vmem:[#allocation3 + $0x10] sm:$0xe]  ;;  %v11328_v57 = vcombine.low %v3747_v42, %v3747_v42  ;;  %v3987_v60 = vor.u32 %v3986_v44, %v3982_v50  ;;  %v11359_v56 = vcombine.low %v4156_v51, %v4148_v13  ;;  %v3342_v58 = vadd.f32 %v12123_v35, %v2457_v23  ;;  %v3877_v23 = vld [vmem:[#allocation3 + $0x1c] sm:$0x1] }
 0x250   : > { %v14582_v24 = vld [vmem:[#allocation3 + $0x10] sm:$0xf]  ;;  %v3261_v18 = vpop.f32.mrf.mxu0  ;;  %v11344_v6 = vcombine.low %v3928_v46, %v3920_v63  ;;  %v3446_v54 = vmax.bf16 %v3434_v55, %v3433_v41  ;;  %4259 = vrot.lane.b32.xlu0 %v4209_v38, %s12897_s23  ;;  %v2452_v49 = vadd.f32 %v2451_v61, %v14448_v53 }
 0x251   : > { %v11351_v26 = vcombine.low %v14582_v24, %v4148_v13  ;;  %v3794_v8 = vshrl.u32 %v11328_v57, 16  ;;  %4032 = vrot.lane.b32.xlu1 %v3987_v60, %s12897_s23  ;;  %v3340_v33 = vadd.f32 %v3261_v18, %v2449_v21  ;;  %v4300_v17 = vrot.slane %v11359_v56, 1  ;;  %v3912_v19 = vld [vmem:[#allocation3 + $0x10] sm:$0xf] }
 0x252   : > { %v12124_v1 = vpop.f32.mrf.mxu0  ;;  %v4072_v14 = vrot.slane %v11344_v6, 1  ;;  %v3461_v11 = vshrl.u32 %v3446_v54, 16  ;;  %v3797_v2 = vshll.u32 %v11328_v57, 16  ;;  %v3381_v37 = vadd.f32 %v14477_v25, %v3342_v58 }
 0x253   : > { %v3343_v9 = vadd.f32 %v12124_v1, %v2460_v32  ;;  %v3796_v22 = vrot.slane %v3794_v8, 7  ;;  %v4213_v52 = vshll.u32 %v11351_v26, 16  ;;  %v3379_v53 = vadd.f32 %v14477_v25, %v3340_v33 }
 0x254   : > { %v3264_v62 = vpop.f32.mrf.mxu0  ;;  %v3486_v30 = vmax.bf16 %v3461_v11, %v3446_v54  ;;  %4082 = vrot.lane.b32.xlu0 %v4072_v14, %s12898_s24  ;;  %v4211_v13 = vshrl.u32 %v11351_v26, 16  ;;  %v11336_v51 = vcombine.low %v3912_v19, %v3920_v63  ;;  %v3413_v60 = vmax.f32 %v3381_v37, 0.0 }
 0x255   : > { %v3382_v31 = vadd.f32 %v14477_v25, %v3343_v9  ;;  %v3341_v16 = vadd.f32 %v3264_v62, %v2452_v49  ;;  %v3799_v4 = vor.u32 %v3797_v2, %v3796_v22  ;;  %v3800_v55 = vrot.slane %v3796_v22, 4  ;;  %4309 = vrot.lane.b32.xlu1 %v4300_v17, %s12898_s24 }
 0x256   : > { %v12093_v50 = vpop.f32.mrf.mxu1  ;;  %v4215_v44 = vrot.slane %v4213_v52, 1  ;;  %v3504_v35 = vshll.u32 %v3486_v30, 16  ;;  %v3542_v61 = vrot.slane %v3486_v30, 1  ;;  %v3411_v18 = vmax.f32 %v3379_v53, 0.0 }
 0x257   : > { %v3875_v42 = vsel %vm14529_vm3, %v3799_v4, %v3874_v36  ;;  %v3878_v41 = vsel %vm14537_vm0, %v3800_v55, %v3877_v23  ;;  %v3414_v38 = vmax.f32 %v3382_v31, 0.0  ;;  %v3380_v21 = vadd.f32 %v14477_v25, %v3341_v16 }
 0x258   : > { %v2464_v46 = vpop.f32.mrf.mxu1  ;;  %3876 = vst [vmem:[#allocation3 + $0x18] sm:$0xf] %v3875_v42  ;;  %3879 = vst [vmem:[#allocation3 + $0x1c] sm:$0x1] %v3878_v41  ;;  %v3506_v57 = vrot.slane %v3504_v35, 1  ;;  %v4216_v6 = vor.u32 %v4215_v44, %v4211_v13  ;;  %v3550_v54 = vrot.slane %v3504_v35, 2  ;;  %v2473_v19 = vadd.f32 %v12093_v50, %v14450_v28 }
 0x259   : > { %v3412_v56 = vmax.f32 %v3380_v21, 0.0  ;;  %v3991_v32 = vshll.u32 %v11336_v51, 16  ;;  %v3566_v26 = vrot.slane %v3486_v30, 2  ;;  %v3436_v33 = vpack.c.bf16 %v3414_v38, %v3413_v60 }
 0x25a   : > { %v3616_v63 = vsel %vm14490_vm9, %v3486_v30, %v3506_v57  ;;  %v12094_v58 = vpop.f32.mrf.mxu1  ;;  %4261 = vrot.lane.b32.xlu1 %v4216_v6, %s12897_s23  ;;  %v3574_v17 = vrot.slane %v3504_v35, 3  ;;  %v3989_v11 = vshrl.u32 %v11336_v51, 16  ;;  %v3590_v9 = vrot.slane %v3486_v30, 3 }
 0x25b   : > { %v3636_v8 = vsel %vm17029_vm5, %v3616_v63, %v3542_v61  ;;  %v3435_v1 = vpack.c.bf16 %v3412_v56, %v3411_v18  ;;  %v3993_v49 = vrot.slane %v3991_v32, 1  ;;  %v3598_v62 = vrot.slane %v3504_v35, 4 }
 0x25c   : > { %v3660_v14 = vsel %vm14495_vm13, %v3636_v8, %v3550_v54  ;;  %v2467_v23 = vpop.f32.mrf.mxu1  ;;  %v2465_v53 = vadd.f32 %v2464_v46, %v14452_v47  ;;  %v2476_v41 = vadd.f32 %v12094_v58, %v14454_v34  ;;  %v3880_v8 = vld [vmem:[#allocation3 + $0x20] sm:$0xf] }
 0x25d   : > { %v3680_v22 = vsel %vm17028_vm7, %v3660_v14, %v3566_v26  ;;  %v3447_v2 = vmax.bf16 %v3436_v33, %v3435_v1  ;;  %v3994_v36 = vor.u32 %v3993_v49, %v3989_v11  ;;  %v2468_v38 = vadd.f32 %v2467_v23, %v14456_v12  ;;  %v3883_v11 = vld [vmem:[#allocation3 + $0x24] sm:$0x1]  ;;  %v14630_v23 = vld [vmem:[%s16944_s4 + $0x14] ss:$0 sps:$4 sm:$0xff]  }
 0x25e   : > { %v3704_v52 = vsel %vm14503_vm4, %v3680_v22, %v3574_v17  ;;  %12371 = vmatprep.subr.msk.bf16.mxu1 %vm17025_vm1, %v14630_v23 }
 0x25f   : > { %v3724_v37 = vsel %vm17027_vm11, %v3704_v52, %v3590_v9  ;;  %v3464_v31 = vshrl.u32 %v3447_v2, 16  ;;  %v4149_v4 = vld [vmem:[#allocation3 + $0x1c] sm:$0x1]  ;;  %v4157_v55 = vld [vmem:[#allocation3 + $0x18] sm:$0xe]  ;;  %4034 = vrot.lane.b32.xlu0 %v3994_v36, %s12897_s23 }
 0x260   : > { %v12127_v16 = vpop.f32.mrf.mxu0  ;;  %v3748_v30 = vsel %vm14511_vm8, %v3724_v37, %v3598_v62  ;;  %v11360_v35 = vcombine.low %v4157_v55, %v4149_v4  ;;  %v3921_v13 = vld [vmem:[#allocation3 + $0x1c] sm:$0x1]  ;;  %v3929_v51 = vld [vmem:[#allocation3 + $0x18] sm:$0xe] }
 0x261   : > { %v3346_v44 = vadd.f32 %v12127_v16, %v2473_v19  ;;  %v14614_v28 = vld [vmem:[#allocation3 + $0x18] sm:$0xf]  ;;  %v11329_v50 = vcombine.low %v3748_v30, %v3748_v30  ;;  %v3487_v42 = vmax.bf16 %v3464_v31, %v3447_v2  ;;  %v11345_v47 = vcombine.low %v3929_v51, %v3921_v13 }
 0x262   : > { %v3277_v21 = vpop.f32.mrf.mxu0  ;;  %v14618_v57 = vld [vmem:[#allocation3 + $0x18] sm:$0xf]  ;;  %v4301_v18 = vrot.slane %v11360_v35, 1  ;;  %v11352_v54 = vcombine.low %v14614_v28, %v4149_v4 }
 0x263   : > { %v3385_v60 = vadd.f32 %v14477_v25, %v3346_v44  ;;  %v3344_v61 = vadd.f32 %v3277_v21, %v2465_v53  ;;  %v3802_v46 = vshrl.u32 %v11329_v50, 16  ;;  %v3508_v56 = vshll.u32 %v3487_v42, 16 }
 0x264   : > { %v12128_v6 = vpop.f32.mrf.mxu0  ;;  %v11337_v63 = vcombine.low %v14618_v57, %v3921_v13  ;;  %v3805_v32 = vshll.u32 %v11329_v50, 16  ;;  %v3543_v26 = vrot.slane %v3487_v42, 1  ;;  %v3567_v34 = vrot.slane %v3487_v42, 2  ;;  %4311 = vrot.lane.b32.xlu0 %v4301_v18, %s12898_s24 }
 0x265   : > { %v3591_v58 = vrot.slane %v3487_v42, 3  ;;  %v3804_v12 = vrot.slane %v3802_v46, 7  ;;  %v3510_v33 = vrot.slane %v3508_v56, 1  ;;  %v3417_v1 = vmax.f32 %v3385_v60, 0.0 }
 0x266   : > { %v3383_v17 = vadd.f32 %v14477_v25, %v3344_v61  ;;  %v3280_v14 = vpop.f32.mrf.mxu0  ;;  %v3551_v49 = vrot.slane %v3508_v56, 2  ;;  %v3575_v9 = vrot.slane %v3508_v56, 3  ;;  %v3347_v22 = vadd.f32 %v12128_v6, %v2476_v41 }
 0x267   : > { %v4073_v2 = vrot.slane %v11345_v47, 1  ;;  %v3807_v62 = vor.u32 %v3805_v32, %v3804_v12  ;;  %v3808_v52 = vrot.slane %v3804_v12, 4  ;;  %v3617_v19 = vsel %vm14490_vm9, %v3487_v42, %v3510_v33 }
 0x268   : > { %v3345_v36 = vadd.f32 %v3280_v14, %v2468_v38  ;;  %v3599_v37 = vrot.slane %v3508_v56, 4  ;;  %v3640_v31 = vsel %vm17029_vm5, %v3617_v19, %v3543_v26  ;;  %v3386_v16 = vadd.f32 %v14477_v25, %v3347_v22 }
 0x269   : > { %4084 = vrot.lane.b32.xlu1 %v4073_v2, %s12898_s24  ;;  %v12097_v4 = vpop.f32.mrf.mxu1  ;;  %v4220_v55 = vshll.u32 %v11352_v54, 16  ;;  %v3881_v30 = vsel %vm14529_vm3, %v3807_v62, %v3880_v8  ;;  %v3884_v53 = vsel %vm14537_vm0, %v3808_v52, %v3883_v11  ;;  %v3661_v44 = vsel %vm14495_vm13, %v3640_v31, %v3551_v49  ;;  %v3886_v2 = vld [vmem:[#allocation3 + $0x28] sm:$0xf]  ;;  %v3889_v62 = vld [vmem:[#allocation3 + $0x2c] sm:$0x1] }
 0x26a   : > { %v3384_v35 = vadd.f32 %v14477_v25, %v3345_v36  ;;  %3882 = vst [vmem:[#allocation3 + $0x20] sm:$0xf] %v3881_v30  ;;  %3885 = vst [vmem:[#allocation3 + $0x24] sm:$0x1] %v3884_v53  ;;  %v3684_v13 = vsel %vm17028_vm7, %v3661_v44, %v3567_v34  ;;  %v3418_v51 = vmax.f32 %v3386_v16, 0.0  ;;  %v4218_v50 = vshrl.u32 %v11352_v54, 16 }
 0x26b   : > { %v4222_v42 = vrot.slane %v4220_v55, 1  ;;  %v3705_v41 = vsel %vm14503_vm4, %v3684_v13, %v3575_v9  ;;  %v3415_v38 = vmax.f32 %v3383_v17, 0.0  ;;  %v3998_v60 = vshll.u32 %v11337_v63, 16  ;;  %v2480_v61 = vpop.f32.mrf.mxu1 }
 0x26c   : > { %v3416_v21 = vmax.f32 %v3384_v35, 0.0  ;;  %v3728_v18 = vsel %vm17027_vm11, %v3705_v41, %v3591_v58  ;;  %v3996_v46 = vshrl.u32 %v11337_v63, 16  ;;  %v3438_v6 = vpack.c.bf16 %v3418_v51, %v3417_v1 }
 0x26d   : > { %v4223_v47 = vor.u32 %v4222_v42, %v4218_v50  ;;  %v3749_v56 = vsel %vm14511_vm8, %v3728_v18, %v3599_v37  ;;  %v4000_v26 = vrot.slane %v3998_v60, 1  ;;  %v12098_v8 = vpop.f32.mrf.mxu1  ;;  %v2489_v49 = vadd.f32 %v12097_v4, %v14458_v45 }
 0x26e   : > { %v3437_v32 = vpack.c.bf16 %v3416_v21, %v3415_v38  ;;  %v11330_v34 = vcombine.low %v3749_v56, %v3749_v56  ;;  %v2481_v19 = vadd.f32 %v2480_v61, %v14460_v29  ;;  %v2492_v35 = vadd.f32 %v12098_v8, %v14462_v43 }
 0x26f   : > { %4263 = vrot.lane.b32.xlu0 %v4223_v47, %s12897_s23  ;;  %v4001_v12 = vor.u32 %v4000_v26, %v3996_v46  ;;  %v2483_v36 = vpop.f32.mrf.mxu1 }
 0x270   : > { %v3448_v54 = vmax.bf16 %v3438_v6, %v3437_v32  ;;  %v3810_v33 = vshrl.u32 %v11330_v34, 16  ;;  %v3813_v63 = vshll.u32 %v11330_v34, 16  ;;  %v2484_v51 = vadd.f32 %v2483_v36, %v14464_v40 }
 0x271   : > { %4036 = vrot.lane.b32.xlu1 %v4001_v12, %s12897_s23  ;;  %v4150_v14 = vld [vmem:[#allocation3 + $0x24] sm:$0x1]  ;;  %v4158_v58 = vld [vmem:[#allocation3 + $0x20] sm:$0xe] }
 0x272   : > { %v3467_v17 = vshrl.u32 %v3448_v54, 16  ;;  %v3812_v11 = vrot.slane %v3810_v33, 7  ;;  %v11361_v9 = vcombine.low %v4158_v58, %v4150_v14  ;;  %v3922_v1 = vld [vmem:[#allocation3 + $0x24] sm:$0x1]  ;;  %v3930_v22 = vld [vmem:[#allocation3 + $0x20] sm:$0xe] }
 0x273   : > { %v11346_v31 = vcombine.low %v3930_v22, %v3922_v1  ;;  %v14661_v50 = vld [vmem:[#allocation3 + $0x20] sm:$0xf] }
 0x274   : > { %v3488_v52 = vmax.bf16 %v3467_v17, %v3448_v54  ;;  %v3815_v16 = vor.u32 %v3813_v63, %v3812_v11  ;;  %v3816_v55 = vrot.slane %v3812_v11, 4  ;;  %v4302_v53 = vrot.slane %v11361_v9, 1  ;;  %v14663_v42 = vld [vmem:[#allocation3 + $0x20] sm:$0xf] }
 0x275   : > { %v12131_v37 = vpop.f32.mrf.mxu0  ;;  %v4074_v46 = vrot.slane %v11346_v31, 1  ;;  %v11353_v32 = vcombine.low %v14661_v50, %v4150_v14  ;;  %v11338_v26 = vcombine.low %v14663_v42, %v3922_v1 }
 0x276   : > { %v3350_v30 = vadd.f32 %v12131_v37, %v2489_v49  ;;  %v3512_v44 = vshll.u32 %v3488_v52, 16  ;;  %v3887_v45 = vsel %vm14529_vm3, %v3815_v16, %v3886_v2  ;;  %v3890_v4 = vsel %vm14537_vm0, %v3816_v55, %v3889_v62  ;;  %4313 = vrot.lane.b32.xlu1 %v4302_v53, %s12898_s24 }
 0x277   : > { %v3293_v13 = vpop.f32.mrf.mxu0  ;;  %3888 = vst [vmem:[#allocation3 + $0x28] sm:$0xf] %v3887_v45  ;;  %3891 = vst [vmem:[#allocation3 + $0x2c] sm:$0x1] %v3890_v4  ;;  %v3544_v43 = vrot.slane %v3488_v52, 1  ;;  %v3568_v38 = vrot.slane %v3488_v52, 2  ;;  %4086 = vrot.lane.b32.xlu0 %v4074_v46, %s12898_s24 }
 0x278   : > { %v3348_v29 = vadd.f32 %v3293_v13, %v2481_v19  ;;  %v3514_v41 = vrot.slane %v3512_v44, 1  ;;  %v3389_v21 = vadd.f32 %v14477_v25, %v3350_v30  ;;  %v3552_v61 = vrot.slane %v3512_v44, 2 }
 0x279   : > { %v12132_v60 = vpop.f32.mrf.mxu0  ;;  %v3592_v18 = vrot.slane %v3488_v52, 3  ;;  %v3576_v34 = vrot.slane %v3512_v44, 3  ;;  %v3600_v33 = vrot.slane %v3512_v44, 4  ;;  %v4227_v11 = vshll.u32 %v11353_v32, 16 }
 0x27a   : > { %v3351_v47 = vadd.f32 %v12132_v60, %v2492_v35  ;;  %v3618_v40 = vsel %vm14490_vm9, %v3488_v52, %v3514_v41  ;;  %v3387_v56 = vadd.f32 %v14477_v25, %v3348_v29  ;;  %v3421_v58 = vmax.f32 %v3389_v21, 0.0 }
 0x27b   : > { %v3296_v6 = vpop.f32.mrf.mxu0  ;;  %v3644_v54 = vsel %vm17029_vm5, %v3618_v40, %v3544_v43  ;;  %v4005_v9 = vshll.u32 %v11338_v26, 16  ;;  %v4225_v2 = vshrl.u32 %v11353_v32, 16  ;;  %v4229_v62 = vrot.slane %v4227_v11, 1 }
 0x27c   : > { %v3390_v12 = vadd.f32 %v14477_v25, %v3351_v47  ;;  %v3349_v8 = vadd.f32 %v3296_v6, %v2484_v51  ;;  %v3662_v17 = vsel %vm14495_vm13, %v3644_v54, %v3552_v61  ;;  %v3419_v22 = vmax.f32 %v3387_v56, 0.0  ;;  %v3895_v54 = vld [vmem:[#allocation3 + $0x34] sm:$0x1] }
 0x27d   : > { %v3688_v63 = vsel %vm17028_vm7, %v3662_v17, %v3568_v38  ;;  %v4003_v36 = vshrl.u32 %v11338_v26, 16  ;;  %v4230_v30 = vor.u32 %v4229_v62, %v4225_v2  ;;  %v4007_v53 = vrot.slane %v4005_v9, 1 }
 0x27e   : > { %v3422_v49 = vmax.f32 %v3390_v12, 0.0  ;;  %v3388_v14 = vadd.f32 %v14477_v25, %v3349_v8  ;;  %v3706_v1 = vsel %vm14503_vm4, %v3688_v63, %v3576_v34  ;;  %v4151_v37 = vld [vmem:[#allocation3 + $0x2c] sm:$0x1]  ;;  %v4159_v31 = vld [vmem:[#allocation3 + $0x28] sm:$0xe]  ;;  %v12101_v55 = vpop.f32.mrf.mxu1 }
 0x27f   : > { %v3732_v52 = vsel %vm17027_vm11, %v3706_v1, %v3592_v18  ;;  %v11362_v25 = vcombine.low %v4159_v31, %v4151_v37  ;;  %v3923_v44 = vld [vmem:[#allocation3 + $0x2c] sm:$0x1]  ;;  %v3931_v35 = vld [vmem:[#allocation3 + $0x28] sm:$0xe]  ;;  %4265 = vrot.lane.b32.xlu1 %v4230_v30, %s12897_s23  ;;  %v4008_v43 = vor.u32 %v4007_v53, %v4003_v36  ;;  %v3892_v34 = vld [vmem:[#allocation3 + $0x30] sm:$0xf] }
 0x280   : > { %v3420_v19 = vmax.f32 %v3388_v14, 0.0  ;;  %v3750_v16 = vsel %vm14511_vm8, %v3732_v52, %v3600_v33  ;;  %v3440_v45 = vpack.c.bf16 %v3422_v49, %v3421_v58  ;;  %v11347_v51 = vcombine.low %v3931_v35, %v3923_v44  ;;  %v14683_v29 = vld [vmem:[#allocation3 + $0x28] sm:$0xf]  ;;  %v2496_v18 = vpop.f32.mrf.mxu1  ;;  %v12578_v36 = vld [vmem:[%s16944_s4 + $0xc] sm:$0xff]  }
 0x281   : > { %v11331_v13 = vcombine.low %v3750_v16, %v3750_v16  ;;  %v14685_v41 = vld [vmem:[#allocation3 + $0x28] sm:$0xf]  ;;  %v11354_v38 = vcombine.low %v14683_v29, %v4151_v37  ;;  %4038 = vrot.lane.b32.xlu0 %v4008_v43, %s12897_s23  ;;  %v4303_v47 = vrot.slane %v11362_v25, 1  ;;  %v2505_v52 = vadd.f32 %v12101_v55, %v14466_v15 }
 0x282   : > { %v3439_v4 = vpack.c.bf16 %v3420_v19, %v3419_v22  ;;  %v11339_v21 = vcombine.low %v14685_v41, %v3923_v44  ;;  %v4075_v46 = vrot.slane %v11347_v51, 1  ;;  %v12102_v63 = vpop.f32.mrf.mxu1  ;;  %v2497_v31 = vadd.f32 %v2496_v18, %v14468_v7 }
 0x283   : > { %v3818_v60 = vshrl.u32 %v11331_v13, 16  ;;  %v4234_v40 = vshll.u32 %v11354_v38, 16  ;;  %v3821_v6 = vshll.u32 %v11331_v13, 16  ;;  %v4232_v12 = vshrl.u32 %v11354_v38, 16 }
 0x284   : > { %v3449_v61 = vmax.bf16 %v3440_v45, %v3439_v4  ;;  %v4012_v26 = vshll.u32 %v11339_v21, 16  ;;  %4088 = vrot.lane.b32.xlu1 %v4075_v46, %s12898_s24  ;;  %v4010_v14 = vshrl.u32 %v11339_v21, 16  ;;  %v2499_v16 = vpop.f32.mrf.mxu1  ;;  %v4410_v15 = vsel %vm17025_vm1, %v14630_v23, 0 }
 0x285   : > { %v3820_v56 = vrot.slane %v3818_v60, 7  ;;  %v4236_v8 = vrot.slane %v4234_v40, 1  ;;  %4315 = vrot.lane.b32.xlu0 %v4303_v47, %s12898_s24  ;;  %v2508_v13 = vadd.f32 %v12102_v63, %v14470_v39  ;;  %12138 = vmatpush3.bf16.msra.mxu1 %v4410_v15  ;;  %v2500_v51 = vadd.f32 %v2499_v16, %v14472_v10  ;;  %v12850_v39 = vld [vmem:[%s16943_s3] ss:$0 sm:$0xff] }
 0x286   : > { %v3470_v32 = vshrl.u32 %v3449_v61, 16  ;;  %v4014_v11 = vrot.slane %v4012_v26, 1  ;;  %12139 = vmatprep.subr.bf16.mxu1 %v12578_v36 }
 0x287   : > { %v3823_v33 = vor.u32 %v3821_v6, %v3820_v56  ;;  %v3824_v17 = vrot.slane %v3820_v56, 4  ;;  %v4237_v49 = vor.u32 %v4236_v8, %v4232_v12 }
 0x288   : > { %v3489_v58 = vmax.bf16 %v3470_v32, %v3449_v61  ;;  %v4015_v2 = vor.u32 %v4014_v11, %v4010_v14 }
 0x289   : > { %v3893_v9 = vsel %vm14529_vm3, %v3823_v33, %v3892_v34  ;;  %v3896_v1 = vsel %vm14537_vm0, %v3824_v17, %v3895_v54  ;;  %4267 = vrot.lane.b32.xlu0 %v4237_v49, %s12897_s23  ;;  %12140 = vmatpush3.bf16.msra.mxu1 %v12578_v36 }
 0x28a   : > { %v3516_v22 = vshll.u32 %v3489_v58, 16  ;;  %3894 = vst [vmem:[#allocation3 + $0x30] sm:$0xf] %v3893_v9  ;;  %3897 = vst [vmem:[#allocation3 + $0x34] sm:$0x1] %v3896_v1  ;;  %v3545_v37 = vrot.slane %v3489_v58, 1  ;;  %4040 = vrot.lane.b32.xlu1 %v4015_v2, %s12897_s23 }
 0x28b   : > { %v3569_v55 = vrot.slane %v3489_v58, 2  ;;  %v3593_v38 = vrot.slane %v3489_v58, 3 }
 0x28c   : > { %v3518_v62 = vrot.slane %v3516_v22, 1  ;;  %v12135_v19 = vpop.f32.mrf.mxu0  ;;  %v3553_v30 = vrot.slane %v3516_v22, 2  ;;  %v3577_v45 = vrot.slane %v3516_v22, 3  ;;  %v3601_v21 = vrot.slane %v3516_v22, 4 }
 0x28d   : > { %v3354_v25 = vadd.f32 %v12135_v19, %v2505_v52 }
 0x28e   : > { %v3619_v53 = vsel %vm14490_vm9, %v3489_v58, %v3518_v62  ;;  %v3309_v44 = vpop.f32.mrf.mxu0 }
 0x28f   : > { %v3648_v35 = vsel %vm17029_vm5, %v3619_v53, %v3545_v37  ;;  %v3352_v7 = vadd.f32 %v3309_v44, %v2497_v31  ;;  %v3393_v18 = vadd.f32 %v12850_v39, %v3354_v25  ;;  %v3901_v53 = vld [vmem:[#allocation3 + $0x3c] sm:$0x1] }
 0x290   : > { %v3663_v4 = vsel %vm14495_vm13, %v3648_v35, %v3553_v30  ;;  %v12136_v43 = vpop.f32.mrf.mxu0  ;;  %v3898_v30 = vld [vmem:[#allocation3 + $0x38] sm:$0xf] }
 0x291   : > { %v3692_v60 = vsel %vm17028_vm7, %v3663_v4, %v3569_v55  ;;  %v3355_v23 = vadd.f32 %v12136_v43, %v2508_v13  ;;  %v4152_v46 = vld [vmem:[#allocation3 + $0x34] sm:$0x1]  ;;  %v4160_v40 = vld [vmem:[#allocation3 + $0x30] sm:$0xe]  ;;  %v3391_v6 = vadd.f32 %v12850_v39, %v3352_v7  ;;  %v3425_v1 = vmax.f32 %v3393_v18, 0.0 }
 0x292   : > { %v3707_v61 = vsel %vm14503_vm4, %v3692_v60, %v3577_v45  ;;  %v3312_v47 = vpop.f32.mrf.mxu0  ;;  %v14719_v56 = vld [vmem:[#allocation3 + $0x30] sm:$0xf]  ;;  %v14724_v54 = vld [vmem:[#allocation3 + $0x34] sm:$0x1]  ;;  %v11363_v8 = vcombine.low %v4160_v40, %v4152_v46 }
 0x293   : > { %v3736_v10 = vsel %vm17027_vm11, %v3707_v61, %v3593_v38  ;;  %v3394_v32 = vadd.f32 %v12850_v39, %v3355_v23  ;;  %v3353_v26 = vadd.f32 %v3312_v47, %v2500_v51  ;;  %v14722_v34 = vld [vmem:[#allocation3 + $0x30] sm:$0xf]  ;;  %v11355_v33 = vcombine.low %v14719_v56, %v4152_v46 }
 0x294   : > { %v3751_v12 = vsel %vm14511_vm8, %v3736_v10, %v3601_v21  ;;  %v11340_v17 = vcombine.low %v14722_v34, %v14724_v54  ;;  %v4304_v49 = vrot.slane %v11363_v8, 1  ;;  %v3423_v22 = vmax.f32 %v3391_v6, 0.0  ;;  %v14738_v61 = vld [vmem:[#allocation3 + $0x10] sm:$0xf] }
 0x295   : > { %v11332_v58 = vcombine.low %v3751_v12, %v3751_v12  ;;  %v3426_v11 = vmax.f32 %v3394_v32, 0.0  ;;  %v3392_v63 = vadd.f32 %v12850_v39, %v3353_v26  ;;  %v4241_v14 = vshll.u32 %v11355_v33, 16  ;;  %v14740_v39 = vld [vmem:[#allocation3 + $0x14] sm:$0x1] }
 0x296   : > { %4317 = vrot.lane.b32.xlu1 %v4304_v49, %s12898_s24  ;;  %v4239_v62 = vshrl.u32 %v11355_v33, 16  ;;  %v4019_v19 = vshll.u32 %v11340_v17, 16  ;;  %v4017_v44 = vshrl.u32 %v11340_v17, 16 }
 0x297   : > { %v3826_v9 = vshrl.u32 %v11332_v58, 16  ;;  %v3424_v2 = vmax.f32 %v3392_v63, 0.0  ;;  %v4243_v52 = vrot.slane %v4241_v14, 1  ;;  %v3829_v37 = vshll.u32 %v11332_v58, 16  ;;  %v14758_v63 = vld [vmem:[#allocation3 + $0x20] sm:$0xf] }
 0x298   : > { %v3442_v31 = vpack.c.bf16 %v3426_v11, %v3425_v1  ;;  %v4021_v15 = vrot.slane %v4019_v19, 1  ;;  %v11389_v11 = vcombine.low %v14738_v61, %v14740_v39  ;;  %v3932_v19 = vld [vmem:[#allocation3 + $0x30] sm:$0xe] }
 0x299   : > { %v3828_v36 = vrot.slane %v3826_v9, 7  ;;  %v3441_v16 = vpack.c.bf16 %v3424_v2, %v3423_v22  ;;  %v4244_v25 = vor.u32 %v4243_v52, %v4239_v62  ;;  %v14761_v22 = vld [vmem:[#allocation3 + $0x24] sm:$0x1] }
 0x29a   : > { %v4022_v7 = vor.u32 %v4021_v15, %v4017_v44  ;;  %v4654_v44 = vshll.u32 %v11389_v11, 16 }
 0x29b   : > { %v3831_v55 = vor.u32 %v3829_v37, %v3828_v36  ;;  %v3832_v35 = vrot.slane %v3828_v36, 4  ;;  %v3450_v13 = vmax.bf16 %v3442_v31, %v3441_v16  ;;  %4269 = vrot.lane.b32.xlu1 %v4244_v25, %s12897_s23  ;;  %v14768_v36 = vld [vmem:[%s16944_s4 + $0x8] ss:$0 sps:$4 sm:$0xff]  }
 0x29c   : > { %4042 = vrot.lane.b32.xlu0 %v4022_v7, %s12897_s23  ;;  %12372 = vmatprep.subr.msk.bf16.mxu1 %vm17025_vm1, %v14768_v36 }
 0x29d   : > { %v3899_v45 = vsel %vm14529_vm3, %v3831_v55, %v3898_v30  ;;  %v3902_v4 = vsel %vm14537_vm0, %v3832_v35, %v3901_v53  ;;  %v3473_v51 = vshrl.u32 %v3450_v13, 16  ;;  %v11348_v35 = vcombine.low %v3932_v19, %v14724_v54  ;;  %v14796_v19 = vld [vmem:[#allocation3 + $0x1c] sm:$0x1] }
 0x29e   : > { %3900 = vst [vmem:[#allocation3 + $0x38] sm:$0xf] %v3899_v45  ;;  %3903 = vst [vmem:[#allocation3 + $0x3c] sm:$0x1] %v3902_v4  ;;  %v4656_v4 = vrot.slane %v4654_v44, 1  ;;  %v4652_v54 = vshrl.u32 %v11389_v11, 16 }
 0x29f   : > { %v3490_v43 = vmax.bf16 %v3473_v51, %v3450_v13  ;;  %v11391_v13 = vcombine.low %v14758_v63, %v14761_v22 }
 0x2a1   : > { %v3520_v38 = vshll.u32 %v3490_v43, 16  ;;  %v3546_v60 = vrot.slane %v3490_v43, 1  ;;  %v3570_v10 = vrot.slane %v3490_v43, 2  ;;  %v3594_v49 = vrot.slane %v3490_v43, 3 }
 0x2a3   : > { %v3522_v21 = vrot.slane %v3520_v38, 1  ;;  %v3554_v23 = vrot.slane %v3520_v38, 2  ;;  %v3578_v33 = vrot.slane %v3520_v38, 3  ;;  %v3602_v2 = vrot.slane %v3520_v38, 4 }
 0x2a4   : > { %v4076_v38 = vrot.slane %v11348_v35, 1 }
 0x2a5   : > { %v3620_v18 = vsel %vm14490_vm9, %v3490_v43, %v3522_v21  ;;  %v4153_v47 = vld [vmem:[#allocation3 + $0x3c] sm:$0x1]  ;;  %v4161_v46 = vld [vmem:[#allocation3 + $0x38] sm:$0xe]  ;;  %v4668_v21 = vshll.u32 %v11391_v13, 16 }
 0x2a6   : > { %v14744_v40 = vld [vmem:[#allocation3 + $0x38] sm:$0xf]  ;;  %v3652_v6 = vsel %vm17029_vm5, %v3620_v18, %v3546_v60  ;;  %v11364_v32 = vcombine.low %v4161_v46, %v4153_v47  ;;  %v14750_v8 = vld [vmem:[#allocation3 + $0x3c] sm:$0x1]  ;;  %v3904_v60 = vld [vmem:[#allocation3 + $0x40] sm:$0xf] }
 0x2a7   : > { %v11356_v26 = vcombine.low %v14744_v40, %v4153_v47  ;;  %v14748_v12 = vld [vmem:[#allocation3 + $0x38] sm:$0xf]  ;;  %v3664_v17 = vsel %vm14495_vm13, %v3652_v6, %v3554_v23  ;;  %v3907_v23 = vld [vmem:[#allocation3 + $0x44] sm:$0x1]  ;;  %v4603_v46 = vld [vmem:[#allocation3 + $0x10] sm:$0xe] }
 0x2a8   : > { %v11341_v58 = vcombine.low %v14748_v12, %v14750_v8  ;;  %v3696_v14 = vsel %vm17028_vm7, %v3664_v17, %v3570_v10  ;;  %v4305_v9 = vrot.slane %v11364_v32, 1  ;;  %v4657_v32 = vor.u32 %v4656_v4, %v4652_v54  ;;  %v4599_v17 = vld [vmem:[#allocation3 + $0x34] sm:$0x1]  ;;  %v3933_v4 = vld [vmem:[#allocation3 + $0x38] sm:$0xe] }
 0x2a9   : > { %v4248_v1 = vshll.u32 %v11356_v26, 16  ;;  %v3708_v62 = vsel %vm14503_vm4, %v3696_v14, %v3578_v33  ;;  %v4246_v31 = vshrl.u32 %v11356_v26, 16  ;;  %v4670_v26 = vrot.slane %v4668_v21, 1  ;;  %v14786_v33 = vld [vmem:[#allocation3 + $0x30] sm:$0xf] }
 0x2aa   : > { %v4026_v52 = vshll.u32 %v11341_v58, 16  ;;  %v3740_v37 = vsel %vm17027_vm11, %v3708_v62, %v3594_v49  ;;  %4319 = vrot.lane.b32.xlu0 %v4305_v9, %s12898_s24  ;;  %v4024_v53 = vshrl.u32 %v11341_v58, 16  ;;  %v4666_v58 = vshrl.u32 %v11391_v13, 16  ;;  %v14791_v9 = vpop.permute.xlu0 %4030 }
 0x2ab   : > { %v4250_v16 = vrot.slane %v4248_v1, 1  ;;  %v3752_v30 = vsel %vm14511_vm8, %v3740_v37, %v3602_v2  ;;  %v11397_v49 = vcombine.low %v4603_v46, %v14740_v39  ;;  %v11393_v11 = vcombine.low %v14786_v33, %v4599_v17  ;;  %v4605_v1 = vld [vmem:[#allocation3 + $0x20] sm:$0xe] }
 0x2ac   : > { %v4028_v25 = vrot.slane %v4026_v52, 1  ;;  %v11333_v15 = vcombine.low %v3752_v30, %v3752_v30  ;;  %v4671_v14 = vor.u32 %v4670_v26, %v4666_v58  ;;  %v14794_v52 = vld [vmem:[#allocation3 + $0x18] sm:$0xf]  ;;  %v11399_v39 = vcombine.low %v4605_v1, %v14761_v22 }
 0x2ad   : > { %v4251_v55 = vor.u32 %v4250_v16, %v4246_v31  ;;  %v4747_v2 = vrot.slane %v11397_v49, 1  ;;  %v4682_v62 = vshll.u32 %v11393_v11, 16  ;;  %v11349_v54 = vcombine.low %v3933_v4, %v14750_v8  ;;  %v14831_v4 = vld [vmem:[#allocation3 + $0x38] sm:$0xf] }
 0x2ae   : > { %v4029_v7 = vor.u32 %v4028_v25, %v4024_v53  ;;  %v3834_v45 = vshrl.u32 %v11333_v15, 16  ;;  %v3837_v43 = vshll.u32 %v11333_v15, 16  ;;  %v14807_v15 = vpop.permute.xlu0 %4078  ;;  %v4749_v22 = vrot.slane %v11399_v39, 1 }
 0x2af   : > { %4271 = vrot.lane.b32.xlu0 %v4251_v55, %s12897_s23  ;;  %vm17158_vm11 = vcmask 23552   ;;  %vm17160_vm7 = vcmask 72704  }
 0x2b0   : > { %4044 = vrot.lane.b32.xlu1 %v4029_v7, %s12897_s23  ;;  %v3836_v51 = vrot.slane %v3834_v45, 7  ;;  %v11390_v7 = vcombine.low %v14794_v52, %v14796_v19  ;;  %v14813_v45 = vld [vmem:[#allocation3 + $0x28] sm:$0xf] }
 0x2b2   : > { %v3839_v18 = vor.u32 %v3837_v43, %v3836_v51  ;;  %v3840_v47 = vrot.slane %v3836_v51, 4  ;;  %v4684_v51 = vrot.slane %v4682_v62, 1  ;;  %v14815_v43 = vld [vmem:[#allocation3 + $0x2c] sm:$0x1]  ;;  %v4661_v46 = vshll.u32 %v11390_v7, 16 }
 0x2b3   : > { %4090 = vrot.lane.b32.xlu0 %v4076_v38, %s12898_s24  ;;  %v4659_v8 = vshrl.u32 %v11390_v7, 16  ;;  %v12851_v7 = vld [vmem:[#allocation3 + $0x8] sm:$0xf] }
 0x2b4   : > { %v3905_v10 = vsel %vm14529_vm3, %v3839_v18, %v3904_v60  ;;  %v3908_v6 = vsel %vm14537_vm0, %v3840_v47, %v3907_v23  ;;  %v4607_v23 = vld [vmem:[#allocation3 + $0x30] sm:$0xe]  ;;  %v4680_v18 = vshrl.u32 %v11393_v11, 16  ;;  %v4663_v1 = vrot.slane %v4661_v46, 1 }
 0x2b5   : > { %3906 = vst [vmem:[#allocation3 + $0x40] sm:$0xf] %v3905_v10  ;;  %3909 = vst [vmem:[#allocation3 + $0x44] sm:$0x1] %v3908_v6  ;;  %v11392_v10 = vcombine.low %v14813_v45, %v14815_v43 }
 0x2b6   : > { %v4685_v6 = vor.u32 %v4684_v51, %v4680_v18  ;;  %v4600_v51 = vld [vmem:[#allocation3 + $0x3c] sm:$0x1] }
 0x2b7   : > { %4707 = vrot.lane.b32.xlu0 %v4657_v32, %s12897_s23  ;;  %v11401_v32 = vcombine.low %v4607_v23, %v4599_v17  ;;  %v4675_v11 = vshll.u32 %v11392_v10, 16  ;;  %v4602_v23 = vld [vmem:[#allocation3 + $0x4c] sm:$0x1] }
 0x2bb   : > { %4711 = vrot.lane.b32.xlu0 %v4671_v14, %s12897_s23  ;;  %v4077_v14 = vrot.slane %v11349_v54, 1 }
 0x2bc   : > { %v4154_v37 = vld [vmem:[#allocation3 + $0x44] sm:$0x1]  ;;  %v4162_v31 = vld [vmem:[#allocation3 + $0x40] sm:$0xe]  ;;  %v4308_v58 = vpop.permute.xlu0 %4307 }
 0x2bd   : > { %v14798_v16 = vld [vmem:[#allocation3 + $0x40] sm:$0xf]  ;;  %v11365_v30 = vcombine.low %v4162_v31, %v4154_v37  ;;  %v14804_v44 = vld [vmem:[#allocation3 + $0x44] sm:$0x1]  ;;  %v14809_v35 = vpop.permute.xlu1 %4080 }
 0x2be   : > { %v11357_v53 = vcombine.low %v14798_v16, %v4154_v37  ;;  %v14802_v25 = vld [vmem:[#allocation3 + $0x40] sm:$0xf] }
 0x2bf   : > { %4755 = vrot.lane.b32.xlu0 %v4747_v2, %s12898_s24  ;;  %v4306_v55 = vrot.slane %v11365_v30, 1  ;;  %v11395_v38 = vcombine.low %v14802_v25, %v14804_v44  ;;  %v4751_v2 = vrot.slane %v11401_v32, 1  ;;  %v4609_v31 = vld [vmem:[#allocation3 + $0x40] sm:$0xe]  ;;  %v4664_v30 = vor.u32 %v4663_v1, %v4659_v8 }
 0x2c0   : > { %v4255_v13 = vshll.u32 %v11357_v53, 16  ;;  %v4253_v21 = vshrl.u32 %v11357_v53, 16  ;;  %v4677_v53 = vrot.slane %v4675_v11, 1 }
 0x2c1   : > { %4321 = vrot.lane.b32.xlu1 %v4306_v55, %s12898_s24  ;;  %v4696_v26 = vshll.u32 %v11395_v38, 16  ;;  %v4694_v17 = vshrl.u32 %v11395_v38, 16  ;;  %v14836_v38 = vld [vmem:[#allocation3 + $0x48] sm:$0xf] }
 0x2c2   : > { %v4257_v60 = vrot.slane %v4255_v13, 1  ;;  %v4260_v39 = vpop.permute.xlu0 %4259  ;;  %v4604_v13 = vld [vmem:[#allocation3 + $0x18] sm:$0xe] }
 0x2c3   : > { %4759 = vrot.lane.b32.xlu0 %v4749_v22, %s12898_s24  ;;  %v14825_v49 = vpop.permute.xlu1 %4032  ;;  %v4698_v62 = vrot.slane %v4696_v26, 1  ;;  %v11403_v22 = vcombine.low %v4609_v31, %v14804_v44  ;;  %v11394_v44 = vcombine.low %v14831_v4, %v4600_v51 }
 0x2c4   : > { %v4258_v47 = vor.u32 %v4257_v60, %v4253_v21  ;;  %v4673_v21 = vshrl.u32 %v11392_v10, 16  ;;  %v4325_v60 = vsel %vm16969_vm6, %v12851_v7, %v4260_v39  ;;  %v4606_v10 = vld [vmem:[#allocation3 + $0x28] sm:$0xe]  ;;  %v4608_v39 = vld [vmem:[#allocation3 + $0x38] sm:$0xe] }
 0x2c5   : > { %v4699_v55 = vor.u32 %v4698_v62, %v4694_v17  ;;  %v4348_v32 = vsel %vm17034_vm10, %v4325_v60, %v4308_v58  ;;  %v11400_v11 = vcombine.low %v4606_v10, %v14815_v43  ;;  %v4687_v8 = vshrl.u32 %v11394_v44, 16 }
 0x2c6   : > { %4273 = vrot.lane.b32.xlu1 %v4258_v47, %s12897_s23  ;;  %v4678_v18 = vor.u32 %v4677_v53, %v4673_v21  ;;  %v11398_v47 = vcombine.low %v4604_v13, %v14796_v19  ;;  %v4610_v53 = vld [vmem:[#allocation3 + $0x48] sm:$0xe]  ;;  %v11402_v43 = vcombine.low %v4608_v39, %v4600_v51 }
 0x2c7   : > { %4715 = vrot.lane.b32.xlu0 %v4685_v6, %s12897_s23  ;;  %v4310_v37 = vpop.permute.xlu1 %4309  ;;  %v4753_v6 = vrot.slane %v11403_v22, 1  ;;  %v4750_v58 = vrot.slane %v11400_v11, 1  ;;  %v11404_v13 = vcombine.low %v4610_v53, %v4602_v23 }
 0x2c8   : > { %v4748_v19 = vrot.slane %v11398_v47, 1  ;;  %v4752_v22 = vrot.slane %v11402_v43, 1 }
 0x2c9   : > { %v4754_v7 = vrot.slane %v11404_v13, 1 }
 0x2ca   : > { %4092 = vrot.lane.b32.xlu1 %v4077_v14, %s12898_s24  ;;  %v11396_v14 = vcombine.low %v14836_v38, %v4602_v23 }
 0x2cb   : > { %4763 = vrot.lane.b32.xlu0 %v4751_v2, %s12898_s24  ;;  %v4689_v2 = vshll.u32 %v11394_v44, 16 }
 0x2cc   : > { %v4262_v54 = vpop.permute.xlu1 %4261 }
 0x2cd   : > { %v4328_v46 = vsel %vm16969_vm6, %v14582_v24, %v4262_v54  ;;  %v4703_v24 = vshll.u32 %v11396_v14, 16  ;;  %v4691_v62 = vrot.slane %v4689_v2, 1 }
 0x2ce   : > { %4709 = vrot.lane.b32.xlu1 %v4664_v30, %s12897_s23  ;;  %v4350_v26 = vsel %vm17034_vm10, %v4328_v46, %v4310_v37  ;;  %v4701_v37 = vshrl.u32 %v11396_v14, 16  ;;  %v12580_v14 = vld [vmem:[%s16944_s4] sm:$0xff]  }
 0x2cf   : > { %4719 = vrot.lane.b32.xlu0 %v4699_v55, %s12897_s23  ;;  %v11369_v1 = vcombine.low %v4348_v32, %v4350_v26  ;;  %v4705_v31 = vrot.slane %v4703_v24, 1  ;;  %v4692_v17 = vor.u32 %v4691_v62, %v4687_v8  ;;  %v14852_v55 = vpop.permute.xlu0 %4082  ;;  %v4519_v26 = vsel %vm17025_vm1, %v14768_v36, 0 }
 0x2d1   : > { %12141 = vmatprep.mubr.msk.bf16.mxu1 %vm16968_vm12, %v11369_v1  ;;  %v4706_v30 = vor.u32 %v4705_v31, %v4701_v37 }
 0x2d2   : > { %4713 = vrot.lane.b32.xlu1 %v4678_v18, %s12897_s23 }
 0x2d3   : > { %4767 = vrot.lane.b32.xlu0 %v4753_v6, %s12898_s24  ;;  %v14858_v60 = vpop.permute.xlu0 %4034 }
 0x2d6   : > { %4757 = vrot.lane.b32.xlu1 %v4748_v19, %s12898_s24 }
 0x2d7   : > { %v4312_v18 = vpop.permute.xlu0 %4311 }
 0x2da   : > { %4761 = vrot.lane.b32.xlu1 %v4750_v58, %s12898_s24 }
 0x2db   : > { %v14855_v21 = vpop.permute.xlu1 %4084 }
 0x2de   : > { %4717 = vrot.lane.b32.xlu1 %v4692_v17, %s12897_s23 }
 0x2e1   : > { %v4264_v44 = vpop.permute.xlu0 %4263 }
 0x2e2   : > { %4721 = vrot.lane.b32.xlu1 %v4706_v30, %s12897_s23  ;;  %v4331_v51 = vsel %vm16969_vm6, %v14614_v28, %v4264_v44  ;;  %v12581_v28 = vld [vmem:[%s16944_s4 + $0x20] ss:$0 sps:$4 sm:$0xff]  }
 0x2e3   : > { %v4037_v47 = vpop.permute.xlu1 %4036  ;;  %v4352_v6 = vsel %vm17034_vm10, %v4331_v51, %v4312_v18  ;;  %v12852_v18 = vld [vmem:[#allocation3] sm:$0xf] }
 0x2e6   : > { %4765 = vrot.lane.b32.xlu1 %v4752_v22, %s12898_s24 }
 0x2e8   : > { %v4314_v54 = vpop.permute.xlu1 %4313 }
 0x2e9   : > { %v4087_v1 = vpop.permute.xlu0 %4086 }
 0x2ea   : > { %4769 = vrot.lane.b32.xlu1 %v4754_v7, %s12898_s24 }
 0x2f1   : > { %v4266_v46 = vpop.permute.xlu1 %4265 }
 0x2f2   : > { %v4334_v23 = vsel %vm16969_vm6, %v14661_v50, %v4266_v46 }
 0x2f3   : > { %v4354_v10 = vsel %vm17034_vm10, %v4334_v23, %v4314_v54  ;;  %v4039_v50 = vpop.permute.xlu0 %4038  ;;  %v12853_v54 = vld [vmem:[#allocation3 + $0x8] sm:$0xf] }
 0x2f4   : > { %v11370_v32 = vcombine.low %v4352_v6, %v4354_v10 }
 0x2f6   : > { %12142 = vmatmul.mubr.msk.bf16.vlgmr.msra.gmra.mxu1 %vm16968_vm12, %v11370_v32  ;;  %v4089_v19 = vpop.permute.xlu1 %4088 }
 0x2f7   : > { %12150 = vmatpush3.bf16.msra.mxu1 %v4519_v26  ;;  %v4316_v11 = vpop.permute.xlu0 %4315 }
 0x2f8   : > { %12151 = vmatprep.subr.bf16.mxu1 %v12580_v14 }
 0x2fb   : > { %12152 = vmatpush3.bf16.msra.mxu1 %v12580_v14  ;;  %v4268_v2 = vpop.permute.xlu0 %4267 }
 0x2fc   : > { %12373 = vmatprep.subr.msk.bf16.mxu1 %vm17025_vm1, %v12581_v28  ;;  %v4041_v36 = vpop.permute.xlu1 %4040  ;;  %v4337_v58 = vsel %vm16969_vm6, %v14683_v29, %v4268_v2  ;;  %v4097_v29 = vsel %vm16969_vm6, %v12852_v18, %v14791_v9 }
 0x2fd   : > { %v4356_v37 = vsel %vm17034_vm10, %v4337_v58, %v4316_v11  ;;  %v4121_v23 = vsel %vm17034_vm10, %v4097_v29, %v14807_v15  ;;  %v4112_v15 = vsel %vm16969_vm6, %v14685_v41, %v4041_v36 }
 0x308   : > { %v4318_v24 = vpop.permute.xlu1 %4317 }
 0x30d   : > { %v4270_v62 = vpop.permute.xlu1 %4269 }
 0x30e   : > { %v4340_v8 = vsel %vm16969_vm6, %v14719_v56, %v4270_v62  ;;  %v4043_v39 = vpop.permute.xlu0 %4042  ;;  %v4100_v56 = vsel %vm16969_vm6, %v12853_v54, %v14825_v49 }
 0x30f   : > { %v4358_v31 = vsel %vm17034_vm10, %v4340_v8, %v4318_v24  ;;  %v4123_v6 = vsel %vm17034_vm10, %v4100_v56, %v14809_v35  ;;  %v12854_v35 = vld [vmem:[#allocation3 + $0x10] sm:$0xf]  ;;  %v4109_v24 = vsel %vm16969_vm6, %v14663_v42, %v4039_v50  ;;  %v4857_v8 = vsel %vm17025_vm1, %v12581_v28, 0 }
 0x310   : > { %v11371_v17 = vcombine.low %v4356_v37, %v4358_v31  ;;  %v11379_v49 = vcombine.low %v4121_v23, %v4123_v6  ;;  %v4129_v36 = vsel %vm17034_vm10, %v4109_v24, %v4087_v1  ;;  %vm17032_vm1 = vcmask 392192  }
 0x312   : > { %12145 = vmatprep.mubr.msk.bf16.mxu1 %vm16968_vm12, %v11371_v17 }
 0x31c   : > { %v4320_v30 = vpop.permute.xlu0 %4319 }
 0x321   : > { %v4272_v53 = vpop.permute.xlu0 %4271 }
 0x322   : > { %v4045_v13 = vpop.permute.xlu1 %4044  ;;  %v4343_v51 = vsel %vm16969_vm6, %v14744_v40, %v4272_v53  ;;  %v4106_v40 = vsel %vm16969_vm6, %v14618_v57, %v4037_v47  ;;  %v4131_v57 = vsel %vm17034_vm10, %v4112_v15, %v4089_v19  ;;  %v4115_v19 = vsel %vm16969_vm6, %v14722_v34, %v4043_v39 }
 0x323   : > { %v4360_v9 = vsel %vm17034_vm10, %v4343_v51, %v4320_v30  ;;  %v4127_v2 = vsel %vm17034_vm10, %v4106_v40, %v14855_v21  ;;  %v11381_v21 = vcombine.low %v4129_v36, %v4131_v57  ;;  %v4118_v42 = vsel %vm16969_vm6, %v14748_v12, %v4045_v13  ;;  %v12584_v40 = vld [vmem:[#allocation4] ss:$0 sps:$4 sm:$0x66]  }
 0x324   : > { %v5219_v15 = vrot.slane %v12584_v40, 1 }
 0x325   : > { %v4091_v43 = vpop.permute.xlu0 %4090 }
 0x326   : > { %v4133_v17 = vsel %vm17034_vm10, %v4115_v19, %v4091_v43 }
 0x329   : > { %v4708_v22 = vpop.permute.xlu0 %4707 }
 0x32a   : > { %v4773_v30 = vsel %vm16969_vm6, %v14738_v61, %v4708_v22 }
 0x32d   : > { %v4712_v44 = vpop.permute.xlu0 %4711 }
 0x32e   : > { %v4779_v61 = vsel %vm16969_vm6, %v14758_v63, %v4712_v44 }
 0x331   : > { %v4756_v14 = vpop.permute.xlu0 %4755 }
 0x332   : > { %v4796_v12 = vsel %vm17034_vm10, %v4773_v30, %v4756_v14  ;;  %v6823_v30 = vld [vmem:[#allocation2 + $0x28] sm:$0xf] }
 0x333   : > { %v4322_v7 = vpop.permute.xlu1 %4321 }
 0x335   : > { %v4760_v62 = vpop.permute.xlu0 %4759 }
 0x336   : > { %v4800_v22 = vsel %vm17034_vm10, %v4779_v61, %v4760_v62  ;;  %v6820_v62 = vld [vmem:[#allocation2 + $0x18] sm:$0xf] }
 0x338   : > { %v4274_v46 = vpop.permute.xlu1 %4273 }
 0x339   : > { %v4346_v10 = vsel %vm16969_vm6, %v14798_v16, %v4274_v46  ;;  %v4103_v16 = vsel %vm16969_vm6, %v12854_v35, %v14858_v60  ;;  %v12582_v60 = vld [vmem:[%s16944_s4 + $0x18] sm:$0xff]   ;;  %v4716_v1 = vpop.permute.xlu0 %4715  ;;  %v6819_v35 = vld [vmem:[#allocation2 + $0x10] sm:$0xf] }
 0x33a   : > { %v4362_v32 = vsel %vm17034_vm10, %v4346_v10, %v4322_v7  ;;  %v4125_v47 = vsel %vm17034_vm10, %v4103_v16, %v14852_v55  ;;  %v4785_v56 = vsel %vm16969_vm6, %v14786_v33, %v4716_v1 }
 0x33b   : > { %v11372_v26 = vcombine.low %v4360_v9, %v4362_v32  ;;  %v11380_v41 = vcombine.low %v4125_v47, %v4127_v2  ;;  %v12586_v2 = vld [vmem:[#allocation2 + $0x14] ss:$0 sps:$4 sm:$0x11]   ;;  %v6866_v47 = vld [vmem:[#allocation2 + $0xc] sm:$0xe] }
 0x33c   : > { %v4093_v11 = vpop.permute.xlu1 %4092  ;;  %v7018_v57 = vshll.u32 %v12586_v2, 16  ;;  %v7283_v1 = vrot.slane %v12586_v2, 1 }
 0x33d   : > { %12146 = vmatmul.mubr.msk.bf16.gmra.mxu1 %vm16968_vm12, %v11372_v26  ;;  %v4135_v55 = vsel %vm17034_vm10, %v4118_v42, %v4093_v11  ;;  %v12583_v26 = vld [vmem:[#allocation4] ss:$0 sps:$4 sm:$0x77]  }
 0x33e   : > { %12153 = vmatprep.mubr.msk.bf16.mxu1 %vm16968_vm12, %v11379_v49  ;;  %v11382_v53 = vcombine.low %v4133_v17, %v4135_v55  ;;  %v5172_v49 = vshrl.u32 %v12583_v26, 16  ;;  %v5174_v14 = vshll.u32 %v12583_v26, 16  ;;  %v7020_v36 = vrot.slane %v7018_v57, 1  ;;  %v12597_v57 = vld [vmem:[#allocation2 + $0x44] ss:$0 sps:$4 sm:$0x11]  }
 0x340   : > { %v4710_v58 = vpop.permute.xlu1 %4709  ;;  %v5176_v11 = vrot.slane %v5174_v14, 1 }
 0x341   : > { %v4776_v28 = vsel %vm16969_vm6, %v14794_v52, %v4710_v58  ;;  %v4764_v52 = vpop.permute.xlu0 %4763 }
 0x342   : > { %v4804_v46 = vsel %vm17034_vm10, %v4785_v56, %v4764_v52  ;;  %v6867_v52 = vld [vmem:[#allocation2 + $0x18] sm:$0xe] }
 0x344   : > { %v4714_v37 = vpop.permute.xlu1 %4713 }
 0x345   : > { %12154 = vmatmul.mubr.msk.bf16.vlgmr.msra.gmra.mxu1 %vm16968_vm12, %v11380_v41  ;;  %v4782_v34 = vsel %vm16969_vm6, %v14813_v45, %v4714_v37  ;;  %v4720_v29 = vpop.permute.xlu0 %4719  ;;  %v12589_v37 = vld [vmem:[#allocation2 + $0x20] ss:$0 sps:$4 sm:$0x11]  }
 0x346   : > { %12162 = vmatpush3.bf16.msra.mxu1 %v4857_v8  ;;  %12157 = vmatprep.mubr.msk.bf16.mxu1 %vm16968_vm12, %v11381_v21  ;;  %v4791_v10 = vsel %vm16969_vm6, %v14802_v25, %v4720_v29  ;;  %v6818_v25 = vld [vmem:[#allocation2 + $0xc] sm:$0xf]  ;;  %v11568_v8 = vcombine.low %v6866_v47, %v6819_v35  ;;  %v7030_v19 = vshll.u32 %v12589_v37, 16  ;;  %v7286_v29 = vrot.slane %v12589_v37, 1  ;;  %v6828_v37 = vld [vmem:[#allocation2 + $0x48] sm:$0xf] }
 0x347   : > { %12163 = vmatprep.subr.bf16.mxu1 %v12582_v60  ;;  %v14956_v16 = vcombine.low %v6818_v25, %v6819_v35  ;;  %v6826_v25 = vld [vmem:[#allocation2 + $0x3c] sm:$0xf]  ;;  %v6827_v35 = vld [vmem:[#allocation2 + $0x40] sm:$0xf] }
 0x348   : > { %v4758_v50 = vpop.permute.xlu1 %4757  ;;  %v7282_v55 = vrot.slane %v11568_v8, 1  ;;  %v6869_v8 = vld [vmem:[#allocation2 + $0x30] sm:$0xe] }
 0x349   : > { %v4798_v31 = vsel %vm17034_vm10, %v4776_v28, %v4758_v50  ;;  %v4768_v6 = vpop.permute.xlu0 %4767  ;;  %v7011_v24 = vshrl.u32 %v14956_v16, 16  ;;  %v7013_v58 = vshll.u32 %v14956_v16, 16 }
 0x34a   : > { %12164 = vmatpush3.bf16.msra.mxu1 %v12582_v60  ;;  %v11408_v13 = vcombine.low %v4796_v12, %v4798_v31  ;;  %v4808_v33 = vsel %vm17034_vm10, %v4791_v10, %v4768_v6  ;;  %v6821_v60 = vld [vmem:[#allocation2 + $0x1c] sm:$0xf]  ;;  %v6822_v31 = vld [vmem:[#allocation2 + $0x24] sm:$0xf] }
 0x34b   : > { %v7015_v41 = vrot.slane %v7013_v58, 1  ;;  %v14961_v21 = vcombine.low %v6820_v62, %v6821_v60  ;;  %v12591_v12 = vld [vmem:[#allocation2 + $0x2c] ss:$0 sps:$4 sm:$0x11]  }
 0x34c   : > { %v4762_v7 = vpop.permute.xlu1 %4761 }
 0x34d   : > { %12158 = vmatmul.mubr.msk.bf16.gmra.mxu1 %vm16968_vm12, %v11382_v53  ;;  %v4802_v39 = vsel %vm17034_vm10, %v4782_v34, %v4762_v7  ;;  %v7016_v42 = vor.u32 %v7015_v41, %v7011_v24  ;;  %v7023_v28 = vshrl.u32 %v14961_v21, 16  ;;  %v7025_v50 = vshll.u32 %v14961_v21, 16 }
 0x34e   : > { %12165 = vmatprep.mubr.msk.bf16.mxu1 %vm16968_vm12, %v11408_v13  ;;  %v11409_v18 = vcombine.low %v4800_v22, %v4802_v39  ;;  %v7032_v13 = vrot.slane %v7030_v19, 1  ;;  %v14967_v7 = vcombine.low %v6822_v31, %v6823_v30  ;;  %v7284_v34 = vsel %vm1344_vm14, %v7282_v55, %v7283_v1  ;;  %v6870_v31 = vld [vmem:[#allocation2 + $0x3c] sm:$0xe] }
 0x34f   : > { %v7021_v17 = vsel %vm1071_vm15, %v7016_v42, %v7020_v36  ;;  %v7027_v53 = vrot.slane %v7025_v50, 1  ;;  %v7042_v39 = vshll.u32 %v12591_v12, 16  ;;  %v14985_v24 = vcombine.low %v6826_v25, %v6827_v35  ;;  %v6829_v42 = vld [vmem:[#allocation2 + $0x4c] sm:$0xf] }
 0x350   : > { %v4718_v43 = vpop.permute.xlu1 %4717  ;;  %v7035_v22 = vshrl.u32 %v14967_v7, 16  ;;  %v7066_v36 = vshll.u32 %v12597_v57, 16  ;;  %v12607_v25 = vld [vmem:[#allocation2 + $0x68] ss:$0 sps:$4 sm:$0x11]  }
 0x351   : > { %v4788_v51 = vsel %vm16969_vm6, %v14831_v4, %v4718_v43  ;;  %v11569_v43 = vcombine.low %v6867_v52, %v6821_v60  ;;  %v7028_v61 = vor.u32 %v7027_v53, %v7023_v28  ;;  %v7061_v47 = vshll.u32 %v14985_v24, 16  ;;  %v12601_v53 = vld [vmem:[#allocation2 + $0x50] ss:$0 sps:$4 sm:$0x11]   ;;  %v6831_v52 = vld [vmem:[#allocation2 + $0x58] sm:$0xf] }
 0x352   : > { %v7059_v62 = vshrl.u32 %v14985_v24, 16  ;;  %v7068_v1 = vrot.slane %v7066_v36, 1  ;;  %v14991_v28 = vcombine.low %v6828_v37, %v6829_v42 }
 0x353   : > { %v7033_v56 = vsel %vm1071_vm15, %v7028_v61, %v7032_v13  ;;  %v7063_v41 = vrot.slane %v7061_v47, 1 }
 0x354   : > { %v4722_v54 = vpop.permute.xlu1 %4721  ;;  %7204 = vrot.lane.b32.xlu1 %v7033_v56, %s12895_s16  ;;  %17091 = vst [vmem:[#allocation16_spill] sm:$0xff] %v14991_v28  ;;  %v7073_v13 = vshll.u32 %v14991_v28, 16 }
 0x355   : > { %12166 = vmatmul.mubr.msk.bf16.vlgmr.msra.gmra.mxu1 %vm16968_vm12, %v11409_v18  ;;  %v4794_v63 = vsel %vm16969_vm6, %v14836_v38, %v4722_v54  ;;  %v5177_v38 = vor.u32 %v5176_v11, %v5172_v49  ;;  %v7037_v18 = vshll.u32 %v14967_v7, 16  ;;  %v7285_v54 = vrot.slane %v11569_v43, 1 }
 0x356   : > { %v7064_v55 = vor.u32 %v7063_v41, %v7059_v62  ;;  %v6835_v62 = vld [vmem:[#allocation2 + $0x70] sm:$0xf] }
 0x357   : > { %5199 = vrot.lane.b32.xlu0 %v5177_v38, %s12898_s24 }
 0x358   : > { %v4766_v45 = vpop.permute.xlu1 %4765 }
 0x359   : > { %v4806_v23 = vsel %vm17034_vm10, %v4788_v51, %v4766_v45  ;;  %v7039_v51 = vrot.slane %v7037_v18, 1  ;;  %v7044_v45 = vrot.slane %v7042_v39, 1  ;;  %v7071_v39 = vshrl.u32 %v14991_v28, 16 }
 0x35a   : > { %v11410_v44 = vcombine.low %v4804_v46, %v4806_v23  ;;  %v7287_v23 = vsel %vm1344_vm14, %v7285_v54, %v7286_v29  ;;  %v7075_v18 = vrot.slane %v7073_v13, 1  ;;  %v7078_v29 = vshll.u32 %v12601_v53, 16  ;;  %v12603_v54 = vld [vmem:[#allocation2 + $0x5c] ss:$0 sps:$4 sm:$0x11]  }
 0x35b   : > { %5223 = vrot.lane.b32.xlu0 %v5219_v15, %s12899_s25  ;;  %v7040_v46 = vor.u32 %v7039_v51, %v7035_v22  ;;  %7332 = vrot.lane.b32.xlu1 %v7287_v23, %s12894_s15  ;;  %v7295_v22 = vrot.slane %v12597_v57, 1  ;;  %v7301_v36 = vrot.slane %v12603_v54, 1 }
 0x35c   : > { %12169 = vmatprep.mubr.msk.bf16.mxu1 %vm16968_vm12, %v11410_v44  ;;  %v4770_v9 = vpop.permute.xlu1 %4769  ;;  %v6824_v44 = vld [vmem:[#allocation2 + $0x30] sm:$0xf] }
 0x35d   : > { %v4810_v4 = vsel %vm17034_vm10, %v4794_v63, %v4770_v9  ;;  %v7045_v6 = vsel %vm1071_vm15, %v7040_v46, %v7044_v45  ;;  %v6868_v63 = vld [vmem:[#allocation2 + $0x24] sm:$0xe]  ;;  %v7289_v9 = vrot.slane %v12591_v12, 1  ;;  %v11572_v12 = vcombine.low %v6870_v31, %v6827_v35 }
 0x35e   : > { %v11411_v32 = vcombine.low %v4808_v33, %v4810_v4  ;;  %v11570_v10 = vcombine.low %v6868_v63, %v6823_v30  ;;  %v6825_v33 = vld [vmem:[#allocation2 + $0x34] sm:$0xf]  ;;  %v12595_v4 = vld [vmem:[#allocation2 + $0x38] ss:$0 sps:$4 sm:$0x11]   ;;  %v7069_v30 = vsel %vm1071_vm15, %v7064_v55, %v7068_v1  ;;  %v7076_v45 = vor.u32 %v7075_v18, %v7071_v39 }
 0x35f   : > { %7202 = vrot.lane.b32.xlu0 %v7021_v17, %s12895_s16  ;;  %v7054_v49 = vshll.u32 %v12595_v4, 16  ;;  %v11571_v60 = vcombine.low %v6869_v8, %v6825_v33  ;;  %v7292_v19 = vrot.slane %v12595_v4, 1  ;;  %v6830_v17 = vld [vmem:[#allocation2 + $0x54] sm:$0xf]  ;;  %v7294_v61 = vrot.slane %v11572_v12, 1 }
 0x360   : > { %12170 = vmatmul.mubr.msk.bf16.gmra.mxu1 %vm16968_vm12, %v11411_v32  ;;  %v14979_v32 = vcombine.low %v6824_v44, %v6825_v33  ;;  %v7288_v26 = vrot.slane %v11570_v10, 1  ;;  %v14998_v43 = vcombine.low %v6830_v17, %v6831_v52  ;;  %v7080_v46 = vrot.slane %v7078_v29, 1  ;;  %v6832_v63 = vld [vmem:[#allocation2 + $0x60] sm:$0xf]  ;;  %v6833_v33 = vld [vmem:[#allocation2 + $0x64] sm:$0xf] }
 0x361   : > { %v7056_v15 = vrot.slane %v7054_v49, 1  ;;  %v7291_v50 = vrot.slane %v11571_v60, 1  ;;  %v7296_v51 = vsel %vm1344_vm14, %v7294_v61, %v7295_v22  ;;  %v7090_v10 = vshll.u32 %v12603_v54, 16  ;;  %v6836_v12 = vld [vmem:[#allocation2 + $0x78] sm:$0xf] }
 0x362   : > { %v7047_v14 = vshrl.u32 %v14979_v32, 16  ;;  %v7049_v11 = vshll.u32 %v14979_v32, 16  ;;  %v7290_v40 = vsel %vm1344_vm14, %v7288_v26, %v7289_v9  ;;  %17092 = vst [vmem:[#allocation15_spill] sm:$0xff] %v14998_v43  ;;  %v7085_v56 = vshll.u32 %v14998_v43, 16  ;;  %v6874_v18 = vld [vmem:[#allocation2 + $0x6c] sm:$0xe] }
 0x363   : > { %7330 = vrot.lane.b32.xlu0 %v7284_v34, %s12894_s15  ;;  %v7293_v34 = vsel %vm1344_vm14, %v7291_v50, %v7292_v19  ;;  %v7083_v23 = vshrl.u32 %v14998_v43, 16  ;;  %v7081_v4 = vsel %vm1071_vm15, %v7076_v45, %v7080_v46  ;;  %v15006_v26 = vcombine.low %v6832_v63, %v6833_v33  ;;  %v12609_v50 = vld [vmem:[#allocation2 + $0x74] ss:$0 sps:$4 sm:$0x11]   ;;  %v6873_v19 = vld [vmem:[#allocation2 + $0x60] sm:$0xe] }
 0x364   : > { %v7051_v38 = vrot.slane %v7049_v11, 1  ;;  %v7087_v44 = vrot.slane %v7085_v56, 1  ;;  %v7102_v60 = vshll.u32 %v12607_v25, 16  ;;  %v7304_v22 = vrot.slane %v12607_v25, 1  ;;  %v6839_v63 = vld [vmem:[#allocation2 + $0x88] sm:$0xf] }
 0x365   : > { %17093 = vst [vmem:[#allocation18_spill] sm:$0xff] %v15006_v26  ;;  %v7097_v35 = vshll.u32 %v15006_v26, 16  ;;  %v7095_v47 = vshrl.u32 %v15006_v26, 16  ;;  %v11576_v54 = vcombine.low %v6874_v18, %v6835_v62  ;;  %v12613_v56 = vld [vmem:[#allocation2 + $0x80] ss:$0 sps:$4 sm:$0x11]  }
 0x366   : > { %v7052_v2 = vor.u32 %v7051_v38, %v7047_v14  ;;  %v7088_v49 = vor.u32 %v7087_v44, %v7083_v23  ;;  %v7092_v14 = vrot.slane %v7090_v10, 1  ;;  %v6872_v38 = vld [vmem:[#allocation2 + $0x54] sm:$0xe]  ;;  %v7104_v1 = vrot.slane %v7102_v60, 1  ;;  %v6840_v25 = vld [vmem:[#allocation2 + $0x90] sm:$0xf] }
 0x367   : > { %7206 = vrot.lane.b32.xlu0 %v7045_v6, %s12895_s16  ;;  %v6871_v6 = vld [vmem:[#allocation2 + $0x48] sm:$0xe]  ;;  %v7099_v8 = vrot.slane %v7097_v35, 1  ;;  %v7306_v44 = vrot.slane %v11576_v54, 1  ;;  %v7307_v10 = vrot.slane %v12609_v50, 1 }
 0x368   : > { %v7057_v58 = vsel %vm1071_vm15, %v7052_v2, %v7056_v15  ;;  %v11573_v9 = vcombine.low %v6871_v6, %v6829_v42  ;;  %v11574_v15 = vcombine.low %v6872_v38, %v6831_v52  ;;  %v6834_v2 = vld [vmem:[#allocation2 + $0x6c] sm:$0xf]  ;;  %v7114_v52 = vshll.u32 %v12609_v50, 16  ;;  %v6838_v6 = vld [vmem:[#allocation2 + $0x84] sm:$0xf] }
 0x369   : > { %7208 = vrot.lane.b32.xlu1 %v7057_v58, %s12895_s16  ;;  %v7093_v58 = vsel %vm1071_vm15, %v7088_v49, %v7092_v14  ;;  %v15015_v37 = vcombine.low %v6834_v2, %v6835_v62  ;;  %v7100_v55 = vor.u32 %v7099_v8, %v7095_v47  ;;  %v15030_v49 = vcombine.low %v6838_v6, %v6839_v63  ;;  %v12615_v14 = vld [vmem:[#allocation2 + $0x8c] ss:$0 sps:$4 sm:$0x11]   ;;  %v6841_v47 = vld [vmem:[#allocation2 + $0x94] sm:$0xf] }
 0x36a   : > { %v7297_v11 = vrot.slane %v11573_v9, 1  ;;  %v7300_v41 = vrot.slane %v11574_v15, 1  ;;  %v7116_v29 = vrot.slane %v7114_v52, 1  ;;  %v6875_v15 = vld [vmem:[#allocation2 + $0x78] sm:$0xe]  ;;  %v7313_v52 = vrot.slane %v12615_v14, 1 }
 0x36b   : > { %7334 = vrot.lane.b32.xlu0 %v7290_v40, %s12894_s15  ;;  %v7298_v40 = vrot.slane %v12601_v53, 1  ;;  %17094 = vst [vmem:[#allocation17_spill] sm:$0xff] %v15015_v37  ;;  %v7107_v31 = vshrl.u32 %v15015_v37, 16  ;;  %v7109_v17 = vshll.u32 %v15015_v37, 16  ;;  %v6837_v53 = vld [vmem:[#allocation2 + $0x7c] sm:$0xf]  ;;  %v7105_v13 = vsel %vm1071_vm15, %v7100_v55, %v7104_v1 }
 0x36c   : > { %v7302_v42 = vsel %vm1344_vm14, %v7300_v41, %v7301_v36  ;;  %17096 = vst [vmem:[#allocation19_spill] sm:$0xff] %v15030_v49  ;;  %v7131_v35 = vshrl.u32 %v15030_v49, 16  ;;  %v7133_v2 = vshll.u32 %v15030_v49, 16  ;;  %v15037_v41 = vcombine.low %v6840_v25, %v6841_v47  ;;  %v6876_v55 = vld [vmem:[#allocation2 + $0x84] sm:$0xe] }
 0x36d   : > { %7336 = vrot.lane.b32.xlu1 %v7293_v34, %s12894_s15  ;;  %v7299_v57 = vsel %vm1344_vm14, %v7297_v11, %v7298_v40  ;;  %v15022_v34 = vcombine.low %v6836_v12, %v6837_v53  ;;  %v7111_v39 = vrot.slane %v7109_v17, 1  ;;  %v7308_v11 = vsel %vm1344_vm14, %v7306_v44, %v7307_v10  ;;  %v12619_v50 = vld [vmem:[#allocation2 + $0x98] ss:$0 sps:$4 sm:$0x11]   ;;  %v15628_v26 = vld [vmem:[#allocation2 + $0xac] sm:$0xf] }
 0x36e   : > { %17097 = vst [vmem:[#allocation22_spill] sm:$0xff] %v15037_v41  ;;  %v7135_v36 = vrot.slane %v7133_v2, 1  ;;  %v11578_v1 = vcombine.low %v6876_v55, %v6839_v63  ;;  %v7143_v12 = vshrl.u32 %v15037_v41, 16  ;;  %v12623_v10 = vld [vmem:[#allocation4 + $0x14] ss:$0 sps:$4 sm:$0x77]  }
 0x36f   : > { %7210 = vrot.lane.b32.xlu0 %v7069_v30, %s12895_s16  ;;  %v11575_v30 = vcombine.low %v6873_v19, %v6833_v33  ;;  %17095 = vst [vmem:[#allocation20_spill] sm:$0xff] %v15022_v34  ;;  %v7112_v45 = vor.u32 %v7111_v39, %v7107_v31  ;;  %v7119_v23 = vshrl.u32 %v15022_v34, 16  ;;  %v7126_v33 = vshll.u32 %v12613_v56, 16  ;;  %v6842_v31 = vld [vmem:[#allocation2 + $0x9c] sm:$0xf] }
 0x370   : > { %v7145_v19 = vshll.u32 %v15037_v41, 16  ;;  %v7136_v17 = vor.u32 %v7135_v36, %v7131_v35  ;;  %v5585_v25 = vshll.u32 %v12623_v10, 16  ;;  %v12626_v2 = vld [vmem:[#allocation2 + $0xb0] ss:$0 sps:$4 sm:$0x11]  }
 0x371   : > { %7212 = vrot.lane.b32.xlu1 %v7081_v4, %s12895_s16  ;;  %v7303_v61 = vrot.slane %v11575_v30, 1  ;;  %v7117_v4 = vsel %vm1071_vm15, %v7112_v45, %v7116_v29  ;;  %v7128_v38 = vrot.slane %v7126_v33, 1  ;;  %v12621_v29 = vld [vmem:[#allocation2 + $0xa4] ss:$0 sps:$4 sm:$0x11]  }
 0x372   : > { %v7147_v39 = vrot.slane %v7145_v19, 1  ;;  %v6877_v45 = vld [vmem:[#allocation2 + $0x90] sm:$0xe]  ;;  %v7162_v63 = vshll.u32 %v12621_v29, 16  ;;  %v6878_v33 = vld [vmem:[#allocation2 + $0x9c] sm:$0xe] }
 0x373   : > { %7338 = vrot.lane.b32.xlu0 %v7296_v51, %s12894_s15  ;;  %v7121_v51 = vshll.u32 %v15022_v34, 16  ;;  %v7305_v46 = vsel %vm1344_vm14, %v7303_v61, %v7304_v22  ;;  %v7150_v61 = vshll.u32 %v12619_v50, 16  ;;  %v11579_v44 = vcombine.low %v6877_v45, %v6841_v47  ;;  %v15378_v41 = vld [vmem:[#allocation2 + $0x44] ss:$0 sps:$4 sm:$0x11]  }
 0x374   : > { %v7319_v19 = vrot.slane %v12621_v29, 1  ;;  %vm5133_vm12 = vsmask.f32 2306 }
 0x375   : > { %7340 = vrot.lane.b32.xlu1 %v7299_v57, %s12894_s15  ;;  %v7123_v9 = vrot.slane %v7121_v51, 1  ;;  %v11577_v57 = vcombine.low %v6875_v15, %v6837_v53  ;;  %v6843_v53 = vld [vmem:[#allocation2 + $0xa0] sm:$0xf]  ;;  %v7152_v51 = vrot.slane %v7150_v61, 1  ;;  %v5583_v15 = vshrl.u32 %v12623_v10, 16  ;;  %vm15084_vm6 = vmand %vm5132_vm2, %vm5133_vm12 }
 0x376   : > { %v15046_v18 = vcombine.low %v6842_v31, %v6843_v53  ;;  %v11580_v47 = vcombine.low %v6878_v33, %v6843_v53  ;;  %v7322_v61 = vrot.slane %v12626_v2, 1  ;;  %vm17030_vm12 = vmmov 0  }
 0x377   : > { %7214 = vrot.lane.b32.xlu0 %v7093_v58, %s12895_s16  ;;  %v7124_v40 = vor.u32 %v7123_v9, %v7119_v23  ;;  %v7138_v58 = vshll.u32 %v12615_v14, 16  ;;  %v7309_v60 = vrot.slane %v11577_v57, 1  ;;  %v6845_v14 = vld [vmem:[#allocation2 + $0xac] sm:$0xf]  ;;  %vm17033_vm2 = vcmask 261120  }
 0x378   : > { %17098 = vst [vmem:[#allocation21_spill] sm:$0xff] %v15046_v18  ;;  %v7155_v23 = vshrl.u32 %v15046_v18, 16  ;;  %v7157_v6 = vshll.u32 %v15046_v18, 16  ;;  %v15356_v18 = vld [vmem:[#allocation2 + $0x40] sm:$0xf] }
 0x379   : > { %7216 = vrot.lane.b32.xlu1 %v7105_v13, %s12895_s16  ;;  %v7129_v62 = vsel %vm1071_vm15, %v7124_v40, %v7128_v38  ;;  %v7140_v8 = vrot.slane %v7138_v58, 1  ;;  %v7312_v13 = vrot.slane %v11578_v1, 1  ;;  %v7164_v40 = vrot.slane %v7162_v63, 1 }
 0x37a   : > { %v7315_v38 = vrot.slane %v11579_v44, 1 }
 0x37b   : > { %7342 = vrot.lane.b32.xlu0 %v7302_v42, %s12894_s15  ;;  %v7310_v42 = vrot.slane %v12613_v56, 1  ;;  %v7141_v22 = vsel %vm1071_vm15, %v7136_v17, %v7140_v8  ;;  %v7314_v54 = vsel %vm1344_vm14, %v7312_v13, %v7313_v52  ;;  %v7148_v56 = vor.u32 %v7147_v39, %v7143_v12  ;;  %v6879_v13 = vld [vmem:[#allocation2 + $0xa8] sm:$0xe] }
 0x37c   : > { %v11581_v39 = vcombine.low %v6879_v13, %v6845_v14 }
 0x37d   : > { %7344 = vrot.lane.b32.xlu1 %v7305_v46, %s12894_s15  ;;  %v7311_v30 = vsel %vm1344_vm14, %v7309_v60, %v7310_v42  ;;  %v7316_v46 = vrot.slane %v12619_v50, 1  ;;  %v7153_v9 = vsel %vm1071_vm15, %v7148_v56, %v7152_v51  ;;  %v7174_v42 = vshll.u32 %v12626_v2, 16 }
 0x37e   : > { %v7318_v50 = vrot.slane %v11580_v47, 1 }
 0x37f   : > { %7218 = vrot.lane.b32.xlu0 %v7117_v4, %s12895_s16  ;;  %v6844_v4 = vld [vmem:[#allocation2 + $0xa8] sm:$0xf]  ;;  %v7317_v57 = vsel %vm1344_vm14, %v7315_v38, %v7316_v46  ;;  %v7176_v31 = vrot.slane %v7174_v42, 1  ;;  %v11418_v38 = vld [vmem:[%s16945_s5] ss:$0 sm:$0xff] }
 0x380   : > { %v15055_v35 = vcombine.low %v6844_v4, %v6845_v14  ;;  %v7320_v12 = vsel %vm1344_vm14, %v7318_v50, %v7319_v19 }
 0x381   : > { %7220 = vrot.lane.b32.xlu1 %v7129_v62, %s12895_s16  ;;  %v5587_v62 = vrot.slane %v5585_v25, 1 }
 0x382   : > { %17099 = vst [vmem:[#allocation24_spill] sm:$0xff] %v15055_v35  ;;  %v7167_v36 = vshrl.u32 %v15055_v35, 16  ;;  %v7169_v8 = vshll.u32 %v15055_v35, 16 }
 0x383   : > { %7346 = vrot.lane.b32.xlu0 %v7308_v11, %s12894_s15  ;;  %v7159_v11 = vrot.slane %v7157_v6, 1  ;;  %v5588_v55 = vor.u32 %v5587_v62, %v5583_v15 }
 0x384   : > { %v7171_v1 = vrot.slane %v7169_v8, 1 }
 0x385   : > { %7348 = vrot.lane.b32.xlu1 %v7311_v30, %s12894_s15  ;;  %v7160_v58 = vor.u32 %v7159_v11, %v7155_v23 }
 0x386   : > { %v7172_v17 = vor.u32 %v7171_v1, %v7167_v36 }
 0x387   : > { %7222 = vrot.lane.b32.xlu0 %v7141_v22, %s12895_s16  ;;  %v7165_v60 = vsel %vm1071_vm15, %v7160_v58, %v7164_v40  ;;  %v7321_v22 = vrot.slane %v11581_v39, 1 }
 0x388   : > { %v7177_v30 = vsel %vm1071_vm15, %v7172_v17, %v7176_v31 }
 0x389   : > { %7224 = vrot.lane.b32.xlu1 %v7153_v9, %s12895_s16  ;;  %v15069_v29 = vsel %vm1344_vm14, %v7321_v22, %v7322_v61 }
 0x38b   : > { %7350 = vrot.lane.b32.xlu0 %v7314_v54, %s12894_s15 }
 0x38d   : > { %7352 = vrot.lane.b32.xlu1 %v7317_v57, %s12894_s15 }
 0x38f   : > { %7226 = vrot.lane.b32.xlu0 %v7165_v60, %s12895_s16 }
 0x391   : > { %7228 = vrot.lane.b32.xlu1 %v7177_v30, %s12895_s16 }
 0x393   : > { %5595 = vrot.lane.b32.xlu0 %v5588_v55, %s12898_s24 }
 0x397   : > { %7354 = vrot.lane.b32.xlu0 %v7320_v12, %s12894_s15 }
 0x3b6   : > { %v12143_v53 = vpop.f32.mrf.mxu1 }
 0x3b8   : > { %v4446_v52 = vpop.f32.mrf.mxu1 }
 0x3ba   : > { %v12144_v54 = vpop.f32.mrf.mxu1 }
 0x3bc   : > { %v4449_v56 = vpop.f32.mrf.mxu1 }
 0x3fd   : > { %v12147_v51 = vpop.f32.mrf.mxu1 }
 0x3ff   : > { %v4462_v45 = vpop.f32.mrf.mxu1 }
 0x401   : > { %v12148_v46 = vpop.f32.mrf.mxu1 }
 0x403   : > { %v4465_v23 = vpop.f32.mrf.mxu1 }
 0x405   : > { %v12155_v6 = vpop.f32.mrf.mxu1 }
 0x406   : > { %v4564_v14 = vadd.f32 %v12155_v6, %v12143_v53 }
 0x407   : > { %v4555_v63 = vpop.f32.mrf.mxu1 }
 0x408   : > { %v4556_v15 = vadd.f32 %v4555_v63, %v4446_v52 }
 0x409   : > { %v12156_v44 = vpop.f32.mrf.mxu1 }
 0x40a   : > { %v4567_v58 = vadd.f32 %v12156_v44, %v12144_v54 }
 0x40b   : > { %v4558_v10 = vpop.f32.mrf.mxu1 }
 0x40c   : > { %v4559_v36 = vadd.f32 %v4558_v10, %v4449_v56 }
 0x40d   : > { %v12159_v9 = vpop.f32.mrf.mxu1 }
 0x40e   : > { %v4580_v30 = vadd.f32 %v12159_v9, %v12147_v51 }
 0x40f   : > { %v4571_v33 = vpop.f32.mrf.mxu1 }
 0x410   : > { %v4572_v39 = vadd.f32 %v4571_v33, %v4462_v45 }
 0x411   : > { %v12160_v4 = vpop.f32.mrf.mxu1 }
 0x412   : > { %v4583_v63 = vadd.f32 %v12160_v4, %v12148_v46 }
 0x413   : > { %v4574_v11 = vpop.f32.mrf.mxu1 }
 0x415   : > { %v12167_v40 = vpop.f32.mrf.mxu1 }
 0x416   : > { %v4926_v25 = vadd.f32 %v12167_v40, %v4564_v14 }
 0x417   : > { %v4893_v2 = vpop.f32.mrf.mxu1 }
 0x418   : > { %v4941_v57 = vadd.f32 %v11418_v38, %v4926_v25  ;;  %v4924_v47 = vadd.f32 %v4893_v2, %v4556_v15  ;;  %v4575_v25 = vadd.f32 %v4574_v11, %v4465_v23 }
 0x419   : > { %v12168_v62 = vpop.f32.mrf.mxu1 }
 0x41a   : > { %v4939_v8 = vadd.f32 %v11418_v38, %v4924_v47  ;;  %v4927_v60 = vadd.f32 %v12168_v62, %v4567_v58  ;;  %v4949_v55 = vmax.f32 %v4941_v57, 0.0 }
 0x41b   : > { %v4896_v42 = vpop.f32.mrf.mxu1 }
 0x41c   : > { %v4942_v1 = vadd.f32 %v11418_v38, %v4927_v60  ;;  %v4925_v50 = vadd.f32 %v4896_v42, %v4559_v36  ;;  %v4947_v19 = vmax.f32 %v4939_v8, 0.0  ;;  %v11859_v12 = vpack.c.bf16 %v4949_v55, %v4949_v55 }
 0x41e   : > { %v4950_v31 = vmax.f32 %v4942_v1, 0.0  ;;  %v4940_v17 = vadd.f32 %v11418_v38, %v4925_v50  ;;  %v11857_v22 = vpack.c.bf16 %v4947_v19, %v4947_v19 }
 0x420   : > { %v11860_v53 = vpack.c.bf16 %v4950_v31, %v4950_v31  ;;  %v4948_v13 = vmax.f32 %v4940_v17, 0.0  ;;  %v12171_v52 = vpop.f32.mrf.mxu1 }
 0x421   : > { %v4930_v61 = vadd.f32 %v12171_v52, %v4580_v30 }
 0x422   : > { %v4988_v54 = vmax.bf16 %v11860_v53, %v11859_v12  ;;  %v11858_v6 = vpack.c.bf16 %v4948_v13, %v4948_v13  ;;  %v4909_v56 = vpop.f32.mrf.mxu1 }
 0x423   : > { %v4945_v44 = vadd.f32 %v11418_v38, %v4930_v61  ;;  %v4928_v10 = vadd.f32 %v4909_v56, %v4572_v39 }
 0x424   : > { %v4997_v14 = vshrl.u32 %v4988_v54, 16  ;;  %v4987_v40 = vmax.bf16 %v11858_v6, %v11857_v22  ;;  %v12172_v15 = vpop.f32.mrf.mxu1 }
 0x425   : > { %v4943_v2 = vadd.f32 %v11418_v38, %v4928_v10  ;;  %v4931_v58 = vadd.f32 %v12172_v15, %v4583_v63  ;;  %v4953_v47 = vmax.f32 %v4945_v44, 0.0 }
 0x426   : > { %v5016_v51 = vmax.bf16 %v4997_v14, %v4988_v54  ;;  %v4992_v9 = vshrl.u32 %v4987_v40, 16  ;;  %v4912_v57 = vpop.f32.mrf.mxu1 }
 0x427   : > { %v4946_v62 = vadd.f32 %v11418_v38, %v4931_v58  ;;  %v4929_v45 = vadd.f32 %v4912_v57, %v4575_v25  ;;  %v4951_v8 = vmax.f32 %v4943_v2, 0.0  ;;  %v11863_v55 = vpack.c.bf16 %v4953_v47, %v4953_v47 }
 0x428   : > { %v11432_v33 = vcombine.low %v5016_v51, %v5016_v51  ;;  %v5015_v36 = vmax.bf16 %v4992_v9, %v4987_v40  ;;  %v17100_v47 = vmov 0 }
 0x429   : > { %v4954_v60 = vmax.f32 %v4946_v62, 0.0  ;;  %v4944_v42 = vadd.f32 %v11418_v38, %v4929_v45  ;;  %v11861_v31 = vpack.c.bf16 %v4951_v8, %v4951_v8  ;;  %v17101_v47 = vsel %vm15084_vm6, 4294967295, %v17100_v47  ;;  %v5138_v62 = vld [vmem:[#allocation4 + $0x8] sm:$0x7] }
 0x42a   : > { %v5036_v46 = vshll.u32 %v11432_v33, 16  ;;  %v11431_v4 = vcombine.low %v5015_v36, %v5015_v36  ;;  %v5052_v11 = vrot.slane %v11432_v33, 1  ;;  %17102 = vst [vmem:[#allocation23_spill] sm:$0xff] %v17101_v47 }
 0x42b   : > { %v11864_v1 = vpack.c.bf16 %v4954_v60, %v4954_v60  ;;  %v4952_v50 = vmax.f32 %v4944_v42, 0.0  ;;  %v5135_v42 = vld [vmem:[#allocation4 + $0x4] sm:$0x7] }
 0x42c   : > { %v5038_v19 = vrot.slane %v5036_v46, 1  ;;  %v5032_v23 = vshll.u32 %v11431_v4, 16  ;;  %v5056_v12 = vrot.slane %v5036_v46, 2  ;;  %v5051_v39 = vrot.slane %v11431_v4, 1 }
 0x42d   : > { %v4990_v17 = vmax.bf16 %v11864_v1, %v11863_v55  ;;  %v11862_v30 = vpack.c.bf16 %v4952_v50, %v4952_v50 }
 0x42e   : > { %v5064_v53 = vsel %vm14490_vm9, %v5016_v51, %v5038_v19  ;;  %v5034_v13 = vrot.slane %v5032_v23, 1  ;;  %v5055_v54 = vrot.slane %v5032_v23, 2 }
 0x42f   : > { %v5073_v52 = vsel %vm17029_vm5, %v5064_v53, %v5052_v11  ;;  %v5007_v38 = vshrl.u32 %v4990_v17, 16  ;;  %v4989_v61 = vmax.bf16 %v11862_v30, %v11861_v31 }
 0x430   : > { %v5084_v22 = vsel %vm14495_vm13, %v5073_v52, %v5056_v12  ;;  %v5063_v6 = vsel %vm14490_vm9, %v5015_v36, %v5034_v13 }
 0x431   : > { %v11436_v56 = vcombine.low %v5084_v22, %v5084_v22  ;;  %v5069_v63 = vsel %vm17029_vm5, %v5063_v6, %v5051_v39  ;;  %v5018_v44 = vmax.bf16 %v5007_v38, %v4990_v17  ;;  %v5002_v10 = vshrl.u32 %v4989_v61, 16  ;;  %v5144_v6 = vld [vmem:[#allocation4 + $0x10] sm:$0x7] }
 0x432   : > { %v5083_v14 = vsel %vm14495_vm13, %v5069_v63, %v5055_v54 }
 0x433   : > { %v5107_v40 = vshrl.u32 %v11436_v56, 16  ;;  %v11435_v15 = vcombine.low %v5083_v14, %v5083_v14  ;;  %v11434_v25 = vcombine.low %v5018_v44, %v5018_v44  ;;  %v5017_v2 = vmax.bf16 %v5002_v10, %v4989_v61  ;;  %v5141_v10 = vld [vmem:[#allocation4 + $0xc] sm:$0x7] }
 0x434   : > { %v5110_v51 = vshll.u32 %v11436_v56, 16 }
 0x435   : > { %v5109_v58 = vrot.slane %v5107_v40, 7  ;;  %v5100_v9 = vshrl.u32 %v11435_v15, 16  ;;  %v5044_v57 = vshll.u32 %v11434_v25, 16  ;;  %v11433_v45 = vcombine.low %v5017_v2, %v5017_v2 }
 0x436   : > { %v5103_v8 = vshll.u32 %v11435_v15, 16  ;;  %v5054_v46 = vrot.slane %v11434_v25, 1 }
 0x437   : > { %v5112_v33 = vor.u32 %v5110_v51, %v5109_v58  ;;  %v5102_v36 = vrot.slane %v5100_v9, 7  ;;  %v5046_v60 = vrot.slane %v5044_v57, 1  ;;  %v5040_v4 = vshll.u32 %v11433_v45, 16 }
 0x438   : > { %v5058_v50 = vrot.slane %v5044_v57, 2  ;;  %v5053_v30 = vrot.slane %v11433_v45, 1 }
 0x439   : > { %v5139_v55 = vsel %vm15084_vm6, %v5112_v33, %v5138_v62  ;;  %v5105_v1 = vor.u32 %v5103_v8, %v5102_v36  ;;  %v5066_v19 = vsel %vm14490_vm9, %v5018_v44, %v5046_v60  ;;  %v5042_v11 = vrot.slane %v5040_v4, 1 }
 0x43a   : > { %5140 = vst [vmem:[#allocation4 + $0x8] sm:$0x7] %v5139_v55  ;;  %v5081_v23 = vsel %vm17029_vm5, %v5066_v19, %v5054_v46  ;;  %v5057_v53 = vrot.slane %v5040_v4, 2 }
 0x43b   : > { %v5136_v31 = vsel %vm15084_vm6, %v5105_v1, %v5135_v42  ;;  %v5086_v17 = vsel %vm14495_vm13, %v5081_v23, %v5058_v50  ;;  %v5065_v13 = vsel %vm14490_vm9, %v5017_v2, %v5042_v11 }
 0x43c   : > { %5137 = vst [vmem:[#allocation4 + $0x4] sm:$0x7] %v5136_v31  ;;  %v11438_v12 = vcombine.low %v5086_v17, %v5086_v17  ;;  %v5077_v52 = vsel %vm17029_vm5, %v5065_v13, %v5053_v30  ;;  %vm17161_vm5 = vcmask 23552  }
 0x43d   : > { %v5085_v38 = vsel %vm14495_vm13, %v5077_v52, %v5057_v53  ;;  %v6846_v52 = vld [vmem:[#allocation2 + $0xb4] sm:$0xf] }
 0x43e   : > { %v5121_v39 = vshrl.u32 %v11438_v12, 16  ;;  %v11437_v61 = vcombine.low %v5085_v38, %v5085_v38  ;;  %v5124_v54 = vshll.u32 %v11438_v12, 16 }
 0x440   : > { %v5123_v22 = vrot.slane %v5121_v39, 7  ;;  %v5114_v56 = vshrl.u32 %v11437_v61, 16  ;;  %v5117_v63 = vshll.u32 %v11437_v61, 16  ;;  %v6847_v39 = vld [vmem:[#allocation2 + $0xb8] sm:$0xf] }
 0x441   : > { %v12627_v14 = vld [vmem:[#allocation4 + $0x8] ss:$0 sps:$4 sm:$0x66]  }
 0x442   : > { %v5126_v44 = vor.u32 %v5124_v54, %v5123_v22  ;;  %v12628_v40 = vld [vmem:[#allocation4 + $0x8] ss:$0 sps:$4 sm:$0x66]   ;;  %v5116_v15 = vrot.slane %v5114_v56, 7  ;;  %v5331_v58 = vrot.slane %v12627_v14, 1  ;;  %v15116_v14 = vcombine.low %v6846_v52, %v6847_v39 }
 0x443   : > { %v12629_v25 = vld [vmem:[#allocation4 + $0x8] ss:$0 sps:$4 sm:$0x66]   ;;  %v5221_v51 = vrot.slane %v12628_v40, 1  ;;  %v7830_v52 = vld [vmem:[#allocation2 + $0x18] sm:$0xf] }
 0x444   : > { %v5145_v2 = vsel %vm15084_vm6, %v5126_v44, %v5144_v6  ;;  %v5119_v9 = vor.u32 %v5117_v63, %v5116_v15  ;;  %v12630_v57 = vld [vmem:[#allocation4 + $0x4] ss:$0 sps:$4 sm:$0x66]   ;;  %5336 = vrot.lane.b32.xlu1 %v5331_v58, %s12899_s25  ;;  %v12631_v62 = vld [vmem:[#allocation4 + $0x8] ss:$0 sps:$4 sm:$0x77]  }
 0x445   : > { %5146 = vst [vmem:[#allocation4 + $0x10] sm:$0x7] %v5145_v2  ;;  %5227 = vrot.lane.b32.xlu0 %v5221_v51, %s12899_s25  ;;  %v12632_v45 = vld [vmem:[#allocation4 + $0x4] ss:$0 sps:$4 sm:$0x66]   ;;  %v5609_v8 = vrot.slane %v12629_v25, 1 }
 0x446   : > { %v5142_v33 = vsel %vm15084_vm6, %v5119_v9, %v5141_v10  ;;  %v12633_v36 = vld [vmem:[#allocation4 + $0x4] ss:$0 sps:$4 sm:$0x77]   ;;  %v5330_v60 = vrot.slane %v12630_v57, 1  ;;  %v5188_v42 = vshll.u32 %v12631_v62, 16  ;;  %v5186_v46 = vshrl.u32 %v12631_v62, 16  ;;  %v15114_v10 = vpop.permute.xlu0 %5199 }
 0x447   : > { %5143 = vst [vmem:[#allocation4 + $0xc] sm:$0x7] %v5142_v33  ;;  %v5285_v4 = vshll.u32 %v12633_v36, 16  ;;  %v12634_v55 = vld [vmem:[#allocation4 + $0x8] ss:$0 sps:$4 sm:$0x77]  }
 0x448   : > { %5613 = vrot.lane.b32.xlu1 %v5609_v8, %s12899_s25  ;;  %v5190_v1 = vrot.slane %v5188_v42, 1  ;;  %v12635_v50 = vld [vmem:[#allocation4 + $0x8] ss:$0 sps:$4 sm:$0x77]   ;;  %v5292_v19 = vshll.u32 %v12634_v55, 16  ;;  %v5220_v11 = vrot.slane %v12632_v45, 1 }
 0x449   : > { %5334 = vrot.lane.b32.xlu0 %v5330_v60, %s12899_s25  ;;  %v5287_v31 = vrot.slane %v5285_v4, 1  ;;  %v5564_v17 = vshll.u32 %v12635_v50, 16  ;;  %v12637_v30 = vld [vmem:[#allocation4 + $0x4] ss:$0 sps:$4 sm:$0x77]   ;;  %v5283_v53 = vshrl.u32 %v12633_v36, 16 }
 0x44a   : > { %v5191_v23 = vor.u32 %v5190_v1, %v5186_v46  ;;  %v5294_v12 = vrot.slane %v5292_v19, 1  ;;  %v5290_v13 = vshrl.u32 %v12634_v55, 16  ;;  %v5181_v6 = vshll.u32 %v12637_v30, 16  ;;  %17103 = vst [vmem:[#allocation25_spill] sm:$0xff] %v15116_v14  ;;  %v6208_v57 = vld [vmem:[#allocation2] sm:$0xf]  ;;  %v15125_v46 = vpop.permute.xlu0 %5223 }
 0x44b   : > { %v5566_v38 = vrot.slane %v5564_v17, 1  ;;  %v5288_v22 = vor.u32 %v5287_v31, %v5283_v53  ;;  %v5562_v63 = vshrl.u32 %v12635_v50, 16  ;;  %v15118_v58 = vld [vmem:[#allocation2 + $0xbc] ss:$0 sps:$4 sm:$0x11]   ;;  %v5179_v51 = vshrl.u32 %v12637_v30, 16 }
 0x44c   : > { %5225 = vrot.lane.b32.xlu1 %v5220_v11, %s12899_s25  ;;  %v5295_v54 = vor.u32 %v5294_v12, %v5290_v13  ;;  %v5183_v25 = vrot.slane %v5181_v6, 1  ;;  %v12639_v62 = vld [vmem:[#allocation4 + $0x10] ss:$0 sps:$4 sm:$0x66]   ;;  %v7181_v45 = vshll.u32 %v15116_v14, 16  ;;  %v7179_v55 = vshrl.u32 %v15116_v14, 16 }
 0x44d   : > { %5203 = vrot.lane.b32.xlu0 %v5191_v23, %s12898_s24  ;;  %v5567_v40 = vor.u32 %v5566_v38, %v5562_v63  ;;  %v15123_v33 = vld [vmem:[#allocation2 + $0x4] sm:$0xf]  ;;  %v12645_v42 = vld [vmem:[#allocation4 + $0x10] ss:$0 sps:$4 sm:$0x77]   ;;  %v7186_v1 = vshll.u32 %v15118_v58, 16 }
 0x44e   : > { %v12636_v61 = vld [vmem:[#allocation4 + $0xc] ss:$0 sps:$4 sm:$0x66]   ;;  %v5184_v36 = vor.u32 %v5183_v25, %v5179_v51  ;;  %v12641_v4 = vld [vmem:[#allocation4 + $0x14] ss:$0 sps:$4 sm:$0x66]   ;;  %v15132_v11 = vcombine.low %v6208_v57, %v15123_v33 }
 0x44f   : > { %v12638_v56 = vld [vmem:[#allocation4 + $0xc] ss:$0 sps:$4 sm:$0x77]   ;;  %v5332_v15 = vrot.slane %v12636_v61, 1  ;;  %v7183_v19 = vrot.slane %v7181_v45, 1  ;;  %v5333_v31 = vrot.slane %v12639_v62, 1  ;;  %v15138_v61 = vpop.permute.xlu0 %7202 }
 0x450   : > { %5312 = vrot.lane.b32.xlu1 %v5295_v54, %s12898_s24  ;;  %v5299_v44 = vshll.u32 %v12638_v56, 16  ;;  %v5297_v9 = vshrl.u32 %v12638_v56, 16  ;;  %v12640_v60 = vld [vmem:[#allocation4 + $0xc] ss:$0 sps:$4 sm:$0x66]   ;;  %17104 = vst [vmem:[#allocation26_spill] sm:$0xff] %v15132_v11 }
 0x451   : > { %5310 = vrot.lane.b32.xlu0 %v5288_v22, %s12898_s24  ;;  %v12642_v50 = vld [vmem:[#allocation4 + $0xc] ss:$0 sps:$4 sm:$0x66]   ;;  %v6880_v23 = vld [vmem:[#allocation2 + $0xb4] sm:$0xe]  ;;  %v5610_v17 = vrot.slane %v12640_v60, 1  ;;  %v7184_v22 = vor.u32 %v7183_v19, %v7179_v55 }
 0x452   : > { %v5301_v2 = vrot.slane %v5299_v44, 1  ;;  %v5306_v30 = vshll.u32 %v12645_v42, 16  ;;  %v12647_v12 = vld [vmem:[#allocation4 + $0x10] ss:$0 sps:$4 sm:$0x77]   ;;  %v5612_v53 = vrot.slane %v12641_v4, 1  ;;  %v11582_v13 = vcombine.low %v6880_v23, %v6847_v39 }
 0x453   : > { %v15136_v38 = vld [vmem:[#allocation2 + $0x1c] sm:$0xf]  ;;  %v7188_v54 = vrot.slane %v7186_v1, 1  ;;  %v15140_v6 = vld [vmem:[#allocation2 + $0x8] ss:$0 sps:$4 sm:$0x11]   ;;  %v15154_v55 = vpop.permute.xlu0 %7330 }
 0x454   : > { %5589 = vrot.lane.b32.xlu1 %v5567_v40, %s12898_s24  ;;  %v5302_v8 = vor.u32 %v5301_v2, %v5297_v9  ;;  %v6403_v56 = vshll.u32 %v15132_v11, 16  ;;  %v5222_v63 = vrot.slane %v12642_v50, 1  ;;  %v5308_v44 = vrot.slane %v5306_v30, 1  ;;  %v6256_v45 = vld [vmem:[#allocation2] sm:$0xe] }
 0x455   : > { %5338 = vrot.lane.b32.xlu0 %v5332_v15, %s12899_s25  ;;  %v5578_v40 = vshll.u32 %v12647_v12, 16  ;;  %v15144_v15 = vcombine.low %v7830_v52, %v15136_v38  ;;  %v5304_v39 = vshrl.u32 %v12645_v42, 16  ;;  %v7324_v25 = vrot.slane %v11582_v13, 1  ;;  %v6848_v60 = vld [vmem:[#allocation2 + $0xc0] sm:$0xf] }
 0x456   : > { %v7325_v2 = vrot.slane %v15118_v58, 1  ;;  %v7189_v51 = vsel %vm1071_vm15, %v7184_v22, %v7188_v54  ;;  %v6401_v9 = vshrl.u32 %v15132_v11, 16  ;;  %v6405_v57 = vrot.slane %v6403_v56, 1  ;;  %v15152_v4 = vld [vmem:[#allocation2 + $0xc4] sm:$0xf] }
 0x457   : > { %17105 = vst [vmem:[#allocation27_spill] sm:$0xff] %v15144_v15  ;;  %v6408_v62 = vshll.u32 %v15140_v6, 16  ;;  %v15156_v1 = vld [vmem:[#allocation2 + $0x20] ss:$0 sps:$4 sm:$0x11]   ;;  %v8025_v42 = vshll.u32 %v15144_v15, 16 }
 0x458   : > { %5201 = vrot.lane.b32.xlu1 %v5184_v36, %s12898_s24  ;;  %v5309_v36 = vor.u32 %v5308_v44, %v5304_v39  ;;  %v7326_v58 = vsel %vm1344_vm14, %v7324_v25, %v7325_v2  ;;  %v5576_v50 = vshrl.u32 %v12647_v12, 16  ;;  %v6406_v19 = vor.u32 %v6405_v57, %v6401_v9  ;;  %v6212_v30 = vld [vmem:[#allocation2 + $0x18] sm:$0xf]  ;;  %v12655_v22 = vld [vmem:[#allocation4 + $0xc] ss:$0 sps:$4 sm:$0x77]  }
 0x459   : > { %5314 = vrot.lane.b32.xlu0 %v5302_v8, %s12898_s24  ;;  %v5580_v8 = vrot.slane %v5578_v40, 1  ;;  %v6410_v23 = vrot.slane %v6408_v62, 1  ;;  %v12650_v52 = vld [vmem:[#allocation4 + $0x10] ss:$0 sps:$4 sm:$0x66]   ;;  %v8023_v54 = vshrl.u32 %v15144_v15, 16  ;;  %v15175_v40 = vpop.permute.xlu0 %7206 }
 0x45a   : > { %v8027_v56 = vrot.slane %v8025_v42, 1  ;;  %v7878_v12 = vld [vmem:[#allocation2 + $0x18] sm:$0xe]  ;;  %v15173_v44 = vld [vmem:[#allocation2 + $0xc8] ss:$0 sps:$4 sm:$0x11]  }
 0x45b   : > { %v5581_v13 = vor.u32 %v5580_v8, %v5576_v50  ;;  %v6411_v39 = vsel %vm1071_vm15, %v6406_v19, %v6410_v23  ;;  %v6210_v9 = vld [vmem:[#allocation2 + $0xc] sm:$0xf]  ;;  %v15182_v57 = vld [vmem:[#allocation2 + $0x10] sm:$0xf]  ;;  %v5611_v62 = vrot.slane %v12650_v52, 1  ;;  %v7198_v50 = vshll.u32 %v15173_v44, 16 }
 0x45c   : > { %5340 = vrot.lane.b32.xlu1 %v5333_v31, %s12899_s25  ;;  %v11520_v31 = vcombine.low %v6256_v45, %v15123_v33  ;;  %v6673_v33 = vrot.slane %v15140_v6, 1  ;;  %v5195_v45 = vshll.u32 %v12655_v22, 16  ;;  %v8028_v6 = vor.u32 %v8027_v56, %v8023_v54  ;;  %v15187_v42 = vld [vmem:[#allocation2 + $0x20] ss:$0 sps:$4 sm:$0x11]  }
 0x45d   : > { %5615 = vrot.lane.b32.xlu0 %v5610_v17, %s12899_s25  ;;  %v15164_v17 = vcombine.low %v6848_v60, %v15152_v4  ;;  %v11652_v60 = vcombine.low %v7878_v12, %v15136_v38  ;;  %v6881_v19 = vld [vmem:[#allocation2 + $0xc0] sm:$0xe]  ;;  %v15194_v23 = vcombine.low %v6210_v9, %v15182_v57  ;;  %v7834_v38 = vld [vmem:[#allocation2 + $0x30] sm:$0xf]  ;;  %v15198_v52 = vld [vmem:[#allocation2 + $0x34] sm:$0xf] }
 0x45e   : > { %v6672_v25 = vrot.slane %v11520_v31, 1  ;;  %v5197_v54 = vrot.slane %v5195_v45, 1  ;;  %v8295_v56 = vrot.slane %v15156_v1, 1  ;;  %v12720_v12 = vld [vmem:[%s16946_s6 + $0x28] sm:$0xff]  }
 0x45f   : > { %17106 = vst [vmem:[#allocation28_spill] sm:$0xff] %v15164_v17  ;;  %v7193_v2 = vshll.u32 %v15164_v17, 16  ;;  %17108 = vst [vmem:[#allocation30_spill] sm:$0xff] %v15194_v23  ;;  %v8294_v9 = vrot.slane %v11652_v60, 1  ;;  %v6415_v45 = vshll.u32 %v15194_v23, 16 }
 0x460   : > { %5229 = vrot.lane.b32.xlu1 %v5222_v63, %s12899_s25  ;;  %v8030_v63 = vshll.u32 %v15156_v1, 16  ;;  %v6674_v31 = vsel %vm1344_vm14, %v6672_v25, %v6673_v33  ;;  %v6432_v33 = vshll.u32 %v15187_v42, 16  ;;  %v15208_v25 = vld [vmem:[#allocation2 + $0x14] ss:$0 sps:$4 sm:$0x11]   ;;  %v11583_v1 = vcombine.low %v6881_v19, %v15152_v4 }
 0x461   : > { %5619 = vrot.lane.b32.xlu0 %v5612_v53, %s12899_s25  ;;  %v15166_v53 = vld [vmem:[#allocation2 + $0x1c] sm:$0xf]  ;;  %v7832_v19 = vld [vmem:[#allocation2 + $0x24] sm:$0xf] }
 0x462   : > { %v8032_v8 = vrot.slane %v8030_v63, 1  ;;  %v15201_v63 = vpop.permute.xlu0 %7334 }
 0x464   : > { %5316 = vrot.lane.b32.xlu1 %v5309_v36, %s12898_s24  ;;  %v15184_v36 = vpop.permute.xlu1 %7204 }
 0x465   : > { %7230 = vrot.lane.b32.xlu0 %v7189_v51, %s12895_s16  ;;  %v15180_v51 = vcombine.low %v6212_v30, %v15166_v53  ;;  %v7195_v30 = vrot.slane %v7193_v2, 1  ;;  %v5193_v2 = vshrl.u32 %v12655_v22, 16  ;;  %v16980_v22 = vmov 0.0  }
 0x466   : > { %12173 = vmatprep.subr.bf16.mxu1 %v16980_v22  ;;  %12193 = vmatprep.subr.bf16.mxu0 %v16980_v22 }
 0x467   : > { %17107 = vst [vmem:[#allocation29_spill] sm:$0xff] %v15180_v51  ;;  %v6425_v20 = vshrl.u32 %v15180_v51, 16  ;;  %v5198_v4 = vor.u32 %v5197_v54, %v5193_v2  ;;  %12174 = vmatpush3.bf16.msra.mxu1 %v12720_v12  ;;  %v7327_v54 = vrot.slane %v11583_v1, 1  ;;  %v6413_v12 = vshrl.u32 %v15194_v23, 16  ;;  %v15242_v2 = vpop.permute.xlu0 %7210 }
 0x468   : > { %5593 = vrot.lane.b32.xlu1 %v5581_v13, %s12898_s24  ;;  %v6427_v13 = vshll.u32 %v15180_v51, 16  ;;  %v15215_v47 = vpop.permute.xlu1 %7332  ;;  %12175 = vmatprep.subr.bf16.mxu1 %v16980_v22  ;;  %v6679_v1 = vrot.slane %v15187_v42, 1 }
 0x469   : > { %7358 = vrot.lane.b32.xlu0 %v7326_v58, %s12894_s15  ;;  %v7191_v58 = vshrl.u32 %v15164_v17, 16 }
 0x46b   : > { %v7196_v60 = vor.u32 %v7195_v30, %v7191_v58  ;;  %v6434_v58 = vrot.slane %v6432_v33, 1  ;;  %v6417_v33 = vrot.slane %v6415_v45, 1  ;;  %v12728_v45 = vld [vmem:[%s16946_s6 + $0x18] sm:$0xff]   ;;  %v15271_v15 = vpop.permute.xlu0 %7338 }
 0x46c   : > { %5617 = vrot.lane.b32.xlu1 %v5611_v62, %s12899_s25  ;;  %v6258_v62 = vld [vmem:[#allocation2 + $0x18] sm:$0xe]  ;;  %17113 = vst [vmem:[#allocation34_spill] sm:$0xff] %v15271_v15 }
 0x46d   : > { %6592 = vrot.lane.b32.xlu0 %v6411_v39, %s12895_s16  ;;  %v8033_v39 = vsel %vm1071_vm15, %v8028_v6, %v8032_v8  ;;  %v15218_v6 = vcombine.low %v7834_v38, %v15198_v52  ;;  %v12747_v8 = vld [vmem:[%s16946_s6 + $0x40] sm:$0xff]   ;;  %v11522_v30 = vcombine.low %v6258_v62, %v15166_v53  ;;  %v8296_v53 = vsel %vm1344_vm14, %v8294_v9, %v8295_v56 }
 0x46e   : > { %v12724_v38 = vld [vmem:[%s16946_s6 + $0x20] sm:$0xff]   ;;  %12194 = vmatpush3.bf16.msra.mxu0 %v12747_v8  ;;  %v6418_v42 = vor.u32 %v6417_v33, %v6413_v12  ;;  %v6676_v12 = vrot.slane %v15208_v25, 1 }
 0x46f   : > { %17109 = vst [vmem:[#allocation31_spill] sm:$0xff] %v15218_v6  ;;  %12195 = vmatprep.subr.bf16.mxu0 %v16980_v22  ;;  %v15247_v22 = vcombine.low %v7832_v19, %v15226_v59  ;;  %12176 = vmatpush3.bf16.msra.mxu1 %v12724_v38  ;;  %v6678_v56 = vrot.slane %v11522_v30, 1  ;;  %v11521_v19 = vcombine.low %v6257_v27, %v15182_v57  ;;  %v7880_v38 = vld [vmem:[#allocation2 + $0x30] sm:$0xe] }
 0x470   : > { %7356 = vrot.lane.b32.xlu1 %v15069_v29, %s12894_s15  ;;  %v6429_v29 = vrot.slane %v6427_v13, 1  ;;  %v6420_v13 = vshll.u32 %v15208_v25, 16  ;;  %v11654_v33 = vcombine.low %v7880_v38, %v15198_v52  ;;  %v7879_v25 = vld [vmem:[#allocation2 + $0x24] sm:$0xe] }
 0x471   : > { %6720 = vrot.lane.b32.xlu0 %v6674_v31, %s12894_s15  ;;  %v7200_v31 = vrot.slane %v7198_v50, 1  ;;  %v7328_v50 = vrot.slane %v15173_v44, 1  ;;  %v8049_v44 = vshll.u32 %v15218_v6, 16  ;;  %17110 = vst [vmem:[#allocation32_spill] sm:$0xff] %v15247_v22  ;;  %v8037_v17 = vshll.u32 %v15247_v22, 16 }
 0x472   : > { %v6430_v8 = vor.u32 %v6429_v29, %v6425_v20  ;;  %v6422_v9 = vrot.slane %v6420_v13, 1  ;;  %v8047_v20 = vshrl.u32 %v15218_v6, 16  ;;  %v15268_v6 = vld [vmem:[#allocation2 + $0x2c] ss:$0 sps:$4 sm:$0x11]   ;;  %v6680_v27 = vsel %vm1344_vm14, %v6678_v56, %v6679_v1 }
 0x473   : > { %v7201_v62 = vsel %vm1071_vm15, %v7196_v60, %v7200_v31  ;;  %v8054_v60 = vshll.u32 %v15234_v48, 16  ;;  %v17111_v31 = vmov 0.0   ;;  %v8051_v29 = vrot.slane %v8049_v44, 1  ;;  %v15301_v38 = vld [vmem:[#allocation2 + $0x2c] ss:$0 sps:$4 sm:$0x11]  }
 0x474   : > { %5205 = vrot.lane.b32.xlu1 %v5198_v4, %s12898_s24  ;;  %v15252_v4 = vpop.permute.xlu1 %7208  ;;  %12177 = vmatprep.subr.bf16.mxu1 %v17111_v31  ;;  %v6435_v30 = vsel %vm1071_vm15, %v6430_v8, %v6434_v58  ;;  %v7329_v13 = vsel %vm1344_vm14, %v7327_v54, %v7328_v50  ;;  %v15278_v58 = vld [vmem:[#allocation2 + $0x38] ss:$0 sps:$4 sm:$0x11]   ;;  %v6423_v50 = vsel %vm1071_vm15, %v6418_v42, %v6422_v9  ;;  %v6675_v44 = vrot.slane %v11521_v19, 1  ;;  %v15296_v9 = vld [vmem:[#allocation2 + $0x4c] sm:$0xf] }
 0x475   : > { %8214 = vrot.lane.b32.xlu0 %v8033_v39, %s12895_s16  ;;  %v6216_v39 = vld [vmem:[#allocation2 + $0x30] sm:$0xf]  ;;  %12178 = vmatpush3.bf16.msra.mxu1 %v12728_v45  ;;  %v8056_v57 = vrot.slane %v8054_v60, 1  ;;  %v8052_v54 = vor.u32 %v8051_v29, %v8047_v20  ;;  %v8039_v1 = vrot.slane %v8037_v17, 1  ;;  %v8042_v45 = vshll.u32 %v15268_v6, 16 }
 0x476   : > { %v15264_v3 = vcombine.low %v6216_v39, %v15249_v0  ;;  %12179 = vmatprep.mubr.msk.bf16.mxu1 %vm17030_vm12, %v17111_v31  ;;  %12183 = vmatprep.subr.bf16.mxu1 %v17111_v31  ;;  %v8035_v39 = vshrl.u32 %v15247_v22, 16  ;;  %v7838_v60 = vld [vmem:[#allocation2 + $0x48] sm:$0xf]  ;;  %v8300_v20 = vrot.slane %v11654_v33, 1  ;;  %v8301_v42 = vrot.slane %v15234_v48, 1  ;;  %v15308_v33 = vpop.permute.xlu0 %7214 }
 0x477   : > { %12199 = vmatprep.mubr.msk.bf16.mxu0 %vm17030_vm12, %v17111_v31  ;;  %v6456_v29 = vshll.u32 %v15278_v58, 16  ;;  %v11653_v19 = vcombine.low %v7879_v25, %v15226_v59  ;;  %v8057_v17 = vsel %vm1071_vm15, %v8052_v54, %v8056_v57  ;;  %17115 = vst [vmem:[#allocation36_spill] sm:$0xff] %v15308_v33  ;;  %v7836_v48 = vld [vmem:[#allocation2 + $0x3c] sm:$0xf]  ;;  %v15310_v22 = vld [vmem:[#allocation2 + $0x40] sm:$0xf] }
 0x478   : > { %7232 = vrot.lane.b32.xlu1 %v7201_v62, %s12895_s16  ;;  %17112 = vst [vmem:[#allocation33_spill] sm:$0xff] %v15264_v3  ;;  %v15273_v62 = vld [vmem:[#allocation2 + $0x28] sm:$0xf]  ;;  %v15286_v8 = vpop.permute.xlu1 %7336  ;;  %v6451_v52 = vshll.u32 %v15264_v3, 16  ;;  %v8040_v23 = vor.u32 %v8039_v1, %v8035_v39  ;;  %v8044_v59 = vrot.slane %v8042_v45, 1  ;;  %v8302_v57 = vsel %vm1344_vm14, %v8300_v20, %v8301_v42  ;;  %v12760_v39 = vld [vmem:[%s16946_s6 + $0x38] sm:$0xff]  }
 0x479   : > { %8342 = vrot.lane.b32.xlu0 %v8296_v53, %s12894_s15  ;;  %v6214_v53 = vld [vmem:[#allocation2 + $0x24] sm:$0xf]  ;;  %v6260_v25 = vld [vmem:[#allocation2 + $0x30] sm:$0xe]  ;;  %v8298_v54 = vrot.slane %v15268_v6, 1  ;;  %v6458_v45 = vrot.slane %v6456_v29, 1  ;;  %12196 = vmatpush3.bf16.msra.mxu0 %v12760_v39 }
 0x47a   : > { %v15292_v56 = vcombine.low %v6214_v53, %v15273_v62  ;;  %v6453_v53 = vrot.slane %v6451_v52, 1  ;;  %v15323_v52 = vcombine.low %v7836_v48, %v15310_v22  ;;  %v6444_v20 = vshll.u32 %v15301_v38, 16  ;;  %v6220_v6 = vld [vmem:[#allocation2 + $0x48] sm:$0xf]  ;;  %v15332_v42 = vld [vmem:[#allocation2 + $0x4c] sm:$0xf]  ;;  %12197 = vmatprep.subr.bf16.mxu0 %v17111_v31 }
 0x47b   : > { %v7882_v29 = vld [vmem:[#allocation2 + $0x48] sm:$0xe] }
 0x47c   : > { %7360 = vrot.lane.b32.xlu1 %v7329_v13, %s12894_s15  ;;  %17114 = vst [vmem:[#allocation35_spill] sm:$0xff] %v15292_v56  ;;  %v6449_v13 = vshrl.u32 %v15264_v3, 16  ;;  %v6439_v35 = vshll.u32 %v15292_v56, 16  ;;  %17118 = vst [vmem:[#allocation39_spill] sm:$0xff] %v15323_v52  ;;  %v6437_v48 = vshrl.u32 %v15292_v56, 16 }
 0x47d   : > { %6596 = vrot.lane.b32.xlu0 %v6435_v30, %s12895_s16  ;;  %v6677_v30 = vsel %vm1344_vm14, %v6675_v44, %v6676_v12  ;;  %v8297_v12 = vrot.slane %v11653_v19, 1  ;;  %v15320_v44 = vld [vmem:[#allocation2 + $0x50] ss:$0 sps:$4 sm:$0x11]   ;;  %v8045_v19 = vsel %vm1071_vm15, %v8040_v23, %v8044_v59  ;;  %v8061_v23 = vshll.u32 %v15323_v52, 16 }
 0x47e   : > { %v6454_v1 = vor.u32 %v6453_v53, %v6449_v13  ;;  %v6441_v3 = vrot.slane %v6439_v35, 1  ;;  %v15338_v13 = vpop.permute.xlu0 %7342  ;;  %v15342_v53 = vld [vmem:[#allocation2 + $0x44] ss:$0 sps:$4 sm:$0x11]   ;;  %v15346_v59 = vcombine.low %v6220_v6, %v15332_v42  ;;  %v6218_v6 = vld [vmem:[#allocation2 + $0x3c] sm:$0xf] }
 0x47f   : > { %17119 = vst [vmem:[#allocation40_spill] sm:$0xff] %v15338_v13 }
 0x480   : > { %6594 = vrot.lane.b32.xlu1 %v6423_v50, %s12895_s16  ;;  %v15316_v50 = vpop.permute.xlu1 %7212  ;;  %17120 = vst [vmem:[#allocation41_spill] sm:$0xff] %v15346_v59  ;;  %v6459_v35 = vsel %vm1071_vm15, %v6454_v1, %v6458_v45  ;;  %v8063_v1 = vrot.slane %v8061_v23, 1  ;;  %v8066_v45 = vshll.u32 %v15342_v53, 16  ;;  %v15372_v23 = vld [vmem:[#allocation2 + $0x50] ss:$0 sps:$4 sm:$0x11]  }
 0x481   : > { %6724 = vrot.lane.b32.xlu0 %v6680_v27, %s12894_s15  ;;  %v15314_v27 = vcombine.low %v7838_v60, %v15296_v9  ;;  %17117 = vst [vmem:[#allocation38_spill] sm:$0xff] %v15316_v50  ;;  %v11524_v60 = vcombine.low %v6260_v25, %v15249_v0  ;;  %v8299_v0 = vsel %vm1344_vm14, %v8297_v12, %v8298_v54  ;;  %v6446_v25 = vrot.slane %v6444_v20, 1  ;;  %v7890_v50 = vld [vmem:[#allocation2 + $0xa8] sm:$0xe] }
 0x482   : > { %v8078_v12 = vshll.u32 %v15320_v44, 16  ;;  %v6442_v54 = vor.u32 %v6441_v3, %v6437_v48  ;;  %v15368_v20 = vcombine.low %v6218_v6, %v15356_v18 }
 0x483   : > { %17116 = vst [vmem:[#allocation37_spill] sm:$0xff] %v15314_v27  ;;  %v8073_v51 = vshll.u32 %v15314_v27, 16  ;;  %v8071_v56 = vshrl.u32 %v15314_v27, 16  ;;  %v6473_v27 = vshrl.u32 %v15346_v59, 16 }
 0x484   : > { %6722 = vrot.lane.b32.xlu1 %v6677_v30, %s12894_s15  ;;  %v6259_v30 = vld [vmem:[#allocation2 + $0x24] sm:$0xe]  ;;  %v15351_v39 = vpop.permute.xlu1 %7340  ;;  %17123 = vst [vmem:[#allocation44_spill] sm:$0xff] %v15368_v20 }
 0x485   : > { %8218 = vrot.lane.b32.xlu0 %v8057_v17, %s12895_s16  ;;  %v6685_v17 = vrot.slane %v15278_v58, 1  ;;  %v6684_v58 = vrot.slane %v11524_v60, 1  ;;  %17121 = vst [vmem:[#allocation42_spill] sm:$0xff] %v15351_v39  ;;  %v8075_v14 = vrot.slane %v8073_v51, 1  ;;  %v11523_v11 = vcombine.low %v6259_v30, %v15273_v62  ;;  %v15365_v62 = vpop.permute.xlu0 %7218 }
 0x486   : > { %v6475_v60 = vshll.u32 %v15346_v59, 16  ;;  %v8080_v51 = vrot.slane %v8078_v12, 1  ;;  %17122 = vst [vmem:[#allocation43_spill] sm:$0xff] %v15365_v62  ;;  %v8068_v12 = vrot.slane %v8066_v45, 1  ;;  %v15391_v45 = vld [vmem:[#allocation2 + $0x64] sm:$0xf] }
 0x487   : > { %v6686_v3 = vsel %vm1344_vm14, %v6684_v58, %v6685_v17  ;;  %v8076_v48 = vor.u32 %v8075_v14, %v8071_v56  ;;  %v6681_v30 = vrot.slane %v11523_v11, 1  ;;  %v7881_v17 = vld [vmem:[#allocation2 + $0x3c] sm:$0xe]  ;;  %v6463_v14 = vshll.u32 %v15368_v20, 16  ;;  %v7840_v11 = vld [vmem:[#allocation2 + $0x54] sm:$0xf] }
 0x488   : > { %8216 = vrot.lane.b32.xlu1 %v8045_v19, %s12895_s16  ;;  %v8059_v19 = vshrl.u32 %v15323_v52, 16  ;;  %v15374_v52 = vpop.permute.xlu1 %7216  ;;  %v6477_v6 = vrot.slane %v6475_v60, 1  ;;  %v15383_v56 = vld [vmem:[#allocation2 + $0x58] sm:$0xf] }
 0x489   : > { %8346 = vrot.lane.b32.xlu0 %v8302_v57, %s12894_s15  ;;  %v11656_v57 = vcombine.low %v7882_v29, %v15296_v9  ;;  %v6447_v9 = vsel %vm1071_vm15, %v6442_v54, %v6446_v25  ;;  %v6682_v29 = vrot.slane %v15301_v38, 1  ;;  %17124 = vst [vmem:[#allocation45_spill] sm:$0xff] %v15374_v52  ;;  %v8081_v38 = vsel %vm1071_vm15, %v8076_v48, %v8080_v51  ;;  %v15619_v62 = vld [vmem:[#allocation2 + $0x98] ss:$0 sps:$4 sm:$0x11]  }
 0x48a   : > { %v8064_v58 = vor.u32 %v8063_v1, %v8059_v19  ;;  %v6480_v25 = vshll.u32 %v15372_v23, 16  ;;  %v11655_v54 = vcombine.low %v7881_v17, %v15310_v22  ;;  %v15389_v19 = vpop.permute.xlu0 %7346  ;;  %v7842_v1 = vld [vmem:[#allocation2 + $0x60] sm:$0xf]  ;;  %v15396_v59 = vcombine.low %v7840_v11, %v15383_v56  ;;  %v6261_v17 = vld [vmem:[#allocation2 + $0x3c] sm:$0xe] }
 0x48b   : > { %17125 = vst [vmem:[#allocation46_spill] sm:$0xff] %v15389_v19  ;;  %v6461_v48 = vshrl.u32 %v15368_v20, 16  ;;  %v6691_v11 = vrot.slane %v15372_v23, 1  ;;  %v15422_v20 = vld [vmem:[#allocation2 + $0x68] ss:$0 sps:$4 sm:$0x11]  }
 0x48c   : > { %8344 = vrot.lane.b32.xlu1 %v8299_v0, %s12894_s15  ;;  %v8307_v0 = vrot.slane %v15320_v44, 1  ;;  %v6683_v44 = vsel %vm1344_vm14, %v6681_v30, %v6682_v29  ;;  %17126 = vst [vmem:[#allocation47_spill] sm:$0xff] %v15396_v59  ;;  %v15400_v51 = vpop.permute.xlu1 %7344  ;;  %v6465_v30 = vrot.slane %v6463_v14, 1  ;;  %v6468_v29 = vshll.u32 %v15378_v41, 16  ;;  %v15459_v19 = vld [vmem:[#allocation2 + $0x70] sm:$0xf] }
 0x48d   : > { %6600 = vrot.lane.b32.xlu0 %v6459_v35, %s12895_s16  ;;  %v8306_v35 = vrot.slane %v11656_v57, 1  ;;  %v6262_v57 = vld [vmem:[#allocation2 + $0x48] sm:$0xe]  ;;  %17127 = vst [vmem:[#allocation48_spill] sm:$0xff] %v15400_v51  ;;  %v6268_v52 = vld [vmem:[#allocation2 + $0x90] sm:$0xe] }
 0x48e   : > { %v11526_v22 = vcombine.low %v6262_v57, %v15332_v42  ;;  %v8085_v42 = vshll.u32 %v15396_v59, 16  ;;  %v11525_v57 = vcombine.low %v6261_v17, %v15356_v18  ;;  %v7883_v17 = vld [vmem:[#allocation2 + $0x54] sm:$0xe]  ;;  %v15461_v51 = vld [vmem:[#allocation2 + $0x68] ss:$0 sps:$4 sm:$0x11]  }
 0x48f   : > { %v8308_v60 = vsel %vm1344_vm14, %v8306_v35, %v8307_v0  ;;  %v6482_v35 = vrot.slane %v6480_v25, 1  ;;  %v8303_v0 = vrot.slane %v11655_v54, 1  ;;  %v6470_v25 = vrot.slane %v6468_v29, 1  ;;  %v15417_v54 = vpop.permute.xlu0 %7222  ;;  %v15660_v39 = vld [vmem:[#allocation2 + $0xb0] ss:$0 sps:$4 sm:$0x11]  }
 0x490   : > { %6598 = vrot.lane.b32.xlu1 %v6447_v9, %s12895_s16  ;;  %v6478_v9 = vor.u32 %v6477_v6, %v6473_v27  ;;  %v8304_v27 = vrot.slane %v15342_v53, 1  ;;  %v15409_v6 = vld [vmem:[#allocation2 + $0x5c] ss:$0 sps:$4 sm:$0x11]   ;;  %v6690_v14 = vrot.slane %v11526_v22, 1  ;;  %v6466_v53 = vor.u32 %v6465_v30, %v6461_v48  ;;  %17129 = vst [vmem:[#allocation50_spill] sm:$0xff] %v15417_v54  ;;  %v15425_v34 = vpop.permute.xlu1 %7220 }
 0x491   : > { %6728 = vrot.lane.b32.xlu0 %v6686_v3, %s12894_s15  ;;  %v8069_v3 = vsel %vm1071_vm15, %v8064_v58, %v8068_v12  ;;  %v15407_v58 = vcombine.low %v7842_v1, %v15391_v45  ;;  %v12689_v12 = vld [vmem:[#allocation4 + $0xc] ss:$0 sps:$4 sm:$0x77]   ;;  %17130 = vst [vmem:[#allocation51_spill] sm:$0xff] %v15425_v34  ;;  %v6224_v22 = vld [vmem:[#allocation2 + $0x60] sm:$0xf] }
 0x492   : > { %v6483_v1 = vsel %vm1071_vm15, %v6478_v9, %v6482_v35  ;;  %v8305_v23 = vsel %vm1344_vm14, %v8303_v0, %v8304_v27  ;;  %v15430_v48 = vld [vmem:[#allocation2 + $0x64] sm:$0xf]  ;;  %v8083_v30 = vshrl.u32 %v15396_v59, 16  ;;  %v8087_v18 = vrot.slane %v8085_v42, 1  ;;  %v7884_v42 = vld [vmem:[#allocation2 + $0x60] sm:$0xe] }
 0x493   : > { %17128 = vst [vmem:[#allocation49_spill] sm:$0xff] %v15407_v58  ;;  %v8097_v49 = vshll.u32 %v15407_v58, 16  ;;  %v8090_v9 = vshll.u32 %v15409_v6, 16  ;;  %v6692_v29 = vsel %vm1344_vm14, %v6690_v14, %v6691_v11  ;;  %v6471_v35 = vsel %vm1071_vm15, %v6466_v53, %v6470_v25  ;;  %v15447_v14 = vpop.permute.xlu0 %7350  ;;  %v15449_v53 = vld [vmem:[#allocation2 + $0x5c] ss:$0 sps:$4 sm:$0x11]  }
 0x494   : > { %6726 = vrot.lane.b32.xlu1 %v6683_v44, %s12894_s15  ;;  %v15413_v44 = vld [vmem:[#allocation2 + $0x58] sm:$0xf]  ;;  %v6687_v0 = vrot.slane %v11525_v57, 1  ;;  %v6688_v27 = vrot.slane %v15378_v41, 1  ;;  %v8102_v59 = vshll.u32 %v15422_v20, 16  ;;  %v15442_v34 = vcombine.low %v6224_v22, %v15430_v48  ;;  %17133 = vst [vmem:[#allocation54_spill] sm:$0xff] %v15447_v14  ;;  %v15455_v22 = vpop.permute.xlu1 %7348 }
 0x495   : > { %8222 = vrot.lane.b32.xlu0 %v8081_v38, %s12895_s16  ;;  %v6222_v38 = vld [vmem:[#allocation2 + $0x54] sm:$0xf]  ;;  %v8099_v54 = vrot.slane %v8097_v49, 1  ;;  %v8088_v25 = vor.u32 %v8087_v18, %v8083_v30  ;;  %v8092_v57 = vrot.slane %v8090_v9, 1  ;;  %v11657_v49 = vcombine.low %v7883_v17, %v15383_v56  ;;  %17134 = vst [vmem:[#allocation55_spill] sm:$0xff] %v15455_v22 }
 0x496   : > { %17132 = vst [vmem:[#allocation53_spill] sm:$0xff] %v15442_v34  ;;  %v11658_v14 = vcombine.low %v7884_v42, %v15391_v45  ;;  %v8104_v18 = vrot.slane %v8102_v59, 1  ;;  %v6499_v9 = vshll.u32 %v15442_v34, 16  ;;  %v6263_v42 = vld [vmem:[#allocation2 + $0x54] sm:$0xe]  ;;  %v8174_v28 = vshll.u32 %v15660_v39, 16 }
 0x497   : > { %v8309_v45 = vrot.slane %v11657_v49, 1  ;;  %v12762_v59 = vld [vmem:[%s16942_s2] sm:$0x1f]  }
 0x498   : > { %8220 = vrot.lane.b32.xlu1 %v8069_v3, %s12895_s16  ;;  %v15428_v3 = vcombine.low %v6222_v38, %v15413_v44  ;;  %v8095_v38 = vshrl.u32 %v15407_v58, 16  ;;  %v5569_v58 = vshrl.u32 %v12689_v12, 16 }
 0x499   : > { %8350 = vrot.lane.b32.xlu0 %v8308_v60, %s12894_s15  ;;  %v5571_v60 = vshll.u32 %v12689_v12, 16  ;;  %v15466_v12 = vld [vmem:[#allocation2 + $0x7c] sm:$0xf] }
 0x49a   : > { %17131 = vst [vmem:[#allocation52_spill] sm:$0xff] %v15428_v3  ;;  %v6487_v41 = vshll.u32 %v15428_v3, 16  ;;  %v6485_v30 = vshrl.u32 %v15428_v3, 16  ;;  %v8100_v56 = vor.u32 %v8099_v54, %v8095_v38  ;;  %v8312_v54 = vrot.slane %v11658_v14, 1 }
 0x49b   : > { %v5573_v11 = vrot.slane %v5571_v60, 1  ;;  %v6689_v60 = vsel %vm1344_vm14, %v6687_v0, %v6688_v27  ;;  %v8093_v0 = vsel %vm1071_vm15, %v8088_v25, %v8092_v57  ;;  %v8310_v27 = vrot.slane %v15409_v6, 1  ;;  %v6264_v57 = vld [vmem:[#allocation2 + $0x60] sm:$0xe] }
 0x49c   : > { %8348 = vrot.lane.b32.xlu1 %v8305_v23, %s12894_s15  ;;  %v7844_v23 = vld [vmem:[#allocation2 + $0x6c] sm:$0xf]  ;;  %v6489_v17 = vrot.slane %v6487_v41, 1  ;;  %v8313_v38 = vrot.slane %v15422_v20, 1  ;;  %v6504_v6 = vshll.u32 %v15461_v51, 16  ;;  %v8105_v41 = vsel %vm1071_vm15, %v8100_v56, %v8104_v18 }
 0x49d   : > { %6604 = vrot.lane.b32.xlu0 %v6483_v1, %s12895_s16  ;;  %v12761_v1 = vld [vmem:[%s16946_s6 + $0x30] sm:$0xff]   ;;  %v15471_v22 = vcombine.low %v7844_v23, %v15459_v19  ;;  %v6501_v25 = vrot.slane %v6499_v9, 1  ;;  %v15488_v23 = vand.u32 %v12762_v59, %v13816_v5  ;;  %v11527_v20 = vcombine.low %v6263_v42, %v15413_v44  ;;  %v6228_v59 = vld [vmem:[#allocation2 + $0x78] sm:$0xf] }
 0x49e   : > { %12198 = vmatpush3.bf16.msra.mxu0 %v12761_v1  ;;  %v7846_v1 = vld [vmem:[#allocation2 + $0x78] sm:$0xf]  ;;  %v15493_v3 = vld [vmem:[#allocation2 + $0x74] ss:$0 sps:$4 sm:$0x11]   ;;  %v8311_v56 = vsel %vm1344_vm14, %v8309_v45, %v8310_v27  ;;  %v11528_v9 = vcombine.low %v6264_v57, %v15430_v48  ;;  %v8314_v44 = vsel %vm1344_vm14, %v8312_v54, %v8313_v38  ;;  %v6694_v48 = vrot.slane %v15449_v53, 1 }
 0x49f   : > { %17135 = vst [vmem:[#allocation56_spill] sm:$0xff] %v15471_v22  ;;  %v15485_v49 = vcombine.low %v7846_v1, %v15466_v12  ;;  %17138 = vst [vmem:[#allocation59_spill] sm:$0xff] %v15488_v23  ;;  %12237 = vmatprep.subr.bf16.mxu0 %v15488_v23  ;;  %v8109_v18 = vshll.u32 %v15471_v22, 16  ;;  %v15501_v1 = vld [vmem:[#allocation2 + $0x70] sm:$0xf]  ;;  %v8107_v57 = vshrl.u32 %v15471_v22, 16 }
 0x4a0   : > { %6602 = vrot.lane.b32.xlu1 %v6471_v35, %s12895_s16  ;;  %v6492_v35 = vshll.u32 %v15449_v53, 16  ;;  %v8114_v23 = vshll.u32 %v15493_v3, 16 }
 0x4a1   : > { %6732 = vrot.lane.b32.xlu0 %v6692_v29, %s12894_s15  ;;  %v5574_v29 = vor.u32 %v5573_v11, %v5569_v58  ;;  %v15478_v58 = vpop.permute.xlu0 %7226  ;;  %v6497_v11 = vshrl.u32 %v15442_v34, 16  ;;  %17137 = vst [vmem:[#allocation58_spill] sm:$0xff] %v15485_v49  ;;  %v6226_v34 = vld [vmem:[#allocation2 + $0x6c] sm:$0xf]  ;;  %v8121_v42 = vshll.u32 %v15485_v49, 16 }
 0x4a2   : > { %17136 = vst [vmem:[#allocation57_spill] sm:$0xff] %v15478_v58  ;;  %v6494_v14 = vrot.slane %v6492_v35, 1  ;;  %v6506_v35 = vrot.slane %v6504_v6, 1  ;;  %v7885_v58 = vld [vmem:[#allocation2 + $0x6c] sm:$0xe]  ;;  %v15516_v54 = vcombine.low %v6226_v34, %v15501_v1  ;;  %v6696_v6 = vrot.slane %v11528_v9, 1 }
 0x4a3   : > { %v11659_v22 = vcombine.low %v7885_v58, %v15459_v19  ;;  %v7848_v9 = vld [vmem:[#allocation2 + $0x84] sm:$0xf]  ;;  %v15542_v19 = vld [vmem:[#allocation2 + $0x80] ss:$0 sps:$4 sm:$0x11]  }
 0x4a4   : > { %6730 = vrot.lane.b32.xlu1 %v6689_v60, %s12894_s15  ;;  %v15490_v60 = vpop.permute.xlu1 %7224  ;;  %17141 = vst [vmem:[#allocation62_spill] sm:$0xff] %v15516_v54 }
 0x4a5   : > { %5591 = vrot.lane.b32.xlu0 %v5574_v29, %s12898_s24  ;;  %17139 = vst [vmem:[#allocation60_spill] sm:$0xff] %v15490_v60  ;;  %v6490_v29 = vor.u32 %v6489_v17, %v6485_v30  ;;  %v15503_v30 = vld [vmem:[#allocation2 + $0x80] ss:$0 sps:$4 sm:$0x11]   ;;  %v6502_v17 = vor.u32 %v6501_v25, %v6497_v11  ;;  %v15509_v45 = vpop.permute.xlu0 %5595  ;;  %v8111_v11 = vrot.slane %v8109_v18, 1  ;;  %v6697_v25 = vrot.slane %v15461_v51, 1 }
 0x4a6   : > { %17140 = vst [vmem:[#allocation61_spill] sm:$0xff] %v15509_v45  ;;  %v8126_v34 = vshll.u32 %v15503_v30, 16  ;;  %v6511_v18 = vshll.u32 %v15516_v54, 16  ;;  %v7850_v45 = vld [vmem:[#allocation2 + $0x90] sm:$0xf] }
 0x4a7   : > { %v6495_v27 = vsel %vm1071_vm15, %v6490_v29, %v6494_v14  ;;  %v6507_v29 = vsel %vm1071_vm15, %v6502_v17, %v6506_v35  ;;  %v8119_v14 = vshrl.u32 %v15485_v49, 16  ;;  %v8112_v35 = vor.u32 %v8111_v11, %v8107_v57 }
 0x4a8   : > { %8224 = vrot.lane.b32.xlu1 %v8093_v0, %s12895_s16  ;;  %v15507_v0 = vld [vmem:[#allocation2 + $0x7c] sm:$0xf]  ;;  %v15518_v38 = vpop.permute.xlu1 %7352  ;;  %v8128_v60 = vrot.slane %v8126_v34, 1  ;;  %v6513_v57 = vrot.slane %v6511_v18, 1  ;;  %v6266_v34 = vld [vmem:[#allocation2 + $0x78] sm:$0xe] }
 0x4a9   : > { %8226 = vrot.lane.b32.xlu0 %v8105_v41, %s12895_s16  ;;  %v6693_v41 = vrot.slane %v11527_v20, 1  ;;  %17142 = vst [vmem:[#allocation63_spill] sm:$0xff] %v15518_v38  ;;  %v15524_v53 = vcombine.low %v6228_v59, %v15507_v0  ;;  %v8123_v20 = vrot.slane %v8121_v42, 1  ;;  %v15530_v38 = vld [vmem:[#allocation2 + $0x74] ss:$0 sps:$4 sm:$0x11]   ;;  %v15534_v51 = vpop.permute.xlu0 %7354 }
 0x4aa   : > { %17144 = vst [vmem:[#allocation65_spill] sm:$0xff] %v15534_v51  ;;  %v15540_v42 = vld [vmem:[#allocation2 + $0x88] sm:$0xf]  ;;  %v8315_v51 = vrot.slane %v11659_v22, 1  ;;  %v6516_v11 = vshll.u32 %v15530_v38, 16 }
 0x4ab   : > { %17143 = vst [vmem:[#allocation64_spill] sm:$0xff] %v15524_v53  ;;  %v6695_v17 = vsel %vm1344_vm14, %v6693_v41, %v6694_v48  ;;  %v6523_v58 = vshll.u32 %v15524_v53, 16  ;;  %v8124_v49 = vor.u32 %v8123_v20, %v8119_v14  ;;  %v15548_v41 = vld [vmem:[#allocation2 + $0x94] sm:$0xf]  ;;  %v6509_v48 = vshrl.u32 %v15516_v54, 16 }
 0x4ac   : > { %8352 = vrot.lane.b32.xlu1 %v8311_v56, %s12894_s15  ;;  %v7886_v56 = vld [vmem:[#allocation2 + $0x78] sm:$0xe]  ;;  %v15536_v59 = vpop.permute.xlu1 %7228  ;;  %v15553_v37 = vcombine.low %v7848_v9, %v15540_v42  ;;  %v8319_v20 = vrot.slane %v15503_v30, 1  ;;  %v11530_v30 = vcombine.low %v6266_v34, %v15507_v0  ;;  %v15588_v0 = vld [vmem:[#allocation2 + $0x94] sm:$0xf] }
 0x4ad   : > { %8354 = vrot.lane.b32.xlu0 %v8314_v44, %s12894_s15  ;;  %v8116_v44 = vrot.slane %v8114_v23, 1  ;;  %17145 = vst [vmem:[#allocation66_spill] sm:$0xff] %v15536_v59  ;;  %v6698_v23 = vsel %vm1344_vm14, %v6696_v6, %v6697_v25  ;;  %v8316_v59 = vrot.slane %v15493_v3, 1  ;;  %v6521_v3 = vshrl.u32 %v15524_v53, 16 }
 0x4ae   : > { %17146 = vst [vmem:[#allocation67_spill] sm:$0xff] %v15553_v37  ;;  %v6525_v22 = vrot.slane %v6523_v58, 1  ;;  %v8129_v25 = vsel %vm1071_vm15, %v8124_v49, %v8128_v60  ;;  %v15570_v58 = vld [vmem:[#allocation2 + $0x8c] ss:$0 sps:$4 sm:$0x11]   ;;  %v6702_v34 = vrot.slane %v11530_v30, 1 }
 0x4af   : > { %v8117_v6 = vsel %vm1071_vm15, %v8112_v35, %v8116_v44  ;;  %v6518_v35 = vrot.slane %v6516_v11, 1  ;;  %v15610_v30 = vld [vmem:[#allocation2 + $0x8c] ss:$0 sps:$4 sm:$0x11]  }
 0x4b0   : > { %6606 = vrot.lane.b32.xlu1 %v6495_v27, %s12895_s16  ;;  %v11660_v27 = vcombine.low %v7886_v56, %v15466_v12  ;;  %v6528_v12 = vshll.u32 %v15542_v19, 16  ;;  %v15563_v56 = vcombine.low %v7850_v45, %v15548_v41  ;;  %v6526_v49 = vor.u32 %v6525_v22, %v6521_v3  ;;  %v6230_v45 = vld [vmem:[#allocation2 + $0x84] sm:$0xf]  ;;  %v6232_v22 = vld [vmem:[#allocation2 + $0x90] sm:$0xf] }
 0x4b1   : > { %6608 = vrot.lane.b32.xlu0 %v6507_v29, %s12895_s16  ;;  %v6265_v29 = vld [vmem:[#allocation2 + $0x6c] sm:$0xe]  ;;  %v6700_v3 = vrot.slane %v15530_v38, 1  ;;  %v6703_v38 = vrot.slane %v15542_v19, 1  ;;  %v15603_v53 = vcombine.low %v6232_v22, %v15588_v0 }
 0x4b2   : > { %v8318_v14 = vrot.slane %v11660_v27, 1  ;;  %17147 = vst [vmem:[#allocation68_spill] sm:$0xff] %v15563_v56  ;;  %v11529_v44 = vcombine.low %v6265_v29, %v15501_v1  ;;  %v6530_v60 = vrot.slane %v6528_v12, 1  ;;  %v8317_v27 = vsel %vm1344_vm14, %v8315_v51, %v8316_v59  ;;  %v15578_v1 = vld [vmem:[#allocation2 + $0x88] sm:$0xf] }
 0x4b3   : > { %v8131_v59 = vshrl.u32 %v15553_v37, 16  ;;  %17150 = vst [vmem:[#allocation71_spill] sm:$0xff] %v15603_v53 }
 0x4b4   : > { %6734 = vrot.lane.b32.xlu1 %v6695_v17, %s12894_s15  ;;  %v6514_v17 = vor.u32 %v6513_v57, %v6509_v48  ;;  %v8320_v54 = vsel %vm1344_vm14, %v8318_v14, %v8319_v20  ;;  %v15580_v48 = vld [vmem:[#allocation2 + $0x98] ss:$0 sps:$4 sm:$0x11]   ;;  %v8145_v57 = vshll.u32 %v15563_v56, 16  ;;  %v7887_v14 = vld [vmem:[#allocation2 + $0x84] sm:$0xe]  ;;  %v6531_v20 = vsel %vm1071_vm15, %v6526_v49, %v6530_v60 }
 0x4b5   : > { %6736 = vrot.lane.b32.xlu0 %v6698_v23, %s12894_s15  ;;  %v8133_v23 = vshll.u32 %v15553_v37, 16  ;;  %v7888_v37 = vld [vmem:[#allocation2 + $0x90] sm:$0xe]  ;;  %v11661_v49 = vcombine.low %v7887_v14, %v15540_v42  ;;  %v6704_v42 = vsel %vm1344_vm14, %v6702_v34, %v6703_v38  ;;  %v6540_v34 = vshll.u32 %v15610_v30, 16  ;;  %v6267_v38 = vld [vmem:[#allocation2 + $0x84] sm:$0xe] }
 0x4b6   : > { %v15567_v9 = vpop.permute.xlu1 %5336  ;;  %v6519_v51 = vsel %vm1071_vm15, %v6514_v17, %v6518_v35  ;;  %v8143_v17 = vshrl.u32 %v15563_v56, 16  ;;  %v8147_v35 = vrot.slane %v8145_v57, 1  ;;  %v11662_v56 = vcombine.low %v7888_v37, %v15548_v41 }
 0x4b7   : > { %v15565_v18 = vpop.permute.xlu0 %5227  ;;  %v8135_v12 = vrot.slane %v8133_v23, 1  ;;  %v8150_v23 = vshll.u32 %v15580_v48, 16 }
 0x4b8   : > { %8228 = vrot.lane.b32.xlu1 %v8117_v6, %s12895_s16  ;;  %v6699_v6 = vrot.slane %v11529_v44, 1  ;;  %v15598_v44 = vcombine.low %v6230_v45, %v15578_v1  ;;  %v7852_v45 = vld [vmem:[#allocation2 + $0x9c] sm:$0xf] }
 0x4b9   : > { %8230 = vrot.lane.b32.xlu0 %v8129_v25, %s12895_s16  ;;  %v8138_v25 = vshll.u32 %v15570_v58, 16  ;;  %v8136_v60 = vor.u32 %v8135_v12, %v8131_v59  ;;  %v8148_v59 = vor.u32 %v8147_v35, %v8143_v17  ;;  %v8152_v12 = vrot.slane %v8150_v23, 1 }
 0x4ba   : > { %v15585_v29 = vpop.permute.xlu1 %5613  ;;  %17149 = vst [vmem:[#allocation70_spill] sm:$0xff] %v15598_v44  ;;  %v6701_v57 = vsel %vm1344_vm14, %v6699_v6, %v6700_v3  ;;  %v6535_v22 = vshll.u32 %v15598_v44, 16  ;;  %v8321_v6 = vrot.slane %v11661_v49, 1  ;;  %v8322_v3 = vrot.slane %v15570_v58, 1 }
 0x4bb   : > { %v15583_v11 = vpop.permute.xlu0 %5334  ;;  %17148 = vst [vmem:[#allocation69_spill] sm:$0xff] %v15585_v29  ;;  %v8140_v19 = vrot.slane %v8138_v25, 1  ;;  %v15617_v29 = vld [vmem:[#allocation2 + $0xa0] sm:$0xf]  ;;  %v6547_v25 = vshll.u32 %v15603_v53, 16  ;;  %v6533_v41 = vshrl.u32 %v15598_v44, 16 }
 0x4bc   : > { %8356 = vrot.lane.b32.xlu1 %v8317_v27, %s12894_s15  ;;  %v15634_v17 = vcombine.low %v7852_v45, %v15617_v29  ;;  %v6537_v35 = vrot.slane %v6535_v22, 1  ;;  %v8324_v23 = vrot.slane %v11662_v56, 1  ;;  %v8325_v58 = vrot.slane %v15580_v48, 1  ;;  %v15650_v56 = vld [vmem:[#allocation2 + $0xa4] ss:$0 sps:$4 sm:$0x11]  }
 0x4bd   : > { %8358 = vrot.lane.b32.xlu0 %v8320_v54, %s12894_s15  ;;  %v8141_v37 = vsel %vm1071_vm15, %v8136_v60, %v8140_v19  ;;  %v6552_v49 = vshll.u32 %v15619_v62, 16  ;;  %v8153_v60 = vsel %vm1071_vm15, %v8148_v59, %v8152_v12  ;;  %v6545_v19 = vshrl.u32 %v15603_v53, 16  ;;  %v15657_v53 = vld [vmem:[#allocation2 + $0xa0] sm:$0xf] }
 0x4be   : > { %v15607_v54 = vpop.permute.xlu1 %5225  ;;  %17151 = vst [vmem:[#allocation72_spill] sm:$0xff] %v15634_v17  ;;  %v6549_v44 = vrot.slane %v6547_v25, 1  ;;  %v11531_v22 = vcombine.low %v6267_v38, %v15578_v1  ;;  %v8157_v48 = vshll.u32 %v15634_v17, 16  ;;  %v6538_v59 = vor.u32 %v6537_v35, %v6533_v41 }
 0x4bf   : > { %v15605_v27 = vpop.permute.xlu0 %5203  ;;  %v6542_v12 = vrot.slane %v6540_v34, 1  ;;  %v11532_v25 = vcombine.low %v6268_v52, %v15588_v0  ;;  %v6554_v38 = vrot.slane %v6552_v49, 1  ;;  %v6706_v41 = vrot.slane %v15610_v30, 1  ;;  %v7889_v0 = vld [vmem:[#allocation2 + $0x9c] sm:$0xe] }
 0x4c0   : > { %6610 = vrot.lane.b32.xlu1 %v6519_v51, %s12895_s16  ;;  %v6550_v1 = vor.u32 %v6549_v44, %v6545_v19  ;;  %v8162_v52 = vshll.u32 %v15650_v56, 16  ;;  %v12902_v34 = vmov 1983009808   ;;  %v8155_v44 = vshrl.u32 %v15634_v17, 16  ;;  %v15670_v49 = vld [vmem:[#allocation2 + $0xac] sm:$0xf] }
 0x4c1   : > { %6612 = vrot.lane.b32.xlu0 %v6531_v20, %s12895_s16  ;;  %v7854_v20 = vld [vmem:[#allocation2 + $0xa8] sm:$0xf]  ;;  %v5376_v35 = vunpack.c.l.s4 %v12902_v34  ;;  %v6543_v19 = vsel %vm1071_vm15, %v6538_v59, %v6542_v12  ;;  %v6709_v30 = vrot.slane %v15619_v62, 1 }
 0x4c2   : > { %v15625_v51 = vpop.permute.xlu1 %5312  ;;  %v15643_v13 = vcombine.low %v7854_v20, %v15628_v26  ;;  %v6234_v20 = vld [vmem:[#allocation2 + $0x9c] sm:$0xf]  ;;  %v6555_v34 = vsel %vm1071_vm15, %v6550_v1, %v6554_v38  ;;  %v8164_v15 = vrot.slane %v8162_v52, 1  ;;  %v15688_v1 = vld [vmem:[#allocation2 + $0xa4] ss:$0 sps:$4 sm:$0x11]  }
 0x4c3   : > { %v15623_v14 = vpop.permute.xlu0 %5310  ;;  %v15677_v33 = vcombine.low %v6234_v20, %v15657_v53  ;;  %v5377_v62 = vunpack.c.0.s8 %v5376_v35  ;;  %v5258_v38 = vld [vmem:[#allocation4 + $0x4] sm:$0x3] }
 0x4c4   : > { %6738 = vrot.lane.b32.xlu1 %v6701_v57, %s12894_s15  ;;  %17152 = vst [vmem:[#allocation73_spill] sm:$0xff] %v15643_v13  ;;  %v8169_v43 = vshll.u32 %v15643_v13, 16  ;;  %v8167_v17 = vshrl.u32 %v15643_v13, 16  ;;  %v5344_v35 = vsel %vm17034_vm10, %v5258_v38, %v15623_v14  ;;  %v5261_v38 = vld [vmem:[#allocation4 + $0x10] sm:$0x3] }
 0x4c5   : > { %6740 = vrot.lane.b32.xlu0 %v6704_v42, %s12894_s15  ;;  %v8323_v42 = vsel %vm1344_vm14, %v8321_v6, %v8322_v3  ;;  %v6705_v3 = vrot.slane %v11531_v22, 1  ;;  %v6708_v22 = vrot.slane %v11532_v25, 1  ;;  %17154 = vst [vmem:[#allocation75_spill] sm:$0xff] %v15677_v33 }
 0x4c6   : > { %v15647_v57 = vpop.permute.xlu1 %5589 }
 0x4c7   : > { %v15645_v45 = vpop.permute.xlu0 %5338  ;;  %17153 = vst [vmem:[#allocation74_spill] sm:$0xff] %v15647_v57  ;;  %v8326_v57 = vsel %vm1344_vm14, %v8324_v23, %v8325_v58  ;;  %v8159_v23 = vrot.slane %v8157_v48, 1  ;;  %v6236_v58 = vld [vmem:[#allocation2 + $0xa8] sm:$0xf]  ;;  %v8171_v48 = vrot.slane %v8169_v43, 1  ;;  %v6707_v13 = vsel %vm1344_vm14, %v6705_v3, %v6706_v41 }
 0x4c8   : > { %8232 = vrot.lane.b32.xlu1 %v8141_v37, %s12895_s16  ;;  %v15686_v12 = vcombine.low %v6236_v58, %v15670_v49  ;;  %v5259_v43 = vld [vmem:[#allocation4 + $0x8] sm:$0x3]  ;;  %v15700_v58 = vld [vmem:[#allocation2 + $0xb8] sm:$0xf] }
 0x4c9   : > { %8234 = vrot.lane.b32.xlu0 %v8153_v60, %s12895_s16  ;;  %v5378_v60 = vlaneseq  ;;  %v8160_v20 = vor.u32 %v8159_v23, %v8155_v44  ;;  %v5347_v52 = vsel %vm17034_vm10, %v5259_v43, %v15625_v51  ;;  %v8176_v44 = vrot.slane %v8174_v28, 1  ;;  %v7856_v23 = vld [vmem:[#allocation2 + $0xb4] sm:$0xf] }
 0x4ca   : > { %v15665_v6 = vpop.permute.xlu1 %5201  ;;  %v6557_v28 = vshrl.u32 %v15677_v33, 16  ;;  %v6564_v51 = vshll.u32 %v15688_v1, 16 }
 0x4cb   : > { %v15663_v37 = vpop.permute.xlu0 %5314  ;;  %v5379_v25 = vshrl.u32 %v5378_v60, 7  ;;  %v8172_v60 = vor.u32 %v8171_v48, %v8167_v17  ;;  %v8165_v14 = vsel %vm1071_vm15, %v8160_v20, %v8164_v15  ;;  %v7858_v17 = vld [vmem:[#allocation2 + $0xc0] sm:$0xf]  ;;  %v5355_v48 = vsel %vm17033_vm2, %v5344_v35, %v15583_v11  ;;  %v6269_v15 = vld [vmem:[#allocation2 + $0x9c] sm:$0xe] }
 0x4cc   : > { %8360 = vrot.lane.b32.xlu1 %v8323_v42, %s12894_s15  ;;  %v8331_v35 = vrot.slane %v15660_v39, 1 }
 0x4cd   : > { %8362 = vrot.lane.b32.xlu0 %v8326_v57, %s12894_s15  ;;  %v11663_v57 = vcombine.low %v7889_v0, %v15617_v29  ;;  %v6559_v29 = vshll.u32 %v15677_v33, 16  ;;  %v11664_v0 = vcombine.low %v7890_v50, %v15628_v26  ;;  %v6571_v26 = vshll.u32 %v15686_v12, 16  ;;  %v6270_v33 = vld [vmem:[#allocation2 + $0xa8] sm:$0xe] }
 0x4ce   : > { %v5341_v59 = vpop.permute.xlu1 %5340  ;;  %v15710_v50 = vsub.s32 %v5377_v62, %v5379_v25  ;;  %v15724_v25 = vcombine.low %v7856_v23, %v15700_v58  ;;  %v8177_v43 = vsel %vm1071_vm15, %v8172_v60, %v8176_v44 }
 0x4cf   : > { %v15682_v42 = vpop.permute.xlu0 %5615  ;;  %v6561_v62 = vrot.slane %v6559_v29, 1  ;;  %v8330_v11 = vrot.slane %v11664_v0, 1  ;;  %v11533_v0 = vcombine.low %v6269_v15, %v15657_v53  ;;  %v11534_v53 = vcombine.low %v6270_v33, %v15670_v49  ;;  %v6238_v15 = vld [vmem:[#allocation2 + $0xb4] sm:$0xf] }
 0x4d0   : > { %17155 = vst [vmem:[#allocation76_spill] sm:$0xff] %v15682_v42  ;;  %6614 = vrot.lane.b32.xlu1 %v6543_v19, %s12895_s16  ;;  %v6710_v42 = vsel %vm1344_vm14, %v6708_v22, %v6709_v30  ;;  %v8327_v19 = vrot.slane %v11663_v57, 1  ;;  %v8328_v22 = vrot.slane %v15650_v56, 1  ;;  %v15707_v30 = vld [vmem:[#allocation2 + $0xb0] ss:$0 sps:$4 sm:$0x11]   ;;  %v5357_v56 = vsel %vm17033_vm2, %v5347_v52, %v15567_v9 }
 0x4d1   : > { %6616 = vrot.lane.b32.xlu0 %v6555_v34, %s12895_s16  ;;  %v15715_v34 = vld [vmem:[#allocation2 + $0xc4] sm:$0xf]  ;;  %v5260_v57 = vld [vmem:[#allocation4 + $0xc] sm:$0x3]  ;;  %17157 = vst [vmem:[#allocation78_spill] sm:$0xff] %v15724_v25  ;;  %v6576_v29 = vshll.u32 %v15707_v30, 16  ;;  %v6562_v44 = vor.u32 %v6561_v62, %v6557_v28 }
 0x4d2   : > { %v15704_v41 = vpop.permute.xlu1 %5229  ;;  %v5350_v20 = vsel %vm17034_vm10, %v5260_v57, %v15663_v37  ;;  %v15735_v23 = vcombine.low %v7858_v17, %v15715_v34  ;;  %v6566_v57 = vrot.slane %v6564_v51, 1  ;;  %v8181_v17 = vshll.u32 %v15724_v25, 16 }
 0x4d3   : > { %v15702_v3 = vpop.permute.xlu0 %5619  ;;  %v5359_v39 = vsel %vm17033_vm2, %v5350_v20, %v15645_v45  ;;  %v8332_v51 = vsel %vm1344_vm14, %v8330_v11, %v8331_v35  ;;  %v15750_v45 = vld [vmem:[#allocation2 + $0xb8] sm:$0xf]  ;;  %v6578_v62 = vrot.slane %v6576_v29, 1  ;;  %v15756_v20 = vld [vmem:[#allocation2 + $0xc8] ss:$0 sps:$4 sm:$0x11]  }
 0x4d4   : > { %17156 = vst [vmem:[#allocation77_spill] sm:$0xff] %v15702_v3  ;;  %6742 = vrot.lane.b32.xlu1 %v6707_v13, %s12894_s15  ;;  %v6569_v13 = vshrl.u32 %v15686_v12, 16  ;;  %v5373_v3 = vcombine.low %v5355_v48, %v5357_v56  ;;  %v8329_v56 = vsel %vm1344_vm14, %v8327_v19, %v8328_v22  ;;  %v6712_v33 = vrot.slane %v15688_v1, 1  ;;  %v12738_v11 = vld [vmem:[%s16946_s6 + $0x10] sm:$0xff]  }
 0x4d5   : > { %6744 = vrot.lane.b32.xlu0 %v6710_v42, %s12894_s15  ;;  %v6573_v42 = vrot.slane %v6571_v26, 1  ;;  %v15744_v26 = vld [vmem:[#allocation2 + $0xbc] ss:$0 sps:$4 sm:$0x11]   ;;  %v6567_v49 = vsel %vm1071_vm15, %v6562_v44, %v6566_v57  ;;  %v8179_v35 = vshrl.u32 %v15724_v25, 16  ;;  %v6714_v29 = vrot.slane %v11534_v53, 1 }
 0x4d6   : > { %v5317_v52 = vpop.permute.xlu1 %5316  ;;  %v5381_v19 = vrot.slane %v5373_v3, %v15710_v50  ;;  %v8186_v3 = vshll.u32 %v15744_v26, 16  ;;  %v6715_v1 = vrot.slane %v15707_v30, 1  ;;  %v5147_v57 = vld [vmem:[#allocation4] sm:$0x3]  ;;  %v8191_v44 = vshrl.u32 %v15735_v23, 16 }
 0x4d7   : > { %v15730_v9 = vpop.permute.xlu0 %7230  ;;  %v5353_v37 = vsel %vm17034_vm10, %v5261_v38, %v5317_v52  ;;  %v6574_v28 = vor.u32 %v6573_v42, %v6569_v13  ;;  %v8193_v38 = vshll.u32 %v15735_v23, 16  ;;  %v8183_v52 = vrot.slane %v8181_v17, 1  ;;  %v7891_v13 = vld [vmem:[#allocation2 + $0xb4] sm:$0xe]  ;;  %v12742_v30 = vld [vmem:[%s16946_s6 + $0x8] sm:$0xff]  }
 0x4d8   : > { %v5361_v60 = vsel %vm17033_vm2, %v5353_v37, %v5341_v59  ;;  %8236 = vrot.lane.b32.xlu1 %v8165_v14, %s12895_s16  ;;  %v15772_v37 = vcombine.low %v6238_v15, %v15750_v45  ;;  %v7892_v53 = vld [vmem:[#allocation2 + $0xc0] sm:$0xe] }
 0x4d9   : > { %8238 = vrot.lane.b32.xlu0 %v8177_v43, %s12895_s16  ;;  %v5374_v48 = vcombine.low %v5359_v39, %v5361_v60  ;;  %v6711_v43 = vrot.slane %v11533_v0, 1  ;;  %v6579_v60 = vsel %vm1071_vm15, %v6574_v28, %v6578_v62  ;;  %v8195_v17 = vrot.slane %v8193_v38, 1  ;;  %v12748_v62 = vld [vmem:[%s16942_s2 + $0x8] sm:$0x1f]  }
 0x4da   : > { %v15754_v14 = vpop.permute.xlu1 %5593  ;;  %v8184_v15 = vor.u32 %v8183_v52, %v8179_v35  ;;  %v8188_v28 = vrot.slane %v8186_v3, 1  ;;  %v15790_v38 = vld [vmem:[#allocation2 + $0xbc] ss:$0 sps:$4 sm:$0x11]   ;;  %v6716_v35 = vsel %vm1344_vm14, %v6714_v29, %v6715_v1  ;;  %v7466_v1 = vand.u32 %v12748_v62, %v13816_v5 }
 0x4db   : > { %v15752_v59 = vpop.permute.xlu0 %7358  ;;  %v5388_v22 = vrot.slane %v5374_v48, %v15710_v50  ;;  %v8198_v48 = vshll.u32 %v15756_v20, 16  ;;  %v8196_v52 = vor.u32 %v8195_v17, %v8191_v44  ;;  %v6271_v44 = vld [vmem:[#allocation2 + $0xb4] sm:$0xe] }
 0x4dc   : > { %8364 = vrot.lane.b32.xlu1 %v8329_v56, %s12894_s15  ;;  %v5148_v56 = vld [vmem:[#allocation4 + $0x4] sm:$0x3]  ;;  %v8189_v29 = vsel %vm1071_vm15, %v8184_v15, %v8188_v28  ;;  %v8337_v28 = vrot.slane %v15756_v20, 1  ;;  %v12755_v20 = vld [vmem:[%s16942_s2 + $0x10] sm:$0x1f]  }
 0x4dd   : > { %8366 = vrot.lane.b32.xlu0 %v8332_v51, %s12894_s15  ;;  %v5389_v42 = vcombine.low %v5381_v19, %v5388_v22  ;;  %v11665_v51 = vcombine.low %v7891_v13, %v15700_v58  ;;  %v5236_v19 = vsel %vm17034_vm10, %v5148_v56, %v15665_v6  ;;  %v6713_v22 = vsel %vm1344_vm14, %v6711_v43, %v6712_v33  ;;  %v7860_v43 = vld [vmem:[#allocation2 + $0xcc] sm:$0xf]  ;;  %v15806_v33 = vld [vmem:[#allocation2 + $0xd0] sm:$0xf] }
 0x4de   : > { %v15776_v39 = vpop.permute.xlu1 %5617  ;;  %v6583_v58 = vshll.u32 %v15772_v37, 16  ;;  %v8200_v3 = vrot.slane %v8198_v48, 1  ;;  %v11666_v6 = vcombine.low %v7892_v53, %v15715_v34  ;;  %v5233_v13 = vsel %vm17034_vm10, %v5147_v57, %v15114_v10  ;;  %v5149_v56 = vld [vmem:[#allocation4 + $0x8] sm:$0x3]  ;;  %v12746_v34 = vld [vmem:[%s16946_s6] sm:$0xff]  }
 0x4df   : > { %v15774_v0 = vpop.permute.xlu0 %6592  ;;  %12180 = vmatmul.mubr.msk.bf16.vlgmr.msra.gmra.mxu1 %vm17032_vm1, %v5389_v42  ;;  %v8333_v42 = vrot.slane %v11665_v51, 1  ;;  %v5247_v25 = vsel %vm17033_vm2, %v5236_v19, %v15607_v54  ;;  %v6588_v10 = vshll.u32 %v15790_v38, 16  ;;  %v6581_v54 = vshrl.u32 %v15772_v37, 16  ;;  %v5150_v51 = vld [vmem:[#allocation4 + $0xc] sm:$0x3] }
 0x4e0   : > { %6618 = vrot.lane.b32.xlu1 %v6567_v49, %s12895_s16  ;;  %12184 = vmatpush3.bf16.msra.mxu1 %v12738_v11  ;;  %v6585_v57 = vrot.slane %v6583_v58, 1  ;;  %v15826_v17 = vcombine.low %v7860_v43, %v15806_v33  ;;  %v5245_v48 = vsel %vm17033_vm2, %v5233_v13, %v15125_v46  ;;  %v8336_v15 = vrot.slane %v11666_v6, 1 }
 0x4e1   : > { %12185 = vmatprep.subr.bf16.mxu1 %v17111_v31  ;;  %6620 = vrot.lane.b32.xlu0 %v6579_v60, %s12895_s16  ;;  %v8334_v60 = vrot.slane %v15744_v26, 1  ;;  %v5239_v26 = vsel %vm17034_vm10, %v5149_v56, %v15605_v27  ;;  %v8201_v27 = vsel %vm1071_vm15, %v8196_v52, %v8200_v3  ;;  %v5457_v62 = vcombine.low %v5245_v48, %v5247_v25  ;;  %v12758_v25 = vld [vmem:[#allocation2 + $0xd4] ss:$0 sps:$4 sm:$0x11]   ;;  %v7893_v48 = vld [vmem:[#allocation2 + $0xcc] sm:$0xe] }
 0x4e2   : > { %v15800_v11 = vpop.permute.xlu1 %7356  ;;  %12189 = vmatprep.mubr.msk.bf16.mxu1 %vm17030_vm12, %v17111_v31  ;;  %v5249_v58 = vsel %vm17033_vm2, %v5239_v26, %v15565_v18  ;;  %v6586_v3 = vor.u32 %v6585_v57, %v6581_v54  ;;  %v6590_v6 = vrot.slane %v6588_v10, 1  ;;  %v8205_v18 = vshll.u32 %v15826_v17, 16 }
 0x4e3   : > { %v15798_v49 = vpop.permute.xlu0 %6720  ;;  %v8338_v13 = vsel %vm1344_vm14, %v8336_v15, %v8337_v28  ;;  %v8210_v10 = vshll.u32 %v12758_v25, 16  ;;  %v8203_v57 = vshrl.u32 %v15826_v17, 16 }
 0x4e4   : > { %6746 = vrot.lane.b32.xlu1 %v6713_v22, %s12894_s15  ;;  %12186 = vmatpush3.bf16.msra.mxu1 %v12742_v30  ;;  %v8335_v22 = vsel %vm1344_vm14, %v8333_v42, %v8334_v60  ;;  %v5465_v42 = vrot.slane %v5457_v62, %v15710_v50  ;;  %v6591_v54 = vsel %vm1071_vm15, %v6586_v3, %v6590_v6 }
 0x4e5   : > { %12187 = vmatprep.subr.bf16.mxu1 %v17111_v31  ;;  %6748 = vrot.lane.b32.xlu0 %v6716_v35, %s12894_s15  ;;  %v11535_v35 = vcombine.low %v6271_v44, %v15750_v45  ;;  %v7363_v45 = vsel %vm17158_vm11, %v14956_v16, %v15138_v61  ;;  %v8207_v16 = vrot.slane %v8205_v18, 1  ;;  %vm17159_vm11 = vcmask 48128   ;;  %v17176_v18 = vld [vmem:[#allocation15_spill] sm:$0xff] }
 0x4e6   : > { %v5206_v53 = vpop.permute.xlu1 %5205 }
 0x4e7   : > { %v15830_v30 = vpop.permute.xlu0 %8214  ;;  %v5242_v19 = vsel %vm17034_vm10, %v5150_v51, %v5206_v53  ;;  %v6717_v56 = vrot.slane %v11535_v35, 1  ;;  %v8208_v51 = vor.u32 %v8207_v16, %v8203_v57  ;;  %v8212_v53 = vrot.slane %v8210_v10, 1  ;;  %v17182_v57 = vld [vmem:[#allocation18_spill] sm:$0xff] }
 0x4e8   : > { %v5251_v46 = vsel %vm17033_vm2, %v5242_v19, %v15704_v41  ;;  %8240 = vrot.lane.b32.xlu1 %v8189_v29, %s12895_s16  ;;  %12188 = vmatpush3.bf16.msra.mxu1 %v12746_v34  ;;  %v6718_v29 = vrot.slane %v15790_v38, 1  ;;  %v8478_v34 = vand.u32 %v12755_v20, %v13816_v5  ;;  %v7395_v38 = vsel %vm17159_vm11, %v7363_v45, %v15154_v55  ;;  %vm17162_vm11 = vmmov %vm17161_vm5  ;;  %v17177_v45 = vld [vmem:[#allocation42_spill] sm:$0xff] }
 0x4e9   : > { %v5458_v52 = vcombine.low %v5249_v58, %v5251_v46  ;;  %12203 = vmatprep.subr.bf16.mxu1 %v7466_v1  ;;  %8242 = vrot.lane.b32.xlu0 %v8201_v27, %s12895_s16  ;;  %v11667_v27 = vcombine.low %v7893_v48, %v15806_v33  ;;  %v7365_v55 = vsel %vm17161_vm5, %v14961_v21, %v15184_v36  ;;  %vm17165_vm5 = vcmask 72704   ;;  %v17184_v48 = vld [vmem:[#allocation43_spill] sm:$0xff] }
 0x4ea   : > { %v15849_v41 = vpop.permute.xlu1 %7232  ;;  %v6719_v5 = vsel %vm1344_vm14, %v6717_v56, %v6718_v29  ;;  %v8213_v62 = vsel %vm1071_vm15, %v8208_v51, %v8212_v53  ;;  %vm17167_vm15 = vcmask 23552   ;;  %v17178_v29 = vld [vmem:[#allocation40_spill] sm:$0xff] }
 0x4eb   : > { %v15847_v43 = vpop.permute.xlu0 %8342  ;;  %v5472_v60 = vrot.slane %v5458_v52, %v15710_v50  ;;  %v8339_v19 = vrot.slane %v11667_v27, 1  ;;  %v17169_v52 = vld [vmem:[#allocation34_spill] sm:$0xff]  ;;  %v17186_v51 = vld [vmem:[#allocation48_spill] sm:$0xff] }
 0x4ec   : > { %8368 = vrot.lane.b32.xlu1 %v8335_v22, %s12894_s15  ;;  %v8340_v22 = vrot.slane %v12758_v25, 1 }
 0x4ed   : > { %v5473_v26 = vcombine.low %v5465_v42, %v5472_v60  ;;  %8370 = vrot.lane.b32.xlu0 %v8338_v13, %s12894_s15 }
 0x4ee   : > { %v15865_v44 = vpop.permute.xlu1 %7360 }
 0x4ef   : > { %v15863_v61 = vpop.permute.xlu0 %6596  ;;  %12190 = vmatmul.mubr.msk.bf16.vlgmr.msra.gmra.mxu1 %vm17032_vm1, %v5473_v26 }
 0x4f0   : > { %6622 = vrot.lane.b32.xlu1 %v6591_v54, %s12895_s16  ;;  %12204 = vmatpush3.bf16.msra.mxu1 %v7466_v1  ;;  %v7367_v1 = vsel %vm17162_vm11, %v14967_v7, %v15175_v40  ;;  %vm17166_vm11 = vmmov %vm17165_vm5  ;;  %v8341_v7 = vsel %vm1344_vm14, %v8339_v19, %v8340_v22  ;;  %v17181_v54 = vld [vmem:[#allocation45_spill] sm:$0xff]  ;;  %v5540_v19 = vld [vmem:[#allocation4 + $0x14] sm:$0x3] }
 0x4f1   : > { %12205 = vmatprep.mubr.msk.bf16.mxu1 %vm17160_vm7, %v7395_v38  ;;  %12271 = vmatprep.subr.bf16.mxu1 %v8478_v34  ;;  %vm17163_vm7 = vcmask 48128   ;;  %v17185_v38 = vld [vmem:[#allocation17_spill] sm:$0xff] }
 0x4f2   : > { %v15876_v28 = vpop.permute.xlu1 %6594  ;;  %v7397_v33 = vsel %vm17163_vm7, %v7365_v55, %v15215_v47  ;;  %vm17164_vm12 = vmmov %vm17163_vm7  ;;  %v7369_v47 = vsel %vm17167_vm15, %v14979_v32, %v15252_v4  ;;  %v5539_v22 = vld [vmem:[#allocation4 + $0x10] sm:$0x3] }
 0x4f3   : > { %v15874_v15 = vpop.permute.xlu0 %6724  ;;  %v7399_v21 = vsel %vm17164_vm12, %v7367_v1, %v15201_v63  ;;  %vm17168_vm12 = vmmov %vm17167_vm15  ;;  %v7401_v35 = vsel %vm17163_vm7, %v7369_v47, %v15286_v8  ;;  %v17175_v8 = vld [vmem:[#allocation36_spill] sm:$0xff]  ;;  %v17187_v1 = vld [vmem:[#allocation46_spill] sm:$0xff] }
 0x4f4   : > { %6750 = vrot.lane.b32.xlu1 %v6719_v5, %s12894_s15  ;;  %v7371_v63 = vsel %vm17168_vm12, %v14985_v24, %v15242_v2  ;;  %vm17170_vm14 = vmmov %vm17163_vm7  ;;  %v17172_v24 = vld [vmem:[#allocation38_spill] sm:$0xff]  ;;  %v17173_v2 = vld [vmem:[#allocation16_spill] sm:$0xff]  ;;  %v7375_v13 = vsel %vm17168_vm12, %v17176_v18, %v17175_v8  ;;  %v7379_v5 = vsel %vm17168_vm12, %v17185_v38, %v17184_v48 }
 0x4f5   : > { %v7403_v3 = vsel %vm17170_vm14, %v7371_v63, %v17169_v52  ;;  %vm17174_vm15 = vmmov %vm17168_vm12  ;;  %v17191_v47 = vld [vmem:[#allocation20_spill] sm:$0xff]  ;;  %v17193_v52 = vld [vmem:[#allocation50_spill] sm:$0xff] }
 0x4f6   : > { %v15890_v46 = vpop.permute.xlu1 %6722  ;;  %v7373_v6 = vsel %vm17174_vm15, %v17173_v2, %v17172_v24  ;;  %vm17179_vm14 = vmmov %vm17163_vm7  ;;  %v5537_v2 = vld [vmem:[#allocation4 + $0x8] sm:$0x3]  ;;  %v17195_v8 = vld [vmem:[#allocation61_spill] sm:$0xff] }
 0x4f7   : > { %v15888_v58 = vpop.permute.xlu0 %8218  ;;  %12206 = vmatmul.mubr.msk.bf16.vlgmr.msra.gmra.mxu1 %vm17165_vm5, %v7397_v33  ;;  %v7405_v42 = vsel %vm17163_vm7, %v7373_v6, %v17177_v45  ;;  %vm17183_vm15 = vmmov %vm17168_vm12  ;;  %v5632_v18 = vsel %vm17034_vm10, %v5540_v19, %v17195_v8  ;;  %v17199_v48 = vld [vmem:[#allocation54_spill] sm:$0xff] }
 0x4f8   : > { %8244 = vrot.lane.b32.xlu1 %v8213_v62, %s12895_s16  ;;  %12209 = vmatprep.mubr.msk.bf16.mxu1 %vm17166_vm11, %v7399_v21  ;;  %vm17171_vm11 = vmmov %vm17165_vm5  ;;  %v7377_v16 = vsel %vm17183_vm15, %v17182_v57, %v17181_v54  ;;  %v5538_v54 = vld [vmem:[#allocation4 + $0xc] sm:$0x3]  ;;  %v17209_v8 = vld [vmem:[#allocation26_spill] sm:$0xff] }
 0x4f9   : > { %12272 = vmatpush3.bf16.msra.mxu1 %v8478_v34  ;;  %v7407_v34 = vsel %vm17179_vm14, %v7375_v13, %v17178_v29  ;;  %v7409_v53 = vsel %vm17163_vm7, %v7377_v16, %v17186_v51  ;;  %vm17188_vm14 = vmmov %vm17163_vm7  ;;  %v17196_v13 = vld [vmem:[#allocation74_spill] sm:$0xff]  ;;  %v17201_v51 = vld [vmem:[#allocation69_spill] sm:$0xff] }
 0x4fa   : > { %v15900_v36 = vpop.permute.xlu1 %8216  ;;  %12361 = vmatprep.subr.bf16.mxu1 %v17111_v31  ;;  %v7411_v62 = vsel %vm17188_vm14, %v7379_v5, %v17187_v1  ;;  %vm17192_vm15 = vmmov %vm17168_vm12  ;;  %v5623_v45 = vsel %vm17034_vm10, %v5537_v2, %v17196_v13  ;;  %v17202_v1 = vld [vmem:[#allocation76_spill] sm:$0xff]  ;;  %v17208_v2 = vld [vmem:[#allocation21_spill] sm:$0xff] }
 0x4fb   : > { %v15898_v40 = vpop.permute.xlu0 %8346  ;;  %vm17200_vm14 = vmmov %vm17163_vm7 }
 0x4fc   : > { %8372 = vrot.lane.b32.xlu1 %v8341_v7, %s12894_s15  ;;  %v17190_v7 = vld [vmem:[#allocation51_spill] sm:$0xff] }
 0x4fd   : > { %v7381_v63 = vsel %vm17192_vm15, %v17191_v47, %v17190_v7  ;;  %v17204_v47 = vld [vmem:[#allocation60_spill] sm:$0xff]  ;;  %vm17206_vm15 = vmmov %vm17168_vm12 }
 0x4fe   : > { %v15914_v25 = vpop.permute.xlu1 %8344 }
 0x4ff   : > { %v15912_v20 = vpop.permute.xlu0 %6600  ;;  %12210 = vmatmul.mubr.msk.bf16.gmra.mxu1 %vm17165_vm5, %v7401_v35  ;;  %v5629_v35 = vsel %vm17034_vm10, %v5539_v22, %v15754_v14 }
 0x500   : > { %12213 = vmatprep.mubr.msk.bf16.mxu1 %vm17171_vm11, %v7403_v3  ;;  %vm17180_vm11 = vmmov %vm17165_vm5  ;;  %v17194_v3 = vld [vmem:[#allocation19_spill] sm:$0xff]  ;;  %v5638_v6 = vsel %vm17033_vm2, %v5629_v35, %v15776_v39 }
 0x501   : > { %v7383_v24 = vsel %vm17168_vm12, %v17194_v3, %v17193_v52 }
 0x502   : > { %v15922_v4 = vpop.permute.xlu1 %6598  ;;  %v7415_v38 = vsel %vm17200_vm14, %v7383_v24, %v17199_v48  ;;  %v17207_v24 = vld [vmem:[#allocation57_spill] sm:$0xff] }
 0x503   : > { %v15920_v32 = vpop.permute.xlu0 %6728 }
 0x506   : > { %v15934_v56 = vpop.permute.xlu1 %6726 }
 0x507   : > { %v15932_v60 = vpop.permute.xlu0 %8222  ;;  %12214 = vmatmul.mubr.msk.bf16.gmra.mxu1 %vm17165_vm5, %v7405_v42  ;;  %v17197_v42 = vld [vmem:[#allocation55_spill] sm:$0xff] }
 0x508   : > { %12217 = vmatprep.mubr.msk.bf16.mxu1 %vm17180_vm11, %v7407_v34  ;;  %vm17189_vm11 = vmmov %vm17165_vm5  ;;  %v7413_v29 = vsel %vm17163_vm7, %v7381_v63, %v17197_v42  ;;  %v17198_v34 = vld [vmem:[#allocation77_spill] sm:$0xff]  ;;  %v17205_v63 = vld [vmem:[#allocation22_spill] sm:$0xff] }
 0x509   : > { %v5640_v14 = vsel %vm17033_vm2, %v5632_v18, %v17198_v34  ;;  %v7385_v35 = vsel %vm17206_vm15, %v17205_v63, %v17204_v47  ;;  %vm17210_vm7 = vmmov %vm17168_vm12  ;;  %vm17215_vm15 = vcmask 72704  }
 0x50a   : > { %v15942_v26 = vpop.permute.xlu1 %8220  ;;  %v5653_v39 = vcombine.low %v5638_v6, %v5640_v14  ;;  %v7387_v6 = vsel %vm17168_vm12, %v17208_v2, %v17207_v24  ;;  %v6753_v18 = vsel %vm17210_vm7, %v17209_v8, %v15774_v0  ;;  %v17212_v14 = vld [vmem:[#allocation65_spill] sm:$0xff]  ;;  %vm17216_vm12 = vmmov %vm17215_vm15  ;;  %v17218_v0 = vld [vmem:[#allocation59_spill] sm:$0xff] }
 0x50b   : > { %v15940_v10 = vpop.permute.xlu0 %8350  ;;  %vm17217_vm7 = vmmov %vm17216_vm12  ;;  %v17240_v2 = vld [vmem:[#allocation28_spill] sm:$0xff]  ;;  %v17242_v8 = vld [vmem:[#allocation35_spill] sm:$0xff] }
 0x50c   : > { %v5667_v52 = vrot.slane %v5653_v39, %v15710_v50  ;;  %v17219_v39 = vld [vmem:[#allocation25_spill] sm:$0xff] }
 0x50e   : > { %v15954_v55 = vpop.permute.xlu1 %8348 }
 0x50f   : > { %v15952_v27 = vpop.permute.xlu0 %6604  ;;  %12218 = vmatmul.mubr.msk.bf16.gmra.mxu1 %vm17165_vm5, %v7409_v53  ;;  %v5634_v53 = vsel %vm17033_vm2, %v5623_v45, %v17201_v51  ;;  %v17211_v45 = vld [vmem:[#allocation63_spill] sm:$0xff]  ;;  %v17221_v51 = vld [vmem:[#allocation29_spill] sm:$0xff] }
 0x510   : > { %12221 = vmatprep.mubr.msk.bf16.mxu1 %vm17189_vm11, %v7411_v62  ;;  %vm17203_vm11 = vmmov %vm17165_vm5  ;;  %v7417_v42 = vsel %vm17200_vm14, %v7385_v35, %v17211_v45 }
 0x512   : > { %v15962_v21 = vpop.permute.xlu1 %6602 }
 0x513   : > { %v15960_v33 = vpop.permute.xlu0 %6732 }
 0x516   : > { %v15982_v16 = vpop.permute.xlu1 %6730 }
 0x517   : > { %v5592_v57 = vpop.permute.xlu0 %5591  ;;  %12222 = vmatmul.mubr.msk.bf16.gmra.mxu1 %vm17165_vm5, %v7413_v29  ;;  %vm17213_vm5 = vmmov %vm17200_vm14  ;;  %vm17220_vm14 = vcmask 23552  }
 0x518   : > { %v5626_v5 = vsel %vm17034_vm10, %v5538_v54, %v5592_v57  ;;  %12225 = vmatprep.mubr.msk.bf16.mxu1 %vm17203_vm11, %v7415_v38  ;;  %v7419_v54 = vsel %vm17213_vm5, %v7387_v6, %v17212_v14  ;;  %vm17214_vm11 = vmmov %vm17213_vm5 }
 0x519   : > { %v5636_v62 = vsel %vm17033_vm2, %v5626_v5, %v17202_v1  ;;  %v6785_v57 = vsel %vm17214_vm11, %v6753_v18, %v15798_v49  ;;  %v7391_v5 = vsel %vm17220_vm14, %v17219_v39, %v15730_v9  ;;  %vm17222_vm5 = vmmov %vm17220_vm14  ;;  %v17224_v1 = vld [vmem:[#allocation24_spill] sm:$0xff] }
 0x51a   : > { %v5652_v19 = vcombine.low %v5634_v53, %v5636_v62  ;;  %v15993_v22 = vpop.permute.xlu1 %8224  ;;  %v6757_v49 = vsel %vm17222_vm5, %v17221_v51, %v15863_v61  ;;  %v17223_v53 = vld [vmem:[#allocation66_spill] sm:$0xff]  ;;  %vm17225_vm11 = vmmov %vm17222_vm5 }
 0x51b   : > { %v15995_v7 = vpop.permute.xlu0 %8226  ;;  %v7389_v62 = vsel %vm17225_vm11, %v17224_v1, %v17223_v53  ;;  %v17269_v1 = vld [vmem:[#allocation53_spill] sm:$0xff] }
 0x51c   : > { %v5660_v3 = vrot.slane %v5652_v19, %v15710_v50  ;;  %v17226_v19 = vld [vmem:[#allocation30_spill] sm:$0xff] }
 0x51e   : > { %v5668_v13 = vcombine.low %v5660_v3, %v5667_v52  ;;  %v16010_v29 = vpop.permute.xlu1 %8352 }
 0x51f   : > { %v16012_v34 = vpop.permute.xlu0 %8354  ;;  %12226 = vmatmul.mubr.msk.bf16.gmra.mxu1 %vm17215_vm15, %v7417_v42  ;;  %vm17227_vm15 = vmmov %vm17222_vm5 }
 0x520   : > { %12200 = vmatmul.mubr.msk.bf16.vlgmr.msra.gmra.mxu0 %vm17032_vm1, %v5668_v13  ;;  %12229 = vmatprep.mubr.msk.bf16.mxu1 %vm17216_vm12, %v7419_v54  ;;  %v6755_v47 = vsel %vm17227_vm15, %v17226_v19, %v15876_v28  ;;  %vm17228_vm12 = vcmask 48128   ;;  %vm17232_vm1 = vcmask 72704   ;;  %v17253_v54 = vld [vmem:[#allocation41_spill] sm:$0xff]  ;;  %v17273_v19 = vld [vmem:[#allocation52_spill] sm:$0xff] }
 0x521   : > { %12239 = vmatprep.mubr.msk.bf16.mxu0 %vm17217_vm7, %v6785_v57  ;;  %12238 = vmatpush3.bf16.msra.mxu0 %v17218_v0  ;;  %v7421_v63 = vsel %vm17228_vm12, %v7389_v62, %v15800_v11  ;;  %vm17229_vm7 = vmmov %vm17228_vm12  ;;  %vm17237_vm12 = vcmask 23552   ;;  %v17257_v0 = vld [vmem:[#allocation44_spill] sm:$0xff]  ;;  %v17271_v62 = vld [vmem:[#allocation39_spill] sm:$0xff] }
 0x522   : > { %v6607_v48 = vpop.permute.xlu1 %6606  ;;  %v6787_v35 = vsel %vm17229_vm7, %v6755_v47, %v15890_v46  ;;  %vm17230_vm14 = vmmov %vm17229_vm7  ;;  %v17236_v46 = vld [vmem:[#allocation27_spill] sm:$0xff] }
 0x523   : > { %v6609_v38 = vpop.permute.xlu0 %6608  ;;  %v7423_v3 = vsel %vm17230_vm14, %v7391_v5, %v15752_v59  ;;  %vm17231_vm5 = vmmov %vm17229_vm7  ;;  %v8375_v24 = vsel %vm17237_vm12, %v17236_v46, %v15830_v30  ;;  %v17238_v59 = vld [vmem:[#allocation33_spill] sm:$0xff] }
 0x524   : > { %v6789_v61 = vsel %vm17231_vm5, %v6757_v49, %v15874_v15  ;;  %vm17233_vm11 = vmmov %vm17232_vm1 }
 0x525   : > { %vm17234_vm2 = vmmov %vm17232_vm1 }
 0x526   : > { %v6735_v52 = vpop.permute.xlu1 %6734  ;;  %vm17235_vm15 = vmmov %vm17232_vm1 }
 0x527   : > { %v6737_v9 = vpop.permute.xlu0 %6736  ;;  %12230 = vmatmul.mubr.msk.bf16.gmra.mxu1 %vm17232_vm1, %v7421_v63  ;;  %vm17239_vm7 = vmmov %vm17237_vm12  ;;  %vm17247_vm12 = vcmask 72704  }
 0x528   : > { %12240 = vmatmul.mubr.msk.bf16.vlgmr.msra.gmra.mxu0 %vm17233_vm11, %v6787_v35  ;;  %12233 = vmatprep.mubr.msk.bf16.mxu1 %vm17234_vm2, %v7423_v3  ;;  %v6761_v15 = vsel %vm17239_vm7, %v17238_v59, %v15912_v20  ;;  %vm17241_vm1 = vmmov %vm17239_vm7  ;;  %v17288_v59 = vld [vmem:[#allocation62_spill] sm:$0xff] }
 0x529   : > { %12243 = vmatprep.mubr.msk.bf16.mxu0 %vm17235_vm15, %v6789_v61  ;;  %v7393_v6 = vsel %vm17241_vm1, %v17240_v2, %v15849_v41  ;;  %vm17243_vm2 = vmmov %vm17241_vm1 }
 0x52a   : > { %v16047_v11 = vpop.permute.xlu1 %8228  ;;  %v6759_v18 = vsel %vm17243_vm2, %v17242_v8, %v15922_v4  ;;  %vm17244_vm14 = vmmov %vm17231_vm5 }
 0x52b   : > { %v16049_v28 = vpop.permute.xlu0 %8230  ;;  %v7425_v13 = vsel %vm17244_vm14, %v7393_v6, %v15865_v44  ;;  %v6791_v45 = vsel %vm17231_vm5, %v6759_v18, %v15934_v56  ;;  %vm17245_vm11 = vmmov %vm17231_vm5  ;;  %v17251_v56 = vld [vmem:[#allocation31_spill] sm:$0xff]  ;;  %vm17252_vm14 = vcmask 23552  }
 0x52c   : > { %v8407_v20 = vsel %vm17245_vm11, %v8375_v24, %v15847_v43  ;;  %vm17246_vm15 = vmmov %vm17231_vm5  ;;  %v8379_v14 = vsel %vm17252_vm14, %v17251_v56, %v15888_v58  ;;  %v17301_v56 = vld [vmem:[#allocation70_spill] sm:$0xff] }
 0x52d   : > { %v6793_v41 = vsel %vm17246_vm15, %v6761_v15, %v15920_v32  ;;  %vm17248_vm7 = vmmov %vm17247_vm12  ;;  %v17255_v32 = vld [vmem:[#allocation32_spill] sm:$0xff] }
 0x52e   : > { %v16067_v42 = vpop.permute.xlu1 %8356  ;;  %vm17249_vm1 = vmmov %vm17248_vm7 }
 0x52f   : > { %v16069_v30 = vpop.permute.xlu0 %8358  ;;  %12234 = vmatmul.mubr.msk.bf16.gmra.mxu1 %vm17247_vm12, %v7425_v13  ;;  %vm17250_vm2 = vmmov %vm17249_vm1  ;;  %vm17259_vm12 = vcmask 48128  }
 0x530   : > { %12244 = vmatmul.mubr.msk.bf16.gmra.mxu0 %vm17248_vm7, %v6791_v45  ;;  %12273 = vmatprep.mubr.msk.bf16.mxu1 %vm17250_vm2, %v8407_v20  ;;  %vm17254_vm5 = vmmov %vm17252_vm14  ;;  %vm17263_vm14 = vcmask 72704   ;;  %v17296_v45 = vld [vmem:[#allocation71_spill] sm:$0xff] }
 0x531   : > { %12247 = vmatprep.mubr.msk.bf16.mxu0 %vm17249_vm1, %v6793_v41  ;;  %v6765_v43 = vsel %vm17254_vm5, %v17253_v54, %v15952_v27  ;;  %vm17256_vm11 = vmmov %vm17254_vm5  ;;  %v17297_v41 = vld [vmem:[#allocation58_spill] sm:$0xff] }
 0x532   : > { %v6611_v44 = vpop.permute.xlu1 %6610  ;;  %v8377_v57 = vsel %vm17256_vm11, %v17255_v32, %v15900_v36  ;;  %vm17258_vm15 = vmmov %vm17254_vm5 }
 0x533   : > { %v6613_v4 = vpop.permute.xlu0 %6612  ;;  %v6763_v39 = vsel %vm17258_vm15, %v17257_v0, %v15962_v21  ;;  %v8409_v5 = vsel %vm17259_vm12, %v8377_v57, %v15914_v25  ;;  %vm17260_vm7 = vmmov %vm17259_vm12  ;;  %v17267_v21 = vld [vmem:[#allocation37_spill] sm:$0xff]  ;;  %vm17268_vm12 = vcmask 23552  }
 0x534   : > { %v6795_v51 = vsel %vm17260_vm7, %v6763_v39, %v15982_v16  ;;  %vm17261_vm1 = vmmov %vm17260_vm7  ;;  %v8383_v16 = vsel %vm17268_vm12, %v17267_v21, %v15932_v60 }
 0x535   : > { %v8411_v53 = vsel %vm17261_vm1, %v8379_v14, %v15898_v40  ;;  %vm17262_vm2 = vmmov %vm17261_vm1 }
 0x536   : > { %v6739_v49 = vpop.permute.xlu1 %6738  ;;  %v6797_v27 = vsel %vm17262_vm2, %v6765_v43, %v15960_v33  ;;  %vm17264_vm5 = vmmov %vm17263_vm14 }
 0x537   : > { %v6741_v58 = vpop.permute.xlu0 %6740  ;;  %12274 = vmatmul.mubr.msk.bf16.vlgmr.msra.gmra.mxu1 %vm17264_vm5, %v8409_v5  ;;  %vm17265_vm11 = vmmov %vm17264_vm5  ;;  %v17309_v5 = vld [vmem:[#allocation68_spill] sm:$0xff] }
 0x538   : > { %12248 = vmatmul.mubr.msk.bf16.gmra.mxu0 %vm17263_vm14, %v6795_v51  ;;  %vm17266_vm15 = vmmov %vm17264_vm5  ;;  %vm17275_vm14 = vcmask 48128   ;;  %v17310_v51 = vld [vmem:[#allocation67_spill] sm:$0xff] }
 0x539   : > { %12251 = vmatprep.mubr.msk.bf16.mxu0 %vm17265_vm11, %v6797_v27  ;;  %12277 = vmatprep.mubr.msk.bf16.mxu1 %vm17266_vm15, %v8411_v53  ;;  %vm17270_vm7 = vmmov %vm17268_vm12  ;;  %vm17279_vm12 = vcmask 72704   ;;  %v17313_v53 = vld [vmem:[#allocation75_spill] sm:$0xff] }
 0x53a   : > { %v8233_v36 = vpop.permute.xlu1 %8232  ;;  %v6769_v40 = vsel %vm17270_vm7, %v17269_v1, %v6609_v38  ;;  %vm17272_vm1 = vmmov %vm17270_vm7 }
 0x53b   : > { %v8235_v25 = vpop.permute.xlu0 %8234  ;;  %v8381_v33 = vsel %vm17272_vm1, %v17271_v62, %v15942_v26  ;;  %vm17274_vm2 = vmmov %vm17272_vm1 }
 0x53c   : > { %v6767_v47 = vsel %vm17274_vm2, %v17273_v19, %v6607_v48  ;;  %v8413_v63 = vsel %vm17275_vm14, %v8381_v33, %v15954_v55  ;;  %vm17276_vm5 = vmmov %vm17275_vm14  ;;  %v17283_v55 = vld [vmem:[#allocation49_spill] sm:$0xff]  ;;  %v17323_v19 = vld [vmem:[#allocation72_spill] sm:$0xff] }
 0x53d   : > { %v6799_v35 = vsel %vm17276_vm5, %v6767_v47, %v6735_v52  ;;  %vm17277_vm11 = vmmov %vm17276_vm5  ;;  %v8387_v38 = vsel %vm17274_vm2, %v17283_v55, %v15995_v7  ;;  %v17284_v52 = vld [vmem:[#allocation64_spill] sm:$0xff] }
 0x53e   : > { %v8361_v3 = vpop.permute.xlu1 %8360  ;;  %v8415_v60 = vsel %vm17277_vm11, %v8383_v16, %v15940_v10  ;;  %vm17278_vm15 = vmmov %vm17276_vm5  ;;  %v17286_v10 = vld [vmem:[#allocation47_spill] sm:$0xff] }
 0x53f   : > { %v8363_v61 = vpop.permute.xlu0 %8362  ;;  %v6801_v46 = vsel %vm17278_vm15, %v6769_v40, %v6737_v9  ;;  %vm17280_vm7 = vmmov %vm17279_vm12 }
 0x540   : > { %12252 = vmatmul.mubr.msk.bf16.gmra.mxu0 %vm17279_vm12, %v6799_v35  ;;  %12278 = vmatmul.mubr.msk.bf16.gmra.mxu1 %vm17280_vm7, %v8413_v63  ;;  %vm17281_vm1 = vmmov %vm17280_vm7 }
 0x541   : > { %12255 = vmatprep.mubr.msk.bf16.mxu0 %vm17281_vm1, %v6801_v46  ;;  %vm17282_vm10 = vmmov %vm17281_vm1 }
 0x542   : > { %12281 = vmatprep.mubr.msk.bf16.mxu1 %vm17282_vm10, %v8415_v60  ;;  %v6615_v26 = vpop.permute.xlu1 %6614  ;;  %vm17285_vm14 = vmmov %vm17274_vm2 }
 0x543   : > { %v6617_v48 = vpop.permute.xlu0 %6616  ;;  %v6773_v24 = vsel %vm17285_vm14, %v17284_v52, %v6613_v4  ;;  %vm17287_vm5 = vmmov %vm17274_vm2 }
 0x544   : > { %v8385_v9 = vsel %vm17287_vm5, %v17286_v10, %v15993_v22  ;;  %vm17289_vm11 = vmmov %vm17274_vm2 }
 0x545   : > { %v6771_v15 = vsel %vm17289_vm11, %v17288_v59, %v6611_v44  ;;  %v8417_v2 = vsel %vm17278_vm15, %v8385_v9, %v16010_v29  ;;  %vm17290_vm10 = vmmov %vm17278_vm15  ;;  %v6777_v29 = vsel %vm17289_vm11, %v17296_v45, %v6617_v48 }
 0x546   : > { %v6803_v6 = vsel %vm17290_vm10, %v6771_v15, %v6739_v49  ;;  %v6743_v8 = vpop.permute.xlu1 %6742  ;;  %vm17291_vm12 = vmmov %vm17290_vm10 }
 0x547   : > { %v6745_v18 = vpop.permute.xlu0 %6744  ;;  %v8419_v7 = vsel %vm17291_vm12, %v8387_v38, %v16012_v34  ;;  %vm17292_vm7 = vmmov %vm17290_vm10  ;;  %v17299_v34 = vld [vmem:[#allocation56_spill] sm:$0xff] }
 0x548   : > { %v6805_v13 = vsel %vm17292_vm7, %v6773_v24, %v6741_v58  ;;  %12256 = vmatmul.mubr.msk.bf16.gmra.mxu0 %vm17281_vm1, %v6803_v6  ;;  %vm17293_vm2 = vmmov %vm17281_vm1  ;;  %v6809_v54 = vsel %vm17292_vm7, %v6777_v29, %v6745_v18 }
 0x549   : > { %12282 = vmatmul.mubr.msk.bf16.gmra.mxu1 %vm17293_vm2, %v8417_v2  ;;  %vm17294_vm14 = vmmov %vm17281_vm1 }
 0x54a   : > { %12259 = vmatprep.mubr.msk.bf16.mxu0 %vm17294_vm14, %v6805_v13  ;;  %vm17295_vm5 = vmmov %vm17281_vm1  ;;  %v8237_v22 = vpop.permute.xlu1 %8236 }
 0x54b   : > { %12285 = vmatprep.mubr.msk.bf16.mxu1 %vm17295_vm5, %v8419_v7  ;;  %v8239_v20 = vpop.permute.xlu0 %8238  ;;  %vm17298_vm15 = vmmov %vm17289_vm11 }
 0x54c   : > { %v8391_v44 = vsel %vm17298_vm15, %v17297_v41, %v16049_v28  ;;  %vm17300_vm10 = vmmov %vm17289_vm11 }
 0x54d   : > { %v8389_v4 = vsel %vm17300_vm10, %v17299_v34, %v16047_v11  ;;  %vm17302_vm12 = vmmov %vm17300_vm10 }
 0x54e   : > { %v6775_v14 = vsel %vm17302_vm12, %v17301_v56, %v6615_v26  ;;  %vm17303_vm1 = vmmov %vm17292_vm7  ;;  %v8365_v57 = vpop.permute.xlu1 %8364  ;;  %v17329_v26 = vld [vmem:[#allocation78_spill] sm:$0xff] }
 0x54f   : > { %v8421_v43 = vsel %vm17303_vm1, %v8389_v4, %v16067_v42  ;;  %vm17304_vm2 = vmmov %vm17303_vm1  ;;  %v8367_v0 = vpop.permute.xlu0 %8366  ;;  %v8395_v42 = vsel %vm17302_vm12, %v17309_v5, %v8235_v25  ;;  %v17321_v25 = vld [vmem:[#allocation73_spill] sm:$0xff] }
 0x550   : > { %v6807_v32 = vsel %vm17304_vm2, %v6775_v14, %v6743_v8  ;;  %vm17305_vm14 = vmmov %vm17303_vm1 }
 0x551   : > { %v8423_v39 = vsel %vm17305_vm14, %v8391_v44, %v16069_v30  ;;  %12260 = vmatmul.mubr.msk.bf16.gmra.mxu0 %vm17295_vm5, %v6807_v32  ;;  %vm17306_vm11 = vmmov %vm17295_vm5  ;;  %v9216_v32 = vld [vmem:[#allocation3 + $0x4] sm:$0x1] }
 0x552   : > { %12286 = vmatmul.mubr.msk.bf16.gmra.mxu1 %vm17306_vm11, %v8421_v43  ;;  %vm17307_vm15 = vmmov %vm17295_vm5  ;;  %v6619_v11 = vpop.permute.xlu1 %6618  ;;  %v9208_v43 = vld [vmem:[#allocation3] sm:$0xf] }
 0x553   : > { %12289 = vmatprep.mubr.msk.bf16.mxu1 %vm17307_vm15, %v8423_v39  ;;  %vm17308_vm10 = vmmov %vm17295_vm5  ;;  %v6621_v28 = vpop.permute.xlu0 %6620 }
 0x554   : > { %12263 = vmatprep.mubr.msk.bf16.mxu0 %vm17308_vm10, %v6809_v54  ;;  %vm17311_vm7 = vmmov %vm17302_vm12 }
 0x555   : > { %v8393_v49 = vsel %vm17311_vm7, %v17310_v51, %v8233_v36  ;;  %vm17312_vm1 = vmmov %vm17311_vm7 }
 0x556   : > { %v6781_v58 = vsel %vm17312_vm1, %v15686_v12, %v6621_v28  ;;  %v8425_v30 = vsel %vm17304_vm2, %v8393_v49, %v8361_v3  ;;  %vm17314_vm14 = vmmov %vm17312_vm1  ;;  %v6747_v21 = vpop.permute.xlu1 %6746 }
 0x557   : > { %v6779_v27 = vsel %vm17314_vm14, %v17313_v53, %v6619_v11  ;;  %vm17315_vm5 = vmmov %vm17304_vm2  ;;  %v6749_v40 = vpop.permute.xlu0 %6748  ;;  %v9224_v53 = vld [vmem:[#allocation3] sm:$0xe] }
 0x558   : > { %v8427_v16 = vsel %vm17315_vm5, %v8395_v42, %v8363_v61  ;;  %vm17316_vm11 = vmmov %vm17304_vm2 }
 0x559   : > { %v6811_v1 = vsel %vm17316_vm11, %v6779_v27, %v6747_v21  ;;  %vm17317_vm15 = vmmov %vm17308_vm10  ;;  %v11704_v27 = vcombine.low %v9224_v53, %v9216_v32 }
 0x55a   : > { %12290 = vmatmul.mubr.msk.bf16.gmra.mxu1 %vm17317_vm15, %v8425_v30  ;;  %12264 = vmatmul.mubr.msk.bf16.gmra.mxu0 %vm17308_vm10, %v6811_v1  ;;  %vm17318_vm12 = vmmov %vm17308_vm10  ;;  %v8241_v12 = vpop.permute.xlu1 %8240 }
 0x55b   : > { %12293 = vmatprep.mubr.msk.bf16.mxu1 %vm17318_vm12, %v8427_v16  ;;  %vm17319_vm7 = vmmov %vm17304_vm2  ;;  %v8243_v33 = vpop.permute.xlu0 %8242  ;;  %v9368_v16 = vrot.slane %v11704_v27, 1 }
 0x55c   : > { %v6813_v36 = vsel %vm17319_vm7, %v6781_v58, %v6749_v40  ;;  %vm17320_vm1 = vmmov %vm17308_vm10 }
 0x55d   : > { %12267 = vmatprep.mubr.msk.bf16.mxu0 %vm17320_vm1, %v6813_v36  ;;  %vm17322_vm2 = vmmov %vm17314_vm14 }
 0x55e   : > { %v8399_v62 = vsel %vm17322_vm2, %v17321_v25, %v8239_v20  ;;  %vm17324_vm14 = vmmov %vm17322_vm2  ;;  %v8369_v35 = vpop.permute.xlu1 %8368 }
 0x55f   : > { %v8397_v47 = vsel %vm17324_vm14, %v17323_v19, %v8237_v22  ;;  %vm17325_vm11 = vmmov %vm17315_vm5  ;;  %v8371_v46 = vpop.permute.xlu0 %8370 }
 0x560   : > { %v8429_v63 = vsel %vm17315_vm5, %v8397_v47, %v8365_v57  ;;  %v8431_v3 = vsel %vm17325_vm11, %v8399_v62, %v8367_v0  ;;  %vm17326_vm15 = vmmov %vm17320_vm1  ;;  %v11696_v0 = vcombine.low %v9208_v43, %v9216_v32 }
 0x561   : > { %vm17327_vm10 = vmmov %vm17320_vm1 }
 0x562   : > { %12294 = vmatmul.mubr.msk.bf16.gmra.mxu1 %vm17326_vm15, %v8429_v63  ;;  %v6623_v61 = vpop.permute.xlu1 %6622  ;;  %vm17328_vm12 = vmmov %vm17322_vm2  ;;  %v9273_v11 = vshrl.u32 %v11696_v0, 16  ;;  %v9275_v28 = vshll.u32 %v11696_v0, 16 }
 0x563   : > { %12297 = vmatprep.mubr.msk.bf16.mxu1 %vm17327_vm10, %v8431_v3  ;;  %v8403_v60 = vsel %vm17328_vm12, %v15735_v23, %v8243_v33  ;;  %vm17330_vm7 = vmmov %vm17322_vm2 }
 0x564   : > { %v8401_v48 = vsel %vm17330_vm7, %v17329_v26, %v8241_v12  ;;  %vm17331_vm1 = vmmov %vm17315_vm5  ;;  %v9277_v42 = vrot.slane %v9275_v28, 1 }
 0x565   : > { %v8435_v55 = vsel %vm17331_vm1, %v8403_v60, %v8371_v46  ;;  %vm17332_vm2 = vmmov %vm17331_vm1 }
 0x566   : > { %v8433_v38 = vsel %vm17332_vm2, %v8401_v48, %v8369_v35  ;;  %vm17333_vm14 = vmmov %vm17330_vm7  ;;  %v6751_v24 = vpop.permute.xlu1 %6750  ;;  %vm17340_vm2 = vmmov 0   ;;  %v9278_v49 = vor.u32 %v9277_v42, %v9273_v11 }
 0x567   : > { %v6783_v52 = vsel %vm17333_vm14, %v15772_v37, %v6623_v61  ;;  %vm17334_vm5 = vmmov %vm17331_vm1  ;;  %vm17342_vm14 = vcmask 1040384  }
 0x568   : > { %v6815_v10 = vsel %vm17334_vm5, %v6783_v52, %v6751_v24  ;;  %vm17335_vm11 = vmmov %vm17327_vm10  ;;  %9328 = vrot.lane.b32.xlu0 %v9278_v49, %s12897_s23  ;;  %vm17344_vm5 = vcmask 1041408  }
 0x569   : > { %vm17336_vm15 = vmmov %vm17327_vm10 }
 0x56a   : > { %12298 = vmatmul.mubr.msk.bf16.gmra.mxu1 %vm17335_vm11, %v8433_v38  ;;  %12268 = vmatmul.mubr.msk.bf16.gmra.mxu0 %vm17336_vm15, %v6815_v10  ;;  %v8245_v23 = vpop.permute.xlu1 %8244  ;;  %vm17337_vm12 = vmmov %vm17330_vm7  ;;  %vm17346_vm11 = vcmask 1042432  }
 0x56b   : > { %12301 = vmatprep.mubr.msk.bf16.mxu1 %vm17327_vm10, %v8435_v55  ;;  %v8405_v9 = vsel %vm17337_vm12, %v15826_v17, %v8245_v23  ;;  %vm17338_vm7 = vmmov %vm17331_vm1 }
 0x56c   : > { %vm17339_vm1 = vmmov %vm17327_vm10  ;;  %9376 = vrot.lane.b32.xlu0 %v9368_v16, %s12898_s24 }
 0x56d   : > { %vm17348_vm15 = vmmov %vm17342_vm14 }
 0x56e   : > { %v8373_v59 = vpop.permute.xlu1 %8372  ;;  %vm17349_vm10 = vmmov %vm17344_vm5 }
 0x56f   : > { %v8437_v15 = vsel %vm17338_vm7, %v8405_v9, %v8373_v59  ;;  %vm17350_vm12 = vmmov %vm17346_vm11 }
 0x570   : > { %vm17353_vm7 = vmmov %vm17342_vm14 }
 0x572   : > { %12302 = vmatmul.mubr.msk.bf16.gmra.mxu1 %vm17339_vm1, %v8437_v15  ;;  %vm17354_vm1 = vmmov %vm17344_vm5 }
 0x573   : > { %12367 = vmatprep.mubr.msk.bf16.mxu1 %vm17340_vm2, %v17111_v31 }
 0x59f   : > { %v5446_v37 = vpop.f32.mrf.mxu1 }
 0x5a1   : > { %v12181_v2 = vpop.f32.mrf.mxu1 }
 0x5a3   : > { %v5449_v6 = vpop.f32.mrf.mxu1 }
 0x5a5   : > { %v12182_v8 = vpop.f32.mrf.mxu1 }
 0x5af   : > { %v5529_v18 = vpop.f32.mrf.mxu1 }
 0x5b0   : > { %v5530_v7 = vadd.f32 %v5529_v18, %v5446_v37 }
 0x5b1   : > { %v12191_v13 = vpop.f32.mrf.mxu1 }
 0x5b3   : > { %v5532_v22 = vpop.f32.mrf.mxu1 }
 0x5b4   : > { %v5533_v45 = vadd.f32 %v5532_v22, %v5449_v6 }
 0x5b5   : > { %v12192_v29 = vpop.f32.mrf.mxu1 }
 0x5b6   : > { %v16274_v29 = vld [vmem:[%s16943_s3] ss:$0 sm:$0xff] }
 0x5b7   : > { %v12207_v20 = vpop.f32.mrf.mxu1 }
 0x5b9   : > { %v7502_v17 = vpop.f32.mrf.mxu1 }
 0x5bb   : > { %v16205_v41 = vpop.f32.mrf.mxu1 }
 0x5bd   : > { %v16207_v44 = vpop.f32.mrf.mxu1 }
 0x5bf   : > { %v16209_v34 = vpop.f32.mrf.mxu1 }
 0x5c1   : > { %v16211_v4 = vpop.f32.mrf.mxu1 }
 0x5c3   : > { %v16213_v56 = vpop.f32.mrf.mxu1 }
 0x5c5   : > { %v16215_v14 = vpop.f32.mrf.mxu1 }
 0x5c7   : > { %v16217_v54 = vpop.f32.mrf.mxu1 }
 0x5c9   : > { %v16219_v57 = vpop.f32.mrf.mxu1 }
 0x5cb   : > { %v16221_v39 = vpop.f32.mrf.mxu1 }
 0x5cd   : > { %v16223_v5 = vpop.f32.mrf.mxu1 }
 0x5cf   : > { %v16225_v51 = vpop.f32.mrf.mxu1 }
 0x5d1   : > { %v16227_v58 = vpop.f32.mrf.mxu1 }
 0x5d3   : > { %v16230_v30 = vpop.f32.mrf.mxu1 }
 0x5d5   : > { %v16232_v21 = vpop.f32.mrf.mxu1 }
 0x5d7   : > { %v16234_v1 = vpop.f32.mrf.mxu1 }
 0x5d9   : > { %v16237_v40 = vpop.f32.mrf.mxu1 }
 0x5db   : > { %v16239_v36 = vpop.f32.mrf.mxu1 }
 0x5dd   : > { %v16241_v12 = vpop.f32.mrf.mxu1 }
 0x5df   : > { %v16243_v62 = vpop.f32.mrf.mxu1 }
 0x5e0   : > { %v5724_v25 = vpop.f32.mrf.mxu0 }
 0x5e1   : > { %v16245_v33 = vadd.f32 %v5724_v25, %v5530_v7  ;;  %v16247_v47 = vpop.f32.mrf.mxu1 }
 0x5e2   : > { %v12201_v19 = vpop.f32.mrf.mxu0 }
 0x5e3   : > { %v16249_v35 = vpop.f32.mrf.mxu1 }
 0x5e4   : > { %v5727_v63 = vpop.f32.mrf.mxu0 }
 0x5e5   : > { %v16251_v3 = vadd.f32 %v5727_v63, %v5533_v45  ;;  %v16253_v60 = vpop.f32.mrf.mxu1 }
 0x5e6   : > { %v12202_v61 = vpop.f32.mrf.mxu0 }
 0x5e7   : > { %v16255_v46 = vpop.f32.mrf.mxu1 }
 0x5e8   : > { %v12241_v26 = vpop.f32.mrf.mxu0 }
 0x5e9   : > { %v16257_v48 = vpop.f32.mrf.mxu1  ;;  %v7712_v18 = vadd.f32 %v12241_v26, %v12207_v20 }
 0x5ea   : > { %v7703_v55 = vpop.f32.mrf.mxu0 }
 0x5eb   : > { %v16259_v38 = vpop.f32.mrf.mxu1  ;;  %v7704_v22 = vadd.f32 %v7703_v55, %v7502_v17 }
 0x5ec   : > { %v12242_v52 = vpop.f32.mrf.mxu0 }
 0x5ed   : > { %v16261_v24 = vpop.f32.mrf.mxu1  ;;  %v7715_v0 = vadd.f32 %v12242_v52, %v16205_v41 }
 0x5ee   : > { %v7706_v10 = vpop.f32.mrf.mxu0 }
 0x5ef   : > { %v16263_v23 = vpop.f32.mrf.mxu1  ;;  %v7707_v49 = vadd.f32 %v7706_v10, %v16207_v44 }
 0x5f0   : > { %v12245_v9 = vpop.f32.mrf.mxu0 }
 0x5f1   : > { %v16265_v59 = vpop.f32.mrf.mxu1  ;;  %v7728_v16 = vadd.f32 %v12245_v9, %v16209_v34 }
 0x5f2   : > { %v7719_v15 = vpop.f32.mrf.mxu0 }
 0x5f3   : > { %v16267_v37 = vpop.f32.mrf.mxu1  ;;  %v7720_v44 = vadd.f32 %v7719_v15, %v16211_v4 }
 0x5f4   : > { %v12246_v2 = vpop.f32.mrf.mxu0 }
 0x5f5   : > { %v16269_v6 = vpop.f32.mrf.mxu1 }
 0x5f6   : > { %v7722_v8 = vpop.f32.mrf.mxu0 }
 0x5f7   : > { %v12275_v13 = vpop.f32.mrf.mxu1 }
 0x5f8   : > { %v12249_v7 = vpop.f32.mrf.mxu0  ;;  %v8643_v45 = vadd.f32 %v12275_v13, %v7712_v18 }
 0x5f9   : > { %v8514_v32 = vpop.f32.mrf.mxu1 }
 0x5fa   : > { %v7735_v43 = vpop.f32.mrf.mxu0  ;;  %v8641_v11 = vadd.f32 %v8514_v32, %v7704_v22  ;;  %v8682_v20 = vadd.f32 %v16274_v29, %v8643_v45  ;;  %v7731_v22 = vadd.f32 %v12246_v2, %v16213_v56  ;;  %v7744_v56 = vadd.f32 %v12249_v7, %v16217_v54 }
 0x5fb   : > { %v12276_v42 = vpop.f32.mrf.mxu1  ;;  %v7736_v2 = vadd.f32 %v7735_v43, %v16219_v57 }
 0x5fc   : > { %v12250_v28 = vpop.f32.mrf.mxu0  ;;  %v8644_v53 = vadd.f32 %v12276_v42, %v7715_v0  ;;  %v8680_v25 = vadd.f32 %v16274_v29, %v8641_v11  ;;  %v8714_v41 = vmax.f32 %v8682_v20, 0.0  ;;  %v7723_v42 = vadd.f32 %v7722_v8, %v16215_v14 }
 0x5fd   : > { %v8517_v17 = vpop.f32.mrf.mxu1 }
 0x5fe   : > { %v7738_v27 = vpop.f32.mrf.mxu0  ;;  %v8683_v19 = vadd.f32 %v16274_v29, %v8644_v53  ;;  %v8642_v63 = vadd.f32 %v8517_v17, %v7707_v49  ;;  %v8712_v45 = vmax.f32 %v8680_v25, 0.0  ;;  %v7747_v25 = vadd.f32 %v12250_v28, %v16221_v39 }
 0x600   : > { %v12253_v61 = vpop.f32.mrf.mxu0  ;;  %v12279_v26 = vpop.f32.mrf.mxu1  ;;  %v8715_v55 = vmax.f32 %v8683_v19, 0.0  ;;  %v8681_v52 = vadd.f32 %v16274_v29, %v8642_v63 }
 0x601   : > { %v8647_v18 = vadd.f32 %v12279_v26, %v7728_v16 }
 0x602   : > { %v7751_v10 = vpop.f32.mrf.mxu0  ;;  %v8530_v13 = vpop.f32.mrf.mxu1  ;;  %v8745_v34 = vpack.c.bf16 %v8715_v55, %v8714_v41  ;;  %v8713_v9 = vmax.f32 %v8681_v52, 0.0 }
 0x603   : > { %v8645_v32 = vadd.f32 %v8530_v13, %v7720_v44  ;;  %v8686_v20 = vadd.f32 %v16274_v29, %v8647_v18  ;;  %v7739_v18 = vadd.f32 %v7738_v27, %v16223_v5  ;;  %v7760_v44 = vadd.f32 %v12253_v61, %v16225_v51 }
 0x604   : > { %v12254_v0 = vpop.f32.mrf.mxu0  ;;  %v12280_v11 = vpop.f32.mrf.mxu1  ;;  %v8744_v49 = vpack.c.bf16 %v8713_v9, %v8712_v45  ;;  %v7752_v13 = vadd.f32 %v7751_v10, %v16227_v58 }
 0x605   : > { %v8648_v53 = vadd.f32 %v12280_v11, %v7731_v22  ;;  %v8684_v63 = vadd.f32 %v16274_v29, %v8645_v32  ;;  %v8718_v41 = vmax.f32 %v8686_v20, 0.0  ;;  %v16297_v39 = vadd.f32 %v12254_v0, %v16230_v30 }
 0x606   : > { %v7754_v17 = vpop.f32.mrf.mxu0  ;;  %v8533_v16 = vpop.f32.mrf.mxu1  ;;  %v8760_v19 = vmax.bf16 %v8745_v34, %v8744_v49 }
 0x607   : > { %v8687_v4 = vadd.f32 %v16274_v29, %v8648_v53  ;;  %v8646_v15 = vadd.f32 %v8533_v16, %v7723_v42  ;;  %v8716_v45 = vmax.f32 %v8684_v63, 0.0  ;;  %v16300_v34 = vadd.f32 %v7754_v17, %v16232_v21 }
 0x608   : > { %v12257_v26 = vpop.f32.mrf.mxu0  ;;  %v8769_v8 = vshrl.u32 %v8760_v19, 16 }
 0x609   : > { %v12283_v14 = vpop.f32.mrf.mxu1  ;;  %v8719_v55 = vmax.f32 %v8687_v4, 0.0  ;;  %v8685_v52 = vadd.f32 %v16274_v29, %v8646_v15  ;;  %v16304_v10 = vadd.f32 %v12257_v26, %v16234_v1 }
 0x60a   : > { %v8651_v54 = vadd.f32 %v12283_v14, %v7744_v56  ;;  %v7767_v7 = vpop.f32.mrf.mxu0  ;;  %v8800_v43 = vmax.bf16 %v8769_v8, %v8760_v19 }
 0x60b   : > { %v8546_v57 = vpop.f32.mrf.mxu1  ;;  %v8747_v28 = vpack.c.bf16 %v8719_v55, %v8718_v41  ;;  %v8717_v22 = vmax.f32 %v8685_v52, 0.0  ;;  %v16307_v32 = vadd.f32 %v7767_v7, %v16237_v40 }
 0x60c   : > { %v8690_v9 = vadd.f32 %v16274_v29, %v8651_v54  ;;  %v8649_v5 = vadd.f32 %v8546_v57, %v7736_v2  ;;  %v12258_v27 = vpop.f32.mrf.mxu0  ;;  %v8809_v61 = vshll.u32 %v8800_v43, 16  ;;  %v8856_v58 = vrot.slane %v8800_v43, 1 }
 0x60d   : > { %v12284_v51 = vpop.f32.mrf.mxu1  ;;  %v8880_v30 = vrot.slane %v8800_v43, 2  ;;  %v8904_v0 = vrot.slane %v8800_v43, 3  ;;  %v8746_v11 = vpack.c.bf16 %v8717_v22, %v8716_v45  ;;  %v16311_v16 = vadd.f32 %v12258_v27, %v16239_v36 }
 0x60e   : > { %v8688_v42 = vadd.f32 %v16274_v29, %v8649_v5  ;;  %v7770_v21 = vpop.f32.mrf.mxu0  ;;  %v8811_v20 = vrot.slane %v8809_v61, 1  ;;  %v8864_v53 = vrot.slane %v8809_v61, 2  ;;  %v8722_v17 = vmax.f32 %v8690_v9, 0.0 }
 0x60f   : > { %v8549_v49 = vpop.f32.mrf.mxu1  ;;  %v8888_v19 = vrot.slane %v8809_v61, 3  ;;  %v8912_v4 = vrot.slane %v8809_v61, 4  ;;  %v8761_v1 = vmax.bf16 %v8747_v28, %v8746_v11  ;;  %v8652_v15 = vadd.f32 %v12284_v51, %v7747_v25 }
 0x610   : > { %v8928_v63 = vsel %vm14490_vm9, %v8800_v43, %v8811_v20  ;;  %v8720_v26 = vmax.f32 %v8688_v42, 0.0  ;;  %v8650_v14 = vadd.f32 %v8549_v49, %v7739_v18  ;;  %v16318_v36 = vadd.f32 %v7770_v21, %v16241_v12 }
 0x611   : > { %v12261_v56 = vpop.f32.mrf.mxu0  ;;  %v8938_v41 = vsel %vm17342_vm14, %v8928_v63, %v8856_v58  ;;  %v8772_v55 = vshrl.u32 %v8761_v1, 16  ;;  %v8691_v52 = vadd.f32 %v16274_v29, %v8652_v15  ;;  %vm17355_vm14 = vmmov %vm17346_vm11 }
 0x612   : > { %v12287_v40 = vpop.f32.mrf.mxu1  ;;  %v8968_v25 = vsel %vm14495_vm13, %v8938_v41, %v8864_v53  ;;  %v8689_v28 = vadd.f32 %v16274_v29, %v8650_v14  ;;  %v16324_v43 = vadd.f32 %v12261_v56, %v16243_v62 }
 0x613   : > { %v8655_v8 = vadd.f32 %v12287_v40, %v7760_v44  ;;  %v7783_v54 = vpop.f32.mrf.mxu0  ;;  %v8978_v44 = vsel %vm17344_vm5, %v8968_v25, %v8880_v30  ;;  %v8801_v22 = vmax.bf16 %v8772_v55, %v8761_v1  ;;  %v8723_v45 = vmax.f32 %v8691_v52, 0.0 }
 0x614   : > { %v8562_v7 = vpop.f32.mrf.mxu1  ;;  %v16331_v12 = vadd.f32 %v7783_v54, %v16247_v47  ;;  %v9008_v51 = vsel %vm14503_vm4, %v8978_v44, %v8888_v19  ;;  %v8721_v61 = vmax.f32 %v8689_v28, 0.0  ;;  %vm17356_vm5 = vcmask 1043456  }
 0x615   : > { %v16327_v18 = vadd.f32 %v16274_v29, %v8655_v8  ;;  %v12262_v9 = vpop.f32.mrf.mxu0  ;;  %v8653_v62 = vadd.f32 %v8562_v7, %v7752_v13  ;;  %v9018_v11 = vsel %vm17346_vm11, %v9008_v51, %v8904_v0  ;;  %v8813_v42 = vshll.u32 %v8801_v22, 16  ;;  %vm17357_vm11 = vmmov %vm17353_vm7 }
 0x616   : > { %v12288_v5 = vpop.f32.mrf.mxu1  ;;  %v8857_v21 = vrot.slane %v8801_v22, 1  ;;  %v16338_v30 = vadd.f32 %v12262_v9, %v16249_v35  ;;  %v9048_v47 = vsel %vm14511_vm8, %v9018_v11, %v8912_v4  ;;  %v8881_v53 = vrot.slane %v8801_v22, 2 }
 0x617   : > { %v8726_v58 = vmax.f32 %v16327_v18, 0.0  ;;  %v8749_v1 = vpack.c.bf16 %v8723_v45, %v8722_v17  ;;  %v8748_v15 = vpack.c.bf16 %v8721_v61, %v8720_v26  ;;  %v11688_v56 = vcombine.low %v9048_v47, %v9048_v47  ;;  %v7786_v14 = vpop.f32.mrf.mxu0 }
 0x618   : > { %v8565_v49 = vpop.f32.mrf.mxu1  ;;  %v8815_v19 = vrot.slane %v8813_v42, 1  ;;  %v8865_v40 = vrot.slane %v8813_v42, 2  ;;  %v8905_v63 = vrot.slane %v8801_v22, 3  ;;  %v8889_v8 = vrot.slane %v8813_v42, 3 }
 0x619   : > { %v8762_v0 = vmax.bf16 %v8749_v1, %v8748_v15  ;;  %v8692_v41 = vadd.f32 %v16274_v29, %v8653_v62  ;;  %v8656_v35 = vadd.f32 %v12288_v5, %v16297_v39  ;;  %v9081_v55 = vshrl.u32 %v11688_v56, 16  ;;  %v9160_v15 = vld [vmem:[#allocation3 + $0x8] sm:$0xf] }
 0x61a   : > { %v12291_v13 = vpop.f32.mrf.mxu1  ;;  %v9084_v52 = vshll.u32 %v11688_v56, 16  ;;  %v8913_v54 = vrot.slane %v8813_v42, 4  ;;  %v8929_v4 = vsel %vm14490_vm9, %v8801_v22, %v8815_v19  ;;  %v16349_v28 = vadd.f32 %v7786_v14, %v16253_v60  ;;  %v12265_v5 = vpop.f32.mrf.mxu0  ;;  %v9163_v56 = vld [vmem:[#allocation3 + $0xc] sm:$0x1] }
 0x61b   : > { %v8942_v26 = vsel %vm17348_vm15, %v8929_v4, %v8857_v21  ;;  %v8775_v7 = vshrl.u32 %v8762_v0, 16  ;;  %v8695_v25 = vadd.f32 %v16274_v29, %v8656_v35  ;;  %v9083_v44 = vrot.slane %v9081_v55, 7  ;;  %vm17358_vm15 = vmmov %vm17354_vm1 }
 0x61c   : > { %v8578_v17 = vpop.f32.mrf.mxu1  ;;  %v8969_v45 = vsel %vm14495_vm13, %v8942_v26, %v8865_v40  ;;  %v8724_v39 = vmax.f32 %v8692_v41, 0.0  ;;  %v8654_v9 = vadd.f32 %v8565_v49, %v16300_v34  ;;  %v8659_v11 = vadd.f32 %v12291_v13, %v16304_v10  ;;  %v7799_v41 = vpop.f32.mrf.mxu0 }
 0x61d   : > { %v8982_v22 = vsel %vm17349_vm10, %v8969_v45, %v8881_v53  ;;  %v8802_v61 = vmax.bf16 %v8775_v7, %v8762_v0  ;;  %v8727_v62 = vmax.f32 %v8695_v25, 0.0  ;;  %v9086_v42 = vor.u32 %v9084_v52, %v9083_v44  ;;  %vm17359_vm10 = vmmov %vm17350_vm12 }
 0x61e   : > { %v12292_v51 = vpop.f32.mrf.mxu1  ;;  %v9087_v21 = vrot.slane %v9083_v44, 4  ;;  %v9009_v60 = vsel %vm14503_vm4, %v8982_v22, %v8889_v8  ;;  %v8693_v47 = vadd.f32 %v16274_v29, %v8654_v9  ;;  %v16361_v53 = vadd.f32 %v12265_v5, %v16255_v46 }
 0x61f   : > { %v9022_v34 = vsel %vm17350_vm12, %v9009_v60, %v8905_v63  ;;  %v8817_v49 = vshll.u32 %v8802_v61, 16  ;;  %v8858_v19 = vrot.slane %v8802_v61, 1  ;;  %v9161_v10 = vsel %vm14529_vm3, %v9086_v42, %v9160_v15  ;;  %v12266_v15 = vpop.f32.mrf.mxu0  ;;  %vm17360_vm12 = vmmov %vm17353_vm7 }
 0x620   : > { %v8581_v1 = vpop.f32.mrf.mxu1  ;;  %v9164_v13 = vsel %vm14537_vm0, %v9087_v21, %v9163_v56  ;;  %v9049_v8 = vsel %vm14511_vm8, %v9022_v34, %v8913_v54  ;;  %v8882_v0 = vrot.slane %v8802_v61, 2  ;;  %9162 = vst [vmem:[#allocation3 + $0x8] sm:$0xf] %v9161_v10  ;;  %v8906_v4 = vrot.slane %v8802_v61, 3  ;;  %v9169_v10 = vld [vmem:[#allocation3 + $0x14] sm:$0x1] }
 0x621   : > { %9165 = vst [vmem:[#allocation3 + $0xc] sm:$0x1] %v9164_v13  ;;  %v11689_v63 = vcombine.low %v9049_v8, %v9049_v8  ;;  %v8819_v55 = vrot.slane %v8817_v49, 1  ;;  %v8866_v52 = vrot.slane %v8817_v49, 2  ;;  %v8890_v46 = vrot.slane %v8817_v49, 3  ;;  %v7802_v8 = vpop.f32.mrf.mxu0 }
 0x622   : > { %v12295_v35 = vpop.f32.mrf.mxu1  ;;  %v8751_v26 = vpack.c.bf16 %v8727_v62, %v8726_v58  ;;  %v8725_v7 = vmax.f32 %v8693_v47, 0.0  ;;  %v8698_v25 = vadd.f32 %v16274_v29, %v8659_v11  ;;  %v8914_v9 = vrot.slane %v8817_v49, 4 }
 0x623   : > { %v9089_v45 = vshrl.u32 %v11689_v63, 16  ;;  %v8930_v54 = vsel %vm14490_vm9, %v8802_v61, %v8819_v55  ;;  %v8657_v5 = vadd.f32 %v8578_v17, %v16307_v32  ;;  %v9092_v22 = vshll.u32 %v11689_v63, 16 }
 0x624   : > { %v8594_v44 = vpop.f32.mrf.mxu1  ;;  %v8946_v42 = vsel %vm17353_vm7, %v8930_v54, %v8858_v19  ;;  %v8750_v21 = vpack.c.bf16 %v8725_v7, %v8724_v39  ;;  %v8730_v60 = vmax.f32 %v8698_v25, 0.0  ;;  %v8660_v62 = vadd.f32 %v12292_v51, %v16311_v16  ;;  %v16393_v16 = vld [vmem:[%s16944_s4 + $0x14] ss:$0 sps:$4 sm:$0xff]   ;;  %v9166_v51 = vld [vmem:[#allocation3 + $0x10] sm:$0xf]  ;;  %vm17361_vm7 = vmmov %vm17354_vm1 }
 0x625   : > { %v9091_v56 = vrot.slane %v9089_v45, 7  ;;  %v8970_v18 = vsel %vm14495_vm13, %v8946_v42, %v8866_v52  ;;  %v8696_v58 = vadd.f32 %v16274_v29, %v8657_v5  ;;  %v16382_v32 = vadd.f32 %v7799_v41, %v16257_v48  ;;  %12374 = vmatprep.subr.msk.bf16.mxu0 %vm17356_vm5, %v16393_v16  ;;  %vm17364_vm5 = vmmov %vm17361_vm7 }
 0x626   : > { %v12296_v11 = vpop.f32.mrf.mxu1  ;;  %v8986_v47 = vsel %vm17354_vm1, %v8970_v18, %v8882_v0  ;;  %v8763_v61 = vmax.bf16 %v8751_v26, %v8750_v21  ;;  %v8658_v17 = vadd.f32 %v8581_v1, %v16318_v36  ;;  %v16388_v19 = vadd.f32 %v12266_v15, %v16259_v38  ;;  %vm17362_vm1 = vmmov %vm17359_vm10 }
 0x627   : > { %v9094_v39 = vor.u32 %v9092_v22, %v9091_v56  ;;  %v9095_v34 = vrot.slane %v9091_v56, 4  ;;  %v9010_v49 = vsel %vm14503_vm4, %v8986_v47, %v8890_v46  ;;  %v8699_v36 = vadd.f32 %v16274_v29, %v8660_v62 }
 0x628   : > { %v9026_v48 = vsel %vm17355_vm14, %v9010_v49, %v8906_v4  ;;  %v8778_v13 = vshrl.u32 %v8763_v61, 16  ;;  %v8697_v1 = vadd.f32 %v16274_v29, %v8658_v17  ;;  %v8728_v63 = vmax.f32 %v8696_v58, 0.0  ;;  %v8597_v55 = vpop.f32.mrf.mxu1  ;;  %vm17363_vm14 = vmmov %vm17357_vm11 }
 0x629   : > { %v9167_v0 = vsel %vm14529_vm3, %v9094_v39, %v9166_v51  ;;  %v9170_v38 = vsel %vm14537_vm0, %v9095_v34, %v9169_v10  ;;  %v9050_v41 = vsel %vm14511_vm8, %v9026_v48, %v8914_v9  ;;  %v8731_v46 = vmax.f32 %v8699_v36, 0.0  ;;  %v9175_v39 = vld [vmem:[#allocation3 + $0x1c] sm:$0x1] }
 0x62a   : > { %9168 = vst [vmem:[#allocation3 + $0x10] sm:$0xf] %v9167_v0  ;;  %9171 = vst [vmem:[#allocation3 + $0x14] sm:$0x1] %v9170_v38  ;;  %v11690_v52 = vcombine.low %v9050_v41, %v9050_v41  ;;  %v8803_v4 = vmax.bf16 %v8778_v13, %v8763_v61  ;;  %v8729_v26 = vmax.f32 %v8697_v1, 0.0  ;;  %v16407_v7 = vadd.f32 %v7802_v8, %v16261_v24  ;;  %v12299_v58 = vpop.f32.mrf.mxu1  ;;  %v12269_v0 = vpop.f32.mrf.mxu0 }
 0x62b   : > { %v8663_v25 = vadd.f32 %v12295_v35, %v16324_v43  ;;  %v8661_v45 = vadd.f32 %v8594_v44, %v16331_v12  ;;  %v8664_v9 = vadd.f32 %v12296_v11, %v16338_v30  ;;  %v8662_v42 = vadd.f32 %v8597_v55, %v16349_v28  ;;  %v9172_v11 = vld [vmem:[#allocation3 + $0x18] sm:$0xf] }
 0x62c   : > { %v9097_v54 = vshrl.u32 %v11690_v52, 16  ;;  %v9100_v5 = vshll.u32 %v11690_v52, 16  ;;  %v8821_v22 = vshll.u32 %v8803_v4, 16  ;;  %v8859_v21 = vrot.slane %v8803_v4, 1  ;;  %v8610_v48 = vpop.f32.mrf.mxu1 }
 0x62d   : > { %v8883_v15 = vrot.slane %v8803_v4, 2  ;;  %v8753_v56 = vpack.c.bf16 %v8731_v46, %v8730_v60  ;;  %v8752_v18 = vpack.c.bf16 %v8729_v26, %v8728_v63  ;;  %v8907_v61 = vrot.slane %v8803_v4, 3 }
 0x62e   : > { %v9099_v62 = vrot.slane %v9097_v54, 7  ;;  %v8823_v47 = vrot.slane %v8821_v22, 1  ;;  %v8867_v24 = vrot.slane %v8821_v22, 2  ;;  %v8891_v17 = vrot.slane %v8821_v22, 3 }
 0x62f   : > { %v8764_v43 = vmax.bf16 %v8753_v56, %v8752_v18  ;;  %v8702_v12 = vadd.f32 %v16274_v29, %v8663_v25  ;;  %v8700_v30 = vadd.f32 %v16274_v29, %v8661_v45  ;;  %v8703_v60 = vadd.f32 %v16274_v29, %v8664_v9 }
 0x630   : > { %v9102_v35 = vor.u32 %v9100_v5, %v9099_v62  ;;  %v9103_v44 = vrot.slane %v9099_v62, 4  ;;  %v8931_v28 = vsel %vm14490_vm9, %v8803_v4, %v8823_v47  ;;  %v8915_v34 = vrot.slane %v8821_v22, 4  ;;  %v9443_v62 = vld [vmem:[#allocation3 + $0xc] sm:$0x1] }
 0x631   : > { %v8950_v49 = vsel %vm17357_vm11, %v8931_v28, %v8859_v21  ;;  %v8781_v51 = vshrl.u32 %v8764_v43, 16  ;;  %v8734_v10 = vmax.f32 %v8702_v12, 0.0  ;;  %v8735_v8 = vmax.f32 %v8703_v60, 0.0  ;;  %vm17365_vm11 = vmmov %vm17362_vm1 }
 0x632   : > { %v9173_v13 = vsel %vm14529_vm3, %v9102_v35, %v9172_v11  ;;  %v9176_v36 = vsel %vm14537_vm0, %v9103_v44, %v9175_v39  ;;  %v8971_v1 = vsel %vm14495_vm13, %v8950_v49, %v8867_v24  ;;  %v8701_v63 = vadd.f32 %v16274_v29, %v8662_v42  ;;  %v9225_v11 = vld [vmem:[#allocation3 + $0x8] sm:$0xe] }
 0x633   : > { %9174 = vst [vmem:[#allocation3 + $0x18] sm:$0xf] %v9173_v13  ;;  %9177 = vst [vmem:[#allocation3 + $0x1c] sm:$0x1] %v9176_v36  ;;  %v8990_v38 = vsel %vm17358_vm15, %v8971_v1, %v8883_v15  ;;  %v8804_v41 = vmax.bf16 %v8781_v51, %v8764_v43  ;;  %v8667_v55 = vadd.f32 %v12299_v58, %v16361_v53  ;;  %v8732_v4 = vmax.f32 %v8700_v30, 0.0  ;;  %v7815_v58 = vpop.f32.mrf.mxu0 }
 0x634   : > { %v9011_v52 = vsel %vm14503_vm4, %v8990_v38, %v8891_v17  ;;  %v8755_v46 = vpack.c.bf16 %v8735_v8, %v8734_v10  ;;  %v8665_v26 = vadd.f32 %v8610_v48, %v16382_v32  ;;  %v16433_v54 = vadd.f32 %v12269_v0, %v16263_v23  ;;  %v12300_v32 = vpop.f32.mrf.mxu1  ;;  %v9451_v17 = vld [vmem:[#allocation3 + $0x8] sm:$0xe]  ;;  %v9217_v43 = vld [vmem:[#allocation3 + $0xc] sm:$0x1]  ;;  %vm17366_vm15 = vmmov %vm17360_vm12 }
 0x635   : > { %v9030_v25 = vsel %vm17359_vm10, %v9011_v52, %v8907_v61  ;;  %v8825_v45 = vshll.u32 %v8804_v41, 16  ;;  %v8860_v9 = vrot.slane %v8804_v41, 1  ;;  %v8884_v22 = vrot.slane %v8804_v41, 2  ;;  %v16453_v0 = vld [vmem:[#allocation3 + $0x8] sm:$0xf]  ;;  %vm17367_vm10 = vmmov %vm17364_vm5 }
 0x636   : > { %v9051_v5 = vsel %vm14511_vm8, %v9030_v25, %v8915_v34  ;;  %v8733_v42 = vmax.f32 %v8701_v63, 0.0  ;;  %v8706_v53 = vadd.f32 %v16274_v29, %v8667_v55  ;;  %v8908_v18 = vrot.slane %v8804_v41, 3  ;;  %v8613_v13 = vpop.f32.mrf.mxu1  ;;  %v16457_v55 = vld [vmem:[#allocation3 + $0x8] sm:$0xf]  ;;  %v9178_v52 = vld [vmem:[#allocation3 + $0x20] sm:$0xf] }
 0x637   : > { %v11691_v21 = vcombine.low %v9051_v5, %v9051_v5  ;;  %v8827_v15 = vrot.slane %v8825_v45, 1  ;;  %v8868_v56 = vrot.slane %v8825_v45, 2  ;;  %v8892_v47 = vrot.slane %v8825_v45, 3 }
 0x638   : > { %v8916_v24 = vrot.slane %v8825_v45, 4  ;;  %v8754_v61 = vpack.c.bf16 %v8733_v42, %v8732_v4  ;;  %v16439_v23 = vadd.f32 %v16274_v29, %v8665_v26  ;;  %v8738_v44 = vmax.f32 %v8706_v53, 0.0  ;;  %v9181_v4 = vld [vmem:[#allocation3 + $0x24] sm:$0x1]  ;;  %v12270_v53 = vpop.f32.mrf.mxu0 }
 0x639   : > { %v9105_v12 = vshrl.u32 %v11691_v21, 16  ;;  %v9108_v30 = vshll.u32 %v11691_v21, 16  ;;  %v8932_v35 = vsel %vm14490_vm9, %v8804_v41, %v8827_v15  ;;  %v16445_v39 = vadd.f32 %v7815_v58, %v16265_v59  ;;  %v12303_v21 = vpop.f32.mrf.mxu1 }
 0x63a   : > { %v8954_v28 = vsel %vm17360_vm12, %v8932_v35, %v8860_v9  ;;  %v8765_v60 = vmax.bf16 %v8755_v46, %v8754_v61  ;;  %v8668_v34 = vadd.f32 %v12300_v32, %v16388_v19  ;;  %v8736_v10 = vmax.f32 %v16439_v23, 0.0  ;;  %vm17368_vm12 = vmmov %vm17362_vm1 }
 0x63b   : > { %v9107_v49 = vrot.slane %v9105_v12, 7  ;;  %v8972_v51 = vsel %vm14495_vm13, %v8954_v28, %v8868_v56  ;;  %v11720_v48 = vcombine.low %v9451_v17, %v9443_v62  ;;  %v11705_v38 = vcombine.low %v9225_v11, %v9217_v43 }
 0x63c   : > { %v8994_v36 = vsel %vm17361_vm7, %v8972_v51, %v8884_v22  ;;  %v8784_v1 = vshrl.u32 %v8765_v60, 16  ;;  %v8707_v8 = vadd.f32 %v16274_v29, %v8668_v34  ;;  %v11712_v42 = vcombine.low %v16453_v0, %v9443_v62  ;;  %vm17369_vm7 = vmmov %vm17363_vm14 }
 0x63d   : > { %v9110_v59 = vor.u32 %v9108_v30, %v9107_v49  ;;  %v9111_v41 = vrot.slane %v9107_v49, 4  ;;  %v9012_v19 = vsel %vm14503_vm4, %v8994_v36, %v8892_v47  ;;  %v9595_v63 = vrot.slane %v11720_v48, 1 }
 0x63e   : > { %v9034_v46 = vsel %vm17362_vm1, %v9012_v19, %v8908_v18  ;;  %v16460_v26 = vmax.bf16 %v8784_v1, %v8765_v60  ;;  %v8739_v25 = vmax.f32 %v8707_v8, 0.0  ;;  %v9369_v45 = vrot.slane %v11705_v38, 1  ;;  %v8626_v60 = vpop.f32.mrf.mxu1  ;;  %v9184_v1 = vld [vmem:[#allocation3 + $0x28] sm:$0xf]  ;;  %v9187_v8 = vld [vmem:[#allocation3 + $0x2c] sm:$0x1]  ;;  %vm17370_vm1 = vmmov %vm17364_vm5 }
 0x63f   : > { %v9179_v9 = vsel %vm14529_vm3, %v9110_v59, %v9178_v52  ;;  %v9182_v5 = vsel %vm14537_vm0, %v9111_v41, %v9181_v4  ;;  %v9052_v22 = vsel %vm14511_vm8, %v9034_v46, %v8916_v24  ;;  %9603 = vrot.lane.b32.xlu0 %v9595_v63, %s12898_s24  ;;  %v11697_v58 = vcombine.low %v16457_v55, %v9217_v43  ;;  %v7818_v63 = vpop.f32.mrf.mxu0  ;;  %v9444_v46 = vld [vmem:[#allocation3 + $0x14] sm:$0x1] }
 0x640   : > { %9180 = vst [vmem:[#allocation3 + $0x20] sm:$0xf] %v9179_v9  ;;  %9183 = vst [vmem:[#allocation3 + $0x24] sm:$0x1] %v9182_v5  ;;  %v11692_v15 = vcombine.low %v9052_v22, %v9052_v22  ;;  %v8829_v56 = vshll.u32 %v16460_v26, 16  ;;  %v8861_v18 = vrot.slane %v16460_v26, 1  ;;  %9378 = vrot.lane.b32.xlu1 %v9369_v45, %s12898_s24  ;;  %v8757_v24 = vpack.c.bf16 %v8739_v25, %v8738_v44  ;;  %v12304_v25 = vpop.f32.mrf.mxu1 }
 0x641   : > { %v8885_v32 = vrot.slane %v16460_v26, 2  ;;  %v8909_v47 = vrot.slane %v16460_v26, 3  ;;  %v8666_v62 = vadd.f32 %v8613_v13, %v16407_v7  ;;  %v7827_v12 = vadd.f32 %v12270_v53, %v16267_v37  ;;  %v9226_v53 = vld [vmem:[#allocation3 + $0x10] sm:$0xe] }
 0x642   : > { %v9113_v61 = vshrl.u32 %v11692_v15, 16  ;;  %v9116_v23 = vshll.u32 %v11692_v15, 16  ;;  %v8831_v17 = vrot.slane %v8829_v56, 1  ;;  %v8869_v30 = vrot.slane %v8829_v56, 2 }
 0x643   : > { %v8893_v35 = vrot.slane %v8829_v56, 3  ;;  %v8917_v11 = vrot.slane %v8829_v56, 4  ;;  %v8705_v28 = vadd.f32 %v16274_v29, %v8666_v62  ;;  %v9500_v49 = vshrl.u32 %v11712_v42, 16 }
 0x644   : > { %v9115_v34 = vrot.slane %v9113_v61, 7  ;;  %v8933_v43 = vsel %vm14490_vm9, %v16460_v26, %v8831_v17  ;;  %v9502_v44 = vshll.u32 %v11712_v42, 16  ;;  %v9280_v48 = vshrl.u32 %v11697_v58, 16  ;;  %v9452_v26 = vld [vmem:[#allocation3 + $0x10] sm:$0xe] }
 0x645   : > { %v8958_v7 = vsel %vm17363_vm14, %v8933_v43, %v8861_v18  ;;  %v8737_v51 = vmax.f32 %v8705_v28, 0.0  ;;  %v9282_v13 = vshll.u32 %v11697_v58, 16  ;;  %v8671_v4 = vadd.f32 %v12303_v21, %v16433_v54  ;;  %v16493_v42 = vld [vmem:[#allocation3 + $0x10] sm:$0xf]  ;;  %vm17371_vm14 = vmmov %vm17365_vm11 }
 0x646   : > { %v9118_v36 = vor.u32 %v9116_v23, %v9115_v34  ;;  %v9119_v37 = vrot.slane %v9115_v34, 4  ;;  %v8973_v38 = vsel %vm14495_vm13, %v8958_v7, %v8869_v30  ;;  %v9504_v59 = vrot.slane %v9502_v44, 1  ;;  %v16502_v61 = vld [vmem:[#allocation3 + $0x10] sm:$0xf]  ;;  %v8629_v30 = vpop.f32.mrf.mxu1 }
 0x647   : > { %v8998_v41 = vsel %vm17364_vm5, %v8973_v38, %v8885_v32  ;;  %v8756_v19 = vpack.c.bf16 %v8737_v51, %v8736_v10  ;;  %v9284_v52 = vrot.slane %v9282_v13, 1  ;;  %v9218_v10 = vld [vmem:[#allocation3 + $0x14] sm:$0x1]  ;;  %v8710_v56 = vadd.f32 %v16274_v29, %v8671_v4 }
 0x648   : > { %v9185_v45 = vsel %vm14529_vm3, %v9118_v36, %v9184_v1  ;;  %v9188_v9 = vsel %vm14537_vm0, %v9119_v37, %v9187_v8  ;;  %v9013_v5 = vsel %vm14503_vm4, %v8998_v41, %v8893_v35  ;;  %v9505_v22 = vor.u32 %v9504_v59, %v9500_v49  ;;  %v9190_v1 = vld [vmem:[#allocation3 + $0x30] sm:$0xf] }
 0x649   : > { %9186 = vst [vmem:[#allocation3 + $0x28] sm:$0xf] %v9185_v45  ;;  %9189 = vst [vmem:[#allocation3 + $0x2c] sm:$0x1] %v9188_v9  ;;  %v9038_v54 = vsel %vm17365_vm11, %v9013_v5, %v8909_v47  ;;  %v8766_v21 = vmax.bf16 %v8757_v24, %v8756_v19  ;;  %v9285_v15 = vor.u32 %v9284_v52, %v9280_v48  ;;  %v8742_v35 = vmax.f32 %v8710_v56, 0.0 }
 0x64a   : > { %v9053_v18 = vsel %vm14511_vm8, %v9038_v54, %v8917_v11  ;;  %v7819_v58 = vadd.f32 %v7818_v63, %v16269_v6  ;;  %9555 = vrot.lane.b32.xlu0 %v9505_v22, %s12897_s23  ;;  %v8669_v32 = vadd.f32 %v8626_v60, %v16445_v39  ;;  %v11721_v62 = vcombine.low %v9452_v26, %v9444_v46  ;;  %v9445_v19 = vld [vmem:[#allocation3 + $0x1c] sm:$0x1]  ;;  %v9453_v26 = vld [vmem:[#allocation3 + $0x18] sm:$0xe] }
 0x64b   : > { %v11693_v23 = vcombine.low %v9053_v18, %v9053_v18  ;;  %v8787_v17 = vshrl.u32 %v8766_v21, 16  ;;  %9330 = vrot.lane.b32.xlu1 %v9285_v15, %s12897_s23  ;;  %v11713_v47 = vcombine.low %v16493_v42, %v9444_v46  ;;  %v11706_v24 = vcombine.low %v9226_v53, %v9218_v10  ;;  %v16512_v22 = vld [vmem:[#allocation3 + $0x18] sm:$0xf] }
 0x64c   : > { %v8708_v11 = vadd.f32 %v16274_v29, %v8669_v32  ;;  %v9596_v28 = vrot.slane %v11721_v62, 1  ;;  %v8672_v6 = vadd.f32 %v12304_v25, %v7827_v12  ;;  %v11698_v39 = vcombine.low %v16502_v61, %v9218_v10  ;;  %v9193_v12 = vld [vmem:[#allocation3 + $0x34] sm:$0x1]  ;;  %v9227_v15 = vld [vmem:[#allocation3 + $0x18] sm:$0xe] }
 0x64d   : > { %v9121_v34 = vshrl.u32 %v11693_v23, 16  ;;  %v8806_v43 = vmax.bf16 %v8787_v17, %v8766_v21  ;;  %v9370_v49 = vrot.slane %v11706_v24, 1  ;;  %v9124_v60 = vshll.u32 %v11693_v23, 16  ;;  %v9219_v21 = vld [vmem:[#allocation3 + $0x1c] sm:$0x1] }
 0x64e   : > { %v8740_v44 = vmax.f32 %v8708_v11, 0.0  ;;  %v8711_v7 = vadd.f32 %v16274_v29, %v8672_v6  ;;  %v8670_v51 = vadd.f32 %v8629_v30, %v7819_v58  ;;  %v9507_v37 = vshrl.u32 %v11713_v47, 16  ;;  %v16521_v62 = vld [vmem:[#allocation3 + $0x18] sm:$0xf]  ;;  %v9446_v6 = vld [vmem:[#allocation3 + $0x24] sm:$0x1] }
 0x64f   : > { %v9123_v48 = vrot.slane %v9121_v34, 7  ;;  %v8833_v13 = vshll.u32 %v8806_v43, 16  ;;  %v8862_v36 = vrot.slane %v8806_v43, 1  ;;  %9605 = vrot.lane.b32.xlu1 %v9596_v28, %s12898_s24  ;;  %9380 = vrot.lane.b32.xlu0 %v9370_v49, %s12898_s24  ;;  %v8886_v8 = vrot.slane %v8806_v43, 2 }
 0x650   : > { %v8743_v38 = vmax.f32 %v8711_v7, 0.0  ;;  %v8709_v59 = vadd.f32 %v16274_v29, %v8670_v51  ;;  %v9509_v41 = vshll.u32 %v11713_v47, 16  ;;  %v8910_v46 = vrot.slane %v8806_v43, 3 }
 0x651   : > { %v9126_v63 = vor.u32 %v9124_v60, %v9123_v48  ;;  %v9127_v52 = vrot.slane %v9123_v48, 4  ;;  %v8835_v4 = vrot.slane %v8833_v13, 1  ;;  %v8870_v25 = vrot.slane %v8833_v13, 2  ;;  %v16531_v60 = vld [vmem:[#allocation3 + $0x20] sm:$0xf] }
 0x652   : > { %v8894_v45 = vrot.slane %v8833_v13, 3  ;;  %v8759_v9 = vpack.c.bf16 %v8743_v38, %v8742_v35  ;;  %v8741_v5 = vmax.f32 %v8709_v59, 0.0  ;;  %v9511_v54 = vrot.slane %v9509_v41, 1  ;;  %v16536_v38 = vld [vmem:[#allocation3 + $0x20] sm:$0xf] }
 0x653   : > { %v9191_v10 = vsel %vm14529_vm3, %v9126_v63, %v9190_v1  ;;  %v9194_v53 = vsel %vm14537_vm0, %v9127_v52, %v9193_v12  ;;  %v8934_v29 = vsel %vm14490_vm9, %v8806_v43, %v8835_v4  ;;  %v9287_v58 = vshrl.u32 %v11698_v39, 16 }
 0x654   : > { %9192 = vst [vmem:[#allocation3 + $0x30] sm:$0xf] %v9191_v10  ;;  %9195 = vst [vmem:[#allocation3 + $0x34] sm:$0x1] %v9194_v53  ;;  %v8962_v56 = vsel %vm17366_vm15, %v8934_v29, %v8862_v36  ;;  %v8758_v18 = vpack.c.bf16 %v8741_v5, %v8740_v44  ;;  %v9289_v32 = vshll.u32 %v11698_v39, 16  ;;  %v9512_v17 = vor.u32 %v9511_v54, %v9507_v37 }
 0x655   : > { %v8974_v23 = vsel %vm14495_vm13, %v8962_v56, %v8870_v25  ;;  %v11722_v47 = vcombine.low %v9453_v26, %v9445_v19  ;;  %v11714_v24 = vcombine.low %v16512_v22, %v9445_v19  ;;  %v11707_v28 = vcombine.low %v9227_v15, %v9219_v21  ;;  %v9454_v39 = vld [vmem:[#allocation3 + $0x20] sm:$0xe]  ;;  %v9220_v36 = vld [vmem:[#allocation3 + $0x24] sm:$0x1] }
 0x656   : > { %v9002_v30 = vsel %vm17367_vm10, %v8974_v23, %v8886_v8  ;;  %v8767_v35 = vmax.bf16 %v8759_v9, %v8758_v18  ;;  %v9291_v11 = vrot.slane %v9289_v32, 1  ;;  %v8918_v34 = vrot.slane %v8833_v13, 4  ;;  %9557 = vrot.lane.b32.xlu1 %v9512_v17, %s12897_s23  ;;  %v9228_v37 = vld [vmem:[#allocation3 + $0x20] sm:$0xe]  ;;  %v9196_v32 = vld [vmem:[#allocation3 + $0x38] sm:$0xf] }
 0x657   : > { %v9014_v43 = vsel %vm14503_vm4, %v9002_v30, %v8894_v45  ;;  %v11699_v49 = vcombine.low %v16521_v62, %v9219_v21  ;;  %v9371_v48 = vrot.slane %v11707_v28, 1  ;;  %v9597_v1 = vrot.slane %v11722_v47, 1  ;;  %v9199_v23 = vld [vmem:[#allocation3 + $0x3c] sm:$0x1] }
 0x658   : > { %v9042_v44 = vsel %vm17368_vm12, %v9014_v43, %v8910_v46  ;;  %v8790_v7 = vshrl.u32 %v8767_v35, 16  ;;  %v9292_v51 = vor.u32 %v9291_v11, %v9287_v58  ;;  %v9516_v12 = vshll.u32 %v11714_v24, 16  ;;  %v9447_v58 = vld [vmem:[#allocation3 + $0x2c] sm:$0x1] }
 0x659   : > { %v9054_v13 = vsel %vm14511_vm8, %v9042_v44, %v8918_v34  ;;  %v9296_v8 = vshll.u32 %v11699_v49, 16  ;;  %v9514_v19 = vshrl.u32 %v11714_v24, 16  ;;  %v9294_v63 = vshrl.u32 %v11699_v49, 16  ;;  %v9221_v43 = vld [vmem:[#allocation3 + $0x2c] sm:$0x1] }
 0x65a   : > { %v11694_v59 = vcombine.low %v9054_v13, %v9054_v13  ;;  %v16538_v41 = vmax.bf16 %v8790_v7, %v8767_v35  ;;  %9332 = vrot.lane.b32.xlu0 %v9292_v51, %s12897_s23  ;;  %9382 = vrot.lane.b32.xlu1 %v9371_v48, %s12898_s24  ;;  %v9518_v52 = vrot.slane %v9516_v12, 1  ;;  %v11723_v46 = vcombine.low %v9454_v39, %v9446_v6  ;;  %v16550_v35 = vld [vmem:[#allocation3 + $0x28] sm:$0xf] }
 0x65b   : > { %v9298_v4 = vrot.slane %v9296_v8, 1  ;;  %v11715_v26 = vcombine.low %v16531_v60, %v9446_v6  ;;  %v11708_v9 = vcombine.low %v9228_v37, %v9220_v36  ;;  %v11700_v5 = vcombine.low %v16536_v38, %v9220_v36  ;;  %v9229_v49 = vld [vmem:[#allocation3 + $0x28] sm:$0xe] }
 0x65c   : > { %v9129_v25 = vshrl.u32 %v11694_v59, 16  ;;  %v8837_v45 = vshll.u32 %v16538_v41, 16  ;;  %v9132_v10 = vshll.u32 %v11694_v59, 16  ;;  %v8863_v53 = vrot.slane %v16538_v41, 1  ;;  %v16556_v48 = vld [vmem:[#allocation3 + $0x28] sm:$0xf] }
 0x65d   : > { %v8887_v29 = vrot.slane %v16538_v41, 2  ;;  %v9299_v54 = vor.u32 %v9298_v4, %v9294_v63  ;;  %v8911_v56 = vrot.slane %v16538_v41, 3  ;;  %v9519_v18 = vor.u32 %v9518_v52, %v9514_v19  ;;  %v9455_v12 = vld [vmem:[#allocation3 + $0x28] sm:$0xe] }
 0x65e   : > { %v9131_v21 = vrot.slane %v9129_v25, 7  ;;  %v8839_v15 = vrot.slane %v8837_v45, 1  ;;  %9607 = vrot.lane.b32.xlu0 %v9597_v1, %s12898_s24  ;;  %v8871_v17 = vrot.slane %v8837_v45, 2  ;;  %v8895_v47 = vrot.slane %v8837_v45, 3  ;;  %v16571_v25 = vld [vmem:[#allocation3 + $0x30] sm:$0xf] }
 0x65f   : > { %v8919_v24 = vrot.slane %v8837_v45, 4  ;;  %9334 = vrot.lane.b32.xlu1 %v9299_v54, %s12897_s23  ;;  %v9598_v30 = vrot.slane %v11723_v46, 1  ;;  %v9523_v34 = vshll.u32 %v11715_v26, 16  ;;  %v9372_v44 = vrot.slane %v11708_v9, 1 }
 0x660   : > { %v9134_v11 = vor.u32 %v9132_v10, %v9131_v21  ;;  %v9135_v28 = vrot.slane %v9131_v21, 4  ;;  %v8935_v6 = vsel %vm14490_vm9, %v16538_v41, %v8839_v15  ;;  %v9521_v7 = vshrl.u32 %v11715_v26, 16  ;;  %v9448_v26 = vld [vmem:[#allocation3 + $0x34] sm:$0x1]  ;;  %v16574_v10 = vld [vmem:[#allocation3 + $0x30] sm:$0xf] }
 0x661   : > { %v8966_v39 = vsel %vm17369_vm7, %v8935_v6, %v8863_v53  ;;  %v9303_v51 = vshll.u32 %v11700_v5, 16  ;;  %v9525_v1 = vrot.slane %v9523_v34, 1  ;;  %v9301_v59 = vshrl.u32 %v11700_v5, 16  ;;  %v16576_v53 = vld [vmem:[#allocation3 + $0x34] sm:$0x1] }
 0x662   : > { %v9197_v36 = vsel %vm14529_vm3, %v9134_v11, %v9196_v32  ;;  %v9200_v37 = vsel %vm14537_vm0, %v9135_v28, %v9199_v23  ;;  %v8975_v13 = vsel %vm14495_vm13, %v8966_v39, %v8871_v17  ;;  %9559 = vrot.lane.b32.xlu0 %v9519_v18, %s12897_s23  ;;  %v11716_v19 = vcombine.low %v16550_v35, %v9447_v58 }
 0x663   : > { %9198 = vst [vmem:[#allocation3 + $0x38] sm:$0xf] %v9197_v36  ;;  %9201 = vst [vmem:[#allocation3 + $0x3c] sm:$0x1] %v9200_v37  ;;  %v9006_v8 = vsel %vm17370_vm1, %v8975_v13, %v8887_v29  ;;  %9609 = vrot.lane.b32.xlu1 %v9598_v30, %s12898_s24  ;;  %v9305_v41 = vrot.slane %v9303_v51, 1  ;;  %v9526_v52 = vor.u32 %v9525_v1, %v9521_v7  ;;  %vm17376_vm5 = vcmask 130048  }
 0x664   : > { %v9015_v63 = vsel %vm14503_vm4, %v9006_v8, %v8895_v47  ;;  %v11709_v4 = vcombine.low %v9229_v49, %v9221_v43  ;;  %v11701_v46 = vcombine.low %v16556_v48, %v9221_v43  ;;  %v11724_v9 = vcombine.low %v9455_v12, %v9447_v58  ;;  %v9456_v58 = vld [vmem:[#allocation3 + $0x30] sm:$0xe]  ;;  %v9202_v13 = vld [vmem:[#allocation3 + $0x40] sm:$0xf]  ;;  %v9205_v1 = vld [vmem:[#allocation3 + $0x44] sm:$0x1] }
 0x665   : > { %v9046_v45 = vsel %vm17371_vm14, %v9015_v63, %v8911_v56  ;;  %v9306_v27 = vor.u32 %v9305_v41, %v9301_v59  ;;  %v9530_v29 = vshll.u32 %v11716_v19, 16  ;;  %v11717_v18 = vcombine.low %v16571_v25, %v9448_v26  ;;  %vm17377_vm11 = vmmov %vm17376_vm5 }
 0x666   : > { %v9055_v5 = vsel %vm14511_vm8, %v9046_v45, %v8919_v24  ;;  %9384 = vrot.lane.b32.xlu0 %v9372_v44, %s12898_s24  ;;  %v9310_v54 = vshll.u32 %v11701_v46, 16  ;;  %v9373_v15 = vrot.slane %v11709_v4, 1  ;;  %v11702_v32 = vcombine.low %v16574_v10, %v16576_v53  ;;  %vm17381_vm7 = vmmov %vm17376_vm5 }
 0x667   : > { %v11695_v21 = vcombine.low %v9055_v5, %v9055_v5  ;;  %9561 = vrot.lane.b32.xlu1 %v9526_v52, %s12897_s23  ;;  %v9308_v17 = vshrl.u32 %v11701_v46, 16  ;;  %v9599_v47 = vrot.slane %v11724_v9, 1  ;;  %v9532_v24 = vrot.slane %v9530_v29, 1  ;;  %vm17382_vm1 = vmmov %vm17376_vm5 }
 0x668   : > { %v9312_v56 = vrot.slane %v9310_v54, 1  ;;  %v9537_v30 = vshll.u32 %v11717_v18, 16  ;;  %v11725_v6 = vcombine.low %v9456_v58, %v9448_v26  ;;  %v9317_v34 = vshll.u32 %v11702_v32, 16  ;;  %v16604_v54 = vld [vmem:[#allocation3 + $0x10] sm:$0xf] }
 0x669   : > { %v9137_v23 = vshrl.u32 %v11695_v21, 16  ;;  %v9140_v20 = vshll.u32 %v11695_v21, 16  ;;  %v9528_v39 = vshrl.u32 %v11716_v19, 16  ;;  %v9315_v46 = vshrl.u32 %v11702_v32, 16  ;;  %v16606_v21 = vld [vmem:[#allocation3 + $0x14] sm:$0x1] }
 0x66a   : > { %9336 = vrot.lane.b32.xlu0 %v9306_v27, %s12897_s23  ;;  %v9313_v28 = vor.u32 %v9312_v56, %v9308_v17  ;;  %v9449_v43 = vld [vmem:[#allocation3 + $0x3c] sm:$0x1]  ;;  %v16587_v49 = vld [vmem:[#allocation3 + $0x38] sm:$0xf]  ;;  %v9319_v8 = vrot.slane %v9317_v34, 1  ;;  %v9600_v63 = vrot.slane %v11725_v6, 1 }
 0x66b   : > { %v9139_v11 = vrot.slane %v9137_v23, 7  ;;  %9386 = vrot.lane.b32.xlu1 %v9373_v15, %s12898_s24  ;;  %v16589_v44 = vld [vmem:[#allocation3 + $0x38] sm:$0xf]  ;;  %v16591_v7 = vld [vmem:[#allocation3 + $0x3c] sm:$0x1]  ;;  %v9533_v12 = vor.u32 %v9532_v24, %v9528_v39  ;;  %v11718_v59 = vcombine.low %v16587_v49, %v9449_v43  ;;  %v9539_v52 = vrot.slane %v9537_v30, 1 }
 0x66c   : > { %v11703_v37 = vcombine.low %v16589_v44, %v16591_v7  ;;  %v9457_v4 = vld [vmem:[#allocation3 + $0x38] sm:$0xe]  ;;  %v9535_v45 = vshrl.u32 %v11717_v18, 16  ;;  %v9320_v9 = vor.u32 %v9319_v8, %v9315_v46  ;;  %v11751_v24 = vcombine.low %v16604_v54, %v16606_v21  ;;  %v9230_v30 = vld [vmem:[#allocation3 + $0x30] sm:$0xe] }
 0x66d   : > { %v9142_v51 = vor.u32 %v9140_v20, %v9139_v11  ;;  %v9143_v36 = vrot.slane %v9139_v11, 4  ;;  %v11726_v5 = vcombine.low %v9457_v4, %v9449_v43  ;;  %v9544_v27 = vshll.u32 %v11718_v59, 16  ;;  %v16615_v11 = vld [vmem:[#allocation3 + $0x20] sm:$0xf]  ;;  %v16620_v43 = vld [vmem:[#allocation3 + $0x18] sm:$0xf] }
 0x66e   : > { %9611 = vrot.lane.b32.xlu0 %v9599_v47, %s12898_s24  ;;  %v9324_v26 = vshll.u32 %v11703_v37, 16  ;;  %v9540_v40 = vor.u32 %v9539_v52, %v9535_v45  ;;  %v9322_v29 = vshrl.u32 %v11703_v37, 16  ;;  %v9542_v17 = vshrl.u32 %v11718_v59, 16  ;;  %v16622_v39 = vld [vmem:[#allocation3 + $0x1c] sm:$0x1] }
 0x66f   : > { %v9203_v41 = vsel %vm14529_vm3, %v9142_v51, %v9202_v13  ;;  %v9206_v19 = vsel %vm14537_vm0, %v9143_v36, %v9205_v1  ;;  %9338 = vrot.lane.b32.xlu1 %v9313_v28, %s12897_s23  ;;  %v9601_v15 = vrot.slane %v11726_v5, 1  ;;  %v9546_v56 = vrot.slane %v9544_v27, 1  ;;  %v16617_v28 = vld [vmem:[#allocation3 + $0x24] sm:$0x1]  ;;  %v16630_v59 = vld [vmem:[#allocation3 + $0x28] sm:$0xf] }
 0x670   : > { %9204 = vst [vmem:[#allocation3 + $0x40] sm:$0xf] %v9203_v41  ;;  %9207 = vst [vmem:[#allocation3 + $0x44] sm:$0x1] %v9206_v19  ;;  %v9326_v14 = vrot.slane %v9324_v26, 1  ;;  %v11710_v36 = vcombine.low %v9230_v30, %v16576_v53  ;;  %v9947_v37 = vshll.u32 %v11751_v24, 16  ;;  %v11753_v1 = vcombine.low %v16615_v11, %v16617_v28 }
 0x671   : > { %v9547_v6 = vor.u32 %v9546_v56, %v9542_v17  ;;  %v11752_v8 = vcombine.low %v16620_v43, %v16622_v39  ;;  %v9231_v41 = vld [vmem:[#allocation3 + $0x38] sm:$0xe]  ;;  %v16633_v19 = vld [vmem:[#allocation3 + $0x2c] sm:$0x1]  ;;  %vm17372_vm0 = vcmask 1043456   ;;  %v9945_v27 = vshrl.u32 %v11751_v24, 16 }
 0x672   : > { %9563 = vrot.lane.b32.xlu0 %v9533_v12, %s12897_s23  ;;  %v9327_v18 = vor.u32 %v9326_v14, %v9322_v29  ;;  %v12812_v53 = vld [vmem:[%s16944_s4 + $0xc] sm:$0xff]   ;;  %v9374_v52 = vrot.slane %v11710_v36, 1  ;;  %v9949_v4 = vrot.slane %v9947_v37, 1  ;;  %v9961_v46 = vshll.u32 %v11753_v1, 16  ;;  %v9896_v29 = vld [vmem:[#allocation3 + $0x10] sm:$0xe]  ;;  %vm17373_vm3 = vmmov %vm17372_vm0 }
 0x673   : > { %9613 = vrot.lane.b32.xlu1 %v9600_v63, %s12898_s24  ;;  %v9704_v26 = vsel %vm17372_vm0, %v16393_v16, 0  ;;  %v11711_v45 = vcombine.low %v9231_v41, %v16591_v7  ;;  %v11754_v5 = vcombine.low %v16630_v59, %v16633_v19  ;;  %v16651_v7 = vld [vmem:[#allocation3 + $0x30] sm:$0xf]  ;;  %v9952_v17 = vshrl.u32 %v11752_v8, 16  ;;  %v16660_v36 = vld [vmem:[#allocation3 + $0x38] sm:$0xf]  ;;  %vm17383_vm14 = vmmov %vm17372_vm0 }
 0x674   : > { %12306 = vmatpush3.bf16.msra.mxu0 %v9704_v26  ;;  %v9950_v14 = vor.u32 %v9949_v4, %v9945_v27  ;;  %v9963_v16 = vrot.slane %v9961_v46, 1  ;;  %v9893_v37 = vld [vmem:[#allocation3 + $0x3c] sm:$0x1]  ;;  %v16664_v41 = vld [vmem:[#allocation3 + $0x48] sm:$0xf]  ;;  %vm17374_vm4 = vcmask 64512  }
 0x675   : > { %12307 = vmatprep.subr.bf16.mxu0 %v12812_v53  ;;  %v11756_v46 = vcombine.low %v16660_v36, %v9893_v37  ;;  %v9899_v26 = vld [vmem:[#allocation3 + $0x28] sm:$0xe]  ;;  %vm17375_vm8 = vmmov %vm17374_vm4  ;;  %vm17378_vm15 = vcmask 195584  }
 0x676   : > { %9340 = vrot.lane.b32.xlu0 %v9320_v9, %s12897_s23  ;;  %v9954_v9 = vshll.u32 %v11752_v8, 16  ;;  %vm17379_vm10 = vmmov %vm17374_vm4 }
 0x677   : > { %9565 = vrot.lane.b32.xlu1 %v9540_v40, %s12897_s23  ;;  %v9450_v58 = vld [vmem:[#allocation3 + $0x44] sm:$0x1]  ;;  %v9458_v32 = vld [vmem:[#allocation3 + $0x40] sm:$0xe]  ;;  %v16648_v40 = vld [vmem:[%s16944_s4 + $0x8] ss:$0 sps:$4 sm:$0xff]  }
 0x678   : > { %v16610_v23 = vld [vmem:[#allocation3 + $0x40] sm:$0xf]  ;;  %v11727_v20 = vcombine.low %v9458_v32, %v9450_v58  ;;  %v9956_v56 = vrot.slane %v9954_v9, 1  ;;  %12308 = vmatpush3.bf16.msra.mxu0 %v12812_v53  ;;  %v9959_v32 = vshrl.u32 %v11753_v1, 16  ;;  %v9894_v4 = vld [vmem:[#allocation3 + $0x44] sm:$0x1]  ;;  %vm17380_vm12 = vmmov %vm17374_vm4 }
 0x679   : > { %v11719_v47 = vcombine.low %v16610_v23, %v9450_v58  ;;  %v9892_v58 = vld [vmem:[#allocation3 + $0x34] sm:$0x1]  ;;  %12375 = vmatprep.subr.msk.bf16.mxu0 %vm17373_vm3, %v16648_v40  ;;  %vm17384_vm0 = vmmov %vm17378_vm15 }
 0x67a   : > { %9615 = vrot.lane.b32.xlu0 %v9601_v15, %s12898_s24  ;;  %v9602_v51 = vrot.slane %v11727_v20, 1  ;;  %v9375_v15 = vrot.slane %v11711_v45, 1  ;;  %v9964_v20 = vor.u32 %v9963_v16, %v9959_v32  ;;  %v11755_v24 = vcombine.low %v16651_v7, %v9892_v58 }
 0x67b   : > { %v9551_v34 = vshll.u32 %v11719_v47, 16  ;;  %9342 = vrot.lane.b32.xlu1 %v9327_v18, %s12897_s23  ;;  %v9549_v12 = vshrl.u32 %v11719_v47, 16  ;;  %v9968_v18 = vshll.u32 %v11754_v5, 16  ;;  %v11759_v47 = vcombine.low %v9896_v29, %v16606_v21  ;;  %v9895_v21 = vld [vmem:[#allocation3 + $0x4c] sm:$0x1] }
 0x67c   : > { %v9957_v30 = vor.u32 %v9956_v56, %v9952_v17  ;;  %v9975_v8 = vshll.u32 %v11755_v24, 16  ;;  %v11758_v45 = vcombine.low %v16664_v41, %v9895_v21  ;;  %v9982_v16 = vshll.u32 %v11756_v46, 16 }
 0x67d   : > { %v9553_v13 = vrot.slane %v9551_v34, 1  ;;  %v9970_v34 = vrot.slane %v9968_v18, 1  ;;  %v10040_v1 = vrot.slane %v11759_v47, 1  ;;  %v9973_v29 = vshrl.u32 %v11755_v24, 16 }
 0x67e   : > { %9567 = vrot.lane.b32.xlu0 %v9547_v6, %s12897_s23  ;;  %v9898_v6 = vld [vmem:[#allocation3 + $0x20] sm:$0xe]  ;;  %v9977_v9 = vrot.slane %v9975_v8, 1  ;;  %v9980_v47 = vshrl.u32 %v11756_v46, 16 }
 0x67f   : > { %9617 = vrot.lane.b32.xlu1 %v9602_v51, %s12898_s24  ;;  %v9554_v63 = vor.u32 %v9553_v13, %v9549_v12  ;;  %v9897_v51 = vld [vmem:[#allocation3 + $0x18] sm:$0xe]  ;;  %v9966_v13 = vshrl.u32 %v11754_v5, 16  ;;  %v11761_v12 = vcombine.low %v9898_v6, %v16617_v28 }
 0x680   : > { %v9978_v56 = vor.u32 %v9977_v9, %v9973_v29  ;;  %v9329_v9 = vpop.permute.xlu0 %9328 }
 0x681   : > { %v9971_v53 = vor.u32 %v9970_v34, %v9966_v13  ;;  %v10042_v28 = vrot.slane %v11761_v12, 1  ;;  %v9902_v13 = vld [vmem:[#allocation3 + $0x40] sm:$0xe] }
 0x682   : > { %9388 = vrot.lane.b32.xlu0 %v9374_v52, %s12898_s24  ;;  %v16667_v52 = vld [vmem:[#allocation3 + $0x40] sm:$0xf]  ;;  %v11765_v8 = vcombine.low %v9902_v13, %v9894_v4 }
 0x683   : > { %9569 = vrot.lane.b32.xlu1 %v9554_v63, %s12897_s23  ;;  %v11760_v63 = vcombine.low %v9897_v51, %v16622_v39  ;;  %v11757_v5 = vcombine.low %v16667_v52, %v9894_v4  ;;  %v11762_v39 = vcombine.low %v9899_v26, %v16633_v19 }
 0x684   : > { %v10046_v26 = vrot.slane %v11765_v8, 1  ;;  %v12814_v8 = vld [vmem:[%s16944_s4] sm:$0xff]  }
 0x685   : > { %v10041_v27 = vrot.slane %v11760_v63, 1  ;;  %v9989_v32 = vshll.u32 %v11757_v5, 16  ;;  %v10043_v17 = vrot.slane %v11762_v39, 1  ;;  %v9987_v24 = vshrl.u32 %v11757_v5, 16  ;;  %v9377_v5 = vpop.permute.xlu0 %9376 }
 0x686   : > { %10000 = vrot.lane.b32.xlu0 %v9950_v14, %s12897_s23  ;;  %v9900_v14 = vld [vmem:[#allocation3 + $0x30] sm:$0xe] }
 0x687   : > { %9390 = vrot.lane.b32.xlu1 %v9375_v15, %s12898_s24  ;;  %v9996_v15 = vshll.u32 %v11758_v45, 16  ;;  %v11763_v18 = vcombine.low %v9900_v14, %v9892_v58  ;;  %v9991_v34 = vrot.slane %v9989_v32, 1 }
 0x689   : > { %v9998_v6 = vrot.slane %v9996_v15, 1  ;;  %v10044_v19 = vrot.slane %v11763_v18, 1  ;;  %v9992_v12 = vor.u32 %v9991_v34, %v9987_v24 }
 0x68a   : > { %10004 = vrot.lane.b32.xlu0 %v9964_v20, %s12897_s23  ;;  %v9984_v20 = vrot.slane %v9982_v16, 1 }
 0x68b   : > { %10002 = vrot.lane.b32.xlu1 %v9957_v30, %s12897_s23  ;;  %v9994_v30 = vshrl.u32 %v11758_v45, 16 }
 0x68c   : > { %v9985_v51 = vor.u32 %v9984_v20, %v9980_v47 }
 0x68d   : > { %v9999_v58 = vor.u32 %v9998_v6, %v9994_v30 }
 0x68e   : > { %10048 = vrot.lane.b32.xlu0 %v10040_v1, %s12898_s24  ;;  %v9901_v1 = vld [vmem:[#allocation3 + $0x38] sm:$0xe] }
 0x68f   : > { %10006 = vrot.lane.b32.xlu1 %v9971_v53, %s12897_s23  ;;  %v9903_v53 = vld [vmem:[#allocation3 + $0x48] sm:$0xe]  ;;  %v11764_v63 = vcombine.low %v9901_v1, %v9893_v37 }
 0x690   : > { %v11766_v46 = vcombine.low %v9903_v53, %v9895_v21 }
 0x691   : > { %v10045_v45 = vrot.slane %v11764_v63, 1 }
 0x692   : > { %10052 = vrot.lane.b32.xlu0 %v10042_v28, %s12898_s24  ;;  %v10047_v28 = vrot.slane %v11766_v46, 1 }
 0x693   : > { %10050 = vrot.lane.b32.xlu1 %v10041_v27, %s12898_s24 }
 0x696   : > { %10008 = vrot.lane.b32.xlu0 %v9978_v56, %s12897_s23 }
 0x697   : > { %10054 = vrot.lane.b32.xlu1 %v10043_v17, %s12898_s24 }
 0x69a   : > { %10056 = vrot.lane.b32.xlu0 %v10044_v19, %s12898_s24 }
 0x69b   : > { %10010 = vrot.lane.b32.xlu1 %v9985_v51, %s12897_s23 }
 0x69e   : > { %10012 = vrot.lane.b32.xlu0 %v9992_v12, %s12897_s23  ;;  %v9813_v12 = vsel %vm17383_vm14, %v16648_v40, 0  ;;  %vm17392_vm14 = vmmov %vm17382_vm1 }
 0x69f   : > { %10014 = vrot.lane.b32.xlu1 %v9999_v58, %s12897_s23 }
 0x6a2   : > { %10060 = vrot.lane.b32.xlu0 %v10046_v26, %s12898_s24 }
 0x6a3   : > { %10058 = vrot.lane.b32.xlu1 %v10045_v45, %s12898_s24 }
 0x6a7   : > { %10062 = vrot.lane.b32.xlu1 %v10047_v28, %s12898_s24 }
 0x6b1   : > { %v9604_v4 = vpop.permute.xlu0 %9603 }
 0x6b2   : > { %v9379_v27 = vpop.permute.xlu1 %9378 }
 0x6bc   : > { %v9556_v37 = vpop.permute.xlu0 %9555 }
 0x6bd   : > { %v9331_v14 = vpop.permute.xlu1 %9330  ;;  %v9621_v21 = vsel %vm17374_vm4, %v16453_v0, %v9556_v37 }
 0x6be   : > { %v9644_v56 = vsel %vm17376_vm5, %v9621_v21, %v9604_v4  ;;  %vm17386_vm5 = vmmov %vm17382_vm1 }
 0x6c1   : > { %v9606_v39 = vpop.permute.xlu1 %9605  ;;  %v16686_v16 = vpop.permute.xlu0 %9380 }
 0x6c8   : > { %v9558_v29 = vpop.permute.xlu1 %9557 }
 0x6c9   : > { %v9624_v15 = vsel %vm17375_vm8, %v16493_v42, %v9558_v29  ;;  %vm17385_vm8 = vmmov %vm17374_vm4 }
 0x6ca   : > { %v9646_v18 = vsel %vm17377_vm11, %v9624_v15, %v9606_v39  ;;  %vm17387_vm11 = vmmov %vm17382_vm1 }
 0x6cb   : > { %v11731_v17 = vcombine.low %v9644_v56, %v9646_v18 }
 0x6cc   : > { %v9333_v32 = vpop.permute.xlu0 %9332  ;;  %v9383_v20 = vpop.permute.xlu1 %9382 }
 0x6cd   : > { %12309 = vmatprep.mubr.msk.bf16.mxu0 %vm17378_vm15, %v11731_v17  ;;  %vm17388_vm15 = vmmov %vm17384_vm0  ;;  %v12855_v17 = vld [vmem:[#allocation3] sm:$0xf] }
 0x6d0   : > { %v9608_v47 = vpop.permute.xlu0 %9607 }
 0x6d1   : > { %v9335_v30 = vpop.permute.xlu1 %9334 }
 0x6d4   : > { %v9560_v6 = vpop.permute.xlu0 %9559 }
 0x6d5   : > { %v9610_v19 = vpop.permute.xlu1 %9609  ;;  %v9627_v0 = vsel %vm17379_vm10, %v16512_v22, %v9560_v6  ;;  %vm17389_vm10 = vmmov %vm17374_vm4 }
 0x6d6   : > { %v9648_v13 = vsel %vm17381_vm7, %v9627_v0, %v9608_v47  ;;  %v9394_v47 = vsel %vm17389_vm10, %v12855_v17, %v9329_v9  ;;  %vm17391_vm7 = vmmov %vm17374_vm4 }
 0x6d7   : > { %v9417_v0 = vsel %vm17382_vm1, %v9394_v47, %v9377_v5 }
 0x6d8   : > { %v9385_v34 = vpop.permute.xlu0 %9384 }
 0x6d9   : > { %v9562_v51 = vpop.permute.xlu1 %9561 }
 0x6da   : > { %v9630_v42 = vsel %vm17380_vm12, %v16531_v60, %v9562_v51  ;;  %v12815_v60 = vld [vmem:[%s16944_s4 + $0x20] ss:$0 sps:$4 sm:$0xff]   ;;  %vm17390_vm12 = vmmov %vm17374_vm4 }
 0x6db   : > { %v9650_v24 = vsel %vm17382_vm1, %v9630_v42, %v9610_v19 }
 0x6dc   : > { %v9337_v1 = vpop.permute.xlu0 %9336  ;;  %v11732_v58 = vcombine.low %v9648_v13, %v9650_v24 }
 0x6dd   : > { %v9387_v53 = vpop.permute.xlu1 %9386 }
 0x6de   : > { %12310 = vmatmul.mubr.msk.bf16.vlgmr.msra.gmra.mxu0 %vm17384_vm0, %v11732_v58  ;;  %vm17393_vm0 = vmmov %vm17374_vm4 }
 0x6df   : > { %12318 = vmatpush3.bf16.msra.mxu0 %v9813_v12  ;;  %vm17400_vm10 = vmmov %vm17393_vm0 }
 0x6e0   : > { %v9612_v22 = vpop.permute.xlu0 %9611  ;;  %12319 = vmatprep.subr.bf16.mxu0 %v12814_v8 }
 0x6e1   : > { %v9339_v63 = vpop.permute.xlu1 %9338 }
 0x6e3   : > { %12320 = vmatpush3.bf16.msra.mxu0 %v12814_v8 }
 0x6e4   : > { %v9564_v46 = vpop.permute.xlu0 %9563  ;;  %12376 = vmatprep.subr.msk.bf16.mxu0 %vm17373_vm3, %v12815_v60  ;;  %vm17394_vm3 = vmmov %vm17382_vm1 }
 0x6e5   : > { %v9614_v40 = vpop.permute.xlu1 %9613  ;;  %v9633_v26 = vsel %vm17374_vm4, %v16550_v35, %v9564_v46  ;;  %v9397_v35 = vsel %vm17390_vm12, %v16457_v55, %v9331_v14  ;;  %vm17395_vm4 = vmmov %vm17382_vm1 }
 0x6e6   : > { %v9652_v37 = vsel %vm17386_vm5, %v9633_v26, %v9612_v22  ;;  %v9419_v51 = vsel %vm17392_vm14, %v9397_v35, %v9379_v27  ;;  %vm17397_vm5 = vmmov %vm17388_vm15 }
 0x6e7   : > { %v11741_v12 = vcombine.low %v9417_v0, %v9419_v51  ;;  %vm17401_vm12 = vmmov %vm17382_vm1 }
 0x6e8   : > { %v9341_v45 = vpop.permute.xlu0 %9340  ;;  %vm17403_vm14 = vmmov %vm17382_vm1 }
 0x6e9   : > { %v9566_v28 = vpop.permute.xlu1 %9565 }
 0x6ea   : > { %v9636_v4 = vsel %vm17385_vm8, %v16571_v25, %v9566_v28  ;;  %vm17396_vm8 = vmmov %vm17393_vm0 }
 0x6eb   : > { %v9654_v39 = vsel %vm17387_vm11, %v9636_v4, %v9614_v40  ;;  %vm17398_vm11 = vmmov %vm17393_vm0 }
 0x6ec   : > { %v11733_v21 = vcombine.low %v9652_v37, %v9654_v39  ;;  %v9616_v29 = vpop.permute.xlu0 %9615  ;;  %v9409_v5 = vsel %vm17398_vm11, %v16556_v48, %v9339_v63 }
 0x6ed   : > { %v9343_v15 = vpop.permute.xlu1 %9342  ;;  %v9427_v46 = vsel %vm17382_vm1, %v9409_v5, %v9387_v53 }
 0x6ee   : > { %12313 = vmatprep.mubr.msk.bf16.mxu0 %vm17388_vm15, %v11733_v21  ;;  %vm17399_vm15 = vmmov %vm17397_vm5 }
 0x6f0   : > { %v9568_v56 = vpop.permute.xlu0 %9567 }
 0x6f1   : > { %v9618_v18 = vpop.permute.xlu1 %9617  ;;  %v9639_v25 = vsel %vm17391_vm7, %v16587_v49, %v9568_v56  ;;  %v9403_v49 = vsel %vm17396_vm8, %v16521_v62, %v9335_v30  ;;  %vm17402_vm7 = vmmov %vm17393_vm0 }
 0x6f2   : > { %v9656_v13 = vsel %vm17394_vm3, %v9639_v25, %v9616_v29  ;;  %v9423_v14 = vsel %vm17401_vm12, %v9403_v49, %v9383_v20  ;;  %v9406_v8 = vsel %vm17402_vm7, %v16536_v38, %v9337_v1  ;;  %vm17405_vm3 = vcmask 1043456  }
 0x6f3   : > { %v10149_v40 = vsel %vm17405_vm3, %v12815_v60, 0 }
 0x6f4   : > { %v9389_v6 = vpop.permute.xlu0 %9388 }
 0x6f5   : > { %v9570_v19 = vpop.permute.xlu1 %9569 }
 0x6f6   : > { %v9642_v42 = vsel %vm17393_vm0, %v16610_v23, %v9570_v19  ;;  %v9400_v23 = vsel %vm17400_vm10, %v16502_v61, %v9333_v32  ;;  %vm17404_vm0 = vmmov %vm17382_vm1  ;;  %v12816_v61 = vld [vmem:[%s16944_s4 + $0x18] sm:$0xff]  }
 0x6f7   : > { %v9658_v24 = vsel %vm17395_vm4, %v9642_v42, %v9618_v18  ;;  %v9421_v62 = vsel %vm17403_vm14, %v9400_v23, %v16686_v16  ;;  %v9425_v48 = vsel %vm17404_vm0, %v9406_v8, %v9385_v34  ;;  %vm17406_vm4 = vmmov %vm17397_vm5  ;;  %v12841_v23 = vld [vmem:[%s16946_s6 + $0x40] sm:$0xff]  }
 0x6f8   : > { %v10001_v9 = vpop.permute.xlu0 %10000  ;;  %v11734_v58 = vcombine.low %v9656_v13, %v9658_v24  ;;  %v11742_v30 = vcombine.low %v9421_v62, %v9423_v14  ;;  %v11743_v32 = vcombine.low %v9425_v48, %v9427_v46  ;;  %vm17407_vm8 = vmmov %vm17406_vm4  ;;  %12362 = vmatpush3.bf16.msra.mxu1 %v12841_v23 }
 0x6f9   : > { %v9391_v55 = vpop.permute.xlu1 %9390  ;;  %vm17409_vm11 = vmmov %vm17404_vm0  ;;  %12363 = vmatprep.subr.bf16.mxu1 %v17111_v31 }
 0x6fa   : > { %12314 = vmatmul.mubr.msk.bf16.gmra.mxu0 %vm17397_vm5, %v11734_v58  ;;  %vm17408_vm5 = vmmov %vm17402_vm7 }
 0x6fb   : > { %12321 = vmatprep.mubr.msk.bf16.mxu0 %vm17399_vm15, %v11741_v12  ;;  %v9415_v38 = vsel %vm17408_vm5, %v16589_v44, %v9343_v15  ;;  %vm17410_vm15 = vmmov %vm17408_vm5 }
 0x6fc   : > { %v10005_v27 = vpop.permute.xlu0 %10004  ;;  %v9431_v34 = vsel %vm17409_vm11, %v9415_v38, %v9391_v55  ;;  %vm17411_vm10 = vmmov %vm17408_vm5  ;;  %v12818_v55 = vld [vmem:[#allocation4] ss:$0 sps:$4 sm:$0x66]  }
 0x6fd   : > { %v10003_v22 = vpop.permute.xlu1 %10002  ;;  %v9412_v60 = vsel %vm17411_vm10, %v16574_v10, %v9341_v45  ;;  %vm17412_vm12 = vmmov %vm17404_vm0 }
 0x6fe   : > { %v10069_v1 = vsel %vm17410_vm15, %v16620_v43, %v10003_v22  ;;  %vm17413_vm7 = vmmov %vm17404_vm0 }
 0x6ff   : > { %v9429_v28 = vsel %vm17413_vm7, %v9412_v60, %v9389_v6  ;;  %vm17414_vm1 = vmmov %vm17408_vm5 }
 0x700   : > { %v10049_v63 = vpop.permute.xlu0 %10048  ;;  %v10066_v4 = vsel %vm17414_vm1, %v16604_v54, %v10001_v9  ;;  %v11744_v44 = vcombine.low %v9429_v28, %v9431_v34  ;;  %vm17415_vm14 = vmmov %vm17404_vm0  ;;  %v12817_v9 = vld [vmem:[#allocation4] ss:$0 sps:$4 sm:$0x77]  }
 0x701   : > { %v10007_v20 = vpop.permute.xlu1 %10006  ;;  %v10089_v37 = vsel %vm17415_vm14, %v10066_v4, %v10049_v63  ;;  %vm17416_vm0 = vmmov %vm17406_vm4  ;;  %v10460_v58 = vshrl.u32 %v12817_v9, 16  ;;  %v10462_v12 = vshll.u32 %v12817_v9, 16 }
 0x702   : > { %12322 = vmatmul.mubr.msk.bf16.vlgmr.msra.gmra.mxu0 %vm17406_vm4, %v11742_v30  ;;  %vm17417_vm3 = vmmov %vm17416_vm0 }
 0x703   : > { %12330 = vmatpush3.bf16.msra.mxu0 %v10149_v40  ;;  %12325 = vmatprep.mubr.msk.bf16.mxu0 %vm17407_vm8, %v11743_v32  ;;  %vm17418_vm4 = vmmov %vm17414_vm1 }
 0x704   : > { %v10053_v16 = vpop.permute.xlu0 %10052  ;;  %12331 = vmatprep.subr.bf16.mxu0 %v12816_v61  ;;  %v10075_v10 = vsel %vm17418_vm4, %v16630_v59, %v10007_v20  ;;  %vm17419_vm8 = vmmov %vm17413_vm7 }
 0x705   : > { %v10051_v53 = vpop.permute.xlu1 %10050  ;;  %vm17420_vm5 = vmmov %vm17414_vm1 }
 0x706   : > { %v10091_v26 = vsel %vm17412_vm12, %v10069_v1, %v10051_v53  ;;  %v10072_v15 = vsel %vm17420_vm5, %v16615_v11, %v10005_v27  ;;  %vm17421_vm11 = vmmov %vm17413_vm7  ;;  %v11780_v53 = vld [vmem:[%s16945_s5] ss:$0 sm:$0xff] }
 0x707   : > { %12332 = vmatpush3.bf16.msra.mxu0 %v12816_v61  ;;  %v11770_v21 = vcombine.low %v10089_v37, %v10091_v26  ;;  %v10093_v56 = vsel %vm17421_vm11, %v10072_v15, %v10053_v16  ;;  %vm17422_vm15 = vmmov %vm17416_vm0  ;;  %vm17431_vm11 = vcmask 1040384  }
 0x708   : > { %v10009_v39 = vpop.permute.xlu0 %10008  ;;  %12341 = vmatprep.subr.bf16.mxu0 %v17111_v31  ;;  %vm17423_vm10 = vmmov %vm17414_vm1 }
 0x709   : > { %v10055_v43 = vpop.permute.xlu1 %10054  ;;  %v10078_v35 = vsel %vm17423_vm10, %v16651_v7, %v10009_v39  ;;  %vm17424_vm12 = vmmov %vm17414_vm1 }
 0x70a   : > { %12326 = vmatmul.mubr.msk.bf16.gmra.mxu0 %vm17416_vm0, %v11744_v44  ;;  %v10095_v29 = vsel %vm17419_vm8, %v10075_v10, %v10055_v43  ;;  %vm17425_vm1 = vmmov %vm17413_vm7 }
 0x70b   : > { %12333 = vmatprep.mubr.msk.bf16.mxu0 %vm17417_vm3, %v11770_v21  ;;  %v11771_v18 = vcombine.low %v10093_v56, %v10095_v29  ;;  %vm17426_vm14 = vmmov %vm17418_vm4 }
 0x70c   : > { %v10057_v45 = vpop.permute.xlu0 %10056  ;;  %vm17427_vm0 = vmmov %vm17418_vm4 }
 0x70d   : > { %v10011_v54 = vpop.permute.xlu1 %10010  ;;  %v10097_v6 = vsel %vm17413_vm7, %v10078_v35, %v10057_v45  ;;  %vm17428_vm4 = vmmov %vm17425_vm1 }
 0x70e   : > { %v10081_v59 = vsel %vm17424_vm12, %v16660_v36, %v10011_v54  ;;  %vm17429_vm8 = vmmov %vm17425_vm1 }
 0x70f   : > { %vm17430_vm5 = vmmov %vm17417_vm3 }
 0x710   : > { %v10013_v17 = vpop.permute.xlu0 %10012  ;;  %vm17434_vm10 = vmmov %vm17431_vm11 }
 0x711   : > { %v10015_v47 = vpop.permute.xlu1 %10014  ;;  %v10084_v51 = vsel %vm17426_vm14, %v16667_v52, %v10013_v17  ;;  %v10464_v52 = vrot.slane %v10462_v12, 1  ;;  %vm17435_vm12 = vmmov %vm17434_vm10 }
 0x712   : > { %12334 = vmatmul.mubr.msk.bf16.vlgmr.msra.gmra.mxu0 %vm17422_vm15, %v11771_v18  ;;  %v10087_v42 = vsel %vm17427_vm0, %v16664_v41, %v10015_v47  ;;  %v10507_v41 = vrot.slane %v12818_v55, 1  ;;  %vm17432_vm15 = vmmov %vm17431_vm11 }
 0x713   : > { %v10465_v49 = vor.u32 %v10464_v52, %v10460_v58  ;;  %vm17439_vm7 = vmmov %vm17425_vm1 }
 0x714   : > { %v10061_v0 = vpop.permute.xlu0 %10060  ;;  %vm17441_vm14 = vmmov %vm17428_vm4 }
 0x715   : > { %v10059_v25 = vpop.permute.xlu1 %10058  ;;  %v10101_v7 = vsel %vm17428_vm4, %v10084_v51, %v10061_v0  ;;  %10487 = vrot.lane.b32.xlu0 %v10465_v49, %s12898_s24 }
 0x716   : > { %v10099_v19 = vsel %vm17425_vm1, %v10081_v59, %v10059_v25 }
 0x717   : > { %v11772_v11 = vcombine.low %v10097_v6, %v10099_v19 }
 0x719   : > { %12337 = vmatprep.mubr.msk.bf16.mxu0 %vm17417_vm3, %v11772_v11  ;;  %v10063_v13 = vpop.permute.xlu1 %10062  ;;  %10511 = vrot.lane.b32.xlu0 %v10507_v41, %s12899_s25 }
 0x71a   : > { %v10103_v36 = vsel %vm17429_vm8, %v10087_v42, %v10063_v13  ;;  %vm17444_vm8 = vmmov %vm17428_vm4 }
 0x71b   : > { %v11773_v24 = vcombine.low %v10101_v7, %v10103_v36 }
 0x71d   : > { %12338 = vmatmul.mubr.msk.bf16.gmra.mxu0 %vm17430_vm5, %v11773_v24  ;;  %vm17445_vm5 = vcmask 392192  }
 0x71e   : > { %12347 = vmatprep.mubr.msk.bf16.mxu0 %vm17340_vm2, %v17111_v31 }
 0x79e   : > { %v12311_v5 = vpop.f32.mrf.mxu0 }
 0x7a0   : > { %v9740_v27 = vpop.f32.mrf.mxu0 }
 0x7a2   : > { %v12312_v14 = vpop.f32.mrf.mxu0 }
 0x7a4   : > { %v9743_v8 = vpop.f32.mrf.mxu0 }
 0x7ba   : > { %v12315_v22 = vpop.f32.mrf.mxu0 }
 0x7bc   : > { %v9756_v46 = vpop.f32.mrf.mxu0 }
 0x7be   : > { %v12316_v62 = vpop.f32.mrf.mxu0 }
 0x7c0   : > { %v9759_v30 = vpop.f32.mrf.mxu0 }
 0x7c2   : > { %v12323_v48 = vpop.f32.mrf.mxu0 }
 0x7c3   : > { %v9858_v34 = vadd.f32 %v12323_v48, %v12311_v5 }
 0x7c4   : > { %v9849_v63 = vpop.f32.mrf.mxu0 }
 0x7c5   : > { %v9850_v60 = vadd.f32 %v9849_v63, %v9740_v27 }
 0x7c6   : > { %v12324_v40 = vpop.f32.mrf.mxu0 }
 0x7c7   : > { %v9861_v4 = vadd.f32 %v12324_v40, %v12312_v14 }
 0x7c8   : > { %v9852_v61 = vpop.f32.mrf.mxu0 }
 0x7c9   : > { %v9853_v21 = vadd.f32 %v9852_v61, %v9743_v8 }
 0x7ca   : > { %v12327_v32 = vpop.f32.mrf.mxu0 }
 0x7cb   : > { %v9874_v47 = vadd.f32 %v12327_v32, %v12315_v22 }
 0x7cc   : > { %v9865_v20 = vpop.f32.mrf.mxu0 }
 0x7cd   : > { %v9866_v19 = vadd.f32 %v9865_v20, %v9756_v46 }
 0x7ce   : > { %v12328_v38 = vpop.f32.mrf.mxu0 }
 0x7cf   : > { %v9877_v7 = vadd.f32 %v12328_v38, %v12316_v62 }
 0x7d0   : > { %v9868_v16 = vpop.f32.mrf.mxu0 }
 0x7d1   : > { %v9869_v52 = vadd.f32 %v9868_v16, %v9759_v30 }
 0x7d2   : > { %v12335_v1 = vpop.f32.mrf.mxu0 }
 0x7d3   : > { %v10218_v26 = vadd.f32 %v12335_v1, %v9858_v34 }
 0x7d4   : > { %v10185_v28 = vpop.f32.mrf.mxu0 }
 0x7d5   : > { %v10233_v44 = vadd.f32 %v11780_v53, %v10218_v26  ;;  %v10216_v37 = vadd.f32 %v10185_v28, %v9850_v60 }
 0x7d6   : > { %v12336_v39 = vpop.f32.mrf.mxu0 }
 0x7d7   : > { %v10231_v43 = vadd.f32 %v11780_v53, %v10216_v37  ;;  %v10219_v10 = vadd.f32 %v12336_v39, %v9861_v4  ;;  %v10241_v29 = vmax.f32 %v10233_v44, 0.0 }
 0x7d8   : > { %v10188_v45 = vpop.f32.mrf.mxu0 }
 0x7d9   : > { %v10234_v54 = vadd.f32 %v11780_v53, %v10219_v10  ;;  %v10217_v15 = vadd.f32 %v10188_v45, %v9853_v21  ;;  %v10239_v56 = vmax.f32 %v10231_v43, 0.0  ;;  %v11867_v35 = vpack.c.bf16 %v10241_v29, %v10241_v29 }
 0x7db   : > { %v10242_v18 = vmax.f32 %v10234_v54, 0.0  ;;  %v10232_v17 = vadd.f32 %v11780_v53, %v10217_v15  ;;  %v11865_v11 = vpack.c.bf16 %v10239_v56, %v10239_v56 }
 0x7dd   : > { %v11868_v59 = vpack.c.bf16 %v10242_v18, %v10242_v18  ;;  %v10240_v25 = vmax.f32 %v10232_v17, 0.0  ;;  %v12339_v6 = vpop.f32.mrf.mxu0 }
 0x7de   : > { %v10222_v0 = vadd.f32 %v12339_v6, %v9874_v47 }
 0x7df   : > { %v10280_v51 = vmax.bf16 %v11868_v59, %v11867_v35  ;;  %v11866_v42 = vpack.c.bf16 %v10240_v25, %v10240_v25  ;;  %v10201_v13 = vpop.f32.mrf.mxu0 }
 0x7e0   : > { %v10237_v36 = vadd.f32 %v11780_v53, %v10222_v0  ;;  %v10220_v24 = vadd.f32 %v10201_v13, %v9866_v19 }
 0x7e1   : > { %v10289_v9 = vshrl.u32 %v10280_v51, 16  ;;  %v10279_v58 = vmax.bf16 %v11866_v42, %v11865_v11  ;;  %v12340_v12 = vpop.f32.mrf.mxu0 }
 0x7e2   : > { %v10235_v55 = vadd.f32 %v11780_v53, %v10220_v24  ;;  %v10223_v49 = vadd.f32 %v12340_v12, %v9877_v7  ;;  %v10245_v27 = vmax.f32 %v10237_v36, 0.0  ;;  %v10426_v36 = vld [vmem:[#allocation4 + $0x8] sm:$0x7] }
 0x7e3   : > { %v10308_v41 = vmax.bf16 %v10289_v9, %v10280_v51  ;;  %v10284_v5 = vshrl.u32 %v10279_v58, 16  ;;  %v10204_v23 = vpop.f32.mrf.mxu0 }
 0x7e4   : > { %v10238_v14 = vadd.f32 %v11780_v53, %v10223_v49  ;;  %v10221_v8 = vadd.f32 %v10204_v23, %v9869_v52  ;;  %v10243_v48 = vmax.f32 %v10235_v55, 0.0  ;;  %v11871_v32 = vpack.c.bf16 %v10245_v27, %v10245_v27 }
 0x7e5   : > { %v11794_v22 = vcombine.low %v10308_v41, %v10308_v41  ;;  %v10307_v46 = vmax.bf16 %v10284_v5, %v10279_v58 }
 0x7e6   : > { %v10246_v63 = vmax.f32 %v10238_v14, 0.0  ;;  %v10236_v40 = vadd.f32 %v11780_v53, %v10221_v8  ;;  %v11869_v1 = vpack.c.bf16 %v10243_v48, %v10243_v48 }
 0x7e7   : > { %v10328_v62 = vshll.u32 %v11794_v22, 16  ;;  %v11793_v61 = vcombine.low %v10307_v46, %v10307_v46  ;;  %v10344_v16 = vrot.slane %v11794_v22, 1 }
 0x7e8   : > { %v11872_v20 = vpack.c.bf16 %v10246_v63, %v10246_v63  ;;  %v10244_v38 = vmax.f32 %v10236_v40, 0.0 }
 0x7e9   : > { %v10330_v34 = vrot.slane %v10328_v62, 1  ;;  %v10324_v30 = vshll.u32 %v11793_v61, 16  ;;  %v10348_v28 = vrot.slane %v10328_v62, 2  ;;  %v10343_v39 = vrot.slane %v11793_v61, 1 }
 0x7ea   : > { %v10282_v60 = vmax.bf16 %v11872_v20, %v11871_v32  ;;  %v11870_v26 = vpack.c.bf16 %v10244_v38, %v10244_v38  ;;  %v10432_v38 = vld [vmem:[#allocation4 + $0x10] sm:$0x7] }
 0x7eb   : > { %v10356_v4 = vsel %vm14490_vm9, %v10308_v41, %v10330_v34  ;;  %v10326_v44 = vrot.slane %v10324_v30, 1  ;;  %v10347_v10 = vrot.slane %v10324_v30, 2  ;;  %v10423_v41 = vld [vmem:[#allocation4 + $0x4] sm:$0x7] }
 0x7ec   : > { %v10365_v37 = vsel %vm17431_vm11, %v10356_v4, %v10344_v16  ;;  %v10299_v53 = vshrl.u32 %v10282_v60, 16  ;;  %v10281_v21 = vmax.bf16 %v11870_v26, %v11869_v1  ;;  %v10429_v4 = vld [vmem:[#allocation4 + $0xc] sm:$0x7] }
 0x7ed   : > { %v10376_v43 = vsel %vm14495_vm13, %v10365_v37, %v10348_v28  ;;  %v10355_v45 = vsel %vm14490_vm9, %v10307_v46, %v10326_v44 }
 0x7ee   : > { %v11798_v29 = vcombine.low %v10376_v43, %v10376_v43  ;;  %v10361_v54 = vsel %vm17432_vm15, %v10355_v45, %v10343_v39  ;;  %v10310_v15 = vmax.bf16 %v10299_v53, %v10282_v60  ;;  %v10294_v56 = vshrl.u32 %v10281_v21, 16  ;;  %vm17447_vm15 = vmmov %vm17428_vm4 }
 0x7ef   : > { %v10375_v18 = vsel %vm14495_vm13, %v10361_v54, %v10347_v10 }
 0x7f0   : > { %v10399_v17 = vshrl.u32 %v11798_v29, 16  ;;  %v11797_v47 = vcombine.low %v10375_v18, %v10375_v18  ;;  %v11796_v35 = vcombine.low %v10310_v15, %v10310_v15  ;;  %v10309_v59 = vmax.bf16 %v10294_v56, %v10281_v21 }
 0x7f1   : > { %v10402_v6 = vshll.u32 %v11798_v29, 16 }
 0x7f2   : > { %v10401_v25 = vrot.slane %v10399_v17, 7  ;;  %v10392_v19 = vshrl.u32 %v11797_v47, 16  ;;  %v10336_v0 = vshll.u32 %v11796_v35, 16  ;;  %v11795_v11 = vcombine.low %v10309_v59, %v10309_v59 }
 0x7f3   : > { %v10395_v13 = vshll.u32 %v11797_v47, 16  ;;  %v10346_v24 = vrot.slane %v11796_v35, 1  ;;  %v12842_v35 = vld [vmem:[%s16946_s6 + $0x38] sm:$0xff]  }
 0x7f4   : > { %v10404_v51 = vor.u32 %v10402_v6, %v10401_v25  ;;  %v10394_v42 = vrot.slane %v10392_v19, 7  ;;  %v10338_v7 = vrot.slane %v10336_v0, 1  ;;  %v10332_v9 = vshll.u32 %v11795_v11, 16  ;;  %12364 = vmatpush3.bf16.msra.mxu1 %v12842_v35 }
 0x7f5   : > { %v10350_v55 = vrot.slane %v10336_v0, 2  ;;  %v10345_v8 = vrot.slane %v11795_v11, 1  ;;  %12365 = vmatprep.subr.bf16.mxu1 %v17111_v31 }
 0x7f6   : > { %v10427_v12 = vsel %vm15084_vm6, %v10404_v51, %v10426_v36  ;;  %v10397_v52 = vor.u32 %v10395_v13, %v10394_v42  ;;  %v10358_v49 = vsel %vm14490_vm9, %v10310_v15, %v10338_v7  ;;  %v10334_v23 = vrot.slane %v10332_v9, 1 }
 0x7f7   : > { %10428 = vst [vmem:[#allocation4 + $0x8] sm:$0x7] %v10427_v12  ;;  %v10373_v5 = vsel %vm17434_vm10, %v10358_v49, %v10346_v24  ;;  %v10349_v46 = vrot.slane %v10332_v9, 2 }
 0x7f8   : > { %v10424_v27 = vsel %vm15084_vm6, %v10397_v52, %v10423_v41  ;;  %v10378_v14 = vsel %vm14495_vm13, %v10373_v5, %v10350_v55  ;;  %v10357_v48 = vsel %vm14490_vm9, %v10309_v59, %v10334_v23  ;;  %v12834_v55 = vld [vmem:[#allocation4 + $0x14] ss:$0 sps:$4 sm:$0x77]   ;;  %vm17436_vm9 = vmmov %vm17425_vm1 }
 0x7f9   : > { %10425 = vst [vmem:[#allocation4 + $0x4] sm:$0x7] %v10424_v27  ;;  %v11800_v22 = vcombine.low %v10378_v14, %v10378_v14  ;;  %v10369_v63 = vsel %vm17435_vm12, %v10357_v48, %v10345_v8  ;;  %v10869_v48 = vshll.u32 %v12834_v55, 16  ;;  %vm17449_vm12 = vmmov %vm17428_vm4 }
 0x7fa   : > { %v10377_v62 = vsel %vm14495_vm13, %v10369_v63, %v10349_v46  ;;  %vm17437_vm13 = vmmov %vm17425_vm1 }
 0x7fb   : > { %v10413_v40 = vshrl.u32 %v11800_v22, 16  ;;  %v11799_v61 = vcombine.low %v10377_v62, %v10377_v62  ;;  %v10416_v20 = vshll.u32 %v11800_v22, 16 }
 0x7fd   : > { %v10415_v32 = vrot.slane %v10413_v40, 7  ;;  %v10406_v34 = vshrl.u32 %v11799_v61, 16  ;;  %v10409_v30 = vshll.u32 %v11799_v61, 16 }
 0x7fe   : > { %v12819_v1 = vld [vmem:[#allocation4 + $0x8] ss:$0 sps:$4 sm:$0x66]  }
 0x7ff   : > { %v10418_v16 = vor.u32 %v10416_v20, %v10415_v32  ;;  %v12820_v60 = vld [vmem:[#allocation4 + $0x8] ss:$0 sps:$4 sm:$0x66]   ;;  %v10408_v26 = vrot.slane %v10406_v34, 7  ;;  %v10618_v44 = vrot.slane %v12819_v1, 1  ;;  %v10867_v34 = vshrl.u32 %v12834_v55, 16 }
 0x800   : > { %v12821_v28 = vld [vmem:[#allocation4 + $0x4] ss:$0 sps:$4 sm:$0x66]   ;;  %v10509_v37 = vrot.slane %v12820_v60, 1 }
 0x801   : > { %v10433_v2 = vsel %vm15084_vm6, %v10418_v16, %v10432_v38  ;;  %v10411_v57 = vor.u32 %v10409_v30, %v10408_v26  ;;  %v12822_v39 = vld [vmem:[#allocation4 + $0x4] ss:$0 sps:$4 sm:$0x66]   ;;  %10623 = vrot.lane.b32.xlu1 %v10618_v44, %s12899_s25  ;;  %v12823_v53 = vld [vmem:[#allocation4 + $0x8] ss:$0 sps:$4 sm:$0x77]  }
 0x802   : > { %10434 = vst [vmem:[#allocation4 + $0x10] sm:$0x7] %v10433_v2  ;;  %10515 = vrot.lane.b32.xlu0 %v10509_v37, %s12899_s25  ;;  %v12824_v21 = vld [vmem:[#allocation4 + $0x8] ss:$0 sps:$4 sm:$0x77]   ;;  %v10617_v10 = vrot.slane %v12821_v28, 1 }
 0x803   : > { %v10430_v43 = vsel %vm15084_vm6, %v10411_v57, %v10429_v4  ;;  %v12825_v45 = vld [vmem:[#allocation4 + $0x4] ss:$0 sps:$4 sm:$0x77]   ;;  %v10508_v29 = vrot.slane %v12822_v39, 1  ;;  %v10474_v54 = vshrl.u32 %v12823_v53, 16  ;;  %v10476_v15 = vshll.u32 %v12823_v53, 16 }
 0x804   : > { %10431 = vst [vmem:[#allocation4 + $0xc] sm:$0x7] %v10430_v43  ;;  %v10579_v56 = vshll.u32 %v12824_v21, 16  ;;  %v10577_v18 = vshrl.u32 %v12824_v21, 16  ;;  %v10572_v17 = vshll.u32 %v12825_v45, 16  ;;  %v10570_v6 = vshrl.u32 %v12825_v45, 16 }
 0x805   : > { %v12826_v47 = vld [vmem:[#allocation4 + $0x4] ss:$0 sps:$4 sm:$0x77]   ;;  %10513 = vrot.lane.b32.xlu1 %v10508_v29, %s12899_s25  ;;  %v10478_v59 = vrot.slane %v10476_v15, 1  ;;  %v10871_v30 = vrot.slane %v10869_v48, 1  ;;  %v12844_v2 = vld [vmem:[%s16946_s6 + $0x20] sm:$0xff]  }
 0x806   : > { %10621 = vrot.lane.b32.xlu0 %v10617_v10, %s12899_s25  ;;  %v10581_v25 = vrot.slane %v10579_v56, 1  ;;  %v10469_v19 = vshll.u32 %v12826_v47, 16  ;;  %v10574_v51 = vrot.slane %v10572_v17, 1  ;;  %v12831_v42 = vld [vmem:[#allocation4 + $0x8] ss:$0 sps:$4 sm:$0x77]  }
 0x807   : > { %v10479_v0 = vor.u32 %v10478_v59, %v10474_v54  ;;  %v10467_v36 = vshrl.u32 %v12826_v47, 16  ;;  %v10848_v23 = vshll.u32 %v12831_v42, 16  ;;  %v10846_v20 = vshrl.u32 %v12831_v42, 16  ;;  %v12843_v16 = vld [vmem:[%s16946_s6 + $0x28] sm:$0xff]   ;;  %v12846_v4 = vld [vmem:[%s16946_s6 + $0x30] sm:$0xff]   ;;  %v12845_v10 = vld [vmem:[%s16946_s6 + $0x18] sm:$0xff]  }
 0x808   : > { %v10582_v11 = vor.u32 %v10581_v25, %v10577_v18  ;;  %v10471_v13 = vrot.slane %v10469_v19, 1  ;;  %v10575_v58 = vor.u32 %v10574_v51, %v10570_v6  ;;  %12342 = vmatpush3.bf16.msra.mxu0 %v12843_v16  ;;  %v10872_v37 = vor.u32 %v10871_v30, %v10867_v34  ;;  %v12835_v57 = vld [vmem:[#allocation4 + $0x8] ss:$0 sps:$4 sm:$0x66]   ;;  %12366 = vmatpush3.bf16.msra.mxu1 %v12846_v4  ;;  %v10545_v55 = vld [vmem:[#allocation4 + $0x4] sm:$0x3] }
 0x809   : > { %v12827_v7 = vld [vmem:[#allocation4 + $0x10] ss:$0 sps:$4 sm:$0x66]   ;;  %v10850_v63 = vrot.slane %v10848_v23, 1  ;;  %12343 = vmatprep.subr.bf16.mxu0 %v17111_v31  ;;  %v10893_v45 = vrot.slane %v12835_v57, 1  ;;  %vm17438_vm6 = vcmask 261120  }
 0x80a   : > { %10491 = vrot.lane.b32.xlu0 %v10479_v0, %s12898_s24  ;;  %10599 = vrot.lane.b32.xlu1 %v10582_v11, %s12898_s24  ;;  %v12832_v24 = vld [vmem:[#allocation4 + $0x10] ss:$0 sps:$4 sm:$0x77]   ;;  %v10472_v12 = vor.u32 %v10471_v13, %v10467_v36  ;;  %v10620_v49 = vrot.slane %v12827_v7, 1  ;;  %v10488_v0 = vpop.permute.xlu0 %10487  ;;  %vm17440_vm1 = vmmov %vm17438_vm6  ;;  %v10437_v57 = vld [vmem:[#allocation4 + $0x8] sm:$0x3] }
 0x80b   : > { %v12828_v9 = vld [vmem:[#allocation4 + $0xc] ss:$0 sps:$4 sm:$0x66]   ;;  %v10593_v14 = vshll.u32 %v12832_v24, 16  ;;  %v10591_v38 = vshrl.u32 %v12832_v24, 16  ;;  %v10851_v1 = vor.u32 %v10850_v63, %v10846_v20  ;;  %vm17442_vm0 = vmmov %vm17440_vm1 }
 0x80c   : > { %v12829_v52 = vld [vmem:[#allocation4 + $0xc] ss:$0 sps:$4 sm:$0x77]   ;;  %v10619_v41 = vrot.slane %v12828_v9, 1  ;;  %12344 = vmatpush3.bf16.msra.mxu0 %v12844_v2  ;;  %v10548_v63 = vld [vmem:[#allocation4 + $0x10] sm:$0x3]  ;;  %vm17443_vm3 = vmmov %vm17442_vm0 }
 0x80d   : > { %v10586_v5 = vshll.u32 %v12829_v52, 16  ;;  %v12830_v27 = vld [vmem:[#allocation4 + $0xc] ss:$0 sps:$4 sm:$0x66]   ;;  %v10584_v46 = vshrl.u32 %v12829_v52, 16  ;;  %v10595_v61 = vrot.slane %v10593_v14, 1  ;;  %12345 = vmatprep.subr.bf16.mxu0 %v17111_v31  ;;  %vm17446_vm11 = vmmov %vm17442_vm0 }
 0x80e   : > { %10597 = vrot.lane.b32.xlu0 %v10575_v58, %s12898_s24  ;;  %10489 = vrot.lane.b32.xlu1 %v10472_v12, %s12898_s24  ;;  %v12833_v22 = vld [vmem:[#allocation4 + $0x10] ss:$0 sps:$4 sm:$0x77]   ;;  %v10510_v62 = vrot.slane %v12830_v27, 1  ;;  %v10512_v11 = vpop.permute.xlu0 %10511  ;;  %vm17448_vm10 = vmmov %vm17442_vm0 }
 0x80f   : > { %v10588_v8 = vrot.slane %v10586_v5, 1  ;;  %v10862_v32 = vshll.u32 %v12833_v22, 16  ;;  %v10596_v60 = vor.u32 %v10595_v61, %v10591_v38  ;;  %v12838_v28 = vld [vmem:[#allocation4 + $0xc] ss:$0 sps:$4 sm:$0x77]   ;;  %v10860_v44 = vshrl.u32 %v12833_v22, 16 }
 0x810   : > { %v12836_v39 = vld [vmem:[#allocation4 + $0xc] ss:$0 sps:$4 sm:$0x66]   ;;  %v10483_v21 = vshll.u32 %v12838_v28, 16  ;;  %12346 = vmatpush3.bf16.msra.mxu0 %v12845_v10  ;;  %v10481_v18 = vshrl.u32 %v12838_v28, 16 }
 0x811   : > { %v10589_v40 = vor.u32 %v10588_v8, %v10584_v46  ;;  %v10864_v26 = vrot.slane %v10862_v32, 1  ;;  %v12839_v43 = vld [vmem:[#allocation4 + $0xc] ss:$0 sps:$4 sm:$0x77]   ;;  %v10894_v29 = vrot.slane %v12836_v39, 1  ;;  %12351 = vmatprep.subr.bf16.mxu0 %v17111_v31 }
 0x812   : > { %10627 = vrot.lane.b32.xlu1 %v10620_v49, %s12899_s25  ;;  %10625 = vrot.lane.b32.xlu0 %v10619_v41, %s12899_s25  ;;  %v12837_v54 = vld [vmem:[#allocation4 + $0x10] ss:$0 sps:$4 sm:$0x66]   ;;  %v10485_v15 = vrot.slane %v10483_v21, 1  ;;  %v10855_v56 = vshll.u32 %v12839_v43, 16  ;;  %v10853_v59 = vshrl.u32 %v12839_v43, 16 }
 0x813   : > { %v10865_v53 = vor.u32 %v10864_v26, %v10860_v44  ;;  %v10895_v17 = vrot.slane %v12837_v54, 1  ;;  %v12840_v25 = vld [vmem:[#allocation4 + $0x14] ss:$0 sps:$4 sm:$0x66]   ;;  %v10546_v41 = vld [vmem:[#allocation4 + $0x8] sm:$0x3] }
 0x814   : > { %v10486_v47 = vor.u32 %v10485_v15, %v10481_v18  ;;  %v10857_v35 = vrot.slane %v10855_v56, 1  ;;  %v10896_v19 = vrot.slane %v12840_v25, 1  ;;  %v10547_v8 = vld [vmem:[#allocation4 + $0xc] sm:$0x3] }
 0x815   : > { %v12847_v28 = vld [vmem:[%s16946_s6 + $0x10] sm:$0xff]  }
 0x816   : > { %10601 = vrot.lane.b32.xlu0 %v10589_v40, %s12898_s24  ;;  %10517 = vrot.lane.b32.xlu1 %v10510_v62, %s12899_s25  ;;  %v10858_v6 = vor.u32 %v10857_v35, %v10853_v59  ;;  %v10822_v35 = vld [vmem:[#allocation4 + $0xc] sm:$0x3] }
 0x81a   : > { %10873 = vrot.lane.b32.xlu0 %v10851_v1, %s12898_s24  ;;  %10603 = vrot.lane.b32.xlu1 %v10596_v60, %s12898_s24  ;;  %v10435_v1 = vld [vmem:[#allocation4] sm:$0x3]  ;;  %v10436_v60 = vld [vmem:[#allocation4 + $0x4] sm:$0x3] }
 0x81e   : > { %10877 = vrot.lane.b32.xlu0 %v10865_v53, %s12898_s24  ;;  %10879 = vrot.lane.b32.xlu1 %v10872_v37, %s12898_s24  ;;  %v10521_v37 = vsel %vm17444_vm8, %v10435_v1, %v10488_v0  ;;  %v12848_v53 = vld [vmem:[%s16946_s6 + $0x8] sm:$0xff]   ;;  %vm17460_vm8 = vmmov %vm17445_vm5 }
 0x81f   : > { %v10532_v43 = vsel %vm17448_vm10, %v10521_v37, %v10512_v11 }
 0x822   : > { %10897 = vrot.lane.b32.xlu0 %v10893_v45, %s12899_s25  ;;  %10899 = vrot.lane.b32.xlu1 %v10894_v29, %s12899_s25  ;;  %v10438_v45 = vld [vmem:[#allocation4 + $0xc] sm:$0x3] }
 0x826   : > { %10901 = vrot.lane.b32.xlu0 %v10895_v17, %s12899_s25  ;;  %10493 = vrot.lane.b32.xlu1 %v10486_v47, %s12898_s24  ;;  %v12849_v17 = vld [vmem:[%s16946_s6] sm:$0xff]  }
 0x82a   : > { %10875 = vrot.lane.b32.xlu1 %v10858_v6, %s12898_s24  ;;  %v10821_v6 = vld [vmem:[#allocation4 + $0x8] sm:$0x3] }
 0x82e   : > { %10903 = vrot.lane.b32.xlu1 %v10896_v19, %s12899_s25  ;;  %v10824_v19 = vld [vmem:[#allocation4 + $0x14] sm:$0x3] }
 0x873   : > { %v10624_v42 = vpop.permute.xlu1 %10623 }
 0x874   : > { %v10516_v51 = vpop.permute.xlu0 %10515 }
 0x877   : > { %v10514_v7 = vpop.permute.xlu1 %10513 }
 0x878   : > { %v10622_v13 = vpop.permute.xlu0 %10621 }
 0x87c   : > { %v10492_v36 = vpop.permute.xlu0 %10491  ;;  %v10600_v24 = vpop.permute.xlu1 %10599 }
 0x87d   : > { %v10634_v27 = vsel %vm17437_vm13, %v10546_v41, %v10600_v24  ;;  %v10527_v21 = vsel %vm17447_vm15, %v10437_v57, %v10492_v36  ;;  %vm17451_vm13 = vmmov %vm17442_vm0  ;;  %v11029_v57 = vld [vmem:[#allocation5] sm:$0xff] }
 0x87e   : > { %v10644_v46 = vsel %vm17440_vm1, %v10634_v27, %v10624_v42  ;;  %vm17455_vm1 = vmmov %vm17442_vm0 }
 0x87f   : > { %vm17462_vm15 = vmmov %vm17455_vm1 }
 0x880   : > { %v10598_v9 = vpop.permute.xlu0 %10597  ;;  %v10490_v58 = vpop.permute.xlu1 %10489 }
 0x881   : > { %v10631_v49 = vsel %vm17436_vm9, %v10545_v55, %v10598_v9  ;;  %v10524_v2 = vsel %vm17428_vm4, %v10436_v60, %v10490_v58  ;;  %vm17450_vm9 = vmmov %vm17442_vm0 }
 0x882   : > { %v10642_v14 = vsel %vm17438_vm6, %v10631_v49, %v10622_v13  ;;  %v10534_v39 = vsel %vm17446_vm11, %v10524_v2, %v10514_v7  ;;  %v10536_v56 = vsel %vm17450_vm9, %v10527_v21, %v10516_v51  ;;  %v10823_v7 = vld [vmem:[#allocation4 + $0x10] sm:$0x3]  ;;  %vm17461_vm11 = vmmov %vm17455_vm1 }
 0x883   : > { %v10659_v62 = vcombine.low %v10642_v14, %v10644_v46  ;;  %v10742_v54 = vcombine.low %v10532_v43, %v10534_v39 }
 0x884   : > { %v10626_v12 = vpop.permute.xlu0 %10625  ;;  %v10628_v52 = vpop.permute.xlu1 %10627 }
 0x885   : > { %v10667_v30 = vrot.slane %v10659_v62, %v15710_v50  ;;  %v10750_v25 = vrot.slane %v10742_v54, %v15710_v50 }
 0x888   : > { %v10602_v5 = vpop.permute.xlu0 %10601  ;;  %v10518_v23 = vpop.permute.xlu1 %10517 }
 0x889   : > { %v10637_v22 = vsel %vm17439_vm7, %v10547_v8, %v10602_v5  ;;  %vm17454_vm7 = vmmov %vm17442_vm0 }
 0x88a   : > { %v10646_v32 = vsel %vm17442_vm0, %v10637_v22, %v10626_v12 }
 0x88c   : > { %v10874_v48 = vpop.permute.xlu0 %10873  ;;  %v10604_v40 = vpop.permute.xlu1 %10603 }
 0x88d   : > { %v10640_v61 = vsel %vm17441_vm14, %v10548_v63, %v10604_v40  ;;  %v11487_v40 = vld [vmem:[%s16947_s7] ss:$0 sm:$0xff] }
 0x88e   : > { %v10648_v20 = vsel %vm17443_vm3, %v10640_v61, %v10628_v52  ;;  %vm17458_vm3 = vmmov %vm17455_vm1 }
 0x88f   : > { %v10660_v38 = vcombine.low %v10646_v32, %v10648_v20  ;;  %v5740_v20 = vadd.f32 %v11487_v40, %v16245_v33  ;;  %v11030_v33 = vld [vmem:[#allocation5 + $0x8] sm:$0xff] }
 0x890   : > { %v10880_v34 = vpop.permute.xlu1 %10879  ;;  %v10878_v26 = vpop.permute.xlu0 %10877 }
 0x891   : > { %v10674_v16 = vrot.slane %v10660_v38, %v15710_v50  ;;  %v5742_v60 = vmax.f32 %v5740_v20, 0.0 }
 0x893   : > { %v10675_v4 = vcombine.low %v10667_v30, %v10674_v16 }
 0x894   : > { %v10900_v44 = vpop.permute.xlu1 %10899  ;;  %v10898_v10 = vpop.permute.xlu0 %10897 }
 0x895   : > { %12348 = vmatmul.mubr.msk.bf16.vlgmr.msra.gmra.mxu0 %vm17445_vm5, %v10675_v4 }
 0x896   : > { %12352 = vmatpush3.bf16.msra.mxu0 %v12847_v28  ;;  %12357 = vmatprep.mubr.msk.bf16.mxu0 %vm17340_vm2, %v17111_v31  ;;  %vm17452_vm2 = vmmov %vm17428_vm4 }
 0x897   : > { %12353 = vmatprep.subr.bf16.mxu0 %v17111_v31  ;;  %vm17453_vm6 = vmmov %vm17452_vm2 }
 0x898   : > { %v10494_v29 = vpop.permute.xlu1 %10493  ;;  %v10907_v51 = vsel %vm17453_vm6, %v10821_v6, %v10874_v48  ;;  %v10902_v42 = vpop.permute.xlu0 %10901  ;;  %vm17456_vm14 = vmmov %vm17452_vm2 }
 0x899   : > { %v10530_v15 = vsel %vm17449_vm12, %v10438_v45, %v10494_v29  ;;  %v10918_v36 = vsel %vm17455_vm1, %v10907_v51, %v10898_v10  ;;  %v10913_v24 = vsel %vm17456_vm14, %v10823_v7, %v10878_v26  ;;  %vm17457_vm0 = vmmov %vm17452_vm2  ;;  %v5741_v26 = vadd.f32 %v11487_v40, %v16251_v3 }
 0x89a   : > { %v10538_v18 = vsel %vm17451_vm13, %v10530_v15, %v10518_v23  ;;  %12354 = vmatpush3.bf16.msra.mxu0 %v12848_v53  ;;  %v10916_v9 = vsel %vm17457_vm0, %v10824_v19, %v10880_v34  ;;  %v10922_v52 = vsel %vm17458_vm3, %v10913_v24, %v10902_v42  ;;  %vm17459_vm4 = vmmov %vm17455_vm1 }
 0x89b   : > { %v10743_v47 = vcombine.low %v10536_v56, %v10538_v18  ;;  %12355 = vmatprep.subr.bf16.mxu0 %v17111_v31  ;;  %v5743_v39 = vmax.f32 %v5741_v26, 0.0 }
 0x89c   : > { %v10876_v59 = vpop.permute.xlu1 %10875 }
 0x89d   : > { %v10757_v0 = vrot.slane %v10743_v47, %v15710_v50  ;;  %v10910_v11 = vsel %vm17452_vm2, %v10822_v35, %v10876_v59 }
 0x89e   : > { %v10920_v13 = vsel %vm17454_vm7, %v10910_v11, %v10900_v44  ;;  %12356 = vmatpush3.bf16.msra.mxu0 %v12849_v17 }
 0x89f   : > { %v10758_v31 = vcombine.low %v10750_v25, %v10757_v0  ;;  %v10935_v58 = vcombine.low %v10918_v36, %v10920_v13 }
 0x8a0   : > { %v10904_v12 = vpop.permute.xlu1 %10903 }
 0x8a1   : > { %v10924_v55 = vsel %vm17459_vm4, %v10916_v9, %v10904_v12  ;;  %12358 = vmatmul.mubr.msk.bf16.vlgmr.msra.gmra.mxu0 %vm17460_vm8, %v10758_v31  ;;  %v10943_v41 = vrot.slane %v10935_v58, %v15710_v50 }
 0x8a2   : > { %v10936_v49 = vcombine.low %v10922_v52, %v10924_v55 }
 0x8a4   : > { %v10950_v5 = vrot.slane %v10936_v49, %v15710_v50  ;;  %v11849_v50 = vld [vmem:[%s16947_s7] ss:$0 sm:$0xff] }
 0x8a6   : > { %v10951_v23 = vcombine.low %v10943_v41, %v10950_v5 }
 0x8a8   : > { %12368 = vmatmul.mubr.msk.bf16.vlgmr.msra.gmra.mxu1 %vm17445_vm5, %v10951_v23 }
 0x955   : > { %v10731_v27 = vpop.f32.mrf.mxu0 }
 0x957   : > { %v12349_v14 = vpop.f32.mrf.mxu0 }
 0x959   : > { %v10734_v8 = vpop.f32.mrf.mxu0 }
 0x95b   : > { %v12350_v22 = vpop.f32.mrf.mxu0 }
 0x961   : > { %v10814_v46 = vpop.f32.mrf.mxu0 }
 0x962   : > { %v10815_v62 = vadd.f32 %v10814_v46, %v10731_v27 }
 0x963   : > { %v12359_v48 = vpop.f32.mrf.mxu0 }
 0x965   : > { %v10817_v63 = vpop.f32.mrf.mxu0 }
 0x966   : > { %v10818_v30 = vadd.f32 %v10817_v63, %v10734_v8 }
 0x967   : > { %v12360_v61 = vpop.f32.mrf.mxu0 }
 0x968   : > { %v11007_v32 = vpop.f32.mrf.mxu1 }
 0x969   : > { %v11014_v38 = vadd.f32 %v11007_v32, %v10815_v62 }
 0x96a   : > { %v12369_v34 = vpop.f32.mrf.mxu1 }
 0x96b   : > { %v11023_v16 = vadd.f32 %v11849_v50, %v11014_v38 }
 0x96c   : > { %v11010_v1 = vpop.f32.mrf.mxu1 }
 0x96d   : > { %v11025_v28 = vmax.f32 %v11023_v16, 0.0  ;;  %v11015_v2 = vadd.f32 %v11010_v1, %v10818_v30 }
 0x96e   : > { %v12370_v4 = vpop.f32.mrf.mxu1 }
 0x96f   : > { %v11027_v44 = vsub.f32 %v5742_v60, %v11025_v28  ;;  %v11024_v37 = vadd.f32 %v11849_v50, %v11015_v2 }
 0x971   : > { %v11031_v53 = vmul.f32 %v11027_v44, %v11027_v44  ;;  %v11026_v21 = vmax.f32 %v11024_v37, 0.0 }
 0x973   : > { %v11033_v43 = vadd.f32 %v11031_v53, %v11029_v57  ;;  %v11028_v10 = vsub.f32 %v5743_v39, %v11026_v21 }
 0x975   : > { %11035 = vst.msk [vmem:[#allocation5] sm:$0xff] %vm17461_vm11, %v11033_v43  ;;  %v11032_v45 = vmul.f32 %v11028_v10, %v11028_v10  ;;  %11040 = sbr.rel (%p11850_p5) target bundleno = 2640 (0xa50), region = 60 }
 0x977   : > { %v11034_v29 = vadd.f32 %v11032_v45, %v11030_v33 }
 0x979   : > { %11036 = vst.msk [vmem:[#allocation5 + $0x8] sm:$0xff] %vm17462_vm15, %v11034_v29 }
 0x97a   : > { %vm17463_vm10 = vcmask 261120   ;;  %vm11057_vm9 = vcmask 0  }
 0x97b   : > { %vm17464_vm12 = vmmov %vm17463_vm10 }
 0x97c   : > { %v11041_v3 = vld [vmem:[#allocation5] sm:$0xff] }
 0x97d   : > { %v11043_v15 = vsel %vm17463_vm10, %v11041_v3, 0.0 }
 0x980   : > { %v11042_v54 = vld [vmem:[#allocation5 + $0x8] sm:$0xff] }
 0x981   : > { %v11044_v56 = vsel %vm17464_vm12, %v11042_v54, 0.0 }
 0x982   : > { %v11045_v18 = vadd.f32 %v11044_v56, %v11043_v15 }
 0x984   : > { %11046 = vadd.xlane.f32.xlu0 %v11045_v18 }
 0xa0d   : > { %v11047_v17 = vpop.xlane.xlu0 %11046 }
 0xa0e   : > { %v11048_v47 = vrot.slane %v11047_v17, 4 }
 0xa10   : > { %v11049_v35 = vadd.f32 %v11048_v47, %v11047_v17 }
 0xa12   : > { %v11050_v59 = vrot.slane %v11049_v35, 2 }
 0xa14   : > { %v11051_v25 = vadd.f32 %v11050_v59, %v11049_v35 }
 0xa16   : > { %v11052_v6 = vrot.slane %v11051_v25, 1 }
 0xa18   : > { %v11053_v19 = vadd.f32 %v11052_v6, %v11051_v25 }
 0xa1a   : > { %12377 = vpush %v11053_v19 }
 0xa4b   : > { %s12378_s15 = spop %12377 }
 0xa4c   : > { %v11055_v0 = vstv %s12378_s15 }
 0xa4d   : > { %v11056_v11 = vmul.f32 0.0009765625, %v11055_v0 }
 0xa4f   : > { %11058 = vst.msk [vmem:[#allocation6] sm:$0x1] %vm11057_vm9, %v11056_v11 }
 0xa50 PF: > { %p12383_p6 = scmp.eq.s32.totalorder %s12955_s28, 1  ;;  %s12903_s16 = smov [#allocation6]  }
 0xa51   : > { %s11066_s19 = sshll.u32 %s12903_s16, 4  ;;  %s11067_s19 = int_to_ptr.vmem [resolvable:$true] %s11066_s19 }
 0xa52   : > { %s12856_s20 = scalar_lea.vmem %s11067_s19, 16  ;;  %s12862_s21 = scalar_lea.vmem %s11067_s19, 32 }
 0xa53   : > { %p12857_p7 = scmp.ne.s32.totalorder %s11067_s19, %s12856_s20  ;;  %p12863_p10 = scmp.lt.s32.totalorder %s11067_s19, %s11067_s19 }
 0xa54   : > { %p12864_p11 = scmp.lt.s32.totalorder %s12862_s21, %s12856_s20 }
 0xa55   : > { %p12858_p8 = pnand %p12857_p7, %p12383_p6 }
 0xa56   : > { %p12865_p12 = por %p12864_p11, %p12863_p10 }
 0xa57   : > { %p12859_p9 = pneg %p12858_p8 }
 0xa59   : > { %p12866_p13 = pnand %p12865_p12, %p12859_p9 }
 0xa5b   : > { %12869 = shalt.err (!%p12866_p13)
}
 0xa5c   : > { %12380 = dma.vmem_to_hbm [thread:$0]  (%p12383_p6), %s11067_s19, 16, %s16948_s8, [#allocation7]  }
 0xa5d   : > { %12885 = dma.done.wait (%p12383_p6), [#allocation7], 16  }
 0xa5e   : > { %12887 = vsyncadd (%p12383_p6), [#allocation7], 4294967280 }
 0xa5f PF: > { %s19_s27 = sadd.s32 1, %s12890_s27  }
 0xa60   : > { %p16_p0 = scmp.ge.s32.totalorder %s19_s27, 4  }
 0xa62   :  { %18 = sbr.rel (!%p16_p0) target bundleno = 1 (0x1), region = 102 }
 0xa67   :  { %11079 = vsyncpa [#allocation7], 1 }
 0xa68   :  { %11081 = vsyncpa [#allocation7 + $0x1], 1 }

</bundles_post_ra>
